<compile_context>
chip_gen: v6e
topology: v6e:2x2x1
jax: 0.10.0
libtpu: 0.0.40
codegen_flags: <defaults>
</compile_context>

<pallas_src>
import functools

import jax
import jax.numpy as jnp
from jax.experimental import pallas as pl
from jax.experimental.pallas import tpu as pltpu

LANE = 128          # every channel dim is zero-padded to the 128-lane width
KSIZE = 3           # 3x3 convolutions
TAPS = KSIZE * KSIZE


# ----------------------------------------------------------------------------
# Fused Pallas kernel: 3 x (conv3x3 + BN + ReLU) for one image, all in VMEM.
# ----------------------------------------------------------------------------
def _tpbranch_kernel(xp_ref, w1_ref, w2_ref, w3_ref, shifts_ref, o_ref,
                     buf, patch, *, H, W, cin):
    # xp_ref:     (1, H+2, W+2, cin)   spatially padded input image (cin lanes)
    # w{1,2,3}:   (TAPS*LANE, LANE)    im2col weights with BN scale pre-folded
    # shifts_ref: (3, LANE)            fused conv-bias + BN shift per layer
    # o_ref:      (1, H*W, LANE)       lane-dense output (channels padded)
    # buf:        (H+2, W+2, LANE)     single reused padded activation buffer
    # patch:      (H*W, TAPS*LANE)     im2col scratch, reused per layer

    # In-kernel channel pad + SAME pad: zero the whole padded buffer (the
    # 1-pixel border stays zero for every layer), then place the cin real
    # input channels into lanes [0, cin).  ~41 vst of zeros -> negligible.
    buf[...] = jnp.zeros_like(buf)
    buf[:, :, :cin] = xp_ref[0]

    def build_patch():
        # im2col: 9 shifted (H, W, LANE) windows of buf -> (H*W, TAPS*LANE).
        # Each column block is exactly one 128-lane tile -> aligned stores.
        for dy in range(KSIZE):
            for dx in range(KSIZE):
                t = dy * KSIZE + dx
                patch[:, t * LANE:(t + 1) * LANE] = (
                    buf[dy:dy + H, dx:dx + W, :].reshape(H * W, LANE))
        return patch[...]

    def layer(w_ref, layer_idx):
        # One big-K matmul on the MXU (K = TAPS*LANE), f32 accumulation,
        # then fused BN shift + ReLU.
        p = build_patch()
        y = jnp.dot(p, w_ref[...], preferred_element_type=jnp.float32)
        y = y + shifts_ref[layer_idx:layer_idx + 1, :]
        return jnp.maximum(y, 0.0)

    # layer 1: padded input (in buf) -> buf interior (activations stay in VMEM)
    y1 = layer(w1_ref, 0)
    buf[1:H + 1, 1:W + 1, :] = y1.reshape(H, W, LANE)

    # layer 2: buf -> buf (patch already captured layer-1 output, so in-place)
    y2 = layer(w2_ref, 1)
    buf[1:H + 1, 1:W + 1, :] = y2.reshape(H, W, LANE)

    # layer 3: buf -> lane-dense output slab
    y3 = layer(w3_ref, 2)
    o_ref[...] = y3.reshape(1, H * W, LANE).astype(o_ref.dtype)


# ----------------------------------------------------------------------------
# Parameter prep (trace time): fold BN scale into weights, pad channels.
# ----------------------------------------------------------------------------
def _prep_layer(p, eps=1e-5):
    w = p["w"]                                    # (3, 3, cin, cout)
    kh, kw, cin, cout = w.shape
    s = p["gamma"] * jax.lax.rsqrt(p["var"] + eps)      # BN scale  (cout,)
    w_fused = w * s                                      # fold scale into conv
    shift = (p["b"] - p["mean"]) * s + p["beta"]         # fused bias/shift
    # zero-pad cin/cout to 128 lanes, then flatten to im2col (9*LANE, LANE)
    w_fused = jnp.pad(w_fused,
                      ((0, 0), (0, 0), (0, LANE - cin), (0, LANE - cout)))
    shift = jnp.pad(shift, (0, LANE - cout))
    return w_fused.reshape(kh * kw * LANE, LANE), shift


@jax.jit
def tp_branch_forward(x_nchw, params):
    """PyTorch-style NCHW in / NCHW out, inference-mode BatchNorm."""
    N, cin, H, W = x_nchw.shape
    cout = params[-1]["w"].shape[-1]
    Hp, Wp = H + 2, W + 2

    # NCHW -> NHWC, 1-px spatial SAME pad only (channel pad happens in-kernel,
    # so HBM carries just the cin real channels).
    x = jnp.transpose(x_nchw, (0, 2, 3, 1))
    xp = jnp.pad(x, ((0, 0), (1, 1), (1, 1), (0, 0)))

    (w1, s1), (w2, s2), (w3, s3) = (_prep_layer(p) for p in params)
    shifts = jnp.stack([s1, s2, s3], axis=0)             # (3, LANE)

    kernel = functools.partial(_tpbranch_kernel, H=H, W=W, cin=cin)
    out = pl.pallas_call(
        kernel,
        out_shape=jax.ShapeDtypeStruct((N, H * W, LANE), jnp.float32),
        grid_spec=pltpu.PrefetchScalarGridSpec(
            num_scalar_prefetch=0,
            grid=(N,),                                    # one image per step
            in_specs=[
                pl.BlockSpec((1, Hp, Wp, cin), lambda n: (n, 0, 0, 0)),
                pl.BlockSpec((TAPS * LANE, LANE), lambda n: (0, 0)),
                pl.BlockSpec((TAPS * LANE, LANE), lambda n: (0, 0)),
                pl.BlockSpec((TAPS * LANE, LANE), lambda n: (0, 0)),
                pl.BlockSpec((3, LANE), lambda n: (0, 0)),
            ],
            out_specs=pl.BlockSpec((1, H * W, LANE), lambda n: (n, 0, 0)),
            scratch_shapes=[
                pltpu.VMEM((Hp, Wp, LANE), jnp.float32),        # activations
                pltpu.VMEM((H * W, TAPS * LANE), jnp.float32),  # im2col patch
            ],
        ),
        compiler_params=pltpu.CompilerParams(
            dimension_semantics=("parallel",),
        ),
    )(xp, w1, w2, w3, shifts)

    # lane-dense slab -> (N, H, W, cout) -> NCHW  (contiguous, free reshapes)
    out = out[:, :, :cout].reshape(N, H, W, cout)
    return jnp.transpose(out, (0, 3, 1, 2))


# ----------------------------------------------------------------------------
# Parameters + pure-JAX reference (correctness check only)
# ----------------------------------------------------------------------------
def make_layer_params(key, cin, cout):
    kw, kb, kg, kbe, km, kv = jax.random.split(key, 6)
    w = 0.1 * jax.random.normal(kw, (3, 3, cin, cout), jnp.float32)
    b = 0.05 * jax.random.normal(kb, (cout,), jnp.float32)
    gamma = 1.0 + 0.1 * jax.random.normal(kg, (cout,), jnp.float32)
    beta = 0.05 * jax.random.normal(kbe, (cout,), jnp.float32)
    mean = 0.05 * jax.random.normal(km, (cout,), jnp.float32)
    var = 1.0 + 0.1 * jax.random.uniform(kv, (cout,), jnp.float32)
    return dict(w=w, b=b, gamma=gamma, beta=beta, mean=mean, var=var)


def ref_forward(x_nchw, params, eps=1e-5):
    x = jnp.transpose(x_nchw, (0, 2, 3, 1))
    for p in params:
        z = jax.lax.conv_general_dilated(
            x, p["w"], (1, 1), "SAME",
            dimension_numbers=("NHWC", "HWIO", "NHWC"),
        ) + p["b"]
        z = (z - p["mean"]) / jnp.sqrt(p["var"] + eps) * p["gamma"] + p["beta"]
        x = jnp.maximum(z, 0.0)
    return jnp.transpose(x, (0, 3, 1, 2))


if __name__ == "__main__":
    in_dim, out_dim = 4, 8
    N, H, W = 2, 16, 16

    root = jax.random.PRNGKey(0)
    kx, k1, k2, k3 = jax.random.split(root, 4)

    x = jax.random.normal(kx, (N, in_dim, H, W), jnp.float32)   # NCHW input
    params = [
        make_layer_params(k1, in_dim, 64),
        make_layer_params(k2, 64, 64),
        make_layer_params(k3, 64, out_dim),
    ]

    out = jax.block_until_ready(tp_branch_forward(x, params))
    ref = jax.block_until_ready(ref_forward(x, params))

    assert out.shape == (N, out_dim, H, W)
    assert jnp.allclose(out, ref, atol=1e-3, rtol=1e-3), "mismatch vs reference"

    print("KERNEL_OK")
</pallas_src>

<mosaic_0001>
module attributes {stable_mosaic.version = 11 : i64} {
  func.func @_tpbranch_kernel(%arg0: i32, %arg1: memref<1x18x18x4xf32, #tpu.memory_space<vmem>>, %arg2: memref<1152x128xf32, #tpu.memory_space<vmem>>, %arg3: memref<1152x128xf32, #tpu.memory_space<vmem>>, %arg4: memref<1152x128xf32, #tpu.memory_space<vmem>>, %arg5: memref<3x128xf32, #tpu.memory_space<vmem>>, %arg6: memref<1x256x128xf32, #tpu.memory_space<vmem>>, %arg7: memref<18x18x128xf32, #tpu.memory_space<vmem>>, %arg8: memref<256x1152xf32, #tpu.memory_space<vmem>>) attributes {dimension_semantics = [#tpu.dimension_semantics<parallel>], iteration_bounds = array<i64: 2>, scalar_prefetch = 0 : i64, scratch_operands = 2 : i64, tpu.core_type = #tpu.core_type<tc>, window_params = [{transform_indices = @transform_0, window_bounds = array<i64: 1, 18, 18, 4>}, {pipeline_mode = #tpu.pipeline_mode<synchronous>, transform_indices = @transform_1, window_bounds = array<i64: 1152, 128>}, {pipeline_mode = #tpu.pipeline_mode<synchronous>, transform_indices = @transform_2, window_bounds = array<i64: 1152, 128>}, {pipeline_mode = #tpu.pipeline_mode<synchronous>, transform_indices = @transform_3, window_bounds = array<i64: 1152, 128>}, {pipeline_mode = #tpu.pipeline_mode<synchronous>, transform_indices = @transform_4, window_bounds = array<i64: 3, 128>}, {transform_indices = @transform_5, window_bounds = array<i64: 1, 256, 128>}]} {
    %cst = arith.constant 0.000000e+00 : f32
    %0 = vector.broadcast %cst : f32 to vector<18x18x128xf32>
    %c0 = arith.constant 0 : index
    %c0_0 = arith.constant 0 : index
    %c0_1 = arith.constant 0 : index
    %1 = vector.load %arg7[%c0, %c0_0, %c0_1] : memref<18x18x128xf32, #tpu.memory_space<vmem>>, vector<18x18x128xf32>
    tpu.vector_store %arg7[%c0, %c0_0, %c0_1], %0 {strides = array<i32>} : memref<18x18x128xf32, #tpu.memory_space<vmem>>, vector<18x18x128xf32>,
    %c0_2 = arith.constant 0 : index
    %c0_3 = arith.constant 0 : index
    %c0_4 = arith.constant 0 : index
    %c0_5 = arith.constant 0 : index
    %2 = vector.load %arg1[%c0_2, %c0_3, %c0_4, %c0_5] : memref<1x18x18x4xf32, #tpu.memory_space<vmem>>, vector<1x18x18x4xf32>
    %3 = vector.shape_cast %2 : vector<1x18x18x4xf32> to vector<18x18x4xf32>
    %c0_6 = arith.constant 0 : index
    %c0_7 = arith.constant 0 : index
    %c0_8 = arith.constant 0 : index
    %4 = vector.load %arg7[%c0_6, %c0_7, %c0_8] : memref<18x18x128xf32, #tpu.memory_space<vmem>>, vector<18x18x4xf32>
    tpu.vector_store %arg7[%c0_6, %c0_7, %c0_8], %3 {strides = array<i32>} : memref<18x18x128xf32, #tpu.memory_space<vmem>>, vector<18x18x4xf32>,
    %c0_9 = arith.constant 0 : index
    %c0_10 = arith.constant 0 : index
    %c0_11 = arith.constant 0 : index
    %5 = vector.load %arg7[%c0_9, %c0_10, %c0_11] : memref<18x18x128xf32, #tpu.memory_space<vmem>>, vector<16x16x128xf32>
    %6 = vector.shape_cast %5 : vector<16x16x128xf32> to vector<256x128xf32>
    %c0_12 = arith.constant 0 : index
    %c0_13 = arith.constant 0 : index
    %7 = vector.load %arg8[%c0_12, %c0_13] : memref<256x1152xf32, #tpu.memory_space<vmem>>, vector<256x128xf32>
    tpu.vector_store %arg8[%c0_12, %c0_13], %6 {strides = array<i32>} : memref<256x1152xf32, #tpu.memory_space<vmem>>, vector<256x128xf32>,
    %c0_14 = arith.constant 0 : index
    %c1 = arith.constant 1 : index
    %c0_15 = arith.constant 0 : index
    %8 = vector.load %arg7[%c0_14, %c1, %c0_15] : memref<18x18x128xf32, #tpu.memory_space<vmem>>, vector<16x16x128xf32>
    %9 = vector.shape_cast %8 : vector<16x16x128xf32> to vector<256x128xf32>
    %c0_16 = arith.constant 0 : index
    %c128 = arith.constant 128 : index
    %10 = vector.load %arg8[%c0_16, %c128] : memref<256x1152xf32, #tpu.memory_space<vmem>>, vector<256x128xf32>
    tpu.vector_store %arg8[%c0_16, %c128], %9 {strides = array<i32>} : memref<256x1152xf32, #tpu.memory_space<vmem>>, vector<256x128xf32>,
    %c0_17 = arith.constant 0 : index
    %c2 = arith.constant 2 : index
    %c0_18 = arith.constant 0 : index
    %11 = vector.load %arg7[%c0_17, %c2, %c0_18] : memref<18x18x128xf32, #tpu.memory_space<vmem>>, vector<16x16x128xf32>
    %12 = vector.shape_cast %11 : vector<16x16x128xf32> to vector<256x128xf32>
    %c0_19 = arith.constant 0 : index
    %c256 = arith.constant 256 : index
    %13 = vector.load %arg8[%c0_19, %c256] : memref<256x1152xf32, #tpu.memory_space<vmem>>, vector<256x128xf32>
    tpu.vector_store %arg8[%c0_19, %c256], %12 {strides = array<i32>} : memref<256x1152xf32, #tpu.memory_space<vmem>>, vector<256x128xf32>,
    %c1_20 = arith.constant 1 : index
    %c0_21 = arith.constant 0 : index
    %c0_22 = arith.constant 0 : index
    %14 = vector.load %arg7[%c1_20, %c0_21, %c0_22] : memref<18x18x128xf32, #tpu.memory_space<vmem>>, vector<16x16x128xf32>
    %15 = vector.shape_cast %14 : vector<16x16x128xf32> to vector<256x128xf32>
    %c0_23 = arith.constant 0 : index
    %c384 = arith.constant 384 : index
    %16 = vector.load %arg8[%c0_23, %c384] : memref<256x1152xf32, #tpu.memory_space<vmem>>, vector<256x128xf32>
    tpu.vector_store %arg8[%c0_23, %c384], %15 {strides = array<i32>} : memref<256x1152xf32, #tpu.memory_space<vmem>>, vector<256x128xf32>,
    %c1_24 = arith.constant 1 : index
    %c1_25 = arith.constant 1 : index
    %c0_26 = arith.constant 0 : index
    %17 = vector.load %arg7[%c1_24, %c1_25, %c0_26] : memref<18x18x128xf32, #tpu.memory_space<vmem>>, vector<16x16x128xf32>
    %18 = vector.shape_cast %17 : vector<16x16x128xf32> to vector<256x128xf32>
    %c0_27 = arith.constant 0 : index
    %c512 = arith.constant 512 : index
    %19 = vector.load %arg8[%c0_27, %c512] : memref<256x1152xf32, #tpu.memory_space<vmem>>, vector<256x128xf32>
    tpu.vector_store %arg8[%c0_27, %c512], %18 {strides = array<i32>} : memref<256x1152xf32, #tpu.memory_space<vmem>>, vector<256x128xf32>,
    %c1_28 = arith.constant 1 : index
    %c2_29 = arith.constant 2 : index
    %c0_30 = arith.constant 0 : index
    %20 = vector.load %arg7[%c1_28, %c2_29, %c0_30] : memref<18x18x128xf32, #tpu.memory_space<vmem>>, vector<16x16x128xf32>
    %21 = vector.shape_cast %20 : vector<16x16x128xf32> to vector<256x128xf32>
    %c0_31 = arith.constant 0 : index
    %c640 = arith.constant 640 : index
    %22 = vector.load %arg8[%c0_31, %c640] : memref<256x1152xf32, #tpu.memory_space<vmem>>, vector<256x128xf32>
    tpu.vector_store %arg8[%c0_31, %c640], %21 {strides = array<i32>} : memref<256x1152xf32, #tpu.memory_space<vmem>>, vector<256x128xf32>,
    %c2_32 = arith.constant 2 : index
    %c0_33 = arith.constant 0 : index
    %c0_34 = arith.constant 0 : index
    %23 = vector.load %arg7[%c2_32, %c0_33, %c0_34] : memref<18x18x128xf32, #tpu.memory_space<vmem>>, vector<16x16x128xf32>
    %24 = vector.shape_cast %23 : vector<16x16x128xf32> to vector<256x128xf32>
    %c0_35 = arith.constant 0 : index
    %c768 = arith.constant 768 : index
    %25 = vector.load %arg8[%c0_35, %c768] : memref<256x1152xf32, #tpu.memory_space<vmem>>, vector<256x128xf32>
    tpu.vector_store %arg8[%c0_35, %c768], %24 {strides = array<i32>} : memref<256x1152xf32, #tpu.memory_space<vmem>>, vector<256x128xf32>,
    %c2_36 = arith.constant 2 : index
    %c1_37 = arith.constant 1 : index
    %c0_38 = arith.constant 0 : index
    %26 = vector.load %arg7[%c2_36, %c1_37, %c0_38] : memref<18x18x128xf32, #tpu.memory_space<vmem>>, vector<16x16x128xf32>
    %27 = vector.shape_cast %26 : vector<16x16x128xf32> to vector<256x128xf32>
    %c0_39 = arith.constant 0 : index
    %c896 = arith.constant 896 : index
    %28 = vector.load %arg8[%c0_39, %c896] : memref<256x1152xf32, #tpu.memory_space<vmem>>, vector<256x128xf32>
    tpu.vector_store %arg8[%c0_39, %c896], %27 {strides = array<i32>} : memref<256x1152xf32, #tpu.memory_space<vmem>>, vector<256x128xf32>,
    %c2_40 = arith.constant 2 : index
    %c2_41 = arith.constant 2 : index
    %c0_42 = arith.constant 0 : index
    %29 = vector.load %arg7[%c2_40, %c2_41, %c0_42] : memref<18x18x128xf32, #tpu.memory_space<vmem>>, vector<16x16x128xf32>
    %30 = vector.shape_cast %29 : vector<16x16x128xf32> to vector<256x128xf32>
    %c0_43 = arith.constant 0 : index
    %c1024 = arith.constant 1024 : index
    %31 = vector.load %arg8[%c0_43, %c1024] : memref<256x1152xf32, #tpu.memory_space<vmem>>, vector<256x128xf32>
    tpu.vector_store %arg8[%c0_43, %c1024], %30 {strides = array<i32>} : memref<256x1152xf32, #tpu.memory_space<vmem>>, vector<256x128xf32>,
    %c0_44 = arith.constant 0 : index
    %c0_45 = arith.constant 0 : index
    %32 = vector.load %arg8[%c0_44, %c0_45] : memref<256x1152xf32, #tpu.memory_space<vmem>>, vector<256x1152xf32>
    %c0_46 = arith.constant 0 : index
    %c0_47 = arith.constant 0 : index
    %33 = vector.load %arg2[%c0_46, %c0_47] : memref<1152x128xf32, #tpu.memory_space<vmem>>, vector<1152x128xf32>
    %cst_48 = arith.constant dense<0.000000e+00> : vector<256x128xf32>
    %34 = tpu.matmul %32, %33, %cst_48 {dimension_numbers = #tpu.dot_dimension_numbers<[1], [0], [0], [1], [0, 0, 1, 1], [], []>} : vector<256x1152xf32>, vector<1152x128xf32>, vector<256x128xf32> -> vector<256x128xf32>
    %c0_49 = arith.constant 0 : index
    %c0_50 = arith.constant 0 : index
    %35 = vector.load %arg5[%c0_49, %c0_50] : memref<3x128xf32, #tpu.memory_space<vmem>>, vector<1x128xf32>
    %36 = vector.broadcast %35 : vector<1x128xf32> to vector<256x128xf32>
    %37 = arith.addf %34, %36 : vector<256x128xf32>
    %cst_51 = arith.constant 0.000000e+00 : f32
    %38 = vector.broadcast %cst_51 : f32 to vector<256x128xf32>
    %39 = arith.maximumf %37, %38 : vector<256x128xf32>
    %40 = vector.shape_cast %39 : vector<256x128xf32> to vector<16x16x128xf32>
    %c1_52 = arith.constant 1 : index
    %c1_53 = arith.constant 1 : index
    %c0_54 = arith.constant 0 : index
    %41 = vector.load %arg7[%c1_52, %c1_53, %c0_54] : memref<18x18x128xf32, #tpu.memory_space<vmem>>, vector<16x16x128xf32>
    tpu.vector_store %arg7[%c1_52, %c1_53, %c0_54], %40 {strides = array<i32>} : memref<18x18x128xf32, #tpu.memory_space<vmem>>, vector<16x16x128xf32>,
    %c0_55 = arith.constant 0 : index
    %c0_56 = arith.constant 0 : index
    %c0_57 = arith.constant 0 : index
    %42 = vector.load %arg7[%c0_55, %c0_56, %c0_57] : memref<18x18x128xf32, #tpu.memory_space<vmem>>, vector<16x16x128xf32>
    %43 = vector.shape_cast %42 : vector<16x16x128xf32> to vector<256x128xf32>
    %c0_58 = arith.constant 0 : index
    %c0_59 = arith.constant 0 : index
    %44 = vector.load %arg8[%c0_58, %c0_59] : memref<256x1152xf32, #tpu.memory_space<vmem>>, vector<256x128xf32>
    tpu.vector_store %arg8[%c0_58, %c0_59], %43 {strides = array<i32>} : memref<256x1152xf32, #tpu.memory_space<vmem>>, vector<256x128xf32>,
    %c0_60 = arith.constant 0 : index
    %c1_61 = arith.constant 1 : index
    %c0_62 = arith.constant 0 : index
    %45 = vector.load %arg7[%c0_60, %c1_61, %c0_62] : memref<18x18x128xf32, #tpu.memory_space<vmem>>, vector<16x16x128xf32>
    %46 = vector.shape_cast %45 : vector<16x16x128xf32> to vector<256x128xf32>
    %c0_63 = arith.constant 0 : index
    %c128_64 = arith.constant 128 : index
    %47 = vector.load %arg8[%c0_63, %c128_64] : memref<256x1152xf32, #tpu.memory_space<vmem>>, vector<256x128xf32>
    tpu.vector_store %arg8[%c0_63, %c128_64], %46 {strides = array<i32>} : memref<256x1152xf32, #tpu.memory_space<vmem>>, vector<256x128xf32>,
    %c0_65 = arith.constant 0 : index
    %c2_66 = arith.constant 2 : index
    %c0_67 = arith.constant 0 : index
    %48 = vector.load %arg7[%c0_65, %c2_66, %c0_67] : memref<18x18x128xf32, #tpu.memory_space<vmem>>, vector<16x16x128xf32>
    %49 = vector.shape_cast %48 : vector<16x16x128xf32> to vector<256x128xf32>
    %c0_68 = arith.constant 0 : index
    %c256_69 = arith.constant 256 : index
    %50 = vector.load %arg8[%c0_68, %c256_69] : memref<256x1152xf32, #tpu.memory_space<vmem>>, vector<256x128xf32>
    tpu.vector_store %arg8[%c0_68, %c256_69], %49 {strides = array<i32>} : memref<256x1152xf32, #tpu.memory_space<vmem>>, vector<256x128xf32>,
    %c1_70 = arith.constant 1 : index
    %c0_71 = arith.constant 0 : index
    %c0_72 = arith.constant 0 : index
    %51 = vector.load %arg7[%c1_70, %c0_71, %c0_72] : memref<18x18x128xf32, #tpu.memory_space<vmem>>, vector<16x16x128xf32>
    %52 = vector.shape_cast %51 : vector<16x16x128xf32> to vector<256x128xf32>
    %c0_73 = arith.constant 0 : index
    %c384_74 = arith.constant 384 : index
    %53 = vector.load %arg8[%c0_73, %c384_74] : memref<256x1152xf32, #tpu.memory_space<vmem>>, vector<256x128xf32>
    tpu.vector_store %arg8[%c0_73, %c384_74], %52 {strides = array<i32>} : memref<256x1152xf32, #tpu.memory_space<vmem>>, vector<256x128xf32>,
    %c1_75 = arith.constant 1 : index
    %c1_76 = arith.constant 1 : index
    %c0_77 = arith.constant 0 : index
    %54 = vector.load %arg7[%c1_75, %c1_76, %c0_77] : memref<18x18x128xf32, #tpu.memory_space<vmem>>, vector<16x16x128xf32>
    %55 = vector.shape_cast %54 : vector<16x16x128xf32> to vector<256x128xf32>
    %c0_78 = arith.constant 0 : index
    %c512_79 = arith.constant 512 : index
    %56 = vector.load %arg8[%c0_78, %c512_79] : memref<256x1152xf32, #tpu.memory_space<vmem>>, vector<256x128xf32>
    tpu.vector_store %arg8[%c0_78, %c512_79], %55 {strides = array<i32>} : memref<256x1152xf32, #tpu.memory_space<vmem>>, vector<256x128xf32>,
    %c1_80 = arith.constant 1 : index
    %c2_81 = arith.constant 2 : index
    %c0_82 = arith.constant 0 : index
    %57 = vector.load %arg7[%c1_80, %c2_81, %c0_82] : memref<18x18x128xf32, #tpu.memory_space<vmem>>, vector<16x16x128xf32>
    %58 = vector.shape_cast %57 : vector<16x16x128xf32> to vector<256x128xf32>
    %c0_83 = arith.constant 0 : index
    %c640_84 = arith.constant 640 : index
    %59 = vector.load %arg8[%c0_83, %c640_84] : memref<256x1152xf32, #tpu.memory_space<vmem>>, vector<256x128xf32>
    tpu.vector_store %arg8[%c0_83, %c640_84], %58 {strides = array<i32>} : memref<256x1152xf32, #tpu.memory_space<vmem>>, vector<256x128xf32>,
    %c2_85 = arith.constant 2 : index
    %c0_86 = arith.constant 0 : index
    %c0_87 = arith.constant 0 : index
    %60 = vector.load %arg7[%c2_85, %c0_86, %c0_87] : memref<18x18x128xf32, #tpu.memory_space<vmem>>, vector<16x16x128xf32>
    %61 = vector.shape_cast %60 : vector<16x16x128xf32> to vector<256x128xf32>
    %c0_88 = arith.constant 0 : index
    %c768_89 = arith.constant 768 : index
    %62 = vector.load %arg8[%c0_88, %c768_89] : memref<256x1152xf32, #tpu.memory_space<vmem>>, vector<256x128xf32>
    tpu.vector_store %arg8[%c0_88, %c768_89], %61 {strides = array<i32>} : memref<256x1152xf32, #tpu.memory_space<vmem>>, vector<256x128xf32>,
    %c2_90 = arith.constant 2 : index
    %c1_91 = arith.constant 1 : index
    %c0_92 = arith.constant 0 : index
    %63 = vector.load %arg7[%c2_90, %c1_91, %c0_92] : memref<18x18x128xf32, #tpu.memory_space<vmem>>, vector<16x16x128xf32>
    %64 = vector.shape_cast %63 : vector<16x16x128xf32> to vector<256x128xf32>
    %c0_93 = arith.constant 0 : index
    %c896_94 = arith.constant 896 : index
    %65 = vector.load %arg8[%c0_93, %c896_94] : memref<256x1152xf32, #tpu.memory_space<vmem>>, vector<256x128xf32>
    tpu.vector_store %arg8[%c0_93, %c896_94], %64 {strides = array<i32>} : memref<256x1152xf32, #tpu.memory_space<vmem>>, vector<256x128xf32>,
    %c2_95 = arith.constant 2 : index
    %c2_96 = arith.constant 2 : index
    %c0_97 = arith.constant 0 : index
    %66 = vector.load %arg7[%c2_95, %c2_96, %c0_97] : memref<18x18x128xf32, #tpu.memory_space<vmem>>, vector<16x16x128xf32>
    %67 = vector.shape_cast %66 : vector<16x16x128xf32> to vector<256x128xf32>
    %c0_98 = arith.constant 0 : index
    %c1024_99 = arith.constant 1024 : index
    %68 = vector.load %arg8[%c0_98, %c1024_99] : memref<256x1152xf32, #tpu.memory_space<vmem>>, vector<256x128xf32>
    tpu.vector_store %arg8[%c0_98, %c1024_99], %67 {strides = array<i32>} : memref<256x1152xf32, #tpu.memory_space<vmem>>, vector<256x128xf32>,
    %c0_100 = arith.constant 0 : index
    %c0_101 = arith.constant 0 : index
    %69 = vector.load %arg8[%c0_100, %c0_101] : memref<256x1152xf32, #tpu.memory_space<vmem>>, vector<256x1152xf32>
    %c0_102 = arith.constant 0 : index
    %c0_103 = arith.constant 0 : index
    %70 = vector.load %arg3[%c0_102, %c0_103] : memref<1152x128xf32, #tpu.memory_space<vmem>>, vector<1152x128xf32>
    %cst_104 = arith.constant dense<0.000000e+00> : vector<256x128xf32>
    %71 = tpu.matmul %69, %70, %cst_104 {dimension_numbers = #tpu.dot_dimension_numbers<[1], [0], [0], [1], [0, 0, 1, 1], [], []>} : vector<256x1152xf32>, vector<1152x128xf32>, vector<256x128xf32> -> vector<256x128xf32>
    %c1_105 = arith.constant 1 : index
    %c0_106 = arith.constant 0 : index
    %72 = vector.load %arg5[%c1_105, %c0_106] : memref<3x128xf32, #tpu.memory_space<vmem>>, vector<1x128xf32>
    %73 = vector.broadcast %72 : vector<1x128xf32> to vector<256x128xf32>
    %74 = arith.addf %71, %73 : vector<256x128xf32>
    %cst_107 = arith.constant 0.000000e+00 : f32
    %75 = vector.broadcast %cst_107 : f32 to vector<256x128xf32>
    %76 = arith.maximumf %74, %75 : vector<256x128xf32>
    %77 = vector.shape_cast %76 : vector<256x128xf32> to vector<16x16x128xf32>
    %c1_108 = arith.constant 1 : index
    %c1_109 = arith.constant 1 : index
    %c0_110 = arith.constant 0 : index
    %78 = vector.load %arg7[%c1_108, %c1_109, %c0_110] : memref<18x18x128xf32, #tpu.memory_space<vmem>>, vector<16x16x128xf32>
    tpu.vector_store %arg7[%c1_108, %c1_109, %c0_110], %77 {strides = array<i32>} : memref<18x18x128xf32, #tpu.memory_space<vmem>>, vector<16x16x128xf32>,
    %c0_111 = arith.constant 0 : index
    %c0_112 = arith.constant 0 : index
    %c0_113 = arith.constant 0 : index
    %79 = vector.load %arg7[%c0_111, %c0_112, %c0_113] : memref<18x18x128xf32, #tpu.memory_space<vmem>>, vector<16x16x128xf32>
    %80 = vector.shape_cast %79 : vector<16x16x128xf32> to vector<256x128xf32>
    %c0_114 = arith.constant 0 : index
    %c0_115 = arith.constant 0 : index
    %81 = vector.load %arg8[%c0_114, %c0_115] : memref<256x1152xf32, #tpu.memory_space<vmem>>, vector<256x128xf32>
    tpu.vector_store %arg8[%c0_114, %c0_115], %80 {strides = array<i32>} : memref<256x1152xf32, #tpu.memory_space<vmem>>, vector<256x128xf32>,
    %c0_116 = arith.constant 0 : index
    %c1_117 = arith.constant 1 : index
    %c0_118 = arith.constant 0 : index
    %82 = vector.load %arg7[%c0_116, %c1_117, %c0_118] : memref<18x18x128xf32, #tpu.memory_space<vmem>>, vector<16x16x128xf32>
    %83 = vector.shape_cast %82 : vector<16x16x128xf32> to vector<256x128xf32>
    %c0_119 = arith.constant 0 : index
    %c128_120 = arith.constant 128 : index
    %84 = vector.load %arg8[%c0_119, %c128_120] : memref<256x1152xf32, #tpu.memory_space<vmem>>, vector<256x128xf32>
    tpu.vector_store %arg8[%c0_119, %c128_120], %83 {strides = array<i32>} : memref<256x1152xf32, #tpu.memory_space<vmem>>, vector<256x128xf32>,
    %c0_121 = arith.constant 0 : index
    %c2_122 = arith.constant 2 : index
    %c0_123 = arith.constant 0 : index
    %85 = vector.load %arg7[%c0_121, %c2_122, %c0_123] : memref<18x18x128xf32, #tpu.memory_space<vmem>>, vector<16x16x128xf32>
    %86 = vector.shape_cast %85 : vector<16x16x128xf32> to vector<256x128xf32>
    %c0_124 = arith.constant 0 : index
    %c256_125 = arith.constant 256 : index
    %87 = vector.load %arg8[%c0_124, %c256_125] : memref<256x1152xf32, #tpu.memory_space<vmem>>, vector<256x128xf32>
    tpu.vector_store %arg8[%c0_124, %c256_125], %86 {strides = array<i32>} : memref<256x1152xf32, #tpu.memory_space<vmem>>, vector<256x128xf32>,
    %c1_126 = arith.constant 1 : index
    %c0_127 = arith.constant 0 : index
    %c0_128 = arith.constant 0 : index
    %88 = vector.load %arg7[%c1_126, %c0_127, %c0_128] : memref<18x18x128xf32, #tpu.memory_space<vmem>>, vector<16x16x128xf32>
    %89 = vector.shape_cast %88 : vector<16x16x128xf32> to vector<256x128xf32>
    %c0_129 = arith.constant 0 : index
    %c384_130 = arith.constant 384 : index
    %90 = vector.load %arg8[%c0_129, %c384_130] : memref<256x1152xf32, #tpu.memory_space<vmem>>, vector<256x128xf32>
    tpu.vector_store %arg8[%c0_129, %c384_130], %89 {strides = array<i32>} : memref<256x1152xf32, #tpu.memory_space<vmem>>, vector<256x128xf32>,
    %c1_131 = arith.constant 1 : index
    %c1_132 = arith.constant 1 : index
    %c0_133 = arith.constant 0 : index
    %91 = vector.load %arg7[%c1_131, %c1_132, %c0_133] : memref<18x18x128xf32, #tpu.memory_space<vmem>>, vector<16x16x128xf32>
    %92 = vector.shape_cast %91 : vector<16x16x128xf32> to vector<256x128xf32>
    %c0_134 = arith.constant 0 : index
    %c512_135 = arith.constant 512 : index
    %93 = vector.load %arg8[%c0_134, %c512_135] : memref<256x1152xf32, #tpu.memory_space<vmem>>, vector<256x128xf32>
    tpu.vector_store %arg8[%c0_134, %c512_135], %92 {strides = array<i32>} : memref<256x1152xf32, #tpu.memory_space<vmem>>, vector<256x128xf32>,
    %c1_136 = arith.constant 1 : index
    %c2_137 = arith.constant 2 : index
    %c0_138 = arith.constant 0 : index
    %94 = vector.load %arg7[%c1_136, %c2_137, %c0_138] : memref<18x18x128xf32, #tpu.memory_space<vmem>>, vector<16x16x128xf32>
    %95 = vector.shape_cast %94 : vector<16x16x128xf32> to vector<256x128xf32>
    %c0_139 = arith.constant 0 : index
    %c640_140 = arith.constant 640 : index
    %96 = vector.load %arg8[%c0_139, %c640_140] : memref<256x1152xf32, #tpu.memory_space<vmem>>, vector<256x128xf32>
    tpu.vector_store %arg8[%c0_139, %c640_140], %95 {strides = array<i32>} : memref<256x1152xf32, #tpu.memory_space<vmem>>, vector<256x128xf32>,
    %c2_141 = arith.constant 2 : index
    %c0_142 = arith.constant 0 : index
    %c0_143 = arith.constant 0 : index
    %97 = vector.load %arg7[%c2_141, %c0_142, %c0_143] : memref<18x18x128xf32, #tpu.memory_space<vmem>>, vector<16x16x128xf32>
    %98 = vector.shape_cast %97 : vector<16x16x128xf32> to vector<256x128xf32>
    %c0_144 = arith.constant 0 : index
    %c768_145 = arith.constant 768 : index
    %99 = vector.load %arg8[%c0_144, %c768_145] : memref<256x1152xf32, #tpu.memory_space<vmem>>, vector<256x128xf32>
    tpu.vector_store %arg8[%c0_144, %c768_145], %98 {strides = array<i32>} : memref<256x1152xf32, #tpu.memory_space<vmem>>, vector<256x128xf32>,
    %c2_146 = arith.constant 2 : index
    %c1_147 = arith.constant 1 : index
    %c0_148 = arith.constant 0 : index
    %100 = vector.load %arg7[%c2_146, %c1_147, %c0_148] : memref<18x18x128xf32, #tpu.memory_space<vmem>>, vector<16x16x128xf32>
    %101 = vector.shape_cast %100 : vector<16x16x128xf32> to vector<256x128xf32>
    %c0_149 = arith.constant 0 : index
    %c896_150 = arith.constant 896 : index
    %102 = vector.load %arg8[%c0_149, %c896_150] : memref<256x1152xf32, #tpu.memory_space<vmem>>, vector<256x128xf32>
    tpu.vector_store %arg8[%c0_149, %c896_150], %101 {strides = array<i32>} : memref<256x1152xf32, #tpu.memory_space<vmem>>, vector<256x128xf32>,
    %c2_151 = arith.constant 2 : index
    %c2_152 = arith.constant 2 : index
    %c0_153 = arith.constant 0 : index
    %103 = vector.load %arg7[%c2_151, %c2_152, %c0_153] : memref<18x18x128xf32, #tpu.memory_space<vmem>>, vector<16x16x128xf32>
    %104 = vector.shape_cast %103 : vector<16x16x128xf32> to vector<256x128xf32>
    %c0_154 = arith.constant 0 : index
    %c1024_155 = arith.constant 1024 : index
    %105 = vector.load %arg8[%c0_154, %c1024_155] : memref<256x1152xf32, #tpu.memory_space<vmem>>, vector<256x128xf32>
    tpu.vector_store %arg8[%c0_154, %c1024_155], %104 {strides = array<i32>} : memref<256x1152xf32, #tpu.memory_space<vmem>>, vector<256x128xf32>,
    %c0_156 = arith.constant 0 : index
    %c0_157 = arith.constant 0 : index
    %106 = vector.load %arg8[%c0_156, %c0_157] : memref<256x1152xf32, #tpu.memory_space<vmem>>, vector<256x1152xf32>
    %c0_158 = arith.constant 0 : index
    %c0_159 = arith.constant 0 : index
    %107 = vector.load %arg4[%c0_158, %c0_159] : memref<1152x128xf32, #tpu.memory_space<vmem>>, vector<1152x128xf32>
    %cst_160 = arith.constant dense<0.000000e+00> : vector<256x128xf32>
    %108 = tpu.matmul %106, %107, %cst_160 {dimension_numbers = #tpu.dot_dimension_numbers<[1], [0], [0], [1], [0, 0, 1, 1], [], []>} : vector<256x1152xf32>, vector<1152x128xf32>, vector<256x128xf32> -> vector<256x128xf32>
    %c2_161 = arith.constant 2 : index
    %c0_162 = arith.constant 0 : index
    %109 = vector.load %arg5[%c2_161, %c0_162] : memref<3x128xf32, #tpu.memory_space<vmem>>, vector<1x128xf32>
    %110 = vector.broadcast %109 : vector<1x128xf32> to vector<256x128xf32>
    %111 = arith.addf %108, %110 : vector<256x128xf32>
    %cst_163 = arith.constant 0.000000e+00 : f32
    %112 = vector.broadcast %cst_163 : f32 to vector<256x128xf32>
    %113 = arith.maximumf %111, %112 : vector<256x128xf32>
    %114 = vector.shape_cast %113 : vector<256x128xf32> to vector<1x256x128xf32>
    %c0_164 = arith.constant 0 : index
    %c0_165 = arith.constant 0 : index
    %c0_166 = arith.constant 0 : index
    %115 = vector.load %arg6[%c0_164, %c0_165, %c0_166] : memref<1x256x128xf32, #tpu.memory_space<vmem>>, vector<1x256x128xf32>
    tpu.vector_store %arg6[%c0_164, %c0_165, %c0_166], %114 {strides = array<i32>} : memref<1x256x128xf32, #tpu.memory_space<vmem>>, vector<1x256x128xf32>,
    return
  }
  func.func @transform_0(%arg0: i32) -> (i32, i32, i32, i32) {
    %c0_i32 = arith.constant 0 : i32
    %c0_i32_0 = arith.constant 0 : i32
    %c0_i32_1 = arith.constant 0 : i32
    %c0_i32_2 = arith.constant 0 : i32
    return %arg0, %c0_i32, %c0_i32_0, %c0_i32_1 : i32, i32, i32, i32
  }
  func.func @transform_1(%arg0: i32) -> (i32, i32) {
    %c0_i32 = arith.constant 0 : i32
    %c0_i32_0 = arith.constant 0 : i32
    %c0_i32_1 = arith.constant 0 : i32
    return %c0_i32, %c0_i32_0 : i32, i32
  }
  func.func @transform_2(%arg0: i32) -> (i32, i32) {
    %c0_i32 = arith.constant 0 : i32
    %c0_i32_0 = arith.constant 0 : i32
    %c0_i32_1 = arith.constant 0 : i32
    return %c0_i32, %c0_i32_0 : i32, i32
  }
  func.func @transform_3(%arg0: i32) -> (i32, i32) {
    %c0_i32 = arith.constant 0 : i32
    %c0_i32_0 = arith.constant 0 : i32
    %c0_i32_1 = arith.constant 0 : i32
    return %c0_i32, %c0_i32_0 : i32, i32
  }
  func.func @transform_4(%arg0: i32) -> (i32, i32) {
    %c0_i32 = arith.constant 0 : i32
    %c0_i32_0 = arith.constant 0 : i32
    %c0_i32_1 = arith.constant 0 : i32
    return %c0_i32, %c0_i32_0 : i32, i32
  }
  func.func @transform_5(%arg0: i32) -> (i32, i32, i32) {
    %c0_i32 = arith.constant 0 : i32
    %c0_i32_0 = arith.constant 0 : i32
    %c0_i32_1 = arith.constant 0 : i32
    return %arg0, %c0_i32, %c0_i32_0 : i32, i32, i32
  }
}

</mosaic_0001>

<bundles_post_ra>
// kernel: tp_branch_forward.1
= control target key start
LH: loop header
LB: loop body
LE: loop exit
PB: predicated region body
PF: predicated region fallthrough
CT: control target
= control target key end

     0   :  { %s7564_s18 = smov 0   ;;  %s11704_s0 = inlined_call_operand.vmem [shape: f32[2,18,18,4], index: 0, kind: input, shape index: {}]   ;;  %s11705_s1 = inlined_call_operand.vmem [shape: f32[1152,128], index: 1, kind: input, shape index: {}]   ;;  %s11706_s2 = inlined_call_operand.vmem [shape: f32[1152,128], index: 2, kind: input, shape index: {}]   ;;  %s11707_s3 = inlined_call_operand.vmem [shape: f32[1152,128], index: 3, kind: input, shape index: {}]   ;;  %s11708_s4 = inlined_call_operand.vmem [shape: f32[3,128], index: 4, kind: input, shape index: {}]   ;;  %s11709_s5 = inlined_call_operand.vmem [shape: f32[2,256,128], index: 5, kind: output, shape index: {}]  }
   0x1 LB: > { %s7052_s19 = sadd.s32 4294967295, %s7531_s18   ;;  %p7056_p0 = scmp.ge.s32.totalorder %s7531_s18, 1  ;;  %s7531_s18 = sphi %s7564_s18, %s15_s18  }
   0x2   : > { %p187_p1 = scmp.lt.s32.totalorder %s7531_s18, 3 }
   0x4   : > { %p188_p2 = pnand %p7056_p0, %p187_p1 }
   0x6   : > { %191 = sbr.rel (%p188_p2) target bundleno = 1534 (0x5fe), region = 40 }
   0xb   : > { %v1270_v0 = vld [vmem:[%s11705_s1 + $0x78] sm:$0xff]  ;;  %v7533_v2 = vmov 0.0   ;;  %v1269_v3 = vld [vmem:[%s11705_s1 + $0x70] sm:$0xff]  ;;  %v1268_v5 = vld [vmem:[%s11705_s1 + $0x68] sm:$0xff]  ;;  %p215_p3 = scmp.lt.s32.totalorder %s7052_s19, 1  ;;  %vm333_vm0 = vcmask 31744  }
   0xc   : > { %v1302_v1 = vld [vmem:[%s11705_s1 + $0x178] sm:$0xff]  ;;  %1404 = vmatprep.subr.mxu0 %v7533_v2  ;;  %225 = vst [vmem:[#allocation2] sm:$0xff] %v7533_v2  ;;  %226 = vst [vmem:[#allocation2 + $0x8] sm:$0xff] %v7533_v2  ;;  %1629 = vmatprep.subr.mxu1 %v7533_v2  ;;  %v1301_v4 = vld [vmem:[%s11705_s1 + $0x170] sm:$0xff]  ;;  %vm336_vm1 = vcmask 25600  }
   0xd   : > { %227 = vst [vmem:[#allocation2 + $0x10] sm:$0x3] %v7533_v2  ;;  %228 = vst [vmem:[#allocation2 + $0x18] sm:$0xff] %v7533_v2  ;;  %1405 = vmatpush1.msra.mxu0 %v1270_v0  ;;  %1630 = vmatpush1.msra.mxu1 %v1302_v1  ;;  %v1300_v6 = vld [vmem:[%s11705_s1 + $0x168] sm:$0xff]  ;;  %v1267_v7 = vld [vmem:[%s11705_s1 + $0x60] sm:$0xff]  ;;  %s11947_s19 = smov (!%p215_p3, %s7052_s19), 1 }
   0xe   : > { %229 = vst [vmem:[#allocation2 + $0x20] sm:$0xff] %v7533_v2  ;;  %230 = vst [vmem:[#allocation2 + $0x28] sm:$0x3] %v7533_v2  ;;  %1406 = vmatprep.subr.mxu0 %v7533_v2  ;;  %1631 = vmatprep.subr.mxu1 %v7533_v2  ;;  %v1299_v8 = vld [vmem:[%s11705_s1 + $0x160] sm:$0xff]  ;;  %v1266_v9 = vld [vmem:[%s11705_s1 + $0x58] sm:$0xff]  ;;  %s7514_s29 = smul.u32 432, %s11947_s19 }
   0xf   : > { %231 = vst [vmem:[#allocation2 + $0x30] sm:$0xff] %v7533_v2  ;;  %232 = vst [vmem:[#allocation2 + $0x38] sm:$0xff] %v7533_v2  ;;  %1407 = vmatpush1.msra.mxu0 %v1269_v3  ;;  %1632 = vmatpush1.msra.mxu1 %v1301_v4  ;;  %v1298_v10 = vld [vmem:[%s11705_s1 + $0x158] sm:$0xff]  ;;  %v1265_v11 = vld [vmem:[%s11705_s1 + $0x50] sm:$0xff]  ;;  %s7065_s28 = sshll.u32 %s11947_s19, 8 }
  0x10   : > { %233 = vst [vmem:[#allocation2 + $0x40] sm:$0x3] %v7533_v2  ;;  %234 = vst [vmem:[#allocation2 + $0x48] sm:$0xff] %v7533_v2  ;;  %1408 = vmatprep.subr.mxu0 %v7533_v2  ;;  %1633 = vmatprep.subr.mxu1 %v7533_v2  ;;  %v1297_v12 = vld [vmem:[%s11705_s1 + $0x150] sm:$0xff]  ;;  %v1264_v13 = vld [vmem:[%s11705_s1 + $0x48] sm:$0xff]  ;;  %s7714_s15 = scalar_lea.vmem %s11704_s0, %s7514_s29  ;;  %s11628_s6 = scalar_lea.vmem %s11709_s5, %s7065_s28 }
  0x11   : > { %235 = vst [vmem:[#allocation2 + $0x50] sm:$0xff] %v7533_v2  ;;  %236 = vst [vmem:[#allocation2 + $0x58] sm:$0x3] %v7533_v2  ;;  %1409 = vmatpush1.msra.mxu0 %v1268_v5  ;;  %1634 = vmatpush1.msra.mxu1 %v1300_v6  ;;  %v1296_v14 = vld [vmem:[%s11705_s1 + $0x148] sm:$0xff]  ;;  %v1263_v15 = vld [vmem:[%s11705_s1 + $0x40] sm:$0xff] }
  0x12   : > { %237 = vst [vmem:[#allocation2 + $0x60] sm:$0xff] %v7533_v2  ;;  %238 = vst [vmem:[#allocation2 + $0x68] sm:$0xff] %v7533_v2  ;;  %1410 = vmatprep.subr.mxu0 %v7533_v2  ;;  %1635 = vmatprep.subr.mxu1 %v7533_v2  ;;  %v1295_v16 = vld [vmem:[%s11705_s1 + $0x140] sm:$0xff]  ;;  %v1262_v17 = vld [vmem:[%s11705_s1 + $0x38] sm:$0xff] }
  0x13   : > { %239 = vst [vmem:[#allocation2 + $0x70] sm:$0x3] %v7533_v2  ;;  %240 = vst [vmem:[#allocation2 + $0x78] sm:$0xff] %v7533_v2  ;;  %1411 = vmatpush1.msra.mxu0 %v1267_v7  ;;  %1636 = vmatpush1.msra.mxu1 %v1299_v8  ;;  %v1294_v18 = vld [vmem:[%s11705_s1 + $0x138] sm:$0xff]  ;;  %v1261_v19 = vld [vmem:[%s11705_s1 + $0x30] sm:$0xff] }
  0x14   : > { %241 = vst [vmem:[#allocation2 + $0x80] sm:$0xff] %v7533_v2  ;;  %242 = vst [vmem:[#allocation2 + $0x88] sm:$0x3] %v7533_v2  ;;  %1412 = vmatprep.subr.mxu0 %v7533_v2  ;;  %1637 = vmatprep.subr.mxu1 %v7533_v2  ;;  %v1293_v20 = vld [vmem:[%s11705_s1 + $0x130] sm:$0xff]  ;;  %v1260_v21 = vld [vmem:[%s11705_s1 + $0x28] sm:$0xff] }
  0x15   : > { %243 = vst [vmem:[#allocation2 + $0x90] sm:$0xff] %v7533_v2  ;;  %244 = vst [vmem:[#allocation2 + $0x98] sm:$0xff] %v7533_v2  ;;  %1413 = vmatpush1.msra.mxu0 %v1266_v9  ;;  %1638 = vmatpush1.msra.mxu1 %v1298_v10  ;;  %v1292_v22 = vld [vmem:[%s11705_s1 + $0x128] sm:$0xff]  ;;  %v279_v23 = vld [vmem:[%s7714_s15] sm:$0xff] }
  0x16   : > { %245 = vst [vmem:[#allocation2 + $0xa0] sm:$0x3] %v7533_v2  ;;  %246 = vst [vmem:[#allocation2 + $0xa8] sm:$0xff] %v7533_v2  ;;  %1414 = vmatprep.subr.mxu0 %v7533_v2  ;;  %1639 = vmatprep.subr.mxu1 %v7533_v2  ;;  %v1259_v24 = vld [vmem:[%s11705_s1 + $0x20] sm:$0xff]  ;;  %v280_v26 = vld [vmem:[%s7714_s15 + $0x8] sm:$0xff] }
  0x17   : > { %247 = vst [vmem:[#allocation2 + $0xb0] sm:$0xff] %v7533_v2  ;;  %248 = vst [vmem:[#allocation2 + $0xb8] sm:$0x3] %v7533_v2  ;;  %1415 = vmatpush1.msra.mxu0 %v1265_v11  ;;  %1640 = vmatpush1.msra.mxu1 %v1297_v12  ;;  %v1291_v25 = vld [vmem:[%s11705_s1 + $0x120] sm:$0xff]  ;;  %v1258_v27 = vld [vmem:[%s11705_s1 + $0x18] sm:$0xff] }
  0x18   : > { %249 = vst [vmem:[#allocation2 + $0xc0] sm:$0xff] %v7533_v2  ;;  %250 = vst [vmem:[#allocation2 + $0xc8] sm:$0xff] %v7533_v2  ;;  %1416 = vmatprep.subr.mxu0 %v7533_v2  ;;  %1641 = vmatprep.subr.mxu1 %v7533_v2  ;;  %v282_v28 = vld [vmem:[%s7714_s15 + $0x18] sm:$0xff]  ;;  %v281_v29 = vld [vmem:[%s7714_s15 + $0x10] sm:$0x3] }
  0x19   : > { %251 = vst [vmem:[#allocation2 + $0xd0] sm:$0x3] %v7533_v2  ;;  %252 = vst [vmem:[#allocation2 + $0xd8] sm:$0xff] %v7533_v2  ;;  %1417 = vmatpush1.msra.mxu0 %v1264_v13  ;;  %1642 = vmatpush1.msra.mxu1 %v1296_v14  ;;  %v1290_v30 = vld [vmem:[%s11705_s1 + $0x118] sm:$0xff]  ;;  %v283_v31 = vld [vmem:[%s7714_s15 + $0x20] sm:$0xff] }
  0x1a   : > { %253 = vst [vmem:[#allocation2 + $0xe0] sm:$0xff] %v7533_v2  ;;  %254 = vst [vmem:[#allocation2 + $0xe8] sm:$0x3] %v7533_v2  ;;  %1418 = vmatprep.subr.mxu0 %v7533_v2  ;;  %1643 = vmatprep.subr.mxu1 %v7533_v2  ;;  %v285_v32 = vld [vmem:[%s7714_s15 + $0x30] sm:$0xff]  ;;  %v284_v33 = vld [vmem:[%s7714_s15 + $0x28] sm:$0x3] }
  0x1b   : > { %255 = vst [vmem:[#allocation2 + $0xf0] sm:$0xff] %v7533_v2  ;;  %256 = vst [vmem:[#allocation2 + $0xf8] sm:$0xff] %v7533_v2  ;;  %1419 = vmatpush1.msra.mxu0 %v1263_v15  ;;  %1644 = vmatpush1.msra.mxu1 %v1295_v16  ;;  %v286_v34 = vld [vmem:[%s7714_s15 + $0x38] sm:$0xff]  ;;  %v1257_v35 = vld [vmem:[%s11705_s1 + $0x10] sm:$0xff] }
  0x1c   : > { %257 = vst [vmem:[#allocation2 + $0x100] sm:$0x3] %v7533_v2  ;;  %258 = vst [vmem:[#allocation2 + $0x108] sm:$0xff] %v7533_v2  ;;  %1420 = vmatprep.subr.mxu0 %v7533_v2  ;;  %1645 = vmatprep.subr.mxu1 %v7533_v2  ;;  %v1289_v36 = vld [vmem:[%s11705_s1 + $0x110] sm:$0xff]  ;;  %v288_v37 = vld [vmem:[%s7714_s15 + $0x48] sm:$0xff] }
  0x1d   : > { %259 = vst [vmem:[#allocation2 + $0x110] sm:$0xff] %v7533_v2  ;;  %260 = vst [vmem:[#allocation2 + $0x118] sm:$0x3] %v7533_v2  ;;  %1421 = vmatpush1.msra.mxu0 %v1262_v17  ;;  %1646 = vmatpush1.msra.mxu1 %v1294_v18  ;;  %v1256_v38 = vld [vmem:[%s11705_s1 + $0x8] sm:$0xff]  ;;  %v287_v39 = vld [vmem:[%s7714_s15 + $0x40] sm:$0x3] }
  0x1e   : > { %261 = vst [vmem:[#allocation2 + $0x120] sm:$0xff] %v7533_v2  ;;  %262 = vst [vmem:[#allocation2 + $0x128] sm:$0xff] %v7533_v2  ;;  %1422 = vmatprep.subr.mxu0 %v7533_v2  ;;  %1647 = vmatprep.subr.mxu1 %v7533_v2  ;;  %v289_v40 = vld [vmem:[%s7714_s15 + $0x50] sm:$0xff]  ;;  %v1288_v41 = vld [vmem:[%s11705_s1 + $0x108] sm:$0xff] }
  0x1f   : > { %263 = vst [vmem:[#allocation2 + $0x130] sm:$0x3] %v7533_v2  ;;  %264 = vst [vmem:[#allocation2 + $0x138] sm:$0xff] %v7533_v2  ;;  %1423 = vmatpush1.msra.mxu0 %v1261_v19  ;;  %1648 = vmatpush1.msra.mxu1 %v1293_v20  ;;  %v291_v42 = vld [vmem:[%s7714_s15 + $0x60] sm:$0xff]  ;;  %v290_v43 = vld [vmem:[%s7714_s15 + $0x58] sm:$0x3] }
  0x20   : > { %265 = vst [vmem:[#allocation2 + $0x140] sm:$0xff] %v7533_v2  ;;  %266 = vst [vmem:[#allocation2 + $0x148] sm:$0x3] %v7533_v2  ;;  %1424 = vmatprep.subr.mxu0 %v7533_v2  ;;  %1649 = vmatprep.subr.mxu1 %v7533_v2  ;;  %v292_v44 = vld [vmem:[%s7714_s15 + $0x68] sm:$0xff]  ;;  %v1255_v45 = vld [vmem:[%s11705_s1] sm:$0xff] }
  0x21   : > { %267 = vst [vmem:[#allocation2 + $0x150] sm:$0xff] %v7533_v2  ;;  %268 = vst [vmem:[#allocation2 + $0x158] sm:$0xff] %v7533_v2  ;;  %1425 = vmatpush1.msra.mxu0 %v1260_v21  ;;  %1650 = vmatpush1.msra.mxu1 %v1292_v22  ;;  %v1287_v46 = vld [vmem:[%s11705_s1 + $0x100] sm:$0xff]  ;;  %v1286_v47 = vld [vmem:[%s11705_s1 + $0xf8] sm:$0xff] }
  0x22   : > { %269 = vst [vmem:[#allocation2 + $0x160] sm:$0x3] %v7533_v2  ;;  %270 = vst [vmem:[#allocation2 + $0x168] sm:$0xff] %v7533_v2  ;;  %1426 = vmatprep.subr.mxu0 %v7533_v2  ;;  %1651 = vmatprep.subr.mxu1 %v7533_v2  ;;  %v1318_v48 = vld [vmem:[%s11705_s1 + $0x1f8] sm:$0xff]  ;;  %v1285_v49 = vld [vmem:[%s11705_s1 + $0xf0] sm:$0xff] }
  0x23   : > { %271 = vst [vmem:[#allocation2 + $0x170] sm:$0xff] %v7533_v2  ;;  %272 = vst [vmem:[#allocation2 + $0x178] sm:$0x3] %v7533_v2  ;;  %1427 = vmatpush1.msra.mxu0 %v1259_v24  ;;  %1652 = vmatpush1.msra.mxu1 %v1291_v25  ;;  %v1317_v50 = vld [vmem:[%s11705_s1 + $0x1f0] sm:$0xff]  ;;  %v1284_v51 = vld [vmem:[%s11705_s1 + $0xe8] sm:$0xff] }
  0x24   : > { %273 = vst [vmem:[#allocation2 + $0x180] sm:$0xff] %v7533_v2  ;;  %274 = vst [vmem:[#allocation2 + $0x188] sm:$0xff] %v7533_v2  ;;  %1428 = vmatprep.subr.mxu0 %v7533_v2  ;;  %1653 = vmatprep.subr.mxu1 %v7533_v2  ;;  %v1316_v52 = vld [vmem:[%s11705_s1 + $0x1e8] sm:$0xff]  ;;  %v1283_v53 = vld [vmem:[%s11705_s1 + $0xe0] sm:$0xff] }
  0x25   : > { %275 = vst [vmem:[#allocation2 + $0x190] sm:$0x3] %v7533_v2  ;;  %276 = vst [vmem:[#allocation2 + $0x198] sm:$0xff] %v7533_v2  ;;  %1429 = vmatpush1.msra.mxu0 %v1258_v27  ;;  %1654 = vmatpush1.msra.mxu1 %v1290_v30  ;;  %v1315_v54 = vld [vmem:[%s11705_s1 + $0x1e0] sm:$0xff]  ;;  %v294_v55 = vld [vmem:[%s7714_s15 + $0x78] sm:$0xff] }
  0x26   : > { %277 = vst [vmem:[#allocation2 + $0x1a0] sm:$0xff] %v7533_v2  ;;  %278 = vst [vmem:[#allocation2 + $0x1a8] sm:$0x3] %v7533_v2  ;;  %1430 = vmatprep.subr.mxu0 %v7533_v2  ;;  %1655 = vmatprep.subr.mxu1 %v7533_v2  ;;  %v1282_v56 = vld [vmem:[%s11705_s1 + $0xd8] sm:$0xff]  ;;  %v293_v57 = vld [vmem:[%s7714_s15 + $0x70] sm:$0x3] }
  0x27   : > { %334 = vst.msk [vmem:[#allocation2] sm:$0xff] %vm333_vm0, %v279_v23  ;;  %335 = vst.msk [vmem:[#allocation2 + $0x8] sm:$0xff] %vm333_vm0, %v280_v26  ;;  %1431 = vmatpush1.msra.mxu0 %v1257_v35  ;;  %1656 = vmatpush1.msra.mxu1 %v1289_v36  ;;  %v1314_v58 = vld [vmem:[%s11705_s1 + $0x1d8] sm:$0xff]  ;;  %v295_v59 = vld [vmem:[%s7714_s15 + $0x80] sm:$0xff] }
  0x28   : > { %338 = vst.msk [vmem:[#allocation2 + $0x18] sm:$0xff] %vm333_vm0, %v282_v28  ;;  %339 = vst.msk [vmem:[#allocation2 + $0x20] sm:$0xff] %vm333_vm0, %v283_v31  ;;  %1432 = vmatprep.subr.mxu0 %v7533_v2  ;;  %1657 = vmatprep.subr.mxu1 %v7533_v2  ;;  %v297_v60 = vld [vmem:[%s7714_s15 + $0x90] sm:$0xff]  ;;  %v296_v61 = vld [vmem:[%s7714_s15 + $0x88] sm:$0x3] }
  0x29   : > { %337 = vst.msk [vmem:[#allocation2 + $0x10] sm:$0x3] %vm336_vm1, %v281_v29  ;;  %340 = vst.msk [vmem:[#allocation2 + $0x28] sm:$0x3] %vm336_vm1, %v284_v33  ;;  %1433 = vmatpush1.msra.mxu0 %v1256_v38  ;;  %1658 = vmatpush1.msra.mxu1 %v1288_v41  ;;  %v298_v62 = vld [vmem:[%s7714_s15 + $0x98] sm:$0xff]  ;;  %v1281_v63 = vld [vmem:[%s11705_s1 + $0xd0] sm:$0xff] }
  0x2a   : > { %341 = vst.msk [vmem:[#allocation2 + $0x30] sm:$0xff] %vm333_vm0, %v285_v32  ;;  %342 = vst.msk [vmem:[#allocation2 + $0x38] sm:$0xff] %vm333_vm0, %v286_v34  ;;  %1434 = vmatprep.subr.mxu0 %v7533_v2  ;;  %1659 = vmatprep.subr.mxu1 %v7533_v2  ;;  %v1313_v0 = vld [vmem:[%s11705_s1 + $0x1d0] sm:$0xff]  ;;  %v300_v1 = vld [vmem:[%s7714_s15 + $0xa8] sm:$0xff] }
  0x2b   : > { %344 = vst.msk [vmem:[#allocation2 + $0x48] sm:$0xff] %vm333_vm0, %v288_v37  ;;  %345 = vst.msk [vmem:[#allocation2 + $0x50] sm:$0xff] %vm333_vm0, %v289_v40  ;;  %1435 = vmatpush1.msra.mxu0 %v1255_v45  ;;  %1660 = vmatpush1.msra.mxu1 %v1287_v46  ;;  %v1280_v3 = vld [vmem:[%s11705_s1 + $0xc8] sm:$0xff]  ;;  %v299_v4 = vld [vmem:[%s7714_s15 + $0xa0] sm:$0x3] }
  0x2c   : > { %343 = vst.msk [vmem:[#allocation2 + $0x40] sm:$0x3] %vm336_vm1, %v287_v39  ;;  %346 = vst.msk [vmem:[#allocation2 + $0x58] sm:$0x3] %vm336_vm1, %v290_v43  ;;  %1436 = vmatprep.subr.mxu0 %v7533_v2  ;;  %1661 = vmatprep.subr.mxu1 %v7533_v2  ;;  %v301_v5 = vld [vmem:[%s7714_s15 + $0xb0] sm:$0xff]  ;;  %v1312_v6 = vld [vmem:[%s11705_s1 + $0x1c8] sm:$0xff] }
  0x2d   : > { %347 = vst.msk [vmem:[#allocation2 + $0x60] sm:$0xff] %vm333_vm0, %v291_v42  ;;  %348 = vst.msk [vmem:[#allocation2 + $0x68] sm:$0xff] %vm333_vm0, %v292_v44  ;;  %1437 = vmatpush2.msra.mxu0 %v1286_v47  ;;  %1662 = vmatpush2.msra.mxu1 %v1318_v48  ;;  %v303_v7 = vld [vmem:[%s7714_s15 + $0xc0] sm:$0xff]  ;;  %v302_v8 = vld [vmem:[%s7714_s15 + $0xb8] sm:$0x3] }
  0x2e   : > { %1438 = vmatprep.subr.mxu0 %v7533_v2  ;;  %1663 = vmatprep.subr.mxu1 %v7533_v2  ;;  %350 = vst.msk [vmem:[#allocation2 + $0x78] sm:$0xff] %vm333_vm0, %v294_v55  ;;  %351 = vst.msk [vmem:[#allocation2 + $0x80] sm:$0xff] %vm333_vm0, %v295_v59  ;;  %v304_v9 = vld [vmem:[%s7714_s15 + $0xc8] sm:$0xff]  ;;  %v306_v10 = vld [vmem:[%s7714_s15 + $0xd8] sm:$0xff] }
  0x2f   : > { %1439 = vmatpush2.msra.mxu0 %v1285_v49  ;;  %1664 = vmatpush2.msra.mxu1 %v1317_v50  ;;  %349 = vst.msk [vmem:[#allocation2 + $0x70] sm:$0x3] %vm336_vm1, %v293_v57  ;;  %352 = vst.msk [vmem:[#allocation2 + $0x88] sm:$0x3] %vm336_vm1, %v296_v61  ;;  %v1279_v11 = vld [vmem:[%s11705_s1 + $0xc0] sm:$0xff]  ;;  %v1278_v14 = vld [vmem:[%s11705_s1 + $0xb8] sm:$0xff] }
  0x30   : > { %1440 = vmatprep.subr.mxu0 %v7533_v2  ;;  %1665 = vmatprep.subr.mxu1 %v7533_v2  ;;  %353 = vst.msk [vmem:[#allocation2 + $0x90] sm:$0xff] %vm333_vm0, %v297_v60  ;;  %354 = vst.msk [vmem:[#allocation2 + $0x98] sm:$0xff] %vm333_vm0, %v298_v62  ;;  %v1311_v12 = vld [vmem:[%s11705_s1 + $0x1c0] sm:$0xff]  ;;  %v305_v13 = vld [vmem:[%s7714_s15 + $0xd0] sm:$0x3] }
  0x31   : > { %1441 = vmatpush2.msra.mxu0 %v1284_v51  ;;  %1666 = vmatpush2.msra.mxu1 %v1316_v52  ;;  %356 = vst.msk [vmem:[#allocation2 + $0xa8] sm:$0xff] %vm333_vm0, %v300_v1  ;;  %357 = vst.msk [vmem:[#allocation2 + $0xb0] sm:$0xff] %vm333_vm0, %v301_v5  ;;  %v1310_v15 = vld [vmem:[%s11705_s1 + $0x1b8] sm:$0xff]  ;;  %v1277_v16 = vld [vmem:[%s11705_s1 + $0xb0] sm:$0xff] }
  0x32   : > { %1442 = vmatprep.subr.mxu0 %v7533_v2  ;;  %1667 = vmatprep.subr.mxu1 %v7533_v2  ;;  %355 = vst.msk [vmem:[#allocation2 + $0xa0] sm:$0x3] %vm336_vm1, %v299_v4  ;;  %358 = vst.msk [vmem:[#allocation2 + $0xb8] sm:$0x3] %vm336_vm1, %v302_v8  ;;  %v1309_v17 = vld [vmem:[%s11705_s1 + $0x1b0] sm:$0xff]  ;;  %v1276_v18 = vld [vmem:[%s11705_s1 + $0xa8] sm:$0xff] }
  0x33   : > { %1443 = vmatpush2.msra.mxu0 %v1283_v53  ;;  %1668 = vmatpush2.msra.mxu1 %v1315_v54  ;;  %359 = vst.msk [vmem:[#allocation2 + $0xc0] sm:$0xff] %vm333_vm0, %v303_v7  ;;  %360 = vst.msk [vmem:[#allocation2 + $0xc8] sm:$0xff] %vm333_vm0, %v304_v9  ;;  %v1308_v19 = vld [vmem:[%s11705_s1 + $0x1a8] sm:$0xff]  ;;  %v1275_v20 = vld [vmem:[%s11705_s1 + $0xa0] sm:$0xff] }
  0x34   : > { %1444 = vmatprep.subr.mxu0 %v7533_v2  ;;  %1669 = vmatprep.subr.mxu1 %v7533_v2  ;;  %362 = vst.msk [vmem:[#allocation2 + $0xd8] sm:$0xff] %vm333_vm0, %v306_v10  ;;  %v1307_v21 = vld [vmem:[%s11705_s1 + $0x1a0] sm:$0xff]  ;;  %v1274_v23 = vld [vmem:[%s11705_s1 + $0x98] sm:$0xff]  ;;  %v309_v25 = vld [vmem:[%s7714_s15 + $0xf0] sm:$0xff] }
  0x35   : > { %1445 = vmatpush2.msra.mxu0 %v1282_v56  ;;  %1670 = vmatpush2.msra.mxu1 %v1314_v58  ;;  %361 = vst.msk [vmem:[#allocation2 + $0xd0] sm:$0x3] %vm336_vm1, %v305_v13  ;;  %v307_v22 = vld [vmem:[%s7714_s15 + $0xe0] sm:$0xff]  ;;  %v1306_v24 = vld [vmem:[%s11705_s1 + $0x198] sm:$0xff]  ;;  %v1273_v26 = vld [vmem:[%s11705_s1 + $0x90] sm:$0xff] }
  0x36   : > { %1446 = vmatprep.subr.mxu0 %v7533_v2  ;;  %1671 = vmatprep.subr.mxu1 %v7533_v2  ;;  %363 = vst.msk [vmem:[#allocation2 + $0xe0] sm:$0xff] %vm333_vm0, %v307_v22  ;;  %v1305_v27 = vld [vmem:[%s11705_s1 + $0x190] sm:$0xff]  ;;  %365 = vst.msk [vmem:[#allocation2 + $0xf0] sm:$0xff] %vm333_vm0, %v309_v25  ;;  %v308_v28 = vld [vmem:[%s7714_s15 + $0xe8] sm:$0x3] }
  0x37   : > { %1447 = vmatpush2.msra.mxu0 %v1281_v63  ;;  %1672 = vmatpush2.msra.mxu1 %v1313_v0  ;;  %364 = vst.msk [vmem:[#allocation2 + $0xe8] sm:$0x3] %vm336_vm1, %v308_v28  ;;  %v310_v29 = vld [vmem:[%s7714_s15 + $0xf8] sm:$0xff]  ;;  %v1272_v30 = vld [vmem:[%s11705_s1 + $0x88] sm:$0xff]  ;;  %v311_v34 = vld [vmem:[%s7714_s15 + $0x100] sm:$0x3] }
  0x38   : > { %1448 = vmatprep.subr.mxu0 %v7533_v2  ;;  %1673 = vmatprep.subr.mxu1 %v7533_v2  ;;  %v453_v31 = vld [vmem:[#allocation2 + $0x1] sm:$0xff]  ;;  %366 = vst.msk [vmem:[#allocation2 + $0xf8] sm:$0xff] %vm333_vm0, %v310_v29  ;;  %v313_v36 = vld [vmem:[%s7714_s15 + $0x110] sm:$0xff]  ;;  %v582_v39 = vld [vmem:[#allocation2 + $0x18] sm:$0xff] }
  0x39   : > { %1449 = vmatpush2.msra.mxu0 %v1280_v3  ;;  %1674 = vmatpush2.msra.mxu1 %v1312_v6  ;;  %v312_v32 = vld [vmem:[%s7714_s15 + $0x108] sm:$0xff]  ;;  %v1271_v35 = vld [vmem:[%s11705_s1 + $0x80] sm:$0xff]  ;;  %367 = vst.msk [vmem:[#allocation2 + $0x100] sm:$0x3] %vm336_vm1, %v311_v34  ;;  %v1334_v41 = vld [vmem:[%s11705_s1 + $0x278] sm:$0xff] }
  0x3a   : > { %1450 = vmatprep.subr.mxu0 %v7533_v2  ;;  %1675 = vmatprep.subr.mxu1 %v7533_v2  ;;  %v1304_v33 = vld [vmem:[%s11705_s1 + $0x188] sm:$0xff]  ;;  %368 = vst.msk [vmem:[#allocation2 + $0x108] sm:$0xff] %vm333_vm0, %v312_v32  ;;  %v389_v37 = vld [vmem:[#allocation2] sm:$0xff]  ;;  %369 = vst.msk [vmem:[#allocation2 + $0x110] sm:$0xff] %vm333_vm0, %v313_v36 }
  0x3b   : > { %1451 = vmatpush2.msra.mxu0 %v1279_v11  ;;  %1676 = vmatpush2.msra.mxu1 %v1311_v12  ;;  %v1303_v38 = vld [vmem:[%s11705_s1 + $0x180] sm:$0xff]  ;;  %v314_v43 = vld [vmem:[%s7714_s15 + $0x118] sm:$0x3]  ;;  %v454_v44 = vld [vmem:[#allocation2 + $0x9] sm:$0xff] }
  0x3c   : > { %1452 = vmatprep.subr.mxu0 %v7533_v2  ;;  %1677 = vmatprep.subr.mxu1 %v7533_v2  ;;  %v315_v40 = vld [vmem:[%s7714_s15 + $0x120] sm:$0xff]  ;;  %370 = vst.msk [vmem:[#allocation2 + $0x118] sm:$0x3] %vm336_vm1, %v314_v43  ;;  %v390_v45 = vld [vmem:[#allocation2 + $0x8] sm:$0xff]  ;;  %v1333_v47 = vld [vmem:[%s11705_s1 + $0x270] sm:$0xff] }
  0x3d   : > { %1453 = vmatpush2.msra.mxu0 %v1278_v14  ;;  %1678 = vmatpush2.msra.mxu1 %v1310_v15  ;;  %v517_v42 = vld [vmem:[#allocation2 + $0x2] sm:$0xff]  ;;  %371 = vst.msk [vmem:[#allocation2 + $0x120] sm:$0xff] %vm333_vm0, %v315_v40  ;;  %v455_v48 = vld [vmem:[#allocation2 + $0x19] sm:$0xff]  ;;  %v518_v50 = vld [vmem:[#allocation2 + $0xa] sm:$0xff] }
  0x3e   : > { %1454 = vmatprep.subr.mxu0 %v7533_v2  ;;  %1679 = vmatprep.subr.mxu1 %v7533_v2  ;;  %v583_v46 = vld [vmem:[#allocation2 + $0x20] sm:$0xff]  ;;  %v316_v49 = vld [vmem:[%s7714_s15 + $0x128] sm:$0xff]  ;;  %v584_v51 = vld [vmem:[#allocation2 + $0x30] sm:$0xff] }
  0x3f   : > { %1455 = vmatpush2.msra.mxu0 %v1277_v16  ;;  %1680 = vmatpush2.msra.mxu1 %v1309_v17  ;;  %372 = vst.msk [vmem:[#allocation2 + $0x128] sm:$0xff] %vm333_vm0, %v316_v49  ;;  %v1332_v52 = vld [vmem:[%s11705_s1 + $0x268] sm:$0xff]  ;;  %v318_v53 = vld [vmem:[%s7714_s15 + $0x138] sm:$0xff]  ;;  %v1331_v55 = vld [vmem:[%s11705_s1 + $0x260] sm:$0xff] }
  0x40   : > { %1456 = vmatprep.subr.mxu0 %v7533_v2  ;;  %1681 = vmatprep.subr.mxu1 %v7533_v2  ;;  %v456_v54 = vld [vmem:[#allocation2 + $0x21] sm:$0xff]  ;;  %374 = vst.msk [vmem:[#allocation2 + $0x138] sm:$0xff] %vm333_vm0, %v318_v53  ;;  %v317_v56 = vld [vmem:[%s7714_s15 + $0x130] sm:$0x3]  ;;  %v7992_v58 = vld [vmem:[#allocation2 + $0x38] sm:$0xff] }
  0x41   : > { %1457 = vmatpush2.msra.mxu0 %v1276_v18  ;;  %1682 = vmatpush2.msra.mxu1 %v1308_v19  ;;  %v7988_v57 = vld [vmem:[#allocation2 + $0x1a] sm:$0xff]  ;;  %373 = vst.msk [vmem:[#allocation2 + $0x130] sm:$0x3] %vm336_vm1, %v317_v56  ;;  %v321_v61 = vld [vmem:[%s7714_s15 + $0x150] sm:$0xff]  ;;  %v8009_v0 = vld [vmem:[#allocation2 + $0x22] sm:$0xff] }
  0x42   : > { %1458 = vmatprep.subr.mxu0 %v7533_v2  ;;  %1683 = vmatprep.subr.mxu1 %v7533_v2  ;;  %v1330_v59 = vld [vmem:[%s11705_s1 + $0x258] sm:$0xff]  ;;  %v319_v60 = vld [vmem:[%s7714_s15 + $0x140] sm:$0xff]  ;;  %v1329_v63 = vld [vmem:[%s11705_s1 + $0x250] sm:$0xff]  ;;  %377 = vst.msk [vmem:[#allocation2 + $0x150] sm:$0xff] %vm333_vm0, %v321_v61 }
  0x43   : > { %1459 = vmatpush2.msra.mxu0 %v1275_v20  ;;  %1684 = vmatpush2.msra.mxu1 %v1307_v21  ;;  %375 = vst.msk [vmem:[#allocation2 + $0x140] sm:$0xff] %vm333_vm0, %v319_v60  ;;  %v8001_v62 = vld [vmem:[#allocation2 + $0x31] sm:$0xff]  ;;  %v320_v1 = vld [vmem:[%s7714_s15 + $0x148] sm:$0x3]  ;;  %v8024_v7 = vld [vmem:[#allocation2 + $0x39] sm:$0xff] }
  0x44   : > { %1460 = vmatprep.subr.mxu0 %v7533_v2  ;;  %1685 = vmatprep.subr.mxu1 %v7533_v2  ;;  %v8012_v3 = vld [vmem:[#allocation2 + $0x48] sm:$0xff]  ;;  %376 = vst.msk [vmem:[#allocation2 + $0x148] sm:$0x3] %vm336_vm1, %v320_v1  ;;  %v322_v5 = vld [vmem:[%s7714_s15 + $0x158] sm:$0xff]  ;;  %v1327_v8 = vld [vmem:[%s11705_s1 + $0x240] sm:$0xff] }
  0x45   : > { %1461 = vmatpush2.msra.mxu0 %v1274_v23  ;;  %1686 = vmatpush2.msra.mxu1 %v1306_v24  ;;  %v1328_v4 = vld [vmem:[%s11705_s1 + $0x248] sm:$0xff]  ;;  %378 = vst.msk [vmem:[#allocation2 + $0x158] sm:$0xff] %vm333_vm0, %v322_v5  ;;  %v8032_v9 = vld [vmem:[#allocation2 + $0x32] sm:$0xff]  ;;  %v323_v10 = vld [vmem:[%s7714_s15 + $0x160] sm:$0x3] }
  0x46   : > { %1462 = vmatprep.subr.mxu0 %v7533_v2  ;;  %1687 = vmatprep.subr.mxu1 %v7533_v2  ;;  %v324_v6 = vld [vmem:[%s7714_s15 + $0x168] sm:$0xff]  ;;  %v8035_v11 = vld [vmem:[#allocation2 + $0x50] sm:$0xff]  ;;  %v1326_v12 = vld [vmem:[%s11705_s1 + $0x238] sm:$0xff]  ;;  %379 = vst.msk [vmem:[#allocation2 + $0x160] sm:$0x3] %vm336_vm1, %v323_v10 }
  0x47   : > { %1463 = vmatpush2.msra.mxu0 %v1273_v26  ;;  %1688 = vmatpush2.msra.mxu1 %v1305_v27  ;;  %380 = vst.msk [vmem:[#allocation2 + $0x168] sm:$0xff] %vm333_vm0, %v324_v6  ;;  %v325_v13 = vld [vmem:[%s7714_s15 + $0x170] sm:$0xff]  ;;  %v327_v16 = vld [vmem:[%s7714_s15 + $0x180] sm:$0xff]  ;;  %v1324_v19 = vld [vmem:[%s11705_s1 + $0x228] sm:$0xff] }
  0x48   : > { %1464 = vmatprep.subr.mxu0 %v7533_v2  ;;  %1689 = vmatprep.subr.mxu1 %v7533_v2  ;;  %v8045_v14 = vld [vmem:[#allocation2 + $0x49] sm:$0xff]  ;;  %381 = vst.msk [vmem:[#allocation2 + $0x170] sm:$0xff] %vm333_vm0, %v325_v13  ;;  %v8054_v17 = vld [vmem:[#allocation2 + $0x3a] sm:$0xff]  ;;  %383 = vst.msk [vmem:[#allocation2 + $0x180] sm:$0xff] %vm333_vm0, %v327_v16 }
  0x49   : > { %1465 = vmatpush2.msra.mxu0 %v1272_v30  ;;  %1468 = vmatprep.mubr.f32.mxu0 %v453_v31  ;;  %v1325_v15 = vld [vmem:[%s11705_s1 + $0x230] sm:$0xff]  ;;  %v8058_v18 = vld [vmem:[#allocation2 + $0x60] sm:$0xff]  ;;  %v326_v20 = vld [vmem:[%s7714_s15 + $0x178] sm:$0x3] }
  0x4a   : > { %1466 = vmatprep.subr.mxu0 %v7533_v2  ;;  %1690 = vmatpush2.msra.mxu1 %v1304_v33  ;;  %v8067_v21 = vld [vmem:[#allocation2 + $0x51] sm:$0xff]  ;;  %v1323_v22 = vld [vmem:[%s11705_s1 + $0x220] sm:$0xff]  ;;  %382 = vst.msk [vmem:[#allocation2 + $0x178] sm:$0x3] %vm336_vm1, %v326_v20  ;;  %v328_v23 = vld [vmem:[%s7714_s15 + $0x188] sm:$0xff] }
  0x4b   : > { %1467 = vmatpush2.msra.mxu0 %v1271_v35  ;;  %1691 = vmatprep.subr.mxu1 %v7533_v2  ;;  %v8076_v24 = vld [vmem:[#allocation2 + $0x4a] sm:$0xff]  ;;  %384 = vst.msk [vmem:[#allocation2 + $0x188] sm:$0xff] %vm333_vm0, %v328_v23  ;;  %v1322_v26 = vld [vmem:[%s11705_s1 + $0x218] sm:$0xff]  ;;  %v8088_v27 = vld [vmem:[#allocation2 + $0x61] sm:$0xff] }
  0x4c   : > { %1469 = vmatmul.mubr.f32.vlgmr.msra.gmra.mxu0 %v389_v37  ;;  %1854 = vmatprep.subr.mxu0 %v7533_v2  ;;  %v8080_v25 = vld [vmem:[#allocation2 + $0x68] sm:$0xff]  ;;  %v1321_v28 = vld [vmem:[%s11705_s1 + $0x210] sm:$0xff]  ;;  %v8098_v30 = vld [vmem:[#allocation2 + $0x78] sm:$0xff] }
  0x4d   : > { %1692 = vmatpush2.msra.mxu1 %v1303_v38  ;;  %1693 = vmatprep.mubr.f32.mxu1 %v582_v39  ;;  %v8095_v29 = vld [vmem:[#allocation2 + $0x52] sm:$0xff]  ;;  %v1320_v31 = vld [vmem:[%s11705_s1 + $0x208] sm:$0xff]  ;;  %v1319_v33 = vld [vmem:[%s11705_s1 + $0x200] sm:$0xff] }
  0x4e   : > { %1855 = vmatpush1.msra.mxu0 %v1334_v41  ;;  %1694 = vmatmul.mubr.f32.vlgmr.msra.gmra.mxu1 %v517_v42  ;;  %v8106_v32 = vld [vmem:[#allocation2 + $0x69] sm:$0xff]  ;;  %v8116_v35 = vld [vmem:[#allocation2 + $0x80] sm:$0xff]  ;;  %v1350_v36 = vld [vmem:[%s11705_s1 + $0x2f8] sm:$0xff] }
  0x4f   : > { %1473 = vmatprep.mubr.f32.mxu0 %v454_v44  ;;  %1856 = vmatprep.subr.mxu0 %v7533_v2  ;;  %v8113_v34 = vld [vmem:[#allocation2 + $0x62] sm:$0xff]  ;;  %v8124_v37 = vld [vmem:[#allocation2 + $0x79] sm:$0xff]  ;;  %v8134_v40 = vld [vmem:[#allocation2 + $0x90] sm:$0xff] }
  0x50   : > { %1474 = vmatmul.mubr.f32.gmra.mxu0 %v390_v45  ;;  %1698 = vmatprep.mubr.f32.mxu1 %v583_v46  ;;  %v1366_v38 = vld [vmem:[%s11705_s1 + $0x378] sm:$0xff]  ;;  %v1365_v41 = vld [vmem:[%s11705_s1 + $0x370] sm:$0xff]  ;;  %v8142_v42 = vld [vmem:[#allocation2 + $0x81] sm:$0xff] }
  0x51   : > { %1857 = vmatpush1.msra.mxu0 %v1333_v47  ;;  %1478 = vmatprep.mubr.f32.mxu0 %v455_v48  ;;  %v1349_v43 = vld [vmem:[%s11705_s1 + $0x2f0] sm:$0xff]  ;;  %v8149_v44 = vld [vmem:[#allocation2 + $0x7a] sm:$0xff]  ;;  %v8164_v48 = vld [vmem:[#allocation2 + $0x82] sm:$0xff] }
  0x52   : > { %1699 = vmatmul.mubr.f32.gmra.mxu1 %v518_v50  ;;  %1858 = vmatprep.subr.mxu0 %v7533_v2  ;;  %v8153_v45 = vld [vmem:[#allocation2 + $0x98] sm:$0xff]  ;;  %v1348_v49 = vld [vmem:[%s11705_s1 + $0x2e8] sm:$0xff]  ;;  %v1361_v56 = vld [vmem:[%s11705_s1 + $0x350] sm:$0xff] }
  0x53   : > { %1703 = vmatprep.mubr.f32.mxu1 %v584_v51  ;;  %1859 = vmatpush1.msra.mxu0 %v1332_v52  ;;  %v8160_v47 = vld [vmem:[#allocation2 + $0x91] sm:$0xff]  ;;  %v8170_v50 = vld [vmem:[#allocation2 + $0xa8] sm:$0xff]  ;;  %v8179_v52 = vld [vmem:[#allocation2 + $0x99] sm:$0xff] }
  0x54   : > { %1479 = vmatmul.mubr.f32.gmra.mxu0 %v582_v39  ;;  %1860 = vmatprep.subr.mxu0 %v7533_v2  ;;  %v8131_v39 = vld [vmem:[#allocation2 + $0x6a] sm:$0xff]  ;;  %v1362_v53 = vld [vmem:[%s11705_s1 + $0x358] sm:$0xff]  ;;  %v1347_v60 = vld [vmem:[%s11705_s1 + $0x2e0] sm:$0xff] }
  0x55   : > { %1483 = vmatprep.mubr.f32.mxu0 %v456_v54  ;;  %1861 = vmatpush1.msra.mxu0 %v1331_v55  ;;  %v8185_v54 = vld [vmem:[#allocation2 + $0x92] sm:$0xff]  ;;  %v8203_v61 = vld [vmem:[#allocation2 + $0x9a] sm:$0xff]  ;;  %v1360_v1 = vld [vmem:[%s11705_s1 + $0x348] sm:$0xff] }
  0x56   : > { %1704 = vmatmul.mubr.f32.gmra.mxu1 %v7988_v57  ;;  %1862 = vmatprep.subr.mxu0 %v7533_v2  ;;  %v8188_v55 = vld [vmem:[#allocation2 + $0xb0] sm:$0xff]  ;;  %v1346_v6 = vld [vmem:[%s11705_s1 + $0x2d8] sm:$0xff]  ;;  %v1359_v10 = vld [vmem:[%s11705_s1 + $0x340] sm:$0xff] }
  0x57   : > { %1708 = vmatprep.mubr.f32.mxu1 %v7992_v58  ;;  %1863 = vmatpush1.msra.mxu0 %v1330_v59  ;;  %v8196_v59 = vld [vmem:[#allocation2 + $0xa9] sm:$0xff]  ;;  %v1358_v13 = vld [vmem:[%s11705_s1 + $0x338] sm:$0xff] }
  0x58   : > { %1484 = vmatmul.mubr.f32.gmra.mxu0 %v583_v46  ;;  %1864 = vmatprep.subr.mxu0 %v7533_v2  ;;  %v1364_v46 = vld [vmem:[%s11705_s1 + $0x368] sm:$0xff]  ;;  %v8242_v16 = vld [vmem:[#allocation2 + $0xd8] sm:$0xff] }
  0x59   : > { %1488 = vmatprep.mubr.f32.mxu0 %v8001_v62  ;;  %1865 = vmatpush1.msra.mxu0 %v1329_v63  ;;  %v8207_v63 = vld [vmem:[#allocation2 + $0xc0] sm:$0xff]  ;;  %v8218_v5 = vld [vmem:[#allocation2 + $0xaa] sm:$0xff] }
  0x5a   : > { %1709 = vmatmul.mubr.f32.gmra.mxu1 %v8009_v0  ;;  %1866 = vmatprep.subr.mxu0 %v7533_v2  ;;  %v8250_v20 = vld [vmem:[#allocation2 + $0xc9] sm:$0xff] }
  0x5b   : > { %1713 = vmatprep.mubr.f32.mxu1 %v8012_v3  ;;  %1867 = vmatpush1.msra.mxu0 %v1328_v4  ;;  %v8214_v4 = vld [vmem:[#allocation2 + $0xb1] sm:$0xff]  ;;  %v8257_v23 = vld [vmem:[#allocation2 + $0xc2] sm:$0xff] }
  0x5c   : > { %1489 = vmatmul.mubr.f32.gmra.mxu0 %v584_v51  ;;  %1868 = vmatprep.subr.mxu0 %v7533_v2  ;;  %v1363_v51 = vld [vmem:[%s11705_s1 + $0x360] sm:$0xff] }
  0x5d   : > { %1493 = vmatprep.mubr.f32.mxu0 %v8024_v7  ;;  %1869 = vmatpush1.msra.mxu0 %v1327_v8  ;;  %v8224_v8 = vld [vmem:[#allocation2 + $0xc8] sm:$0xff] }
  0x5e   : > { %1714 = vmatmul.mubr.f32.gmra.mxu1 %v8032_v9  ;;  %1870 = vmatprep.subr.mxu0 %v7533_v2 }
  0x5f   : > { %1718 = vmatprep.mubr.f32.mxu1 %v8035_v11  ;;  %1871 = vmatpush1.msra.mxu0 %v1326_v12  ;;  %v8233_v12 = vld [vmem:[#allocation2 + $0xc1] sm:$0xff] }
  0x60   : > { %1494 = vmatmul.mubr.f32.gmra.mxu0 %v7992_v58  ;;  %1872 = vmatprep.subr.mxu0 %v7533_v2 }
  0x61   : > { %1498 = vmatprep.mubr.f32.mxu0 %v8045_v14  ;;  %1873 = vmatpush1.msra.mxu0 %v1325_v15  ;;  %v8239_v15 = vld [vmem:[#allocation2 + $0xb2] sm:$0xff] }
  0x62   : > { %1719 = vmatmul.mubr.f32.gmra.mxu1 %v8054_v17  ;;  %1874 = vmatprep.subr.mxu0 %v7533_v2 }
  0x63   : > { %1723 = vmatprep.mubr.f32.mxu1 %v8058_v18  ;;  %1875 = vmatpush1.msra.mxu0 %v1324_v19  ;;  %v1357_v19 = vld [vmem:[%s11705_s1 + $0x330] sm:$0xff] }
  0x64   : > { %1499 = vmatmul.mubr.f32.gmra.mxu0 %v8012_v3  ;;  %1876 = vmatprep.subr.mxu0 %v7533_v2 }
  0x65   : > { %1503 = vmatprep.mubr.f32.mxu0 %v8067_v21  ;;  %1877 = vmatpush1.msra.mxu0 %v1323_v22  ;;  %v1345_v22 = vld [vmem:[%s11705_s1 + $0x2d0] sm:$0xff] }
  0x66   : > { %1724 = vmatmul.mubr.f32.gmra.mxu1 %v8076_v24  ;;  %1878 = vmatprep.subr.mxu0 %v7533_v2 }
  0x67   : > { %1728 = vmatprep.mubr.f32.mxu1 %v8080_v25  ;;  %1879 = vmatpush1.msra.mxu0 %v1322_v26  ;;  %v8261_v26 = vld [vmem:[#allocation2 + $0xe0] sm:$0xff] }
  0x68   : > { %1504 = vmatmul.mubr.f32.gmra.mxu0 %v8035_v11  ;;  %1880 = vmatprep.subr.mxu0 %v7533_v2 }
  0x69   : > { %1508 = vmatprep.mubr.f32.mxu0 %v8088_v27  ;;  %1881 = vmatpush1.msra.mxu0 %v1321_v28  ;;  %v1356_v28 = vld [vmem:[%s11705_s1 + $0x328] sm:$0xff] }
  0x6a   : > { %1729 = vmatmul.mubr.f32.gmra.mxu1 %v8095_v29  ;;  %1882 = vmatprep.subr.mxu0 %v7533_v2 }
  0x6b   : > { %1733 = vmatprep.mubr.f32.mxu1 %v8098_v30  ;;  %1883 = vmatpush1.msra.mxu0 %v1320_v31  ;;  %v8268_v31 = vld [vmem:[#allocation2 + $0xd9] sm:$0xff] }
  0x6c   : > { %1509 = vmatmul.mubr.f32.gmra.mxu0 %v8058_v18  ;;  %1884 = vmatprep.subr.mxu0 %v7533_v2 }
  0x6d   : > { %1513 = vmatprep.mubr.f32.mxu0 %v8106_v32  ;;  %1885 = vmatpush1.msra.mxu0 %v1319_v33  ;;  %v8270_v33 = vld [vmem:[#allocation2 + $0x198] sm:$0xff] }
  0x6e   : > { %1734 = vmatmul.mubr.f32.gmra.mxu1 %v8113_v34  ;;  %1886 = vmatprep.subr.mxu0 %v7533_v2 }
  0x6f   : > { %1738 = vmatprep.mubr.f32.mxu1 %v8116_v35  ;;  %1887 = vmatpush2.msra.mxu0 %v1350_v36  ;;  %v1344_v36 = vld [vmem:[%s11705_s1 + $0x2c8] sm:$0xff] }
  0x70   : > { %1514 = vmatmul.mubr.f32.gmra.mxu0 %v8080_v25  ;;  %2079 = vmatprep.subr.mxu1 %v7533_v2 }
  0x71   : > { %1518 = vmatprep.mubr.f32.mxu0 %v8124_v37  ;;  %2080 = vmatpush1.msra.mxu1 %v1366_v38  ;;  %v8280_v38 = vld [vmem:[#allocation2 + $0xf0] sm:$0xff] }
  0x72   : > { %1739 = vmatmul.mubr.f32.gmra.mxu1 %v8131_v39  ;;  %1888 = vmatprep.subr.mxu0 %v7533_v2 }
  0x73   : > { %1743 = vmatprep.mubr.f32.mxu1 %v8134_v40  ;;  %2081 = vmatprep.subr.mxu1 %v7533_v2 }
  0x74   : > { %1519 = vmatmul.mubr.f32.gmra.mxu0 %v8098_v30  ;;  %2082 = vmatpush1.msra.mxu1 %v1365_v41  ;;  %v1355_v41 = vld [vmem:[%s11705_s1 + $0x320] sm:$0xff] }
  0x75   : > { %1523 = vmatprep.mubr.f32.mxu0 %v8142_v42  ;;  %1889 = vmatpush2.msra.mxu0 %v1349_v43  ;;  %v8289_v43 = vld [vmem:[#allocation2 + $0xe1] sm:$0xff] }
  0x76   : > { %1744 = vmatmul.mubr.f32.gmra.mxu1 %v8149_v44  ;;  %2083 = vmatprep.subr.mxu1 %v7533_v2 }
  0x77   : > { %1748 = vmatprep.mubr.f32.mxu1 %v8153_v45  ;;  %2084 = vmatpush1.msra.mxu1 %v1364_v46  ;;  %v1354_v46 = vld [vmem:[%s11705_s1 + $0x318] sm:$0xff] }
  0x78   : > { %1524 = vmatmul.mubr.f32.gmra.mxu0 %v8116_v35  ;;  %1890 = vmatprep.subr.mxu0 %v7533_v2 }
  0x79   : > { %1528 = vmatprep.mubr.f32.mxu0 %v8160_v47  ;;  %2085 = vmatprep.subr.mxu1 %v7533_v2 }
  0x7a   : > { %1749 = vmatmul.mubr.f32.gmra.mxu1 %v8164_v48  ;;  %1891 = vmatpush2.msra.mxu0 %v1348_v49  ;;  %v8295_v49 = vld [vmem:[#allocation2 + $0xda] sm:$0xff] }
  0x7b   : > { %1753 = vmatprep.mubr.f32.mxu1 %v8170_v50  ;;  %2086 = vmatpush1.msra.mxu1 %v1363_v51  ;;  %v8298_v51 = vld [vmem:[#allocation2 + $0xf8] sm:$0xff] }
  0x7c   : > { %1529 = vmatmul.mubr.f32.gmra.mxu0 %v8134_v40  ;;  %2087 = vmatprep.subr.mxu1 %v7533_v2  ;;  %11800 = vst [vmem:[#allocation4_spill] sm:$0xff] %v8298_v51 }
  0x7d   : > { %1533 = vmatprep.mubr.f32.mxu0 %v8179_v52  ;;  %2088 = vmatpush1.msra.mxu1 %v1362_v53  ;;  %v1353_v53 = vld [vmem:[%s11705_s1 + $0x310] sm:$0xff] }
  0x7e   : > { %1754 = vmatmul.mubr.f32.gmra.mxu1 %v8185_v54  ;;  %1892 = vmatprep.subr.mxu0 %v7533_v2 }
  0x7f   : > { %1758 = vmatprep.mubr.f32.mxu1 %v8188_v55  ;;  %2089 = vmatprep.subr.mxu1 %v7533_v2 }
  0x80   : > { %1534 = vmatmul.mubr.f32.gmra.mxu0 %v8153_v45  ;;  %2090 = vmatpush1.msra.mxu1 %v1361_v56  ;;  %v8306_v56 = vld [vmem:[#allocation2 + $0xf1] sm:$0xff] }
  0x81   : > { %1538 = vmatprep.mubr.f32.mxu0 %v8196_v59  ;;  %1893 = vmatpush2.msra.mxu0 %v1347_v60  ;;  %v1343_v60 = vld [vmem:[%s11705_s1 + $0x2c0] sm:$0xff] }
  0x82   : > { %1759 = vmatmul.mubr.f32.gmra.mxu1 %v8203_v61  ;;  %2091 = vmatprep.subr.mxu1 %v7533_v2 }
  0x83   : > { %1763 = vmatprep.mubr.f32.mxu1 %v8207_v63  ;;  %2092 = vmatpush1.msra.mxu1 %v1360_v1  ;;  %v8313_v1 = vld [vmem:[#allocation2 + $0xe2] sm:$0xff] }
  0x84   : > { %1539 = vmatmul.mubr.f32.gmra.mxu0 %v8170_v50  ;;  %1894 = vmatprep.subr.mxu0 %v7533_v2 }
  0x85   : > { %1543 = vmatprep.mubr.f32.mxu0 %v8214_v4  ;;  %2093 = vmatprep.subr.mxu1 %v7533_v2 }
  0x86   : > { %1764 = vmatmul.mubr.f32.gmra.mxu1 %v8218_v5  ;;  %1895 = vmatpush2.msra.mxu0 %v1346_v6  ;;  %v8317_v6 = vld [vmem:[#allocation2 + $0x108] sm:$0xff] }
  0x87   : > { %1768 = vmatprep.mubr.f32.mxu1 %v8224_v8  ;;  %2094 = vmatpush1.msra.mxu1 %v1359_v10  ;;  %11801 = vst [vmem:[#allocation5_spill] sm:$0xff] %v8317_v6  ;;  %v1352_v10 = vld [vmem:[%s11705_s1 + $0x308] sm:$0xff] }
  0x88   : > { %1544 = vmatmul.mubr.f32.gmra.mxu0 %v8188_v55  ;;  %2095 = vmatprep.subr.mxu1 %v7533_v2 }
  0x89   : > { %1548 = vmatprep.mubr.f32.mxu0 %v8233_v12  ;;  %2096 = vmatpush1.msra.mxu1 %v1358_v13  ;;  %v8324_v13 = vld [vmem:[#allocation2 + $0xf9] sm:$0xff] }
  0x8a   : > { %1769 = vmatmul.mubr.f32.gmra.mxu1 %v8239_v15  ;;  %1896 = vmatprep.subr.mxu0 %v7533_v2  ;;  %11802 = vst [vmem:[#allocation6_spill] sm:$0xff] %v8324_v13 }
  0x8b   : > { %1773 = vmatprep.mubr.f32.mxu1 %v8242_v16  ;;  %2097 = vmatprep.subr.mxu1 %v7533_v2  ;;  %v8274_v2 = vld [vmem:[#allocation2 + $0xca] sm:$0xff] }
  0x8c   : > { %1549 = vmatmul.mubr.f32.gmra.mxu0 %v8207_v63  ;;  %2098 = vmatpush1.msra.mxu1 %v1357_v19  ;;  %v8328_v19 = vld [vmem:[#allocation2 + $0xf2] sm:$0xff] }
  0x8d   : > { %1553 = vmatprep.mubr.f32.mxu0 %v8250_v20  ;;  %1897 = vmatpush2.msra.mxu0 %v1345_v22  ;;  %11803 = vst [vmem:[#allocation7_spill] sm:$0xff] %v8328_v19  ;;  %v1342_v22 = vld [vmem:[%s11705_s1 + $0x2b8] sm:$0xff] }
  0x8e   : > { %1774 = vmatmul.mubr.f32.gmra.mxu1 %v8257_v23  ;;  %2099 = vmatprep.subr.mxu1 %v8270_v33 }
  0x8f   : > { %1778 = vmatprep.mubr.f32.mxu1 %v8261_v26  ;;  %2100 = vmatpush1.msra.mxu1 %v1356_v28  ;;  %v8334_v28 = vld [vmem:[#allocation2 + $0x110] sm:$0xff] }
  0x90   : > { %1554 = vmatmul.mubr.f32.gmra.mxu0 %v8224_v8  ;;  %1898 = vmatprep.subr.mxu0 %v8270_v33  ;;  %11804 = vst [vmem:[#allocation8_spill] sm:$0xff] %v8334_v28 }
  0x91   : > { %1558 = vmatprep.mubr.f32.mxu0 %v8268_v31  ;;  %2101 = vmatprep.subr.mxu1 %v8270_v33 }
  0x92   : > { %1779 = vmatmul.mubr.f32.gmra.mxu1 %v8274_v2  ;;  %1899 = vmatpush2.msra.mxu0 %v1344_v36  ;;  %v1351_v36 = vld [vmem:[%s11705_s1 + $0x300] sm:$0xff] }
  0x93   : > { %1783 = vmatprep.mubr.f32.mxu1 %v8280_v38  ;;  %2102 = vmatpush1.msra.mxu1 %v1355_v41  ;;  %v8343_v41 = vld [vmem:[#allocation2 + $0x109] sm:$0xff] }
  0x94   : > { %1559 = vmatmul.mubr.f32.gmra.mxu0 %v8242_v16  ;;  %2103 = vmatprep.subr.mxu1 %v8270_v33  ;;  %11805 = vst [vmem:[#allocation9_spill] sm:$0xff] %v8343_v41 }
  0x95   : > { %1563 = vmatprep.mubr.f32.mxu0 %v8289_v43  ;;  %2104 = vmatpush1.msra.mxu1 %v1354_v46  ;;  %v1382_v46 = vld [vmem:[%s11705_s1 + $0x3f8] sm:$0xff] }
  0x96   : > { %1784 = vmatmul.mubr.f32.gmra.mxu1 %v8295_v49  ;;  %1900 = vmatprep.subr.mxu0 %v8270_v33 }
  0x97   : > { %1788 = vmatprep.mubr.f32.mxu1 %v8298_v51  ;;  %2105 = vmatprep.subr.mxu1 %v8270_v33 }
  0x98   : > { %1564 = vmatmul.mubr.f32.gmra.mxu0 %v8261_v26  ;;  %2106 = vmatpush1.msra.mxu1 %v1353_v53  ;;  %v8349_v53 = vld [vmem:[#allocation2 + $0xfa] sm:$0xff] }
  0x99   : > { %1568 = vmatprep.mubr.f32.mxu0 %v8306_v56  ;;  %1901 = vmatpush2.msra.mxu0 %v1343_v60  ;;  %11806 = vst [vmem:[#allocation10_spill] sm:$0xff] %v8349_v53  ;;  %v8352_v60 = vld [vmem:[#allocation2 + $0x120] sm:$0xff] }
  0x9a   : > { %1789 = vmatmul.mubr.f32.gmra.mxu1 %v8313_v1  ;;  %2107 = vmatprep.subr.mxu1 %v8270_v33  ;;  %11807 = vst [vmem:[#allocation11_spill] sm:$0xff] %v8352_v60 }
  0x9b   : > { %1793 = vmatprep.mubr.f32.mxu1 %v8317_v6  ;;  %2108 = vmatpush1.msra.mxu1 %v1352_v10  ;;  %v1381_v10 = vld [vmem:[%s11705_s1 + $0x3f0] sm:$0xff] }
  0x9c   : > { %1569 = vmatmul.mubr.f32.gmra.mxu0 %v8280_v38  ;;  %1902 = vmatprep.subr.mxu0 %v8270_v33 }
  0x9d   : > { %1573 = vmatprep.mubr.f32.mxu0 %v8324_v13  ;;  %2109 = vmatprep.subr.mxu1 %v8270_v33  ;;  %v8493_v13 = vld [vmem:[#allocation2 + $0x169] sm:$0xff] }
  0x9e   : > { %1794 = vmatmul.mubr.f32.gmra.mxu1 %v8328_v19  ;;  %1903 = vmatpush2.msra.mxu0 %v1342_v22  ;;  %v8360_v22 = vld [vmem:[#allocation2 + $0x111] sm:$0xff]  ;;  %11826 = vst [vmem:[#allocation30_spill] sm:$0xff] %v8493_v13 }
  0x9f   : > { %1798 = vmatprep.mubr.f32.mxu1 %v8334_v28  ;;  %2110 = vmatpush1.msra.mxu1 %v1351_v36  ;;  %11808 = vst [vmem:[#allocation12_spill] sm:$0xff] %v8360_v22  ;;  %v1341_v36 = vld [vmem:[%s11705_s1 + $0x2b0] sm:$0xff] }
  0xa0   : > { %1574 = vmatmul.mubr.f32.gmra.mxu0 %v8298_v51  ;;  %2111 = vmatprep.subr.mxu1 %v8270_v33  ;;  %v8367_v51 = vld [vmem:[#allocation2 + $0x10a] sm:$0xff]  ;;  %v8382_v19 = vld [vmem:[#allocation2 + $0x112] sm:$0xff] }
  0xa1   : > { %1578 = vmatprep.mubr.f32.mxu0 %v8343_v41  ;;  %2112 = vmatpush2.msra.mxu1 %v1382_v46  ;;  %11809 = vst [vmem:[#allocation13_spill] sm:$0xff] %v8367_v51  ;;  %v8371_v46 = vld [vmem:[#allocation2 + $0x128] sm:$0xff]  ;;  %11812 = vst [vmem:[#allocation16_spill] sm:$0xff] %v8382_v19 }
  0xa2   : > { %1799 = vmatmul.mubr.f32.gmra.mxu1 %v8349_v53  ;;  %1904 = vmatprep.subr.mxu0 %v8270_v33  ;;  %11810 = vst [vmem:[#allocation14_spill] sm:$0xff] %v8371_v46  ;;  %v1380_v53 = vld [vmem:[%s11705_s1 + $0x3e8] sm:$0xff] }
  0xa3   : > { %1803 = vmatprep.mubr.f32.mxu1 %v8352_v60  ;;  %2113 = vmatprep.subr.mxu1 %v8270_v33  ;;  %v8378_v41 = vld [vmem:[#allocation2 + $0x121] sm:$0xff] }
  0xa4   : > { %1579 = vmatmul.mubr.f32.gmra.mxu0 %v8317_v6  ;;  %2114 = vmatpush2.msra.mxu1 %v1381_v10  ;;  %11811 = vst [vmem:[#allocation15_spill] sm:$0xff] %v8378_v41  ;;  %v1340_v10 = vld [vmem:[%s11705_s1 + $0x2a8] sm:$0xff]  ;;  %v8388_v6 = vld [vmem:[#allocation2 + $0x138] sm:$0xff] }
  0xa5   : > { %1583 = vmatprep.mubr.f32.mxu0 %v8360_v22  ;;  %1905 = vmatpush2.msra.mxu0 %v1341_v36  ;;  %11813 = vst [vmem:[#allocation17_spill] sm:$0xff] %v8388_v6  ;;  %v1379_v36 = vld [vmem:[%s11705_s1 + $0x3e0] sm:$0xff] }
  0xa6   : > { %1804 = vmatmul.mubr.f32.gmra.mxu1 %v8367_v51  ;;  %2115 = vmatprep.subr.mxu1 %v8270_v33  ;;  %v8403_v51 = vld [vmem:[#allocation2 + $0x122] sm:$0xff] }
  0xa7   : > { %1808 = vmatprep.mubr.f32.mxu1 %v8371_v46  ;;  %2116 = vmatpush2.msra.mxu1 %v1380_v53  ;;  %v8397_v53 = vld [vmem:[#allocation2 + $0x129] sm:$0xff]  ;;  %11815 = vst [vmem:[#allocation19_spill] sm:$0xff] %v8403_v51  ;;  %v8406_v22 = vld [vmem:[#allocation2 + $0x140] sm:$0xff] }
  0xa8   : > { %1584 = vmatmul.mubr.f32.gmra.mxu0 %v8334_v28  ;;  %1906 = vmatprep.subr.mxu0 %v8270_v33  ;;  %11814 = vst [vmem:[#allocation18_spill] sm:$0xff] %v8397_v53  ;;  %v1378_v28 = vld [vmem:[%s11705_s1 + $0x3d8] sm:$0xff]  ;;  %11816 = vst [vmem:[#allocation20_spill] sm:$0xff] %v8406_v22 }
  0xa9   : > { %1588 = vmatprep.mubr.f32.mxu0 %v8378_v41  ;;  %2117 = vmatprep.subr.mxu1 %v8270_v33  ;;  %v8436_v41 = vld [vmem:[#allocation2 + $0x13a] sm:$0xff] }
  0xaa   : > { %1809 = vmatmul.mubr.f32.gmra.mxu1 %v8382_v19  ;;  %1907 = vmatpush2.msra.mxu0 %v1340_v10  ;;  %v1377_v10 = vld [vmem:[%s11705_s1 + $0x3d0] sm:$0xff]  ;;  %v8414_v19 = vld [vmem:[#allocation2 + $0x139] sm:$0xff]  ;;  %11821 = vst [vmem:[#allocation25_spill] sm:$0xff] %v8436_v41 }
  0xab   : > { %1813 = vmatprep.mubr.f32.mxu1 %v8388_v6  ;;  %2118 = vmatpush2.msra.mxu1 %v1379_v36  ;;  %11817 = vst [vmem:[#allocation21_spill] sm:$0xff] %v8414_v19  ;;  %v1339_v36 = vld [vmem:[%s11705_s1 + $0x2a0] sm:$0xff] }
  0xac   : > { %1589 = vmatmul.mubr.f32.gmra.mxu0 %v8352_v60  ;;  %2119 = vmatprep.subr.mxu1 %v8270_v33  ;;  %v8421_v60 = vld [vmem:[#allocation2 + $0x12a] sm:$0xff] }
  0xad   : > { %1593 = vmatprep.mubr.f32.mxu0 %v8397_v53  ;;  %2120 = vmatpush2.msra.mxu1 %v1378_v28  ;;  %11818 = vst [vmem:[#allocation22_spill] sm:$0xff] %v8421_v60  ;;  %v8425_v28 = vld [vmem:[#allocation2 + $0x150] sm:$0xff]  ;;  %v8432_v53 = vld [vmem:[#allocation2 + $0x141] sm:$0xff] }
  0xae   : > { %1814 = vmatmul.mubr.f32.gmra.mxu1 %v8403_v51  ;;  %1908 = vmatprep.subr.mxu0 %v8270_v33  ;;  %11819 = vst [vmem:[#allocation23_spill] sm:$0xff] %v8425_v28  ;;  %v1376_v51 = vld [vmem:[%s11705_s1 + $0x3c8] sm:$0xff]  ;;  %11820 = vst [vmem:[#allocation24_spill] sm:$0xff] %v8432_v53 }
  0xaf   : > { %1818 = vmatprep.mubr.f32.mxu1 %v8406_v22  ;;  %2121 = vmatprep.subr.mxu1 %v8270_v33 }
  0xb0   : > { %1594 = vmatmul.mubr.f32.gmra.mxu0 %v8371_v46  ;;  %2122 = vmatpush2.msra.mxu1 %v1377_v10  ;;  %v1338_v10 = vld [vmem:[%s11705_s1 + $0x298] sm:$0xff]  ;;  %v8460_v46 = vld [vmem:[#allocation2 + $0x168] sm:$0xff] }
  0xb1   : > { %1598 = vmatprep.mubr.f32.mxu0 %v8414_v19  ;;  %1909 = vmatpush2.msra.mxu0 %v1339_v36  ;;  %v8442_v19 = vld [vmem:[#allocation2 + $0x158] sm:$0xff]  ;;  %v1375_v36 = vld [vmem:[%s11705_s1 + $0x3c0] sm:$0xff] }
  0xb2   : > { %1819 = vmatmul.mubr.f32.gmra.mxu1 %v8421_v60  ;;  %2123 = vmatprep.subr.mxu1 %v8270_v33  ;;  %11822 = vst [vmem:[#allocation26_spill] sm:$0xff] %v8442_v19  ;;  %v8457_v60 = vld [vmem:[#allocation2 + $0x142] sm:$0xff] }
  0xb3   : > { %1823 = vmatprep.mubr.f32.mxu1 %v8425_v28  ;;  %2124 = vmatpush2.msra.mxu1 %v1376_v51  ;;  %v8451_v51 = vld [vmem:[#allocation2 + $0x151] sm:$0xff]  ;;  %11824 = vst [vmem:[#allocation28_spill] sm:$0xff] %v8457_v60 }
  0xb4   : > { %1599 = vmatmul.mubr.f32.gmra.mxu0 %v8388_v6  ;;  %1910 = vmatprep.subr.mxu0 %v8270_v33  ;;  %11823 = vst [vmem:[#allocation27_spill] sm:$0xff] %v8451_v51  ;;  %v1374_v6 = vld [vmem:[%s11705_s1 + $0x3b8] sm:$0xff] }
  0xb5   : > { %1603 = vmatprep.mubr.f32.mxu0 %v8432_v53  ;;  %2125 = vmatprep.subr.mxu1 %v8270_v33  ;;  %v329_v53 = vld [vmem:[%s7714_s15 + $0x190] sm:$0x3] }
  0xb6   : > { %1824 = vmatmul.mubr.f32.gmra.mxu1 %v8436_v41  ;;  %1911 = vmatpush2.msra.mxu0 %v1338_v10  ;;  %v1373_v10 = vld [vmem:[%s11705_s1 + $0x3b0] sm:$0xff]  ;;  %385 = vst.msk [vmem:[#allocation2 + $0x190] sm:$0x3] %vm336_vm1, %v329_v53  ;;  %v331_v41 = vld [vmem:[%s7714_s15 + $0x1a0] sm:$0xff] }
  0xb7   : > { %1828 = vmatprep.mubr.f32.mxu1 %v8442_v19  ;;  %2126 = vmatpush2.msra.mxu1 %v1375_v36  ;;  %v8470_v36 = vld [vmem:[#allocation2 + $0x159] sm:$0xff]  ;;  %v8484_v53 = vld [vmem:[#allocation2 + $0x170] sm:$0xff]  ;;  %387 = vst.msk [vmem:[#allocation2 + $0x1a0] sm:$0xff] %vm333_vm0, %v331_v41 }
  0xb8   : > { %1604 = vmatmul.mubr.f32.gmra.mxu0 %v8406_v22  ;;  %2127 = vmatprep.subr.mxu1 %v8270_v33  ;;  %v1337_v22 = vld [vmem:[%s11705_s1 + $0x290] sm:$0xff]  ;;  %v8503_v41 = vld [vmem:[#allocation2 + $0x180] sm:$0xff] }
  0xb9   : > { %1608 = vmatprep.mubr.f32.mxu0 %v8451_v51  ;;  %2128 = vmatpush2.msra.mxu1 %v1374_v6  ;;  %v8477_v51 = vld [vmem:[#allocation2 + $0x152] sm:$0xff]  ;;  %v1372_v6 = vld [vmem:[%s11705_s1 + $0x3a8] sm:$0xff]  ;;  %11827 = vst [vmem:[#allocation31_spill] sm:$0xff] %v8503_v41 }
  0xba   : > { %1829 = vmatmul.mubr.f32.gmra.mxu1 %v8457_v60  ;;  %1912 = vmatprep.subr.mxu0 %v8270_v33  ;;  %11825 = vst [vmem:[#allocation29_spill] sm:$0xff] %v8477_v51  ;;  %v330_v60 = vld [vmem:[%s7714_s15 + $0x198] sm:$0xff] }
  0xbb   : > { %1833 = vmatprep.mubr.f32.mxu1 %v8460_v46  ;;  %2129 = vmatprep.subr.mxu1 %v8270_v33  ;;  %386 = vst.msk [vmem:[#allocation2 + $0x198] sm:$0xff] %vm333_vm0, %v330_v60  ;;  %v1371_v60 = vld [vmem:[%s11705_s1 + $0x3a0] sm:$0xff] }
  0xbc   : > { %1609 = vmatmul.mubr.f32.gmra.mxu0 %v8425_v28  ;;  %2130 = vmatpush2.msra.mxu1 %v1373_v10  ;;  %v8496_v28 = vld [vmem:[#allocation2 + $0x15a] sm:$0xff]  ;;  %v1336_v10 = vld [vmem:[%s11705_s1 + $0x288] sm:$0xff] }
  0xbd   : > { %1613 = vmatprep.mubr.f32.mxu0 %v8470_v36  ;;  %1913 = vmatpush2.msra.mxu0 %v1337_v22  ;;  %v332_v22 = vld [vmem:[%s7714_s15 + $0x1a8] sm:$0x3] }
  0xbe   : > { %1834 = vmatmul.mubr.f32.gmra.mxu1 %v8477_v51  ;;  %2131 = vmatprep.subr.mxu1 %v8270_v33  ;;  %388 = vst.msk [vmem:[#allocation2 + $0x1a8] sm:$0x3] %vm336_vm1, %v332_v22  ;;  %v8519_v51 = vld [vmem:[#allocation2 + $0x16a] sm:$0xff]  ;;  %v8536_v22 = vld [vmem:[#allocation2 + $0x172] sm:$0xff] }
  0xbf   : > { %1838 = vmatprep.mubr.f32.mxu1 %v8484_v53  ;;  %2132 = vmatpush2.msra.mxu1 %v1372_v6  ;;  %v8513_v6 = vld [vmem:[#allocation2 + $0x171] sm:$0xff]  ;;  %11828 = vst [vmem:[#allocation32_spill] sm:$0xff] %v8519_v51  ;;  %11830 = vst [vmem:[#allocation34_spill] sm:$0xff] %v8536_v22 }
  0xc0   : > { %1614 = vmatmul.mubr.f32.gmra.mxu0 %v8442_v19  ;;  %1914 = vmatprep.subr.mxu0 %v8270_v33  ;;  %v1370_v19 = vld [vmem:[%s11705_s1 + $0x398] sm:$0xff] }
  0xc1   : > { %1618 = vmatprep.mubr.f32.mxu0 %v8493_v13  ;;  %2133 = vmatprep.subr.mxu1 %v8270_v33  ;;  %v8523_v13 = vld [vmem:[#allocation2 + $0x188] sm:$0xff] }
  0xc2   : > { %1839 = vmatmul.mubr.f32.gmra.mxu1 %v8496_v28  ;;  %1915 = vmatpush2.msra.mxu0 %v1336_v10  ;;  %11829 = vst [vmem:[#allocation33_spill] sm:$0xff] %v8523_v13  ;;  %v1369_v10 = vld [vmem:[%s11705_s1 + $0x390] sm:$0xff] }
  0xc3   : > { %1843 = vmatprep.mubr.f32.mxu1 %v8503_v41  ;;  %2134 = vmatpush2.msra.mxu1 %v1371_v60  ;;  %v1335_v60 = vld [vmem:[%s11705_s1 + $0x280] sm:$0xff]  ;;  %v1398_v41 = vld [vmem:[%s11705_s1 + $0x478] sm:$0xff] }
  0xc4   : > { %1619 = vmatmul.mubr.f32.gmra.mxu0 %v8460_v46  ;;  %2135 = vmatprep.subr.mxu1 %v8270_v33 }
  0xc5   : > { %1623 = vmatprep.mubr.f32.mxu0 %v8513_v6  ;;  %2136 = vmatpush2.msra.mxu1 %v1370_v19  ;;  %v1368_v19 = vld [vmem:[%s11705_s1 + $0x388] sm:$0xff] }
  0xc6   : > { %1844 = vmatmul.mubr.f32.gmra.mxu1 %v8519_v51  ;;  %1916 = vmatprep.subr.mxu0 %v8270_v33  ;;  %v646_v51 = vld [vmem:[#allocation2 + $0x19] sm:$0xff] }
  0xc7   : > { %2137 = vmatprep.subr.mxu1 %v8270_v33  ;;  %1848 = vmatprep.mubr.f32.mxu1 %v8523_v13  ;;  %v775_v13 = vld [vmem:[#allocation2 + $0x30] sm:$0xff] }
  0xc8   : > { %1624 = vmatmul.mubr.f32.gmra.mxu0 %v8484_v53  ;;  %2138 = vmatpush2.msra.mxu1 %v1369_v10  ;;  %v1367_v10 = vld [vmem:[%s11705_s1 + $0x380] sm:$0xff] }
  0xc9   : > { %1917 = vmatpush2.msra.mxu0 %v1335_v60  ;;  %2139 = vmatprep.subr.mxu1 %v8270_v33  ;;  %v647_v60 = vld [vmem:[#allocation2 + $0x21] sm:$0xff] }
  0xca   : > { %1849 = vmatmul.mubr.f32.gmra.mxu1 %v8536_v22  ;;  %1918 = vmatprep.mubr.f32.mxu0 %v7988_v57  ;;  %v1397_v22 = vld [vmem:[%s11705_s1 + $0x470] sm:$0xff]  ;;  %v1396_v57 = vld [vmem:[%s11705_s1 + $0x468] sm:$0xff] }
  0xcb   : > { %2140 = vmatpush2.msra.mxu1 %v1368_v19  ;;  %7210 = vmatprep.subr.mxu0 %v1398_v41 }
  0xcc   : > { %1919 = vmatmul.mubr.f32.vlgmr.msra.gmra.mxu0 %v646_v51  ;;  %2141 = vmatprep.subr.mxu1 %v8270_v33  ;;  %v1395_v51 = vld [vmem:[%s11705_s1 + $0x460] sm:$0xff] }
  0xcd   : > { %2142 = vmatpush2.msra.mxu1 %v1367_v10  ;;  %2143 = vmatprep.mubr.f32.mxu1 %v8001_v62 }
  0xce   : > { %7211 = vmatpush3.msra.mxu0 %v1398_v41  ;;  %2144 = vmatmul.mubr.f32.vlgmr.msra.gmra.mxu1 %v775_v13  ;;  %v11841_v41 = vld [vmem:[#allocation16_spill] sm:$0xff] }
  0xcf   : > { %1923 = vmatprep.mubr.f32.mxu0 %v8009_v0  ;;  %2148 = vmatprep.mubr.f32.mxu1 %v8024_v7  ;;  %v1394_v0 = vld [vmem:[%s11705_s1 + $0x458] sm:$0xff] }
  0xd0   : > { %1924 = vmatmul.mubr.f32.gmra.mxu0 %v647_v60  ;;  %7212 = vmatprep.subr.mxu0 %v1397_v22  ;;  %v11842_v60 = vld [vmem:[#allocation11_spill] sm:$0xff] }
  0xd1   : > { %1928 = vmatprep.mubr.f32.mxu0 %v8032_v9  ;;  %7213 = vmatpush3.msra.mxu0 %v1397_v22  ;;  %v1393_v9 = vld [vmem:[%s11705_s1 + $0x450] sm:$0xff]  ;;  %v3470_v22 = vld [vmem:[%s11706_s2 + $0x68] sm:$0xff] }
  0xd2   : > { %2149 = vmatmul.mubr.f32.gmra.mxu1 %v7992_v58  ;;  %7214 = vmatprep.subr.mxu0 %v1396_v57  ;;  %v1392_v58 = vld [vmem:[%s11705_s1 + $0x448] sm:$0xff] }
  0xd3   : > { %2153 = vmatprep.mubr.f32.mxu1 %v8045_v14  ;;  %7215 = vmatpush3.msra.mxu0 %v1396_v57 }
  0xd4   : > { %1929 = vmatmul.mubr.f32.gmra.mxu0 %v8001_v62  ;;  %7216 = vmatprep.subr.mxu0 %v1395_v51  ;;  %v1391_v62 = vld [vmem:[%s11705_s1 + $0x440] sm:$0xff] }
  0xd5   : > { %1933 = vmatprep.mubr.f32.mxu0 %v8054_v17  ;;  %7217 = vmatpush3.msra.mxu0 %v1395_v51  ;;  %v1386_v17 = vld [vmem:[%s11705_s1 + $0x418] sm:$0xff]  ;;  %v11843_v51 = vld [vmem:[#allocation18_spill] sm:$0xff] }
  0xd6   : > { %2154 = vmatmul.mubr.f32.gmra.mxu1 %v8012_v3  ;;  %7218 = vmatprep.subr.mxu0 %v1394_v0  ;;  %v1390_v3 = vld [vmem:[%s11705_s1 + $0x438] sm:$0xff] }
  0xd7   : > { %2158 = vmatprep.mubr.f32.mxu1 %v8067_v21  ;;  %7219 = vmatpush3.msra.mxu0 %v1394_v0 }
  0xd8   : > { %1934 = vmatmul.mubr.f32.gmra.mxu0 %v8024_v7  ;;  %7220 = vmatprep.subr.mxu0 %v1393_v9  ;;  %v1389_v7 = vld [vmem:[%s11705_s1 + $0x430] sm:$0xff] }
  0xd9   : > { %1938 = vmatprep.mubr.f32.mxu0 %v8076_v24  ;;  %7221 = vmatpush3.msra.mxu0 %v1393_v9  ;;  %v1383_v24 = vld [vmem:[%s11705_s1 + $0x400] sm:$0xff] }
  0xda   : > { %2159 = vmatmul.mubr.f32.gmra.mxu1 %v8035_v11  ;;  %7222 = vmatprep.subr.mxu0 %v1392_v58  ;;  %v1388_v11 = vld [vmem:[%s11705_s1 + $0x428] sm:$0xff] }
  0xdb   : > { %2163 = vmatprep.mubr.f32.mxu1 %v8088_v27  ;;  %7223 = vmatpush3.msra.mxu0 %v1392_v58 }
  0xdc   : > { %1939 = vmatmul.mubr.f32.gmra.mxu0 %v8045_v14  ;;  %7224 = vmatprep.subr.mxu0 %v1391_v62  ;;  %v1387_v14 = vld [vmem:[%s11705_s1 + $0x420] sm:$0xff] }
  0xdd   : > { %1943 = vmatprep.mubr.f32.mxu0 %v8095_v29  ;;  %7225 = vmatpush3.msra.mxu0 %v1391_v62  ;;  %v11844_v62 = vld [vmem:[#allocation19_spill] sm:$0xff] }
  0xde   : > { %2164 = vmatmul.mubr.f32.gmra.mxu1 %v8058_v18  ;;  %7226 = vmatprep.subr.mxu0 %v1390_v3  ;;  %v1385_v18 = vld [vmem:[%s11705_s1 + $0x410] sm:$0xff] }
  0xdf   : > { %2168 = vmatprep.mubr.f32.mxu1 %v8106_v32  ;;  %7227 = vmatpush3.msra.mxu0 %v1390_v3  ;;  %v3469_v3 = vld [vmem:[%s11706_s2 + $0x60] sm:$0xff] }
  0xe0   : > { %1944 = vmatmul.mubr.f32.gmra.mxu0 %v8067_v21  ;;  %7228 = vmatprep.subr.mxu0 %v1389_v7  ;;  %v1384_v21 = vld [vmem:[%s11705_s1 + $0x408] sm:$0xff] }
  0xe1   : > { %1948 = vmatprep.mubr.f32.mxu0 %v8113_v34  ;;  %7229 = vmatpush3.msra.mxu0 %v1389_v7 }
  0xe2   : > { %2169 = vmatmul.mubr.f32.gmra.mxu1 %v8080_v25  ;;  %7230 = vmatprep.subr.mxu0 %v1388_v11  ;;  %v8663_v25 = vld [vmem:[%s11708_s4] ss:$0 sm:$0xff] }
  0xe3   : > { %2173 = vmatprep.mubr.f32.mxu1 %v8124_v37  ;;  %7231 = vmatpush3.msra.mxu0 %v1388_v11 }
  0xe4   : > { %1949 = vmatmul.mubr.f32.gmra.mxu0 %v8088_v27  ;;  %7232 = vmatprep.subr.mxu0 %v1387_v14 }
  0xe5   : > { %1953 = vmatprep.mubr.f32.mxu0 %v8131_v39  ;;  %7233 = vmatpush3.msra.mxu0 %v1387_v14  ;;  %v11845_v14 = vld [vmem:[#allocation14_spill] sm:$0xff] }
  0xe6   : > { %2174 = vmatmul.mubr.f32.gmra.mxu1 %v8098_v30  ;;  %7234 = vmatprep.subr.mxu0 %v1386_v17 }
  0xe7   : > { %2178 = vmatprep.mubr.f32.mxu1 %v8142_v42  ;;  %7235 = vmatpush3.msra.mxu0 %v1386_v17 }
  0xe8   : > { %1954 = vmatmul.mubr.f32.gmra.mxu0 %v8106_v32  ;;  %7236 = vmatprep.subr.mxu0 %v1385_v18 }
  0xe9   : > { %1958 = vmatprep.mubr.f32.mxu0 %v8149_v44  ;;  %7237 = vmatpush3.msra.mxu0 %v1385_v18  ;;  %v11846_v18 = vld [vmem:[#allocation21_spill] sm:$0xff] }
  0xea   : > { %2179 = vmatmul.mubr.f32.gmra.mxu1 %v8116_v35  ;;  %7238 = vmatprep.subr.mxu0 %v1384_v21  ;;  %v11831_v35 = vld [vmem:[#allocation6_spill] sm:$0xff] }
  0xeb   : > { %2183 = vmatprep.mubr.f32.mxu1 %v8160_v47  ;;  %7239 = vmatpush3.msra.mxu0 %v1384_v21 }
  0xec   : > { %1959 = vmatmul.mubr.f32.gmra.mxu0 %v8124_v37  ;;  %7240 = vmatprep.subr.mxu0 %v1383_v24 }
  0xed   : > { %1963 = vmatprep.mubr.f32.mxu0 %v8164_v48  ;;  %7241 = vmatpush3.msra.mxu0 %v1383_v24 }
  0xee   : > { %2184 = vmatmul.mubr.f32.gmra.mxu1 %v8134_v40  ;;  %3606 = vmatprep.subr.mxu1 %v8270_v33 }
  0xef   : > { %2188 = vmatprep.mubr.f32.mxu1 %v8179_v52  ;;  %3831 = vmatprep.subr.mxu0 %v8270_v33 }
  0xf0   : > { %1964 = vmatmul.mubr.f32.gmra.mxu0 %v8142_v42  ;;  %v11832_v42 = vld [vmem:[#allocation7_spill] sm:$0xff] }
  0xf1   : > { %1968 = vmatprep.mubr.f32.mxu0 %v8185_v54 }
  0xf2   : > { %2189 = vmatmul.mubr.f32.gmra.mxu1 %v8153_v45 }
  0xf3   : > { %2193 = vmatprep.mubr.f32.mxu1 %v8196_v59 }
  0xf4   : > { %1969 = vmatmul.mubr.f32.gmra.mxu0 %v8160_v47  ;;  %v11833_v47 = vld [vmem:[#allocation4_spill] sm:$0xff] }
  0xf5   : > { %1973 = vmatprep.mubr.f32.mxu0 %v8203_v61  ;;  %v3472_v61 = vld [vmem:[%s11706_s2 + $0x78] sm:$0xff] }
  0xf6   : > { %2194 = vmatmul.mubr.f32.gmra.mxu1 %v8170_v50  ;;  %v11834_v50 = vld [vmem:[#allocation9_spill] sm:$0xff] }
  0xf7   : > { %2198 = vmatprep.mubr.f32.mxu1 %v8214_v4  ;;  %3607 = vmatpush1.msra.mxu1 %v3472_v61  ;;  %v11852_v61 = vld [vmem:[#allocation27_spill] sm:$0xff] }
  0xf8   : > { %1974 = vmatmul.mubr.f32.gmra.mxu0 %v8179_v52  ;;  %3608 = vmatprep.subr.mxu1 %v8270_v33 }
  0xf9   : > { %1978 = vmatprep.mubr.f32.mxu0 %v8218_v5  ;;  %v11836_v5 = vld [vmem:[#allocation5_spill] sm:$0xff] }
  0xfa   : > { %2199 = vmatmul.mubr.f32.gmra.mxu1 %v8188_v55 }
  0xfb   : > { %2203 = vmatprep.mubr.f32.mxu1 %v8233_v12 }
  0xfc   : > { %1979 = vmatmul.mubr.f32.gmra.mxu0 %v8196_v59  ;;  %v11835_v59 = vld [vmem:[#allocation10_spill] sm:$0xff] }
  0xfd   : > { %1983 = vmatprep.mubr.f32.mxu0 %v8239_v15 }
  0xfe   : > { %2204 = vmatmul.mubr.f32.gmra.mxu1 %v8207_v63 }
  0xff   : > { %2208 = vmatprep.mubr.f32.mxu1 %v8250_v20 }
 0x100   : > { %1984 = vmatmul.mubr.f32.gmra.mxu0 %v8214_v4 }
 0x101   : > { %1988 = vmatprep.mubr.f32.mxu0 %v8257_v23  ;;  %v11838_v23 = vld [vmem:[#allocation13_spill] sm:$0xff] }
 0x102   : > { %2209 = vmatmul.mubr.f32.gmra.mxu1 %v8224_v8 }
 0x103   : > { %2213 = vmatprep.mubr.f32.mxu1 %v8268_v31 }
 0x104   : > { %1989 = vmatmul.mubr.f32.gmra.mxu0 %v8233_v12  ;;  %v11837_v12 = vld [vmem:[#allocation12_spill] sm:$0xff] }
 0x105   : > { %1993 = vmatprep.mubr.f32.mxu0 %v8274_v2 }
 0x106   : > { %2214 = vmatmul.mubr.f32.gmra.mxu1 %v8242_v16 }
 0x107   : > { %2218 = vmatprep.mubr.f32.mxu1 %v8289_v43 }
 0x108   : > { %1994 = vmatmul.mubr.f32.gmra.mxu0 %v8250_v20 }
 0x109   : > { %1998 = vmatprep.mubr.f32.mxu0 %v8295_v49  ;;  %v11840_v49 = vld [vmem:[#allocation15_spill] sm:$0xff] }
 0x10a   : > { %2219 = vmatmul.mubr.f32.gmra.mxu1 %v8261_v26  ;;  %v3471_v26 = vld [vmem:[%s11706_s2 + $0x70] sm:$0xff] }
 0x10b   : > { %2223 = vmatprep.mubr.f32.mxu1 %v8306_v56  ;;  %3609 = vmatpush1.msra.mxu1 %v3471_v26 }
 0x10c   : > { %v1470_v27 = vpop.f32.mrf.mxu0  ;;  %1999 = vmatmul.mubr.f32.gmra.mxu0 %v8268_v31  ;;  %3610 = vmatprep.subr.mxu1 %v8270_v33 }
 0x10d   : > { %v1471_v29 = vadd.f32 %v8663_v25, %v1470_v27  ;;  %2003 = vmatprep.mubr.f32.mxu0 %v8313_v1  ;;  %3611 = vmatpush1.msra.mxu1 %v3470_v22 }
 0x10e   : > { %v1472_v30 = vpop.f32.mrf.mxu0  ;;  %v1695_v32 = vpop.f32.mrf.mxu1  ;;  %2224 = vmatmul.mubr.f32.gmra.mxu1 %v8280_v38  ;;  %v11839_v38 = vld [vmem:[#allocation8_spill] sm:$0xff]  ;;  %3612 = vmatprep.subr.mxu1 %v8270_v33 }
 0x10f   : > { %v8670_v34 = vadd.f32 %v1695_v32, %v1471_v29  ;;  %2228 = vmatprep.mubr.f32.mxu1 %v11831_v35  ;;  %3613 = vmatpush1.msra.mxu1 %v3469_v3  ;;  %v11847_v29 = vld [vmem:[#allocation22_spill] sm:$0xff]  ;;  %v3468_v30 = vld [vmem:[%s11706_s2 + $0x58] sm:$0xff] }
 0x110   : > { %v1475_v37 = vpop.f32.mrf.mxu0  ;;  %v1697_v39 = vpop.f32.mrf.mxu1  ;;  %2004 = vmatmul.mubr.f32.gmra.mxu0 %v8289_v43  ;;  %3614 = vmatprep.subr.mxu1 %v8270_v33 }
 0x111   : > { %v1476_v40 = vadd.f32 %v8663_v25, %v1475_v37  ;;  %2008 = vmatprep.mubr.f32.mxu0 %v11832_v42  ;;  %v11848_v37 = vld [vmem:[#allocation17_spill] sm:$0xff]  ;;  %3615 = vmatpush1.msra.mxu1 %v3468_v30 }
 0x112   : > { %v1477_v44 = vpop.f32.mrf.mxu0  ;;  %v1700_v45 = vpop.f32.mrf.mxu1  ;;  %2229 = vmatmul.mubr.f32.gmra.mxu1 %v11833_v47  ;;  %3616 = vmatprep.subr.mxu1 %v8270_v33  ;;  %v11850_v47 = vld [vmem:[#allocation25_spill] sm:$0xff] }
 0x113   : > { %v8677_v48 = vadd.f32 %v1700_v45, %v1476_v40  ;;  %2233 = vmatprep.mubr.f32.mxu1 %v11834_v50  ;;  %v11849_v40 = vld [vmem:[#allocation24_spill] sm:$0xff] }
 0x114   : > { %v1480_v52 = vpop.f32.mrf.mxu0  ;;  %v1702_v54 = vpop.f32.mrf.mxu1  ;;  %2009 = vmatmul.mubr.f32.gmra.mxu0 %v8306_v56 }
 0x115   : > { %v1481_v55 = vadd.f32 %v8663_v25, %v1480_v52  ;;  %2013 = vmatprep.mubr.f32.mxu0 %v11835_v59 }
 0x116   : > { %v1482_v63 = vpop.f32.mrf.mxu0  ;;  %v1705_v4 = vpop.f32.mrf.mxu1  ;;  %2234 = vmatmul.mubr.f32.gmra.mxu1 %v11836_v5 }
 0x117   : > { %v8687_v8 = vadd.f32 %v1705_v4, %v1481_v55  ;;  %2238 = vmatprep.mubr.f32.mxu1 %v11837_v12  ;;  %v11851_v55 = vld [vmem:[#allocation20_spill] sm:$0xff] }
 0x118   : > { %v1485_v15 = vpop.f32.mrf.mxu0  ;;  %v1707_v16 = vpop.f32.mrf.mxu1  ;;  %2014 = vmatmul.mubr.f32.gmra.mxu0 %v11831_v35 }
 0x119   : > { %v1486_v20 = vadd.f32 %v8663_v25, %v1485_v15  ;;  %2018 = vmatprep.mubr.f32.mxu0 %v11838_v23  ;;  %v3466_v15 = vld [vmem:[%s11706_s2 + $0x48] sm:$0xff] }
 0x11a   : > { %v1487_v31 = vpop.f32.mrf.mxu0  ;;  %v1710_v2 = vpop.f32.mrf.mxu1  ;;  %2239 = vmatmul.mubr.f32.gmra.mxu1 %v11839_v38  ;;  %v11854_v23 = vld [vmem:[#allocation23_spill] sm:$0xff] }
 0x11b   : > { %v8698_v43 = vadd.f32 %v1710_v2, %v1486_v20  ;;  %2243 = vmatprep.mubr.f32.mxu1 %v11840_v49 }
 0x11c   : > { %v1490_v56 = vpop.f32.mrf.mxu0  ;;  %v1712_v1 = vpop.f32.mrf.mxu1  ;;  %2019 = vmatmul.mubr.f32.gmra.mxu0 %v11834_v50  ;;  %v3467_v50 = vld [vmem:[%s11706_s2 + $0x50] sm:$0xff] }
 0x11d   : > { %v1491_v13 = vadd.f32 %v8663_v25, %v1490_v56  ;;  %2023 = vmatprep.mubr.f32.mxu0 %v11841_v41  ;;  %3617 = vmatpush1.msra.mxu1 %v3467_v50  ;;  %v3465_v56 = vld [vmem:[%s11706_s2 + $0x40] sm:$0xff] }
 0x11e   : > { %v1492_v19 = vpop.f32.mrf.mxu0  ;;  %v1715_v10 = vpop.f32.mrf.mxu1  ;;  %2244 = vmatmul.mubr.f32.gmra.mxu1 %v11842_v60  ;;  %3618 = vmatprep.subr.mxu1 %v8270_v33  ;;  %v11856_v41 = vld [vmem:[#allocation26_spill] sm:$0xff] }
 0x11f   : > { %v8709_v57 = vadd.f32 %v1715_v10, %v1491_v13  ;;  %2248 = vmatprep.mubr.f32.mxu1 %v11843_v51  ;;  %3619 = vmatpush1.msra.mxu1 %v3466_v15  ;;  %v11857_v19 = vld [vmem:[#allocation30_spill] sm:$0xff] }
 0x120   : > { %v1495_v0 = vpop.f32.mrf.mxu0  ;;  %v1717_v9 = vpop.f32.mrf.mxu1  ;;  %2024 = vmatmul.mubr.f32.gmra.mxu0 %v11837_v12  ;;  %v11853_v12 = vld [vmem:[#allocation28_spill] sm:$0xff]  ;;  %3620 = vmatprep.subr.mxu1 %v8270_v33  ;;  %v869_v50 = vld [vmem:[#allocation2 + $0x199] sm:$0xff] }
 0x121   : > { %v1496_v58 = vadd.f32 %v8663_v25, %v1495_v0  ;;  %2028 = vmatprep.mubr.f32.mxu0 %v11844_v62  ;;  %3621 = vmatpush1.msra.mxu1 %v3465_v56  ;;  %v3464_v0 = vld [vmem:[%s11706_s2 + $0x38] sm:$0xff]  ;;  %v806_v56 = vld [vmem:[#allocation2 + $0x1a0] sm:$0xff] }
 0x122   : > { %v1497_v7 = vpop.f32.mrf.mxu0  ;;  %v1720_v11 = vpop.f32.mrf.mxu1  ;;  %2249 = vmatmul.mubr.f32.gmra.mxu1 %v11845_v14  ;;  %3622 = vmatprep.subr.mxu1 %v8270_v33  ;;  %v11858_v14 = vld [vmem:[#allocation32_spill] sm:$0xff] }
 0x123   : > { %v8720_v17 = vadd.f32 %v1720_v11, %v1496_v58  ;;  %2253 = vmatprep.mubr.f32.mxu1 %v11846_v18  ;;  %3623 = vmatpush1.msra.mxu1 %v3464_v0  ;;  %v867_v11 = vld [vmem:[#allocation2 + $0x181] sm:$0xff]  ;;  %v905_v0 = vld [vmem:[#allocation2 + $0x4a] sm:$0xff] }
 0x124   : > { %v1500_v21 = vpop.f32.mrf.mxu0  ;;  %v1722_v24 = vpop.f32.mrf.mxu1  ;;  %2029 = vmatmul.mubr.f32.gmra.mxu0 %v11840_v49  ;;  %v11855_v49 = vld [vmem:[#allocation29_spill] sm:$0xff]  ;;  %3624 = vmatprep.subr.mxu1 %v8270_v33 }
 0x125   : > { %v1501_v27 = vadd.f32 %v8663_v25, %v1500_v21  ;;  %2033 = vmatprep.mubr.f32.mxu0 %v11847_v29  ;;  %v868_v29 = vld [vmem:[#allocation2 + $0x189] sm:$0xff] }
 0x126   : > { %v1502_v32 = vpop.f32.mrf.mxu0  ;;  %v1725_v35 = vpop.f32.mrf.mxu1  ;;  %2254 = vmatmul.mubr.f32.gmra.mxu1 %v11848_v37 }
 0x127   : > { %v8731_v39 = vadd.f32 %v1725_v35, %v1501_v27  ;;  %2258 = vmatprep.mubr.f32.mxu1 %v11849_v40  ;;  %v11859_v32 = vld [vmem:[#allocation34_spill] sm:$0xff]  ;;  %v3462_v35 = vld [vmem:[%s11706_s2 + $0x28] sm:$0xff] }
 0x128   : > { %v1505_v42 = vpop.f32.mrf.mxu0  ;;  %v1727_v44 = vpop.f32.mrf.mxu1  ;;  %2034 = vmatmul.mubr.f32.gmra.mxu0 %v11843_v51 }
 0x129   : > { %v1506_v45 = vadd.f32 %v8663_v25, %v1505_v42  ;;  %2038 = vmatprep.mubr.f32.mxu0 %v11850_v47  ;;  %v8796_v42 = vld [vmem:[#allocation2 + $0x182] sm:$0xff] }
 0x12a   : > { %v1507_v52 = vpop.f32.mrf.mxu0  ;;  %v1730_v54 = vpop.f32.mrf.mxu1  ;;  %2259 = vmatmul.mubr.f32.gmra.mxu1 %v11851_v55 }
 0x12b   : > { %v8742_v59 = vadd.f32 %v1730_v54, %v1506_v45  ;;  %2263 = vmatprep.mubr.f32.mxu1 %v11852_v61  ;;  %v3461_v54 = vld [vmem:[%s11706_s2 + $0x20] sm:$0xff] }
 0x12c   : > { %v1510_v63 = vpop.f32.mrf.mxu0  ;;  %v1732_v4 = vpop.f32.mrf.mxu1  ;;  %2039 = vmatmul.mubr.f32.gmra.mxu0 %v11846_v18 }
 0x12d   : > { %v1511_v5 = vadd.f32 %v8663_v25, %v1510_v63  ;;  %2043 = vmatprep.mubr.f32.mxu0 %v11853_v12  ;;  %v11861_v63 = vld [vmem:[#allocation33_spill] sm:$0xff]  ;;  %v8808_v4 = vld [vmem:[#allocation2 + $0x18a] sm:$0xff] }
 0x12e   : > { %v1512_v16 = vpop.f32.mrf.mxu0  ;;  %v1735_v20 = vpop.f32.mrf.mxu1  ;;  %2264 = vmatmul.mubr.f32.gmra.mxu1 %v11854_v23  ;;  %v3460_v23 = vld [vmem:[%s11706_s2 + $0x18] sm:$0xff] }
 0x12f   : > { %v8753_v26 = vadd.f32 %v1735_v20, %v1511_v5  ;;  %2268 = vmatprep.mubr.f32.mxu1 %v8470_v36  ;;  %v870_v16 = vld [vmem:[#allocation2 + $0x1a1] sm:$0xff] }
 0x130   : > { %v1515_v31 = vpop.f32.mrf.mxu0  ;;  %v1737_v2 = vpop.f32.mrf.mxu1  ;;  %2044 = vmatmul.mubr.f32.gmra.mxu0 %v11849_v40  ;;  %v11860_v40 = vld [vmem:[#allocation31_spill] sm:$0xff] }
 0x131   : > { %v1516_v38 = vadd.f32 %v8663_v25, %v1515_v31  ;;  %2048 = vmatprep.mubr.f32.mxu0 %v11855_v49 }
 0x132   : > { %v1517_v1 = vpop.f32.mrf.mxu0  ;;  %v1740_v13 = vpop.f32.mrf.mxu1  ;;  %2269 = vmatmul.mubr.f32.gmra.mxu1 %v11856_v41 }
 0x133   : > { %v8764_v22 = vadd.f32 %v1740_v13, %v1516_v38  ;;  %2273 = vmatprep.mubr.f32.mxu1 %v11857_v19  ;;  %v903_v38 = vld [vmem:[#allocation2 + $0x32] sm:$0xff] }
 0x134   : > { %v1520_v10 = vpop.f32.mrf.mxu0  ;;  %v1742_v60 = vpop.f32.mrf.mxu1  ;;  %2049 = vmatmul.mubr.f32.gmra.mxu0 %v11852_v61 }
 0x135   : > { %v1521_v51 = vadd.f32 %v8663_v25, %v1520_v10  ;;  %2053 = vmatprep.mubr.f32.mxu0 %v8496_v28  ;;  %v3459_v10 = vld [vmem:[%s11706_s2 + $0x10] sm:$0xff] }
 0x136   : > { %v1522_v9 = vpop.f32.mrf.mxu0  ;;  %v1745_v58 = vpop.f32.mrf.mxu1  ;;  %2274 = vmatmul.mubr.f32.gmra.mxu1 %v8460_v46  ;;  %v3463_v46 = vld [vmem:[%s11706_s2 + $0x30] sm:$0xff] }
 0x137   : > { %v8775_v62 = vadd.f32 %v1745_v58, %v1521_v51  ;;  %2278 = vmatprep.mubr.f32.mxu1 %v8513_v6  ;;  %3625 = vmatpush1.msra.mxu1 %v3463_v46 }
 0x138   : > { %v1525_v3 = vpop.f32.mrf.mxu0  ;;  %v1747_v7 = vpop.f32.mrf.mxu1  ;;  %2054 = vmatmul.mubr.f32.gmra.mxu0 %v8470_v36  ;;  %3626 = vmatprep.subr.mxu1 %v8270_v33 }
 0x139   : > { %v1526_v28 = vadd.f32 %v8663_v25, %v1525_v3  ;;  %2058 = vmatprep.mubr.f32.mxu0 %v11858_v14  ;;  %3627 = vmatpush1.msra.mxu1 %v3462_v35 }
 0x13a   : > { %v1527_v18 = vpop.f32.mrf.mxu0  ;;  %v1750_v21 = vpop.f32.mrf.mxu1  ;;  %2279 = vmatmul.mubr.f32.gmra.mxu1 %v8484_v53  ;;  %3628 = vmatprep.subr.mxu1 %v8270_v33 }
 0x13b   : > { %v8786_v24 = vadd.f32 %v1750_v21, %v1526_v28  ;;  %2283 = vmatprep.mubr.f32.mxu1 %v867_v11  ;;  %3629 = vmatpush1.msra.mxu1 %v3461_v54  ;;  %v3458_v28 = vld [vmem:[%s11706_s2 + $0x8] sm:$0xff]  ;;  %v3488_v54 = vld [vmem:[%s11706_s2 + $0xf8] sm:$0xff] }
 0x13c   : > { %v1530_v36 = vpop.f32.mrf.mxu0  ;;  %v1752_v27 = vpop.f32.mrf.mxu1  ;;  %2059 = vmatmul.mubr.f32.gmra.mxu0 %v11857_v19  ;;  %3630 = vmatprep.subr.mxu1 %v8270_v33  ;;  %v904_v19 = vld [vmem:[#allocation2 + $0x3a] sm:$0xff]  ;;  %v907_v18 = vld [vmem:[#allocation2 + $0x62] sm:$0xff] }
 0x13d   : > { %v1531_v30 = vadd.f32 %v8663_v25, %v1530_v36  ;;  %2063 = vmatprep.mubr.f32.mxu0 %v11859_v32  ;;  %3631 = vmatpush1.msra.mxu1 %v3460_v23  ;;  %v3457_v32 = vld [vmem:[%s11706_s2] sm:$0xff]  ;;  %v3487_v23 = vld [vmem:[%s11706_s2 + $0xf0] sm:$0xff] }
 0x13e   : > { %v1532_v53 = vpop.f32.mrf.mxu0  ;;  %v1755_v37 = vpop.f32.mrf.mxu1  ;;  %2284 = vmatmul.mubr.f32.gmra.mxu1 %v11860_v40  ;;  %3632 = vmatprep.subr.mxu1 %v8270_v33 }
 0x13f   : > { %v8798_v44 = vadd.f32 %v1755_v37, %v1531_v30  ;;  %2288 = vmatprep.mubr.f32.mxu1 %v868_v29  ;;  %3633 = vmatpush1.msra.mxu1 %v3459_v10  ;;  %v908_v30 = vld [vmem:[#allocation2 + $0x6a] sm:$0xff]  ;;  %v909_v37 = vld [vmem:[#allocation2 + $0x7a] sm:$0xff]  ;;  %v914_v10 = vld [vmem:[#allocation2 + $0xb2] sm:$0xff] }
 0x140   : > { %v1535_v45 = vpop.f32.mrf.mxu0  ;;  %v1757_v47 = vpop.f32.mrf.mxu1  ;;  %2064 = vmatmul.mubr.f32.gmra.mxu0 %v8513_v6  ;;  %v805_v6 = vld [vmem:[#allocation2 + $0x198] sm:$0xff]  ;;  %3634 = vmatprep.subr.mxu1 %v8270_v33 }
 0x141   : > { %v1536_v52 = vadd.f32 %v8663_v25, %v1535_v45  ;;  %2068 = vmatprep.mubr.f32.mxu0 %v8796_v42  ;;  %3635 = vmatpush1.msra.mxu1 %v3458_v28 }
 0x142   : > { %v1537_v55 = vpop.f32.mrf.mxu0  ;;  %v1760_v61 = vpop.f32.mrf.mxu1  ;;  %2289 = vmatmul.mubr.f32.gmra.mxu1 %v11861_v63  ;;  %3636 = vmatprep.subr.mxu1 %v8270_v33  ;;  %v911_v63 = vld [vmem:[#allocation2 + $0x92] sm:$0xff] }
 0x143   : > { %v8810_v5 = vadd.f32 %v1760_v61, %v1536_v52  ;;  %2293 = vmatprep.mubr.f32.mxu1 %v869_v50  ;;  %3637 = vmatpush1.msra.mxu1 %v3457_v32  ;;  %v910_v52 = vld [vmem:[#allocation2 + $0x82] sm:$0xff] }
 0x144   : > { %v1540_v12 = vpop.f32.mrf.mxu0  ;;  %v1762_v15 = vpop.f32.mrf.mxu1  ;;  %2069 = vmatmul.mubr.f32.gmra.mxu0 %v867_v11  ;;  %v906_v11 = vld [vmem:[#allocation2 + $0x52] sm:$0xff]  ;;  %3638 = vmatprep.subr.mxu1 %v8270_v33  ;;  %v3501_v32 = vld [vmem:[%s11706_s2 + $0x160] sm:$0xff] }
 0x145   : > { %v1541_v20 = vadd.f32 %v8663_v25, %v1540_v12  ;;  %2073 = vmatprep.mubr.f32.mxu0 %v8808_v4  ;;  %3639 = vmatpush2.msra.mxu1 %v3488_v54 }
 0x146   : > { %v1542_v31 = vpop.f32.mrf.mxu0  ;;  %v1765_v2 = vpop.f32.mrf.mxu1  ;;  %2294 = vmatmul.mubr.f32.gmra.mxu1 %v805_v6  ;;  %3640 = vmatprep.subr.mxu1 %v8270_v33 }
 0x147   : > { %v8818_v49 = vadd.f32 %v1765_v2, %v1541_v20  ;;  %2298 = vmatprep.mubr.f32.mxu1 %v870_v16  ;;  %v912_v20 = vld [vmem:[#allocation2 + $0x9a] sm:$0xff]  ;;  %3641 = vmatpush2.msra.mxu1 %v3487_v23 }
 0x148   : > { %v1545_v1 = vpop.f32.mrf.mxu0  ;;  %v1767_v13 = vpop.f32.mrf.mxu1  ;;  %2074 = vmatmul.mubr.f32.gmra.mxu0 %v868_v29  ;;  %3642 = vmatprep.subr.mxu1 %v8270_v33 }
 0x149   : > { %v1546_v41 = vadd.f32 %v8663_v25, %v1545_v1  ;;  %7242 = vmatprep.mubr.f32.mxu0 %v903_v38  ;;  %v913_v38 = vld [vmem:[#allocation2 + $0xaa] sm:$0xff] }
 0x14a   : > { %v1547_v60 = vpop.f32.mrf.mxu0  ;;  %v1770_v51 = vpop.f32.mrf.mxu1  ;;  %2299 = vmatmul.mubr.f32.gmra.mxu1 %v806_v56 }
 0x14b   : > { %v8825_v9 = vadd.f32 %v1770_v51, %v1546_v41  ;;  %v3504_v41 = vld [vmem:[%s11706_s2 + $0x178] sm:$0xff]  ;;  %v3486_v60 = vld [vmem:[%s11706_s2 + $0xe8] sm:$0xff] }
 0x14c   : > { %v1550_v58 = vpop.f32.mrf.mxu0  ;;  %v1772_v3 = vpop.f32.mrf.mxu1  ;;  %7243 = vmatmul.mubr.f32.vlgmr.msra.gmra.mxu0 %v904_v19  ;;  %3643 = vmatpush2.msra.mxu1 %v3486_v60 }
 0x14d   : > { %v1551_v7 = vadd.f32 %v8663_v25, %v1550_v58  ;;  %7245 = vmatprep.mubr.f32.mxu0 %v905_v0  ;;  %3832 = vmatpush1.msra.mxu0 %v3504_v41  ;;  %v915_v58 = vld [vmem:[#allocation2 + $0xc2] sm:$0xff]  ;;  %v3503_v3 = vld [vmem:[%s11706_s2 + $0x170] sm:$0xff] }
 0x14e   : > { %v1552_v14 = vpop.f32.mrf.mxu0  ;;  %v1775_v46 = vpop.f32.mrf.mxu1  ;;  %3833 = vmatprep.subr.mxu0 %v8270_v33  ;;  %3644 = vmatprep.subr.mxu1 %v8270_v33  ;;  %v3497_v41 = vld [vmem:[%s11706_s2 + $0x140] sm:$0xff] }
 0x14f   : > { %v8832_v21 = vadd.f32 %v1775_v46, %v1551_v7  ;;  %3834 = vmatpush1.msra.mxu0 %v3503_v3  ;;  %v3502_v14 = vld [vmem:[%s11706_s2 + $0x168] sm:$0xff] }
 0x150   : > { %v1555_v36 = vpop.f32.mrf.mxu0  ;;  %v1777_v27 = vpop.f32.mrf.mxu1  ;;  %7246 = vmatmul.mubr.f32.gmra.mxu0 %v906_v11  ;;  %3835 = vmatprep.subr.mxu0 %v8270_v33  ;;  %v3482_v3 = vld [vmem:[%s11706_s2 + $0xc8] sm:$0xff] }
 0x151   : > { %v1556_v29 = vadd.f32 %v8663_v25, %v1555_v36  ;;  %7248 = vmatprep.mubr.f32.mxu0 %v907_v18  ;;  %v916_v18 = vld [vmem:[#allocation2 + $0xca] sm:$0xff]  ;;  %v3485_v36 = vld [vmem:[%s11706_s2 + $0xe0] sm:$0xff]  ;;  %3836 = vmatpush1.msra.mxu0 %v3502_v14 }
 0x152   : > { %v1557_v35 = vpop.f32.mrf.mxu0  ;;  %v1780_v53 = vpop.f32.mrf.mxu1  ;;  %3645 = vmatpush2.msra.mxu1 %v3485_v36  ;;  %3837 = vmatprep.subr.mxu0 %v8270_v33  ;;  %v923_v14 = vld [vmem:[#allocation2 + $0x122] sm:$0xff] }
 0x153   : > { %v8839_v40 = vadd.f32 %v1780_v53, %v1556_v29  ;;  %3838 = vmatpush1.msra.mxu0 %v3501_v32  ;;  %3646 = vmatprep.subr.mxu1 %v8270_v33  ;;  %v924_v32 = vld [vmem:[#allocation2 + $0x12a] sm:$0xff] }
 0x154   : > { %v1560_v45 = vpop.f32.mrf.mxu0  ;;  %v1782_v47 = vpop.f32.mrf.mxu1  ;;  %7249 = vmatmul.mubr.f32.gmra.mxu0 %v908_v30  ;;  %v917_v30 = vld [vmem:[#allocation2 + $0xda] sm:$0xff]  ;;  %3839 = vmatprep.subr.mxu0 %v8270_v33 }
 0x155   : > { %v1561_v50 = vadd.f32 %v8663_v25, %v1560_v45  ;;  %7251 = vmatprep.mubr.f32.mxu0 %v909_v37  ;;  %v3500_v45 = vld [vmem:[%s11706_s2 + $0x158] sm:$0xff] }
 0x156   : > { %v1562_v55 = vpop.f32.mrf.mxu0  ;;  %v1785_v61 = vpop.f32.mrf.mxu1  ;;  %3840 = vmatpush1.msra.mxu0 %v3500_v45 }
 0x157   : > { %v8846_v6 = vadd.f32 %v1785_v61, %v1561_v50  ;;  %v918_v50 = vld [vmem:[#allocation2 + $0xe2] sm:$0xff]  ;;  %v919_v61 = vld [vmem:[#allocation2 + $0xf2] sm:$0xff]  ;;  %3841 = vmatprep.subr.mxu0 %v8270_v33 }
 0x158   : > { %v1565_v12 = vpop.f32.mrf.mxu0  ;;  %v1787_v15 = vpop.f32.mrf.mxu1  ;;  %7252 = vmatmul.mubr.f32.gmra.mxu0 %v910_v52  ;;  %v3484_v52 = vld [vmem:[%s11706_s2 + $0xd8] sm:$0xff] }
 0x159   : > { %v1566_v16 = vadd.f32 %v8663_v25, %v1565_v12  ;;  %7254 = vmatprep.mubr.f32.mxu0 %v911_v63  ;;  %3647 = vmatpush2.msra.mxu1 %v3484_v52  ;;  %v3499_v63 = vld [vmem:[%s11706_s2 + $0x150] sm:$0xff] }
 0x15a   : > { %v1567_v31 = vpop.f32.mrf.mxu0  ;;  %v1790_v2 = vpop.f32.mrf.mxu1  ;;  %3842 = vmatpush1.msra.mxu0 %v3499_v63  ;;  %3648 = vmatprep.subr.mxu1 %v8270_v33 }
 0x15b   : > { %v8853_v56 = vadd.f32 %v1790_v2, %v1566_v16  ;;  %3843 = vmatprep.subr.mxu0 %v8270_v33  ;;  %v920_v31 = vld [vmem:[#allocation2 + $0xfa] sm:$0xff]  ;;  %v3483_v2 = vld [vmem:[%s11706_s2 + $0xd0] sm:$0xff] }
 0x15c   : > { %v1570_v1 = vpop.f32.mrf.mxu0  ;;  %v1792_v13 = vpop.f32.mrf.mxu1  ;;  %7255 = vmatmul.mubr.f32.gmra.mxu0 %v912_v20  ;;  %v3498_v20 = vld [vmem:[%s11706_s2 + $0x148] sm:$0xff]  ;;  %3649 = vmatpush2.msra.mxu1 %v3483_v2  ;;  %v3491_v2 = vld [vmem:[%s11706_s2 + $0x110] sm:$0xff] }
 0x15d   : > { %v1571_v19 = vadd.f32 %v8663_v25, %v1570_v1  ;;  %7257 = vmatprep.mubr.f32.mxu0 %v913_v38  ;;  %3844 = vmatpush1.msra.mxu0 %v3498_v20  ;;  %v921_v13 = vld [vmem:[#allocation2 + $0x10a] sm:$0xff] }
 0x15e   : > { %v1572_v51 = vpop.f32.mrf.mxu0  ;;  %v1795_v0 = vpop.f32.mrf.mxu1  ;;  %3845 = vmatprep.subr.mxu0 %v8270_v33  ;;  %3650 = vmatprep.subr.mxu1 %v8270_v33 }
 0x15f   : > { %v8867_v7 = vadd.f32 %v1795_v0, %v1571_v19  ;;  %3846 = vmatpush1.msra.mxu0 %v3497_v41  ;;  %v3496_v51 = vld [vmem:[%s11706_s2 + $0x138] sm:$0xff]  ;;  %3651 = vmatpush2.msra.mxu1 %v3482_v3  ;;  %v3490_v41 = vld [vmem:[%s11706_s2 + $0x108] sm:$0xff] }
 0x160   : > { %v1575_v11 = vpop.f32.mrf.mxu0  ;;  %v1797_v28 = vpop.f32.mrf.mxu1  ;;  %7258 = vmatmul.mubr.f32.gmra.mxu0 %v914_v10  ;;  %3847 = vmatprep.subr.mxu0 %v8270_v33  ;;  %v929_v3 = vld [vmem:[#allocation2 + $0x16a] sm:$0xff] }
 0x161   : > { %v1576_v46 = vadd.f32 %v8663_v25, %v1575_v11  ;;  %7260 = vmatprep.mubr.f32.mxu0 %v915_v58  ;;  %v922_v58 = vld [vmem:[#allocation2 + $0x112] sm:$0xff]  ;;  %3848 = vmatpush1.msra.mxu0 %v3496_v51 }
 0x162   : > { %v1577_v27 = vpop.f32.mrf.mxu0  ;;  %v1800_v29 = vpop.f32.mrf.mxu1  ;;  %3849 = vmatprep.subr.mxu0 %v8270_v33  ;;  %3652 = vmatprep.subr.mxu1 %v8270_v33  ;;  %v3479_v51 = vld [vmem:[%s11706_s2 + $0xb0] sm:$0xff] }
 0x163   : > { %v8882_v35 = vadd.f32 %v1800_v29, %v1576_v46  ;;  %v3495_v46 = vld [vmem:[%s11706_s2 + $0x130] sm:$0xff]  ;;  %v3494_v29 = vld [vmem:[%s11706_s2 + $0x128] sm:$0xff] }
 0x164   : > { %v1580_v53 = vpop.f32.mrf.mxu0  ;;  %v1802_v37 = vpop.f32.mrf.mxu1  ;;  %7261 = vmatmul.mubr.f32.gmra.mxu0 %v916_v18 }
 0x165   : > { %v1581_v47 = vadd.f32 %v8663_v25, %v1580_v53  ;;  %7263 = vmatprep.mubr.f32.mxu0 %v917_v30  ;;  %3850 = vmatpush1.msra.mxu0 %v3495_v46  ;;  %v3481_v53 = vld [vmem:[%s11706_s2 + $0xc0] sm:$0xff] }
 0x166   : > { %v1582_v54 = vpop.f32.mrf.mxu0  ;;  %v1805_v55 = vpop.f32.mrf.mxu1  ;;  %3851 = vmatprep.subr.mxu0 %v8270_v33  ;;  %3653 = vmatpush2.msra.mxu1 %v3481_v53 }
 0x167   : > { %v8897_v12 = vadd.f32 %v1805_v55, %v1581_v47  ;;  %3852 = vmatpush1.msra.mxu0 %v3494_v29  ;;  %v925_v47 = vld [vmem:[#allocation2 + $0x13a] sm:$0xff]  ;;  %3654 = vmatprep.subr.mxu1 %v8270_v33  ;;  %v930_v29 = vld [vmem:[#allocation2 + $0x172] sm:$0xff] }
 0x168   : > { %v1585_v15 = vpop.f32.mrf.mxu0  ;;  %v1807_v16 = vpop.f32.mrf.mxu1  ;;  %7264 = vmatmul.mubr.f32.gmra.mxu0 %v918_v50  ;;  %3853 = vmatprep.subr.mxu0 %v8270_v33  ;;  %v3493_v50 = vld [vmem:[%s11706_s2 + $0x120] sm:$0xff] }
 0x169   : > { %v1586_v23 = vadd.f32 %v8663_v25, %v1585_v15  ;;  %7266 = vmatprep.mubr.f32.mxu0 %v919_v61  ;;  %3854 = vmatpush1.msra.mxu0 %v3493_v50  ;;  %v3492_v61 = vld [vmem:[%s11706_s2 + $0x118] sm:$0xff]  ;;  %v926_v15 = vld [vmem:[#allocation2 + $0x142] sm:$0xff] }
 0x16a   : > { %v1587_v38 = vpop.f32.mrf.mxu0  ;;  %v1810_v1 = vpop.f32.mrf.mxu1  ;;  %3855 = vmatprep.subr.mxu0 %v8270_v33  ;;  %v3480_v16 = vld [vmem:[%s11706_s2 + $0xb8] sm:$0xff] }
 0x16b   : > { %v8912_v19 = vadd.f32 %v1810_v1, %v1586_v23  ;;  %3856 = vmatpush1.msra.mxu0 %v3492_v61  ;;  %3655 = vmatpush2.msra.mxu1 %v3480_v16  ;;  %v3477_v61 = vld [vmem:[%s11706_s2 + $0xa0] sm:$0xff] }
 0x16c   : > { %v1590_v10 = vpop.f32.mrf.mxu0  ;;  %v1812_v60 = vpop.f32.mrf.mxu1  ;;  %7267 = vmatmul.mubr.f32.gmra.mxu0 %v920_v31  ;;  %v927_v31 = vld [vmem:[#allocation2 + $0x152] sm:$0xff]  ;;  %3857 = vmatprep.subr.mxu0 %v8270_v33  ;;  %v933_v16 = vld [vmem:[#allocation2 + $0x19a] sm:$0xff] }
 0x16d   : > { %v1591_v0 = vadd.f32 %v8663_v25, %v1590_v10  ;;  %7269 = vmatprep.mubr.f32.mxu0 %v921_v13  ;;  %3858 = vmatpush1.msra.mxu0 %v3491_v2  ;;  %v928_v60 = vld [vmem:[#allocation2 + $0x15a] sm:$0xff] }
 0x16e   : > { %v1592_v11 = vpop.f32.mrf.mxu0  ;;  %v1815_v28 = vpop.f32.mrf.mxu1  ;;  %3656 = vmatprep.subr.mxu1 %v8270_v33  ;;  %3859 = vmatprep.subr.mxu0 %v8270_v33  ;;  %v3516_v2 = vld [vmem:[%s11706_s2 + $0x1d8] sm:$0xff] }
 0x16f   : > { %v8927_v18 = vadd.f32 %v1815_v28, %v1591_v0  ;;  %3860 = vmatpush1.msra.mxu0 %v3490_v41  ;;  %3657 = vmatpush2.msra.mxu1 %v3479_v51  ;;  %v3489_v11 = vld [vmem:[%s11706_s2 + $0x100] sm:$0xff]  ;;  %v3476_v41 = vld [vmem:[%s11706_s2 + $0x98] sm:$0xff] }
 0x170   : > { %v1595_v36 = vpop.f32.mrf.mxu0  ;;  %v1817_v27 = vpop.f32.mrf.mxu1  ;;  %7270 = vmatmul.mubr.f32.gmra.mxu0 %v922_v58  ;;  %3861 = vmatprep.subr.mxu0 %v8270_v33 }
 0x171   : > { %v1596_v30 = vadd.f32 %v8663_v25, %v1595_v36  ;;  %7272 = vmatprep.mubr.f32.mxu0 %v923_v14  ;;  %3862 = vmatpush1.msra.mxu0 %v3489_v11  ;;  %v3520_v36 = vld [vmem:[%s11706_s2 + $0x1f8] sm:$0xff]  ;;  %v3514_v11 = vld [vmem:[%s11706_s2 + $0x1c8] sm:$0xff] }
 0x172   : > { %v1597_v37 = vpop.f32.mrf.mxu0  ;;  %v1820_v45 = vpop.f32.mrf.mxu1  ;;  %3658 = vmatprep.subr.mxu1 %v8270_v33  ;;  %3863 = vmatprep.subr.mxu0 %v8270_v33 }
 0x173   : > { %v8942_v52 = vadd.f32 %v1820_v45, %v1596_v30  ;;  %v3478_v30 = vld [vmem:[%s11706_s2 + $0xa8] sm:$0xff]  ;;  %3864 = vmatpush2.msra.mxu0 %v3520_v36  ;;  %v3519_v37 = vld [vmem:[%s11706_s2 + $0x1f0] sm:$0xff] }
 0x174   : > { %v1600_v54 = vpop.f32.mrf.mxu0  ;;  %v1822_v55 = vpop.f32.mrf.mxu1  ;;  %7273 = vmatmul.mubr.f32.gmra.mxu0 %v924_v32  ;;  %3659 = vmatpush2.msra.mxu1 %v3478_v30 }
 0x175   : > { %v1601_v63 = vadd.f32 %v8663_v25, %v1600_v54  ;;  %7275 = vmatprep.mubr.f32.mxu0 %v925_v47  ;;  %3865 = vmatprep.subr.mxu0 %v8270_v33  ;;  %v3518_v54 = vld [vmem:[%s11706_s2 + $0x1e8] sm:$0xff] }
 0x176   : > { %v1602_v20 = vpop.f32.mrf.mxu0  ;;  %v1825_v23 = vpop.f32.mrf.mxu1  ;;  %3866 = vmatpush2.msra.mxu0 %v3519_v37  ;;  %3660 = vmatprep.subr.mxu1 %v8270_v33  ;;  %v3473_v37 = vld [vmem:[%s11706_s2 + $0x80] sm:$0xff] }
 0x177   : > { %v8957_v38 = vadd.f32 %v1825_v23, %v1601_v63  ;;  %3867 = vmatprep.subr.mxu0 %v8270_v33  ;;  %3661 = vmatpush2.msra.mxu1 %v3477_v61  ;;  %v3517_v20 = vld [vmem:[%s11706_s2 + $0x1e0] sm:$0xff] }
 0x178   : > { %v1605_v1 = vpop.f32.mrf.mxu0  ;;  %v1827_v13 = vpop.f32.mrf.mxu1  ;;  %7276 = vmatmul.mubr.f32.gmra.mxu0 %v926_v15  ;;  %3662 = vmatprep.subr.mxu1 %v8270_v33 }
 0x179   : > { %v1606_v10 = vadd.f32 %v8663_v25, %v1605_v1  ;;  %7278 = vmatprep.mubr.f32.mxu0 %v927_v31  ;;  %3868 = vmatpush2.msra.mxu0 %v3518_v54  ;;  %v934_v13 = vld [vmem:[#allocation2 + $0x1a2] sm:$0xff] }
 0x17a   : > { %v1607_v0 = vpop.f32.mrf.mxu0  ;;  %v1830_v58 = vpop.f32.mrf.mxu1  ;;  %3869 = vmatprep.subr.mxu0 %v8270_v33  ;;  %3663 = vmatpush2.msra.mxu1 %v3476_v41  ;;  %v2593_v54 = vld [vmem:[#allocation2] sm:$0xff] }
 0x17b   : > { %v8972_v28 = vadd.f32 %v1830_v58, %v1606_v10  ;;  %3870 = vmatpush2.msra.mxu0 %v3517_v20  ;;  %3664 = vmatprep.subr.mxu1 %v8270_v33  ;;  %v3509_v41 = vld [vmem:[%s11706_s2 + $0x1a0] sm:$0xff] }
 0x17c   : > { %v1610_v14 = vpop.f32.mrf.mxu0  ;;  %v1832_v46 = vpop.f32.mrf.mxu1  ;;  %7279 = vmatmul.mubr.f32.gmra.mxu0 %v928_v60  ;;  %3871 = vmatprep.subr.mxu0 %v8270_v33 }
 0x17d   : > { %v1611_v27 = vadd.f32 %v8663_v25, %v1610_v14  ;;  %7281 = vmatprep.mubr.f32.mxu0 %v929_v3  ;;  %3872 = vmatpush2.msra.mxu0 %v3516_v2  ;;  %v3475_v3 = vld [vmem:[%s11706_s2 + $0x90] sm:$0xff]  ;;  %v2594_v2 = vld [vmem:[#allocation2 + $0x8] sm:$0xff] }
 0x17e   : > { %v1612_v32 = vpop.f32.mrf.mxu0  ;;  %v1835_v53 = vpop.f32.mrf.mxu1  ;;  %3873 = vmatprep.subr.mxu0 %v8270_v33  ;;  %3665 = vmatpush2.msra.mxu1 %v3475_v3 }
 0x17f   : > { %v8987_v45 = vadd.f32 %v1835_v53, %v1611_v27  ;;  %v3513_v27 = vld [vmem:[%s11706_s2 + $0x1c0] sm:$0xff]  ;;  %3666 = vmatprep.subr.mxu1 %v8270_v33  ;;  %v3512_v53 = vld [vmem:[%s11706_s2 + $0x1b8] sm:$0xff] }
 0x180   : > { %v1615_v47 = vpop.f32.mrf.mxu0  ;;  %v1837_v50 = vpop.f32.mrf.mxu1  ;;  %7282 = vmatmul.mubr.f32.gmra.mxu0 %v930_v29  ;;  %v3474_v29 = vld [vmem:[%s11706_s2 + $0x88] sm:$0xff] }
 0x181   : > { %v1616_v55 = vadd.f32 %v8663_v25, %v1615_v47  ;;  %7284 = vmatprep.mubr.f32.mxu0 %v8796_v42  ;;  %3667 = vmatpush2.msra.mxu1 %v3474_v29  ;;  %v2657_v47 = vld [vmem:[#allocation2 + $0x1] sm:$0xff]  ;;  %v3536_v29 = vld [vmem:[%s11706_s2 + $0x278] sm:$0xff] }
 0x182   : > { %v1617_v63 = vpop.f32.mrf.mxu0  ;;  %v1840_v15 = vpop.f32.mrf.mxu1  ;;  %3668 = vmatprep.subr.mxu1 %v8270_v33  ;;  %3670 = vmatprep.mubr.f32.mxu1 %v2657_v47 }
 0x183   : > { %v9003_v23 = vadd.f32 %v1840_v15, %v1616_v55  ;;  %3669 = vmatpush2.msra.mxu1 %v3473_v37  ;;  %v3511_v63 = vld [vmem:[%s11706_s2 + $0x1b0] sm:$0xff] }
 0x184   : > { %v1620_v42 = vpop.f32.mrf.mxu0  ;;  %v1842_v31 = vpop.f32.mrf.mxu1  ;;  %7285 = vmatmul.mubr.f32.gmra.mxu0 %v8808_v4  ;;  %v3515_v4 = vld [vmem:[%s11706_s2 + $0x1d0] sm:$0xff]  ;;  %3671 = vmatmul.mubr.f32.vlgmr.msra.gmra.mxu1 %v2593_v54 }
 0x185   : > { %v1621_v1 = vadd.f32 %v8663_v25, %v1620_v42  ;;  %7287 = vmatprep.mubr.f32.mxu0 %v933_v16  ;;  %3874 = vmatpush2.msra.mxu0 %v3515_v4  ;;  %v2658_v42 = vld [vmem:[#allocation2 + $0x9] sm:$0xff] }
 0x186   : > { %v1622_v10 = vpop.f32.mrf.mxu0  ;;  %v1845_v60 = vpop.f32.mrf.mxu1  ;;  %3875 = vmatprep.subr.mxu0 %v8270_v33  ;;  %4056 = vmatprep.subr.mxu1 %v8270_v33  ;;  %v3535_v54 = vld [vmem:[%s11706_s2 + $0x270] sm:$0xff] }
 0x187   : > { %v9019_v51 = vadd.f32 %v1845_v60, %v1621_v1  ;;  %3876 = vmatpush2.msra.mxu0 %v3514_v11  ;;  %3675 = vmatprep.mubr.f32.mxu1 %v2658_v42  ;;  %v3507_v11 = vld [vmem:[%s11706_s2 + $0x190] sm:$0xff]  ;;  %v3534_v42 = vld [vmem:[%s11706_s2 + $0x268] sm:$0xff] }
 0x188   : > { %v1625_v0 = vpop.f32.mrf.mxu0  ;;  %v1847_v58 = vpop.f32.mrf.mxu1  ;;  %7288 = vmatmul.mubr.f32.gmra.mxu0 %v934_v13  ;;  %3877 = vmatprep.subr.mxu0 %v8270_v33 }
 0x189   : > { %v1626_v14 = vadd.f32 %v8663_v25, %v1625_v0  ;;  %3878 = vmatpush2.msra.mxu0 %v3513_v27  ;;  %3676 = vmatmul.mubr.f32.gmra.mxu1 %v2594_v2 }
 0x18a   : > { %v1627_v46 = vpop.f32.mrf.mxu0  ;;  %v1850_v36 = vpop.f32.mrf.mxu1  ;;  %3879 = vmatprep.subr.mxu0 %v8270_v33  ;;  %4057 = vmatpush1.msra.mxu1 %v3536_v29 }
 0x18b   : > { %v9038_v30 = vadd.f32 %v1850_v36, %v1626_v14  ;;  %3880 = vmatpush2.msra.mxu0 %v3512_v53  ;;  %v3505_v53 = vld [vmem:[%s11706_s2 + $0x180] sm:$0xff]  ;;  %4058 = vmatprep.subr.mxu1 %v8270_v33 }
 0x18c   : > { %v1852_v25 = vpop.f32.mrf.mxu1  ;;  %v1920_v32 = vpop.f32.mrf.mxu0  ;;  %3881 = vmatprep.subr.mxu0 %v8270_v33  ;;  %4059 = vmatpush1.msra.mxu1 %v3535_v54  ;;  %v3530_v54 = vld [vmem:[%s11706_s2 + $0x248] sm:$0xff] }
 0x18d   : > { %v1921_v50 = vadd.f32 %v1920_v32, %v8670_v34  ;;  %3882 = vmatpush2.msra.mxu0 %v3511_v63  ;;  %v3510_v34 = vld [vmem:[%s11706_s2 + $0x1a8] sm:$0xff]  ;;  %4060 = vmatprep.subr.mxu1 %v8270_v33 }
 0x18e   : > { %v1922_v55 = vpop.f32.mrf.mxu0  ;;  %v2145_v61 = vpop.f32.mrf.mxu1  ;;  %3883 = vmatprep.subr.mxu0 %v8270_v33  ;;  %4061 = vmatpush1.msra.mxu1 %v3534_v42  ;;  %v3529_v42 = vld [vmem:[%s11706_s2 + $0x240] sm:$0xff] }
 0x18f   : > { %v9053_v15 = vadd.f32 %v2145_v61, %v1921_v50  ;;  %3884 = vmatpush2.msra.mxu0 %v3510_v34  ;;  %4062 = vmatprep.subr.mxu1 %v8270_v33 }
 0x190   : > { %v1925_v16 = vpop.f32.mrf.mxu0  ;;  %v2147_v20 = vpop.f32.mrf.mxu1  ;;  %3885 = vmatprep.subr.mxu0 %v8270_v33 }
 0x191   : > { %v1926_v31 = vadd.f32 %v1925_v16, %v8677_v48  ;;  %3886 = vmatpush2.msra.mxu0 %v3509_v41  ;;  %v3508_v48 = vld [vmem:[%s11706_s2 + $0x198] sm:$0xff] }
 0x192   : > { %v1927_v1 = vpop.f32.mrf.mxu0  ;;  %v2150_v13 = vpop.f32.mrf.mxu1  ;;  %3887 = vmatprep.subr.mxu0 %v8270_v33 }
 0x193   : > { %v9065_v10 = vadd.f32 %v2150_v13, %v1926_v31  ;;  %3888 = vmatpush2.msra.mxu0 %v3508_v48 }
 0x194   : > { %v1930_v60 = vpop.f32.mrf.mxu0  ;;  %v2152_v4 = vpop.f32.mrf.mxu1  ;;  %3889 = vmatprep.subr.mxu0 %v8270_v33 }
 0x195   : > { %v1931_v0 = vadd.f32 %v1930_v60, %v8687_v8  ;;  %3890 = vmatpush2.msra.mxu0 %v3507_v11  ;;  %v3506_v8 = vld [vmem:[%s11706_s2 + $0x188] sm:$0xff]  ;;  %v3533_v60 = vld [vmem:[%s11706_s2 + $0x260] sm:$0xff]  ;;  %v3532_v11 = vld [vmem:[%s11706_s2 + $0x258] sm:$0xff] }
 0x196   : > { %v1932_v58 = vpop.f32.mrf.mxu0  ;;  %v2155_v3 = vpop.f32.mrf.mxu1  ;;  %3891 = vmatprep.subr.mxu0 %v8270_v33  ;;  %4063 = vmatpush1.msra.mxu1 %v3533_v60  ;;  %v3528_v60 = vld [vmem:[%s11706_s2 + $0x238] sm:$0xff] }
 0x197   : > { %v9076_v14 = vadd.f32 %v2155_v3, %v1931_v0  ;;  %3892 = vmatpush2.msra.mxu0 %v3506_v8  ;;  %4064 = vmatprep.subr.mxu1 %v8270_v33 }
 0x198   : > { %v1935_v46 = vpop.f32.mrf.mxu0  ;;  %v2157_v36 = vpop.f32.mrf.mxu1  ;;  %3893 = vmatprep.subr.mxu0 %v8270_v33  ;;  %4065 = vmatpush1.msra.mxu1 %v3532_v11  ;;  %v3527_v11 = vld [vmem:[%s11706_s2 + $0x230] sm:$0xff] }
 0x199   : > { %v1936_v27 = vadd.f32 %v1935_v46, %v8698_v43  ;;  %3894 = vmatpush2.msra.mxu0 %v3505_v53  ;;  %4066 = vmatprep.subr.mxu1 %v8270_v33 }
 0x19a   : > { %v1937_v25 = vpop.f32.mrf.mxu0  ;;  %v2160_v32 = vpop.f32.mrf.mxu1  ;;  %4281 = vmatprep.subr.mxu0 %v8270_v33 }
 0x19b   : > { %v9090_v37 = vadd.f32 %v2160_v32, %v1936_v27  ;;  %v3531_v25 = vld [vmem:[%s11706_s2 + $0x250] sm:$0xff] }
 0x19c   : > { %v1940_v43 = vpop.f32.mrf.mxu0  ;;  %v2162_v47 = vpop.f32.mrf.mxu1  ;;  %4067 = vmatpush1.msra.mxu1 %v3531_v25  ;;  %v3526_v25 = vld [vmem:[%s11706_s2 + $0x228] sm:$0xff] }
 0x19d   : > { %v1941_v50 = vadd.f32 %v1940_v43, %v8709_v57  ;;  %4068 = vmatprep.subr.mxu1 %v8270_v33 }
 0x19e   : > { %v1942_v55 = vpop.f32.mrf.mxu0  ;;  %v2165_v61 = vpop.f32.mrf.mxu1  ;;  %4069 = vmatpush1.msra.mxu1 %v3530_v54  ;;  %v3525_v54 = vld [vmem:[%s11706_s2 + $0x220] sm:$0xff] }
 0x19f   : > { %v9098_v63 = vadd.f32 %v2165_v61, %v1941_v50  ;;  %4070 = vmatprep.subr.mxu1 %v8270_v33 }
 0x1a0   : > { %v1945_v16 = vpop.f32.mrf.mxu0  ;;  %v2167_v20 = vpop.f32.mrf.mxu1  ;;  %4071 = vmatpush1.msra.mxu1 %v3529_v42  ;;  %v3524_v42 = vld [vmem:[%s11706_s2 + $0x218] sm:$0xff] }
 0x1a1   : > { %v1946_v34 = vadd.f32 %v1945_v16, %v8720_v17  ;;  %4072 = vmatprep.subr.mxu1 %v8270_v33 }
 0x1a2   : > { %v1947_v57 = vpop.f32.mrf.mxu0  ;;  %v2170_v31 = vpop.f32.mrf.mxu1  ;;  %4073 = vmatpush1.msra.mxu1 %v3528_v60  ;;  %v3523_v60 = vld [vmem:[%s11706_s2 + $0x210] sm:$0xff] }
 0x1a3   : > { %v9105_v2 = vadd.f32 %v2170_v31, %v1946_v34  ;;  %4074 = vmatprep.subr.mxu1 %v8270_v33 }
 0x1a4   : > { %v1950_v1 = vpop.f32.mrf.mxu0  ;;  %v2172_v13 = vpop.f32.mrf.mxu1  ;;  %4075 = vmatpush1.msra.mxu1 %v3527_v11  ;;  %v3521_v11 = vld [vmem:[%s11706_s2 + $0x200] sm:$0xff] }
 0x1a5   : > { %v1951_v41 = vadd.f32 %v1950_v1, %v8731_v39  ;;  %4076 = vmatprep.subr.mxu1 %v8270_v33 }
 0x1a6   : > { %v1952_v17 = vpop.f32.mrf.mxu0  ;;  %v2175_v4 = vpop.f32.mrf.mxu1  ;;  %4077 = vmatpush1.msra.mxu1 %v3526_v25 }
 0x1a7   : > { %v9112_v48 = vadd.f32 %v2175_v4, %v1951_v41  ;;  %4078 = vmatprep.subr.mxu1 %v8270_v33 }
 0x1a8   : > { %v1955_v0 = vpop.f32.mrf.mxu0  ;;  %v2177_v58 = vpop.f32.mrf.mxu1  ;;  %4079 = vmatpush1.msra.mxu1 %v3525_v54 }
 0x1a9   : > { %v1956_v3 = vadd.f32 %v1955_v0, %v8742_v59  ;;  %4080 = vmatprep.subr.mxu1 %v8270_v33 }
 0x1aa   : > { %v1957_v39 = vpop.f32.mrf.mxu0  ;;  %v2180_v46 = vpop.f32.mrf.mxu1  ;;  %4081 = vmatpush1.msra.mxu1 %v3524_v42 }
 0x1ab   : > { %v9119_v36 = vadd.f32 %v2180_v46, %v1956_v3  ;;  %4082 = vmatprep.subr.mxu1 %v8270_v33 }
 0x1ac   : > { %v1960_v8 = vpop.f32.mrf.mxu0  ;;  %v2182_v27 = vpop.f32.mrf.mxu1  ;;  %4083 = vmatpush1.msra.mxu1 %v3523_v60 }
 0x1ad   : > { %v1961_v29 = vadd.f32 %v1960_v8, %v8753_v26  ;;  %4084 = vmatprep.subr.mxu1 %v8270_v33 }
 0x1ae   : > { %v1962_v59 = vpop.f32.mrf.mxu0  ;;  %v2185_v32 = vpop.f32.mrf.mxu1 }
 0x1af   : > { %v9126_v53 = vadd.f32 %v2185_v32, %v1961_v29 }
 0x1b0   : > { %v1965_v43 = vpop.f32.mrf.mxu0  ;;  %v2187_v47 = vpop.f32.mrf.mxu1 }
 0x1b1   : > { %v1966_v50 = vadd.f32 %v1965_v43, %v8764_v22 }
 0x1b2   : > { %v1967_v26 = vpop.f32.mrf.mxu0  ;;  %v2190_v55 = vpop.f32.mrf.mxu1 }
 0x1b3   : > { %v9133_v61 = vadd.f32 %v2190_v55, %v1966_v50 }
 0x1b4   : > { %v1970_v16 = vpop.f32.mrf.mxu0  ;;  %v2192_v20 = vpop.f32.mrf.mxu1 }
 0x1b5   : > { %v1971_v34 = vadd.f32 %v1970_v16, %v8775_v62 }
 0x1b6   : > { %v1972_v22 = vpop.f32.mrf.mxu0  ;;  %v2195_v57 = vpop.f32.mrf.mxu1 }
 0x1b7   : > { %v9140_v31 = vadd.f32 %v2195_v57, %v1971_v34 }
 0x1b8   : > { %v1975_v1 = vpop.f32.mrf.mxu0  ;;  %v2197_v13 = vpop.f32.mrf.mxu1 }
 0x1b9   : > { %v1976_v41 = vadd.f32 %v1975_v1, %v8786_v24 }
 0x1ba   : > { %v1977_v62 = vpop.f32.mrf.mxu0  ;;  %v2200_v17 = vpop.f32.mrf.mxu1 }
 0x1bb   : > { %v9147_v4 = vadd.f32 %v2200_v17, %v1976_v41 }
 0x1bc   : > { %v1980_v0 = vpop.f32.mrf.mxu0  ;;  %v2202_v58 = vpop.f32.mrf.mxu1 }
 0x1bd   : > { %v1981_v3 = vadd.f32 %v1980_v0, %v8798_v44  ;;  %v3522_v0 = vld [vmem:[%s11706_s2 + $0x208] sm:$0xff] }
 0x1be   : > { %v1982_v24 = vpop.f32.mrf.mxu0  ;;  %v2205_v39 = vpop.f32.mrf.mxu1  ;;  %4085 = vmatpush1.msra.mxu1 %v3522_v0 }
 0x1bf   : > { %v9154_v46 = vadd.f32 %v2205_v39, %v1981_v3  ;;  %4086 = vmatprep.subr.mxu1 %v8270_v33 }
 0x1c0   : > { %v1985_v8 = vpop.f32.mrf.mxu0  ;;  %v2207_v27 = vpop.f32.mrf.mxu1  ;;  %4087 = vmatpush1.msra.mxu1 %v3521_v11  ;;  %v3548_v11 = vld [vmem:[%s11706_s2 + $0x2d8] sm:$0xff] }
 0x1c1   : > { %v1986_v29 = vadd.f32 %v1985_v8, %v8810_v5  ;;  %4088 = vmatprep.subr.mxu1 %v8270_v33 }
 0x1c2   : > { %v1987_v44 = vpop.f32.mrf.mxu0  ;;  %v2210_v59 = vpop.f32.mrf.mxu1 }
 0x1c3   : > { %v9161_v32 = vadd.f32 %v2210_v59, %v1986_v29 }
 0x1c4   : > { %v1990_v43 = vpop.f32.mrf.mxu0  ;;  %v2212_v47 = vpop.f32.mrf.mxu1 }
 0x1c5   : > { %v1991_v50 = vadd.f32 %v1990_v43, %v8818_v49 }
 0x1c6   : > { %v1992_v5 = vpop.f32.mrf.mxu0  ;;  %v2215_v26 = vpop.f32.mrf.mxu1 }
 0x1c7   : > { %v9168_v55 = vadd.f32 %v2215_v26, %v1991_v50  ;;  %v3551_v5 = vld [vmem:[%s11706_s2 + $0x2f0] sm:$0xff] }
 0x1c8   : > { %v1995_v16 = vpop.f32.mrf.mxu0  ;;  %v2217_v20 = vpop.f32.mrf.mxu1 }
 0x1c9   : > { %v1996_v34 = vadd.f32 %v1995_v16, %v8825_v9 }
 0x1ca   : > { %v1997_v49 = vpop.f32.mrf.mxu0  ;;  %v2220_v22 = vpop.f32.mrf.mxu1 }
 0x1cb   : > { %v9175_v57 = vadd.f32 %v2220_v22, %v1996_v34  ;;  %v3550_v49 = vld [vmem:[%s11706_s2 + $0x2e8] sm:$0xff] }
 0x1cc   : > { %v2000_v1 = vpop.f32.mrf.mxu0  ;;  %v2222_v13 = vpop.f32.mrf.mxu1 }
 0x1cd   : > { %v2001_v41 = vadd.f32 %v2000_v1, %v8832_v21 }
 0x1ce   : > { %v2002_v9 = vpop.f32.mrf.mxu0  ;;  %v2225_v62 = vpop.f32.mrf.mxu1 }
 0x1cf   : > { %v9182_v17 = vadd.f32 %v2225_v62, %v2001_v41  ;;  %v3549_v9 = vld [vmem:[%s11706_s2 + $0x2e0] sm:$0xff] }
 0x1d0   : > { %v2005_v58 = vpop.f32.mrf.mxu0  ;;  %v2227_v3 = vpop.f32.mrf.mxu1 }
 0x1d1   : > { %v2006_v21 = vadd.f32 %v2005_v58, %v8839_v40  ;;  %v3552_v40 = vld [vmem:[%s11706_s2 + $0x2f8] sm:$0xff] }
 0x1d2   : > { %v2007_v24 = vpop.f32.mrf.mxu0  ;;  %v2230_v39 = vpop.f32.mrf.mxu1  ;;  %4089 = vmatpush2.msra.mxu1 %v3552_v40  ;;  %v3547_v40 = vld [vmem:[%s11706_s2 + $0x2d0] sm:$0xff] }
 0x1d3   : > { %v9193_v8 = vadd.f32 %v2230_v39, %v2006_v21  ;;  %4090 = vmatprep.subr.mxu1 %v8270_v33 }
 0x1d4   : > { %v2010_v27 = vpop.f32.mrf.mxu0  ;;  %v2232_v29 = vpop.f32.mrf.mxu1  ;;  %4091 = vmatpush2.msra.mxu1 %v3551_v5  ;;  %v3546_v5 = vld [vmem:[%s11706_s2 + $0x2c8] sm:$0xff] }
 0x1d5   : > { %v2011_v25 = vadd.f32 %v2010_v27, %v8846_v6  ;;  %4092 = vmatprep.subr.mxu1 %v8270_v33 }
 0x1d6   : > { %v2012_v44 = vpop.f32.mrf.mxu0  ;;  %v2235_v59 = vpop.f32.mrf.mxu1  ;;  %4093 = vmatpush2.msra.mxu1 %v3550_v49  ;;  %v3545_v49 = vld [vmem:[%s11706_s2 + $0x2c0] sm:$0xff] }
 0x1d7   : > { %v9200_v43 = vadd.f32 %v2235_v59, %v2011_v25  ;;  %4094 = vmatprep.subr.mxu1 %v8270_v33 }
 0x1d8   : > { %v2015_v47 = vpop.f32.mrf.mxu0  ;;  %v2237_v50 = vpop.f32.mrf.mxu1  ;;  %4095 = vmatpush2.msra.mxu1 %v3549_v9  ;;  %v3544_v9 = vld [vmem:[%s11706_s2 + $0x2b8] sm:$0xff] }
 0x1d9   : > { %v2016_v54 = vadd.f32 %v2015_v47, %v8853_v56  ;;  %4096 = vmatprep.subr.mxu1 %v8270_v33 }
 0x1da   : > { %v2017_v6 = vpop.f32.mrf.mxu0  ;;  %v2240_v26 = vpop.f32.mrf.mxu1  ;;  %4097 = vmatpush2.msra.mxu1 %v3548_v11  ;;  %v3543_v11 = vld [vmem:[%s11706_s2 + $0x2b0] sm:$0xff] }
 0x1db   : > { %v9207_v16 = vadd.f32 %v2240_v26, %v2016_v54  ;;  %4098 = vmatprep.subr.mxu1 %v8270_v33 }
 0x1dc   : > { %v2020_v20 = vpop.f32.mrf.mxu0  ;;  %v2242_v34 = vpop.f32.mrf.mxu1  ;;  %4099 = vmatpush2.msra.mxu1 %v3547_v40  ;;  %v3542_v40 = vld [vmem:[%s11706_s2 + $0x2a8] sm:$0xff] }
 0x1dd   : > { %v2021_v42 = vadd.f32 %v2020_v20, %v8867_v7  ;;  %4100 = vmatprep.subr.mxu1 %v8270_v33 }
 0x1de   : > { %v2022_v56 = vpop.f32.mrf.mxu0  ;;  %v2245_v22 = vpop.f32.mrf.mxu1  ;;  %4101 = vmatpush2.msra.mxu1 %v3546_v5  ;;  %v3541_v5 = vld [vmem:[%s11706_s2 + $0x2a0] sm:$0xff] }
 0x1df   : > { %v9214_v1 = vadd.f32 %v2245_v22, %v2021_v42  ;;  %4102 = vmatprep.subr.mxu1 %v8270_v33 }
 0x1e0   : > { %v2025_v13 = vpop.f32.mrf.mxu0  ;;  %v2247_v41 = vpop.f32.mrf.mxu1  ;;  %4103 = vmatpush2.msra.mxu1 %v3545_v49  ;;  %v3540_v49 = vld [vmem:[%s11706_s2 + $0x298] sm:$0xff] }
 0x1e1   : > { %v2026_v60 = vadd.f32 %v2025_v13, %v8882_v35  ;;  %4104 = vmatprep.subr.mxu1 %v8270_v33 }
 0x1e2   : > { %v2027_v7 = vpop.f32.mrf.mxu0  ;;  %v2250_v62 = vpop.f32.mrf.mxu1  ;;  %4105 = vmatpush2.msra.mxu1 %v3544_v9 }
 0x1e3   : > { %v9221_v0 = vadd.f32 %v2250_v62, %v2026_v60  ;;  %4106 = vmatprep.subr.mxu1 %v8270_v33 }
 0x1e4   : > { %v2030_v58 = vpop.f32.mrf.mxu0  ;;  %v2252_v3 = vpop.f32.mrf.mxu1  ;;  %4107 = vmatpush2.msra.mxu1 %v3543_v11 }
 0x1e5   : > { %v2031_v21 = vadd.f32 %v2030_v58, %v8897_v12  ;;  %4108 = vmatprep.subr.mxu1 %v8270_v33 }
 0x1e6   : > { %v2032_v35 = vpop.f32.mrf.mxu0  ;;  %v2255_v24 = vpop.f32.mrf.mxu1  ;;  %4109 = vmatpush2.msra.mxu1 %v3542_v40 }
 0x1e7   : > { %v9228_v39 = vadd.f32 %v2255_v24, %v2031_v21  ;;  %4110 = vmatprep.subr.mxu1 %v8270_v33 }
 0x1e8   : > { %v2035_v27 = vpop.f32.mrf.mxu0  ;;  %v2257_v29 = vpop.f32.mrf.mxu1  ;;  %4111 = vmatpush2.msra.mxu1 %v3541_v5 }
 0x1e9   : > { %v2036_v25 = vadd.f32 %v2035_v27, %v8912_v19  ;;  %4112 = vmatprep.subr.mxu1 %v8270_v33 }
 0x1ea   : > { %v2037_v12 = vpop.f32.mrf.mxu0  ;;  %v2260_v44 = vpop.f32.mrf.mxu1  ;;  %4113 = vmatpush2.msra.mxu1 %v3540_v49 }
 0x1eb   : > { %v9235_v59 = vadd.f32 %v2260_v44, %v2036_v25  ;;  %4114 = vmatprep.subr.mxu1 %v8270_v33 }
 0x1ec   : > { %v2040_v47 = vpop.f32.mrf.mxu0  ;;  %v2262_v50 = vpop.f32.mrf.mxu1 }
 0x1ed   : > { %v2041_v54 = vadd.f32 %v2040_v47, %v8927_v18 }
 0x1ee   : > { %v2042_v19 = vpop.f32.mrf.mxu0  ;;  %v2265_v6 = vpop.f32.mrf.mxu1 }
 0x1ef   : > { %v9242_v26 = vadd.f32 %v2265_v6, %v2041_v54 }
 0x1f0   : > { %v2045_v20 = vpop.f32.mrf.mxu0  ;;  %v2267_v34 = vpop.f32.mrf.mxu1 }
 0x1f1   : > { %v2046_v42 = vadd.f32 %v2045_v20, %v8942_v52 }
 0x1f2   : > { %v2047_v18 = vpop.f32.mrf.mxu0  ;;  %v2270_v56 = vpop.f32.mrf.mxu1 }
 0x1f3   : > { %v9249_v22 = vadd.f32 %v2270_v56, %v2046_v42 }
 0x1f4   : > { %v2050_v13 = vpop.f32.mrf.mxu0  ;;  %v2272_v41 = vpop.f32.mrf.mxu1 }
 0x1f5   : > { %v2051_v60 = vadd.f32 %v2050_v13, %v8957_v38 }
 0x1f6   : > { %v2052_v52 = vpop.f32.mrf.mxu0  ;;  %v2275_v7 = vpop.f32.mrf.mxu1 }
 0x1f7   : > { %v9256_v62 = vadd.f32 %v2275_v7, %v2051_v60  ;;  %v3539_v60 = vld [vmem:[%s11706_s2 + $0x290] sm:$0xff] }
 0x1f8   : > { %v2055_v58 = vpop.f32.mrf.mxu0  ;;  %v2277_v3 = vpop.f32.mrf.mxu1  ;;  %4115 = vmatpush2.msra.mxu1 %v3539_v60 }
 0x1f9   : > { %v2056_v21 = vadd.f32 %v2055_v58, %v8972_v28  ;;  %4116 = vmatprep.subr.mxu1 %v8270_v33  ;;  %v3538_v3 = vld [vmem:[%s11706_s2 + $0x288] sm:$0xff] }
 0x1fa   : > { %v2057_v38 = vpop.f32.mrf.mxu0  ;;  %v2280_v35 = vpop.f32.mrf.mxu1  ;;  %4117 = vmatpush2.msra.mxu1 %v3538_v3 }
 0x1fb   : > { %v9263_v24 = vadd.f32 %v2280_v35, %v2056_v21  ;;  %4118 = vmatprep.subr.mxu1 %v8270_v33 }
 0x1fc   : > { %v2060_v27 = vpop.f32.mrf.mxu0  ;;  %v2282_v29 = vpop.f32.mrf.mxu1 }
 0x1fd   : > { %v2061_v25 = vadd.f32 %v2060_v27, %v8987_v45 }
 0x1fe   : > { %v2062_v28 = vpop.f32.mrf.mxu0  ;;  %v2285_v12 = vpop.f32.mrf.mxu1 }
 0x1ff   : > { %v9270_v44 = vadd.f32 %v2285_v12, %v2061_v25 }
 0x200   : > { %v2065_v47 = vpop.f32.mrf.mxu0  ;;  %v2287_v50 = vpop.f32.mrf.mxu1 }
 0x201   : > { %v2066_v54 = vadd.f32 %v2065_v47, %v9003_v23 }
 0x202   : > { %v2067_v45 = vpop.f32.mrf.mxu0  ;;  %v2290_v19 = vpop.f32.mrf.mxu1 }
 0x203   : > { %v9277_v6 = vadd.f32 %v2290_v19, %v2066_v54  ;;  %v2721_v19 = vld [vmem:[#allocation2 + $0x2] sm:$0xff] }
 0x204   : > { %v2070_v20 = vpop.f32.mrf.mxu0  ;;  %v2292_v34 = vpop.f32.mrf.mxu1 }
 0x205   : > { %v2071_v42 = vadd.f32 %v2070_v20, %v9019_v51  ;;  %v9328_v34 = vld [vmem:[%s11706_s2 + $0x378] sm:$0xff] }
 0x206   : > { %v2072_v23 = vpop.f32.mrf.mxu0  ;;  %v2295_v18 = vpop.f32.mrf.mxu1 }
 0x207   : > { %v9284_v56 = vadd.f32 %v2295_v18, %v2071_v42  ;;  %v9339_v23 = vld [vmem:[%s11706_s2 + $0x370] sm:$0xff] }
 0x208   : > { %v9287_v13 = vpop.f32.mrf.mxu0  ;;  %v2297_v41 = vpop.f32.mrf.mxu1 }
 0x20a   : > { %v2077_v9 = vpop.f32.mrf.mxu0  ;;  %v9292_v51 = vpop.f32.mrf.mxu1 }
 0x20c   : > { %v7244_v52 = vpop.f32.mrf.mxu0  ;;  %v2302_v7 = vpop.f32.mrf.mxu1 }
 0x20d   : > { %v2376_v58 = vadd.f32 %v7244_v52, %v9065_v10  ;;  %v3537_v10 = vld [vmem:[%s11706_s2 + $0x280] sm:$0xff] }
 0x20e   : > { %v2370_v21 = vpop.f32.mrf.mxu0  ;;  %4119 = vmatpush2.msra.mxu1 %v3537_v10 }
 0x20f   : > { %v2530_v11 = vmax.f32 %v2376_v58, 0.0  ;;  %v2371_v38 = vadd.f32 %v2370_v21, %v9053_v15  ;;  %7450 = vmatprep.subr.mxu1 %v8270_v33 }
 0x210   : > { %v7247_v35 = vpop.f32.mrf.mxu0 }
 0x211   : > { %2562 = vst [vmem:[#allocation2 + $0x21] sm:$0xff] %v2530_v11  ;;  %v2529_v27 = vmax.f32 %v2371_v38, 0.0  ;;  %v9302_v29 = vadd.f32 %v7247_v35, %v9090_v37 }
 0x212   : > { %v2380_v25 = vpop.f32.mrf.mxu0 }
 0x213   : > { %2561 = vst [vmem:[#allocation2 + $0x19] sm:$0xff] %v2529_v27  ;;  %v2532_v40 = vmax.f32 %v9302_v29, 0.0  ;;  %v2381_v28 = vadd.f32 %v2380_v25, %v9076_v14  ;;  %3680 = vmatprep.mubr.f32.mxu1 %v2529_v27  ;;  %v9391_v25 = vld [vmem:[%s11706_s2 + $0x358] sm:$0xff] }
 0x214   : > { %v7250_v15 = vpop.f32.mrf.mxu0 }
 0x215   : > { %2564 = vst [vmem:[#allocation2 + $0x39] sm:$0xff] %v2532_v40  ;;  %v2531_v37 = vmax.f32 %v2381_v28, 0.0  ;;  %v9313_v12 = vadd.f32 %v7250_v15, %v9105_v2 }
 0x216   : > { %v2390_v47 = vpop.f32.mrf.mxu0 }
 0x217   : > { %2563 = vst [vmem:[#allocation2 + $0x31] sm:$0xff] %v2531_v37  ;;  %v2534_v50 = vmax.f32 %v9313_v12, 0.0  ;;  %v9317_v54 = vadd.f32 %v2390_v47, %v9098_v63 }
 0x218   : > { %v7253_v5 = vpop.f32.mrf.mxu0 }
 0x219   : > { %2566 = vst [vmem:[#allocation2 + $0x51] sm:$0xff] %v2534_v50  ;;  %v2533_v14 = vmax.f32 %v9317_v54, 0.0  ;;  %v9323_v45 = vadd.f32 %v7253_v5, %v9119_v36  ;;  %v9434_v54 = vld [vmem:[%s11706_s2 + $0x348] sm:$0xff] }
 0x21a   : > { %v2400_v20 = vpop.f32.mrf.mxu0  ;;  %v2785_v2 = vld [vmem:[#allocation2 + $0x18] sm:$0xff]  ;;  %v2786_v49 = vld [vmem:[#allocation2 + $0x20] sm:$0xff] }
 0x21b   : > { %2565 = vst [vmem:[#allocation2 + $0x49] sm:$0xff] %v2533_v14  ;;  %v2536_v63 = vmax.f32 %v9323_v45, 0.0  ;;  %v9334_v42 = vadd.f32 %v2400_v20, %v9112_v48  ;;  %3895 = vmatprep.mubr.f32.mxu0 %v2785_v2  ;;  %3681 = vmatmul.mubr.f32.gmra.mxu1 %v2785_v2  ;;  %v2722_v48 = vld [vmem:[#allocation2 + $0xa] sm:$0xff] }
 0x21c   : > { %v7256_v36 = vpop.f32.mrf.mxu0  ;;  %3896 = vmatmul.mubr.f32.vlgmr.msra.gmra.mxu0 %v2721_v19  ;;  %3685 = vmatprep.mubr.f32.mxu1 %v2530_v11  ;;  %v9372_v11 = vld [vmem:[%s11706_s2 + $0x360] sm:$0xff] }
 0x21d   : > { %2568 = vst [vmem:[#allocation2 + $0x69] sm:$0xff] %v2536_v63  ;;  %v2535_v18 = vmax.f32 %v9334_v42, 0.0  ;;  %v9345_v41 = vadd.f32 %v7256_v36, %v9133_v61  ;;  %3900 = vmatprep.mubr.f32.mxu0 %v2786_v49  ;;  %4282 = vmatpush1.msra.mxu0 %v9328_v34  ;;  %v9359_v61 = vld [vmem:[%s11706_s2 + $0x368] sm:$0xff]  ;;  %v9497_v42 = vld [vmem:[%s11706_s2 + $0x330] sm:$0xff] }
 0x21e   : > { %v2410_v60 = vpop.f32.mrf.mxu0  ;;  %4283 = vmatprep.subr.mxu0 %v8270_v33  ;;  %v2787_v58 = vld [vmem:[#allocation2 + $0x30] sm:$0xff]  ;;  %v9386_v10 = vld [vmem:[#allocation2 + $0x38] sm:$0xff] }
 0x21f   : > { %2567 = vst [vmem:[#allocation2 + $0x61] sm:$0xff] %v2535_v18  ;;  %v2538_v9 = vmax.f32 %v9345_v41, 0.0  ;;  %v9353_v52 = vadd.f32 %v2410_v60, %v9126_v53  ;;  %3686 = vmatmul.mubr.f32.gmra.mxu1 %v2786_v49  ;;  %4284 = vmatpush1.msra.mxu0 %v9339_v23  ;;  %v9443_v2 = vld [vmem:[#allocation2 + $0x32] sm:$0xff] }
 0x220   : > { %v7259_v7 = vpop.f32.mrf.mxu0  ;;  %3901 = vmatmul.mubr.f32.gmra.mxu0 %v2722_v48  ;;  %3690 = vmatprep.mubr.f32.mxu1 %v2531_v37  ;;  %v9409_v37 = vld [vmem:[#allocation2 + $0x22] sm:$0xff] }
 0x221   : > { %2570 = vst [vmem:[#allocation2 + $0x81] sm:$0xff] %v2538_v9  ;;  %v2537_v3 = vmax.f32 %v9353_v52, 0.0  ;;  %v9365_v53 = vadd.f32 %v7259_v7, %v9147_v4  ;;  %3905 = vmatprep.mubr.f32.mxu0 %v2787_v58  ;;  %4285 = vmatprep.subr.mxu0 %v8270_v33  ;;  %v9380_v4 = vld [vmem:[#allocation2 + $0x1a] sm:$0xff] }
 0x222   : > { %v2420_v21 = vpop.f32.mrf.mxu0  ;;  %4286 = vmatpush1.msra.mxu0 %v9359_v61  ;;  %v9420_v5 = vld [vmem:[#allocation2 + $0x48] sm:$0xff]  ;;  %v9449_v49 = vld [vmem:[#allocation2 + $0x50] sm:$0xff]  ;;  %v9454_v48 = vld [vmem:[%s11706_s2 + $0x340] sm:$0xff] }
 0x223   : > { %2569 = vst [vmem:[#allocation2 + $0x79] sm:$0xff] %v2537_v3  ;;  %v2540_v38 = vmax.f32 %v9365_v53, 0.0  ;;  %v9378_v35 = vadd.f32 %v2420_v21, %v9140_v31  ;;  %3691 = vmatmul.mubr.f32.gmra.mxu1 %v2787_v58  ;;  %4287 = vmatprep.subr.mxu0 %v8270_v33  ;;  %v9472_v58 = vld [vmem:[#allocation2 + $0x3a] sm:$0xff] }
 0x224   : > { %v7262_v27 = vpop.f32.mrf.mxu0  ;;  %3906 = vmatmul.mubr.f32.gmra.mxu0 %v9380_v4  ;;  %3695 = vmatprep.mubr.f32.mxu1 %v2532_v40  ;;  %v9560_v52 = vld [vmem:[%s11706_s2 + $0x318] sm:$0xff] }
 0x225   : > { %2572 = vst [vmem:[#allocation2 + $0x99] sm:$0xff] %v2540_v38  ;;  %v2539_v31 = vmax.f32 %v9378_v35, 0.0  ;;  %v9397_v28 = vadd.f32 %v7262_v27, %v9161_v32  ;;  %3910 = vmatprep.mubr.f32.mxu0 %v9386_v10  ;;  %4288 = vmatpush1.msra.mxu0 %v9372_v11  ;;  %v9415_v32 = vld [vmem:[%s11706_s2 + $0x350] sm:$0xff]  ;;  %v9623_v35 = vld [vmem:[%s11706_s2 + $0x300] sm:$0xff] }
 0x226   : > { %v2430_v29 = vpop.f32.mrf.mxu0  ;;  %4289 = vmatprep.subr.mxu0 %v8270_v33  ;;  %v9483_v27 = vld [vmem:[#allocation2 + $0x60] sm:$0xff] }
 0x227   : > { %2571 = vst [vmem:[#allocation2 + $0x91] sm:$0xff] %v2539_v31  ;;  %v11760_v40 = vmax.f32 %v9397_v28, 0.0  ;;  %v9406_v15 = vadd.f32 %v2430_v29, %v9154_v46  ;;  %3696 = vmatmul.mubr.f32.gmra.mxu1 %v9386_v10  ;;  %4290 = vmatpush1.msra.mxu0 %v9391_v25 }
 0x228   : > { %v7265_v47 = vpop.f32.mrf.mxu0  ;;  %3911 = vmatmul.mubr.f32.gmra.mxu0 %v9409_v37  ;;  %3700 = vmatprep.mubr.f32.mxu1 %v2533_v14 }
 0x229   : > { %2574 = vst [vmem:[#allocation2 + $0xb1] sm:$0xff] %v11760_v40  ;;  %v11762_v46 = vmax.f32 %v9406_v15, 0.0  ;;  %v9426_v19 = vadd.f32 %v7265_v47, %v9175_v57  ;;  %3915 = vmatprep.mubr.f32.mxu0 %v9420_v5  ;;  %4291 = vmatprep.subr.mxu0 %v8270_v33 }
 0x22a   : > { %v2440_v20 = vpop.f32.mrf.mxu0  ;;  %4292 = vmatpush1.msra.mxu0 %v9415_v32 }
 0x22b   : > { %2573 = vst [vmem:[#allocation2 + $0xa9] sm:$0xff] %v11762_v46  ;;  %v11755_v14 = vmax.f32 %v9426_v19, 0.0  ;;  %v9440_v57 = vadd.f32 %v2440_v20, %v9168_v55  ;;  %3701 = vmatmul.mubr.f32.gmra.mxu1 %v9420_v5  ;;  %4293 = vmatprep.subr.mxu0 %v8270_v33  ;;  %v9506_v20 = vld [vmem:[#allocation2 + $0x4a] sm:$0xff] }
 0x22c   : > { %v7268_v36 = vpop.f32.mrf.mxu0  ;;  %3916 = vmatmul.mubr.f32.gmra.mxu0 %v9443_v2  ;;  %3705 = vmatprep.mubr.f32.mxu1 %v2534_v50 }
 0x22d   : > { %2576 = vst [vmem:[#allocation2 + $0xc9] sm:$0xff] %v11755_v14  ;;  %v11757_v55 = vmax.f32 %v9440_v57, 0.0  ;;  %v9460_v60 = vadd.f32 %v7268_v36, %v9193_v8  ;;  %3920 = vmatprep.mubr.f32.mxu0 %v9449_v49  ;;  %4294 = vmatpush1.msra.mxu0 %v9434_v54  ;;  %v9478_v8 = vld [vmem:[%s11706_s2 + $0x338] sm:$0xff]  ;;  %v9575_v14 = vld [vmem:[#allocation2 + $0x80] sm:$0xff] }
 0x22e   : > { %v2450_v12 = vpop.f32.mrf.mxu0  ;;  %4295 = vmatprep.subr.mxu0 %v8270_v33 }
 0x22f   : > { %2575 = vst [vmem:[#allocation2 + $0xc1] sm:$0xff] %v11757_v55  ;;  %v11750_v50 = vmax.f32 %v9460_v60, 0.0  ;;  %v9469_v7 = vadd.f32 %v2450_v12, %v9182_v17  ;;  %3706 = vmatmul.mubr.f32.gmra.mxu1 %v9449_v49  ;;  %4296 = vmatpush1.msra.mxu0 %v9454_v48  ;;  %v9512_v12 = vld [vmem:[#allocation2 + $0x68] sm:$0xff] }
 0x230   : > { %v7271_v21 = vpop.f32.mrf.mxu0  ;;  %3921 = vmatmul.mubr.f32.gmra.mxu0 %v9472_v58  ;;  %3710 = vmatprep.mubr.f32.mxu1 %v2535_v18 }
 0x231   : > { %2578 = vst [vmem:[#allocation2 + $0xe1] sm:$0xff] %v11750_v50  ;;  %v11753_v17 = vmax.f32 %v9469_v7, 0.0  ;;  %v9489_v29 = vadd.f32 %v7271_v21, %v9207_v16  ;;  %3925 = vmatprep.mubr.f32.mxu0 %v9483_v27  ;;  %4297 = vmatprep.subr.mxu0 %v8270_v33  ;;  %v9517_v21 = vld [vmem:[%s11706_s2 + $0x328] sm:$0xff] }
 0x232   : > { %v2460_v47 = vpop.f32.mrf.mxu0  ;;  %4298 = vmatpush1.msra.mxu0 %v9478_v8 }
 0x233   : > { %2577 = vst [vmem:[#allocation2 + $0xd9] sm:$0xff] %v11753_v17  ;;  %v11751_v18 = vmax.f32 %v9489_v29, 0.0  ;;  %v9503_v16 = vadd.f32 %v2460_v47, %v9200_v43  ;;  %3711 = vmatmul.mubr.f32.gmra.mxu1 %v9483_v27  ;;  %4299 = vmatprep.subr.mxu0 %v8270_v33 }
 0x234   : > { %v7274_v36 = vpop.f32.mrf.mxu0  ;;  %3926 = vmatmul.mubr.f32.gmra.mxu0 %v9506_v20  ;;  %3715 = vmatprep.mubr.f32.mxu1 %v2536_v63 }
 0x235   : > { %2580 = vst [vmem:[#allocation2 + $0xf9] sm:$0xff] %v11751_v18  ;;  %v11752_v43 = vmax.f32 %v9503_v16, 0.0  ;;  %v9523_v47 = vadd.f32 %v7274_v36, %v9221_v0  ;;  %3930 = vmatprep.mubr.f32.mxu0 %v9512_v12  ;;  %4300 = vmatpush1.msra.mxu0 %v9497_v42  ;;  %v9535_v18 = vld [vmem:[#allocation2 + $0x52] sm:$0xff]  ;;  %v9541_v0 = vld [vmem:[%s11706_s2 + $0x320] sm:$0xff] }
 0x236   : > { %v2470_v45 = vpop.f32.mrf.mxu0  ;;  %4301 = vmatprep.subr.mxu0 %v8270_v33 }
 0x237   : > { %2579 = vst [vmem:[#allocation2 + $0xf1] sm:$0xff] %v11752_v43  ;;  %v11754_v63 = vmax.f32 %v9523_v47, 0.0  ;;  %v9532_v50 = vadd.f32 %v2470_v45, %v9214_v1  ;;  %3716 = vmatmul.mubr.f32.gmra.mxu1 %v9512_v12  ;;  %4302 = vmatpush1.msra.mxu0 %v9517_v21  ;;  %v9546_v43 = vld [vmem:[#allocation2 + $0x78] sm:$0xff] }
 0x238   : > { %v7277_v36 = vpop.f32.mrf.mxu0  ;;  %3931 = vmatmul.mubr.f32.gmra.mxu0 %v9535_v18  ;;  %3720 = vmatprep.mubr.f32.mxu1 %v2537_v3 }
 0x239   : > { %2582 = vst [vmem:[#allocation2 + $0x111] sm:$0xff] %v11754_v63  ;;  %v11756_v1 = vmax.f32 %v9532_v50, 0.0  ;;  %v9552_v45 = vadd.f32 %v7277_v36, %v9235_v59  ;;  %3935 = vmatprep.mubr.f32.mxu0 %v9546_v43  ;;  %4303 = vmatprep.subr.mxu0 %v8270_v33  ;;  %v9569_v36 = vld [vmem:[#allocation2 + $0x62] sm:$0xff] }
 0x23a   : > { %v2480_v17 = vpop.f32.mrf.mxu0  ;;  %4304 = vmatpush1.msra.mxu0 %v9541_v0 }
 0x23b   : > { %2581 = vst [vmem:[#allocation2 + $0x109] sm:$0xff] %v11756_v1  ;;  %v11758_v3 = vmax.f32 %v9552_v45, 0.0  ;;  %v9566_v59 = vadd.f32 %v2480_v17, %v9228_v39  ;;  %3721 = vmatmul.mubr.f32.gmra.mxu1 %v9546_v43  ;;  %4305 = vmatprep.subr.mxu0 %v8270_v33  ;;  %v9580_v1 = vld [vmem:[%s11706_s2 + $0x310] sm:$0xff] }
 0x23c   : > { %v7280_v63 = vpop.f32.mrf.mxu0  ;;  %3936 = vmatmul.mubr.f32.gmra.mxu0 %v9569_v36  ;;  %3725 = vmatprep.mubr.f32.mxu1 %v2538_v9 }
 0x23d   : > { %2584 = vst [vmem:[#allocation2 + $0x129] sm:$0xff] %v11758_v3  ;;  %v11759_v39 = vmax.f32 %v9566_v59, 0.0  ;;  %v9586_v17 = vadd.f32 %v7280_v63, %v9249_v22  ;;  %3940 = vmatprep.mubr.f32.mxu0 %v9575_v14  ;;  %4306 = vmatpush1.msra.mxu0 %v9560_v52  ;;  %v9598_v3 = vld [vmem:[#allocation2 + $0x6a] sm:$0xff] }
 0x23e   : > { %v2490_v41 = vpop.f32.mrf.mxu0  ;;  %4307 = vmatprep.subr.mxu0 %v8270_v33  ;;  %v9604_v22 = vld [vmem:[%s11706_s2 + $0x308] sm:$0xff] }
 0x23f   : > { %2583 = vst [vmem:[#allocation2 + $0x121] sm:$0xff] %v11759_v39  ;;  %v11761_v9 = vmax.f32 %v9586_v17, 0.0  ;;  %v9595_v55 = vadd.f32 %v2490_v41, %v9242_v26  ;;  %3726 = vmatmul.mubr.f32.gmra.mxu1 %v9575_v14  ;;  %4308 = vmatpush1.msra.mxu0 %v9580_v1  ;;  %v9609_v39 = vld [vmem:[#allocation2 + $0x90] sm:$0xff] }
 0x240   : > { %v7283_v63 = vpop.f32.mrf.mxu0  ;;  %3941 = vmatmul.mubr.f32.gmra.mxu0 %v9598_v3  ;;  %3730 = vmatprep.mubr.f32.mxu1 %v2539_v31  ;;  %v2076_v31 = vadd.f32 %v9287_v13, %v9038_v30  ;;  %v9640_v30 = vld [vmem:[#allocation2 + $0x98] sm:$0xff] }
 0x241   : > { %2586 = vst [vmem:[#allocation2 + $0x141] sm:$0xff] %v11761_v9  ;;  %v11763_v26 = vmax.f32 %v9595_v55, 0.0  ;;  %v9615_v41 = vadd.f32 %v7283_v63, %v9263_v24  ;;  %3945 = vmatprep.mubr.f32.mxu0 %v9609_v39  ;;  %4309 = vmatprep.subr.mxu0 %v8270_v33  ;;  %v9634_v9 = vld [vmem:[#allocation2 + $0x7a] sm:$0xff] }
 0x242   : > { %v2500_v40 = vpop.f32.mrf.mxu0  ;;  %4310 = vmatpush1.msra.mxu0 %v9604_v22  ;;  %v9645_v13 = vld [vmem:[%s11706_s2 + $0x3f8] sm:$0xff] }
 0x243   : > { %2585 = vst [vmem:[#allocation2 + $0x139] sm:$0xff] %v11763_v26  ;;  %v11764_v24 = vmax.f32 %v9615_v41, 0.0  ;;  %v9631_v63 = vadd.f32 %v2500_v40, %v9256_v62  ;;  %3731 = vmatmul.mubr.f32.gmra.mxu1 %v9609_v39  ;;  %4311 = vmatprep.subr.mxu0 %v8270_v33  ;;  %11862 = vst [vmem:[#allocation6_spill] sm:$0xff] %v9645_v13 }
 0x244   : > { %v7286_v46 = vpop.f32.mrf.mxu0  ;;  %3946 = vmatmul.mubr.f32.gmra.mxu0 %v9634_v9  ;;  %3735 = vmatprep.mubr.f32.mxu1 %v2540_v38  ;;  %v2301_v38 = vadd.f32 %v9292_v51, %v2076_v31  ;;  %v11864_v31 = vmax.f32 %v9406_v15, 0.0  ;;  %v9686_v15 = vld [vmem:[%s11706_s2 + $0x3e8] sm:$0xff] }
 0x245   : > { %2588 = vst [vmem:[#allocation2 + $0x159] sm:$0xff] %v11764_v24  ;;  %v11765_v62 = vmax.f32 %v9631_v63, 0.0  ;;  %v9651_v40 = vadd.f32 %v7286_v46, %v9277_v6  ;;  %3950 = vmatprep.mubr.f32.mxu0 %v9640_v30  ;;  %4312 = vmatpush1.msra.mxu0 %v9623_v35  ;;  %v9664_v6 = vld [vmem:[#allocation2 + $0x82] sm:$0xff]  ;;  %v9670_v46 = vld [vmem:[%s11706_s2 + $0x3f0] sm:$0xff]  ;;  %11865 = vst [vmem:[#allocation4_spill] sm:$0xff] %v9686_v15 }
 0x246   : > { %v2510_v53 = vpop.f32.mrf.mxu0  ;;  %4313 = vmatprep.subr.mxu0 %v8270_v33  ;;  %11863 = vst [vmem:[#allocation7_spill] sm:$0xff] %v9670_v46 }
 0x247   : > { %2587 = vst [vmem:[#allocation2 + $0x151] sm:$0xff] %v11765_v62  ;;  %v11767_v26 = vmax.f32 %v9651_v40, 0.0  ;;  %v9661_v24 = vadd.f32 %v2510_v53, %v9270_v44  ;;  %3736 = vmatmul.mubr.f32.gmra.mxu1 %v9640_v30  ;;  %4314 = vmatpush2.msra.mxu0 %v9645_v13  ;;  %v9675_v62 = vld [vmem:[#allocation2 + $0xa8] sm:$0xff] }
 0x248   : > { %v7289_v51 = vpop.f32.mrf.mxu0  ;;  %3951 = vmatmul.mubr.f32.gmra.mxu0 %v9664_v6  ;;  %3740 = vmatprep.mubr.f32.mxu1 %v11864_v31 }
 0x249   : > { %2590 = vst [vmem:[#allocation2 + $0x171] sm:$0xff] %v11767_v26  ;;  %v11769_v44 = vmax.f32 %v9661_v24, 0.0  ;;  %v2526_v53 = vadd.f32 %v7289_v51, %v2301_v38  ;;  %3955 = vmatprep.mubr.f32.mxu0 %v9675_v62  ;;  %4315 = vmatprep.subr.mxu0 %v8270_v33  ;;  %v9692_v38 = vld [vmem:[#allocation2 + $0x92] sm:$0xff]  ;;  %v11866_v51 = vmax.f32 %v9397_v28, 0.0  ;;  %v9709_v28 = vld [vmem:[#allocation2 + $0x9a] sm:$0xff] }
 0x24a   : > { %v2520_v13 = vpop.f32.mrf.mxu0  ;;  %4316 = vmatpush2.msra.mxu0 %v9670_v46  ;;  %v9698_v46 = vld [vmem:[#allocation2 + $0xb0] sm:$0xff] }
 0x24b   : > { %2589 = vst [vmem:[#allocation2 + $0x169] sm:$0xff] %v11769_v44  ;;  %v2560_v31 = vmax.f32 %v2526_v53, 0.0  ;;  %v2521_v26 = vadd.f32 %v2520_v13, %v9284_v56  ;;  %3741 = vmatmul.mubr.f32.gmra.mxu1 %v9675_v62  ;;  %4317 = vmatprep.subr.mxu0 %v8270_v33  ;;  %v9703_v44 = vld [vmem:[%s11706_s2 + $0x3e0] sm:$0xff]  ;;  %v9715_v13 = vld [vmem:[%s11706_s2 + $0x3d8] sm:$0xff] }
 0x24c   : > { %3956 = vmatmul.mubr.f32.gmra.mxu0 %v9692_v38  ;;  %3745 = vmatprep.mubr.f32.mxu1 %v11866_v51  ;;  %11867 = vst [vmem:[#allocation9_spill] sm:$0xff] %v9703_v44  ;;  %11868 = vst [vmem:[#allocation10_spill] sm:$0xff] %v9715_v13  ;;  %v9720_v53 = vld [vmem:[#allocation2 + $0xc0] sm:$0xff]  ;;  %v9730_v51 = vld [vmem:[%s11706_s2 + $0x3d0] sm:$0xff] }
 0x24d   : > { %2592 = vst [vmem:[#allocation2 + $0x189] sm:$0xff] %v2560_v31  ;;  %v2559_v56 = vmax.f32 %v2521_v26, 0.0  ;;  %3960 = vmatprep.mubr.f32.mxu0 %v9698_v46  ;;  %4318 = vmatpush2.msra.mxu0 %v9686_v15  ;;  %v11869_v26 = vmax.f32 %v9440_v57, 0.0  ;;  %v9724_v31 = vpop.f32.mrf.mxu1  ;;  %11871 = vst [vmem:[#allocation12_spill] sm:$0xff] %v9730_v51 }
 0x24e   : > { %4319 = vmatprep.subr.mxu0 %v8270_v33  ;;  %11870 = vst [vmem:[#allocation5_spill] sm:$0xff] %v9724_v31  ;;  %v9791_v31 = vld [vmem:[#allocation2 + $0xca] sm:$0xff] }
 0x24f   : > { %2591 = vst [vmem:[#allocation2 + $0x181] sm:$0xff] %v2559_v56  ;;  %3746 = vmatmul.mubr.f32.gmra.mxu1 %v9698_v46  ;;  %4320 = vmatpush2.msra.mxu0 %v9703_v44  ;;  %v9733_v56 = vld [vmem:[#allocation2 + $0xaa] sm:$0xff]  ;;  %v3674_v57 = vpop.f32.mrf.mxu1 }
 0x250   : > { %3961 = vmatmul.mubr.f32.gmra.mxu0 %v9709_v28  ;;  %3750 = vmatprep.mubr.f32.mxu1 %v11869_v26  ;;  %v11872_v26 = vmax.f32 %v9426_v19, 0.0  ;;  %v9739_v44 = vld [vmem:[#allocation2 + $0xc8] sm:$0xff]  ;;  %v9752_v57 = vld [vmem:[#allocation2 + $0xb2] sm:$0xff]  ;;  %v9758_v19 = vld [vmem:[%s11706_s2 + $0x3c0] sm:$0xff] }
 0x251   : > { %3965 = vmatprep.mubr.f32.mxu0 %v9720_v53  ;;  %4321 = vmatprep.subr.mxu0 %v8270_v33  ;;  %v9748_v15 = vpop.f32.mrf.mxu1  ;;  %11875 = vst [vmem:[#allocation15_spill] sm:$0xff] %v9758_v19 }
 0x252   : > { %4322 = vmatpush2.msra.mxu0 %v9715_v13  ;;  %v9744_v13 = vld [vmem:[%s11706_s2 + $0x3c8] sm:$0xff]  ;;  %11874 = vst [vmem:[#allocation8_spill] sm:$0xff] %v9748_v15  ;;  %v9763_v15 = vld [vmem:[#allocation2 + $0xd8] sm:$0xff] }
 0x253   : > { %3751 = vmatmul.mubr.f32.gmra.mxu1 %v9720_v53  ;;  %4323 = vmatprep.subr.mxu0 %v8270_v33  ;;  %11873 = vst [vmem:[#allocation13_spill] sm:$0xff] %v9744_v13  ;;  %11877 = vst [vmem:[#allocation16_spill] sm:$0xff] %v9763_v15 }
 0x254   : > { %3966 = vmatmul.mubr.f32.gmra.mxu0 %v9733_v56  ;;  %3755 = vmatprep.mubr.f32.mxu1 %v11872_v26  ;;  %v3679_v26 = vpop.f32.mrf.mxu1 }
 0x255   : > { %3970 = vmatprep.mubr.f32.mxu0 %v9739_v44  ;;  %4324 = vmatpush2.msra.mxu0 %v9730_v51  ;;  %v11876_v51 = vmax.f32 %v9469_v7, 0.0  ;;  %v9774_v26 = vld [vmem:[#allocation2 + $0xc2] sm:$0xff]  ;;  %v11879_v7 = vmax.f32 %v9460_v60, 0.0 }
 0x256   : > { %4325 = vmatprep.subr.mxu0 %v8270_v33  ;;  %v9797_v60 = vld [vmem:[%s11706_s2 + $0x3a8] sm:$0xff] }
 0x257   : > { %3756 = vmatmul.mubr.f32.gmra.mxu1 %v9739_v44  ;;  %4326 = vmatpush2.msra.mxu0 %v9744_v13  ;;  %v9771_v13 = vld [vmem:[%s11706_s2 + $0x3b8] sm:$0xff]  ;;  %11882 = vst [vmem:[#allocation14_spill] sm:$0xff] %v9797_v60 }
 0x258   : > { %3971 = vmatmul.mubr.f32.gmra.mxu0 %v9752_v57  ;;  %3760 = vmatprep.mubr.f32.mxu1 %v11876_v51  ;;  %11878 = vst [vmem:[#allocation11_spill] sm:$0xff] %v9771_v13  ;;  %v9780_v51 = vld [vmem:[#allocation2 + $0xe0] sm:$0xff] }
 0x259   : > { %3975 = vmatprep.mubr.f32.mxu0 %v9763_v15  ;;  %4327 = vmatprep.subr.mxu0 %v8270_v33  ;;  %11880 = vst [vmem:[#allocation18_spill] sm:$0xff] %v9780_v51 }
 0x25a   : > { %4328 = vmatpush2.msra.mxu0 %v9758_v19  ;;  %v9785_v19 = vld [vmem:[%s11706_s2 + $0x3b0] sm:$0xff] }
 0x25b   : > { %3761 = vmatmul.mubr.f32.gmra.mxu1 %v9763_v15  ;;  %4329 = vmatprep.subr.mxu0 %v8270_v33  ;;  %11881 = vst [vmem:[#allocation19_spill] sm:$0xff] %v9785_v19  ;;  %v9802_v15 = vld [vmem:[#allocation2 + $0xf0] sm:$0xff] }
 0x25c   : > { %3976 = vmatmul.mubr.f32.gmra.mxu0 %v9774_v26  ;;  %3765 = vmatprep.mubr.f32.mxu1 %v11879_v7  ;;  %v11883_v7 = vmax.f32 %v9503_v16, 0.0  ;;  %11884 = vst [vmem:[#allocation21_spill] sm:$0xff] %v9802_v15  ;;  %v11886_v16 = vmax.f32 %v9489_v29, 0.0  ;;  %v9836_v29 = vld [vmem:[%s11706_s2 + $0x390] sm:$0xff] }
 0x25d   : > { %3980 = vmatprep.mubr.f32.mxu0 %v9780_v51  ;;  %4330 = vmatpush2.msra.mxu0 %v9771_v13  ;;  %v9813_v13 = vld [vmem:[#allocation2 + $0xda] sm:$0xff]  ;;  %11888 = vst [vmem:[#allocation24_spill] sm:$0xff] %v9836_v29 }
 0x25e   : > { %4331 = vmatprep.subr.mxu0 %v8270_v33 }
 0x25f   : > { %3766 = vmatmul.mubr.f32.gmra.mxu1 %v9780_v51  ;;  %4332 = vmatpush2.msra.mxu0 %v9785_v19  ;;  %v9810_v19 = vld [vmem:[%s11706_s2 + $0x3a0] sm:$0xff]  ;;  %v9841_v51 = vld [vmem:[#allocation2 + $0x108] sm:$0xff] }
 0x260   : > { %3981 = vmatmul.mubr.f32.gmra.mxu0 %v9791_v31  ;;  %3770 = vmatprep.mubr.f32.mxu1 %v11883_v7  ;;  %11885 = vst [vmem:[#allocation22_spill] sm:$0xff] %v9810_v19  ;;  %v9819_v7 = vld [vmem:[#allocation2 + $0xf8] sm:$0xff]  ;;  %11890 = vst [vmem:[#allocation25_spill] sm:$0xff] %v9841_v51 }
 0x261   : > { %3985 = vmatprep.mubr.f32.mxu0 %v9802_v15  ;;  %4333 = vmatprep.subr.mxu0 %v8270_v33 }
 0x262   : > { %4334 = vmatpush2.msra.mxu0 %v9797_v60  ;;  %v9824_v60 = vld [vmem:[%s11706_s2 + $0x398] sm:$0xff] }
 0x263   : > { %3771 = vmatmul.mubr.f32.gmra.mxu1 %v9802_v15  ;;  %4335 = vmatprep.subr.mxu0 %v8270_v33  ;;  %11887 = vst [vmem:[#allocation17_spill] sm:$0xff] %v9824_v60  ;;  %v9830_v15 = vld [vmem:[#allocation2 + $0xe2] sm:$0xff] }
 0x264   : > { %3986 = vmatmul.mubr.f32.gmra.mxu0 %v9813_v13  ;;  %3775 = vmatprep.mubr.f32.mxu1 %v11886_v16  ;;  %v11889_v16 = vmax.f32 %v9532_v50, 0.0  ;;  %v11892_v50 = vmax.f32 %v9523_v47, 0.0  ;;  %v11895_v47 = vmax.f32 %v9566_v59, 0.0  ;;  %v9889_v59 = vld [vmem:[#allocation2 + $0x112] sm:$0xff] }
 0x265   : > { %3990 = vmatprep.mubr.f32.mxu0 %v9819_v7  ;;  %4336 = vmatpush2.msra.mxu0 %v9810_v19  ;;  %v9852_v19 = vld [vmem:[#allocation2 + $0xf2] sm:$0xff] }
 0x266   : > { %4337 = vmatprep.subr.mxu0 %v8270_v33 }
 0x267   : > { %3776 = vmatmul.mubr.f32.gmra.mxu1 %v9819_v7  ;;  %4338 = vmatpush2.msra.mxu0 %v9824_v60  ;;  %v9849_v60 = vld [vmem:[%s11706_s2 + $0x388] sm:$0xff] }
 0x268   : > { %3991 = vmatmul.mubr.f32.gmra.mxu0 %v9830_v15  ;;  %3780 = vmatprep.mubr.f32.mxu1 %v11889_v16  ;;  %11891 = vst [vmem:[#allocation20_spill] sm:$0xff] %v9849_v60  ;;  %v9858_v16 = vld [vmem:[#allocation2 + $0x110] sm:$0xff] }
 0x269   : > { %3995 = vmatprep.mubr.f32.mxu0 %v9841_v51  ;;  %4339 = vmatprep.subr.mxu0 %v8270_v33  ;;  %11893 = vst [vmem:[#allocation27_spill] sm:$0xff] %v9858_v16 }
 0x26a   : > { %4340 = vmatpush2.msra.mxu0 %v9836_v29  ;;  %v9863_v29 = vld [vmem:[%s11706_s2 + $0x380] sm:$0xff] }
 0x26b   : > { %3781 = vmatmul.mubr.f32.gmra.mxu1 %v9841_v51  ;;  %4341 = vmatprep.subr.mxu0 %v8270_v33  ;;  %11894 = vst [vmem:[#allocation28_spill] sm:$0xff] %v9863_v29  ;;  %v9869_v51 = vld [vmem:[#allocation2 + $0xfa] sm:$0xff] }
 0x26c   : > { %3996 = vmatmul.mubr.f32.gmra.mxu0 %v9852_v19  ;;  %3785 = vmatprep.mubr.f32.mxu1 %v11892_v50  ;;  %v9875_v50 = vld [vmem:[#allocation2 + $0x120] sm:$0xff] }
 0x26d   : > { %4000 = vmatprep.mubr.f32.mxu0 %v9858_v16  ;;  %4342 = vmatpush2.msra.mxu0 %v9849_v60  ;;  %11896 = vst [vmem:[#allocation23_spill] sm:$0xff] %v9875_v50  ;;  %v9880_v60 = vld [vmem:[#allocation2 + $0x10a] sm:$0xff] }
 0x26e   : > { %4343 = vmatprep.subr.mxu0 %v8270_v33 }
 0x26f   : > { %3786 = vmatmul.mubr.f32.gmra.mxu1 %v9858_v16  ;;  %4344 = vmatpush2.msra.mxu0 %v9863_v29  ;;  %v11897_v16 = vmax.f32 %v9552_v45, 0.0  ;;  %v9885_v29 = vld [vmem:[#allocation2 + $0x128] sm:$0xff] }
 0x270   : > { %4001 = vmatmul.mubr.f32.gmra.mxu0 %v9869_v51  ;;  %3790 = vmatprep.mubr.f32.mxu1 %v11895_v47  ;;  %11898 = vst [vmem:[#allocation29_spill] sm:$0xff] %v9885_v29  ;;  %v11899_v47 = vmax.f32 %v9595_v55, 0.0  ;;  %v9898_v45 = vld [vmem:[#allocation2 + $0x122] sm:$0xff]  ;;  %v9907_v55 = vld [vmem:[#allocation2 + $0x12a] sm:$0xff] }
 0x271   : > { %4005 = vmatprep.mubr.f32.mxu0 %v9875_v50  ;;  %5808 = vmatprep.subr.mxu0 %v8270_v33 }
 0x273   : > { %3791 = vmatmul.mubr.f32.gmra.mxu1 %v9875_v50  ;;  %v9894_v50 = vld [vmem:[#allocation2 + $0x138] sm:$0xff] }
 0x274   : > { %4006 = vmatmul.mubr.f32.gmra.mxu0 %v9880_v60  ;;  %3795 = vmatprep.mubr.f32.mxu1 %v11897_v16  ;;  %11900 = vst [vmem:[#allocation26_spill] sm:$0xff] %v9894_v50  ;;  %v11901_v16 = vmax.f32 %v9586_v17, 0.0  ;;  %v9916_v17 = vld [vmem:[#allocation2 + $0x13a] sm:$0xff] }
 0x275   : > { %4010 = vmatprep.mubr.f32.mxu0 %v9885_v29 }
 0x277   : > { %3796 = vmatmul.mubr.f32.gmra.mxu1 %v9885_v29  ;;  %v9903_v29 = vld [vmem:[#allocation2 + $0x140] sm:$0xff] }
 0x278   : > { %4011 = vmatmul.mubr.f32.gmra.mxu0 %v9889_v59  ;;  %3800 = vmatprep.mubr.f32.mxu1 %v11899_v47  ;;  %11902 = vst [vmem:[#allocation30_spill] sm:$0xff] %v9903_v29  ;;  %v11903_v47 = vmax.f32 %v9631_v63, 0.0  ;;  %v9925_v63 = vld [vmem:[#allocation2 + $0x142] sm:$0xff] }
 0x279   : > { %4015 = vmatprep.mubr.f32.mxu0 %v9894_v50 }
 0x27b   : > { %3801 = vmatmul.mubr.f32.gmra.mxu1 %v9894_v50  ;;  %v9912_v50 = vld [vmem:[#allocation2 + $0x150] sm:$0xff] }
 0x27c   : > { %4016 = vmatmul.mubr.f32.gmra.mxu0 %v9898_v45  ;;  %3805 = vmatprep.mubr.f32.mxu1 %v11901_v16  ;;  %11904 = vst [vmem:[#allocation32_spill] sm:$0xff] %v9912_v50  ;;  %v11905_v16 = vmax.f32 %v9615_v41, 0.0  ;;  %v9934_v41 = vld [vmem:[#allocation2 + $0x152] sm:$0xff] }
 0x27d   : > { %4020 = vmatprep.mubr.f32.mxu0 %v9903_v29  ;;  %11909 = vst [vmem:[#allocation33_spill] sm:$0xff] %v9934_v41 }
 0x27f   : > { %3806 = vmatmul.mubr.f32.gmra.mxu1 %v9903_v29  ;;  %v9921_v29 = vld [vmem:[#allocation2 + $0x158] sm:$0xff] }
 0x280   : > { %4021 = vmatmul.mubr.f32.gmra.mxu0 %v9907_v55  ;;  %3810 = vmatprep.mubr.f32.mxu1 %v11903_v47  ;;  %11906 = vst [vmem:[#allocation34_spill] sm:$0xff] %v9921_v29  ;;  %v11907_v47 = vmax.f32 %v9661_v24, 0.0  ;;  %v9943_v24 = vld [vmem:[#allocation2 + $0x15a] sm:$0xff] }
 0x281   : > { %4025 = vmatprep.mubr.f32.mxu0 %v9912_v50 }
 0x283   : > { %3811 = vmatmul.mubr.f32.gmra.mxu1 %v9912_v50  ;;  %v9930_v50 = vld [vmem:[#allocation2 + $0x168] sm:$0xff] }
 0x284   : > { %4026 = vmatmul.mubr.f32.gmra.mxu0 %v9916_v17  ;;  %3815 = vmatprep.mubr.f32.mxu1 %v11905_v16  ;;  %11908 = vst [vmem:[#allocation31_spill] sm:$0xff] %v9930_v50  ;;  %v11910_v16 = vmax.f32 %v9651_v40, 0.0  ;;  %v9953_v40 = vld [vmem:[#allocation2 + $0x188] sm:$0xff] }
 0x285   : > { %4030 = vmatprep.mubr.f32.mxu0 %v9921_v29 }
 0x287   : > { %3816 = vmatmul.mubr.f32.gmra.mxu1 %v9921_v29  ;;  %v9939_v29 = vld [vmem:[#allocation2 + $0x170] sm:$0xff] }
 0x288   : > { %4031 = vmatmul.mubr.f32.gmra.mxu0 %v9925_v63  ;;  %3820 = vmatprep.mubr.f32.mxu1 %v11907_v47  ;;  %v9946_v47 = vld [vmem:[#allocation2 + $0x180] sm:$0xff] }
 0x289   : > { %4035 = vmatprep.mubr.f32.mxu0 %v9930_v50 }
 0x28b   : > { %3821 = vmatmul.mubr.f32.gmra.mxu1 %v9930_v50  ;;  %v2849_v50 = vld [vmem:[#allocation2 + $0x19] sm:$0xff] }
 0x28c   : > { %4036 = vmatmul.mubr.f32.gmra.mxu0 %v9934_v41  ;;  %3825 = vmatprep.mubr.f32.mxu1 %v11910_v16  ;;  %v9950_v41 = vld [vmem:[#allocation2 + $0x16a] sm:$0xff]  ;;  %v2850_v16 = vld [vmem:[#allocation2 + $0x21] sm:$0xff] }
 0x28d   : > { %4040 = vmatprep.mubr.f32.mxu0 %v9939_v29 }
 0x28f   : > { %3826 = vmatmul.mubr.f32.gmra.mxu1 %v9939_v29 }
 0x290   : > { %4041 = vmatmul.mubr.f32.gmra.mxu0 %v9943_v24  ;;  %4120 = vmatprep.mubr.f32.mxu1 %v9380_v4  ;;  %v9959_v4 = vld [vmem:[#allocation2 + $0x172] sm:$0xff] }
 0x291   : > { %4045 = vmatprep.mubr.f32.mxu0 %v9946_v47 }
 0x293   : > { %4121 = vmatmul.mubr.f32.vlgmr.msra.gmra.mxu1 %v2849_v50  ;;  %v3041_v50 = vld [vmem:[#allocation2 + $0x31] sm:$0xff] }
 0x294   : > { %4046 = vmatmul.mubr.f32.gmra.mxu0 %v9950_v41  ;;  %4125 = vmatprep.mubr.f32.mxu1 %v9409_v37  ;;  %v2977_v37 = vld [vmem:[#allocation2 + $0x30] sm:$0xff] }
 0x295   : > { %4050 = vmatprep.mubr.f32.mxu0 %v9953_v40  ;;  %7482 = vmatpush1.msra.mxu1 %v9328_v34  ;;  %v3042_v34 = vld [vmem:[#allocation2 + $0x39] sm:$0xff] }
 0x296   : > { %7451 = vmatprep.subr.mxu1 %v8270_v33 }
 0x297   : > { %4126 = vmatmul.mubr.f32.gmra.mxu1 %v2850_v16 }
 0x298   : > { %4051 = vmatmul.mubr.f32.gmra.mxu0 %v9959_v4  ;;  %4130 = vmatprep.mubr.f32.mxu1 %v9443_v2  ;;  %v3052_v2 = vld [vmem:[#allocation2 + $0xb1] sm:$0xff] }
 0x299   : > { %7483 = vmatpush1.msra.mxu1 %v9339_v23  ;;  %4345 = vmatprep.mubr.f32.mxu0 %v3041_v50  ;;  %v3043_v23 = vld [vmem:[#allocation2 + $0x49] sm:$0xff] }
 0x29a   : > { %7452 = vmatprep.subr.mxu1 %v8270_v33 }
 0x29b   : > { %4131 = vmatmul.mubr.f32.gmra.mxu1 %v3041_v50 }
 0x29c   : > { %4346 = vmatmul.mubr.f32.vlgmr.msra.gmra.mxu0 %v2977_v37  ;;  %4135 = vmatprep.mubr.f32.mxu1 %v9472_v58  ;;  %v3055_v58 = vld [vmem:[#allocation2 + $0xd9] sm:$0xff] }
 0x29d   : > { %7484 = vmatpush1.msra.mxu1 %v9359_v61  ;;  %4350 = vmatprep.mubr.f32.mxu0 %v3042_v34  ;;  %v3044_v61 = vld [vmem:[#allocation2 + $0x51] sm:$0xff] }
 0x29e   : > { %7453 = vmatprep.subr.mxu1 %v8270_v33 }
 0x29f   : > { %4136 = vmatmul.mubr.f32.gmra.mxu1 %v3042_v34  ;;  %v11922_v34 = vld [vmem:[#allocation27_spill] sm:$0xff] }
 0x2a0   : > { %4351 = vmatmul.mubr.f32.gmra.mxu0 %v9386_v10  ;;  %4140 = vmatprep.mubr.f32.mxu1 %v9506_v20  ;;  %v3046_v10 = vld [vmem:[#allocation2 + $0x69] sm:$0xff]  ;;  %v11913_v20 = vld [vmem:[#allocation18_spill] sm:$0xff] }
 0x2a1   : > { %7485 = vmatpush1.msra.mxu1 %v9372_v11  ;;  %4355 = vmatprep.mubr.f32.mxu0 %v3043_v23  ;;  %v3045_v11 = vld [vmem:[#allocation2 + $0x61] sm:$0xff] }
 0x2a2   : > { %7454 = vmatprep.subr.mxu1 %v8270_v33 }
 0x2a3   : > { %4141 = vmatmul.mubr.f32.gmra.mxu1 %v3043_v23 }
 0x2a4   : > { %4356 = vmatmul.mubr.f32.gmra.mxu0 %v9420_v5  ;;  %4145 = vmatprep.mubr.f32.mxu1 %v9535_v18  ;;  %v3049_v5 = vld [vmem:[#allocation2 + $0x91] sm:$0xff]  ;;  %v10027_v18 = vld [vmem:[%s11708_s4 + $0x1] ss:$0 sm:$0xff] }
 0x2a5   : > { %7486 = vmatpush1.msra.mxu1 %v9391_v25  ;;  %4360 = vmatprep.mubr.f32.mxu0 %v3044_v61  ;;  %v3047_v25 = vld [vmem:[#allocation2 + $0x79] sm:$0xff] }
 0x2a6   : > { %7455 = vmatprep.subr.mxu1 %v8270_v33 }
 0x2a7   : > { %4146 = vmatmul.mubr.f32.gmra.mxu1 %v3044_v61  ;;  %v11923_v61 = vld [vmem:[#allocation12_spill] sm:$0xff] }
 0x2a8   : > { %4361 = vmatmul.mubr.f32.gmra.mxu0 %v9449_v49  ;;  %4150 = vmatprep.mubr.f32.mxu1 %v9569_v36  ;;  %v3053_v49 = vld [vmem:[#allocation2 + $0xc1] sm:$0xff]  ;;  %v3058_v36 = vld [vmem:[#allocation2 + $0xf9] sm:$0xff] }
 0x2a9   : > { %7487 = vmatpush1.msra.mxu1 %v9415_v32  ;;  %4365 = vmatprep.mubr.f32.mxu0 %v3045_v11  ;;  %v3048_v32 = vld [vmem:[#allocation2 + $0x81] sm:$0xff] }
 0x2aa   : > { %7456 = vmatprep.subr.mxu1 %v8270_v33 }
 0x2ab   : > { %4151 = vmatmul.mubr.f32.gmra.mxu1 %v3045_v11 }
 0x2ac   : > { %4366 = vmatmul.mubr.f32.gmra.mxu0 %v9483_v27  ;;  %4155 = vmatprep.mubr.f32.mxu1 %v9598_v3  ;;  %v3056_v27 = vld [vmem:[#allocation2 + $0xe1] sm:$0xff]  ;;  %v11916_v3 = vld [vmem:[#allocation21_spill] sm:$0xff] }
 0x2ad   : > { %7488 = vmatpush1.msra.mxu1 %v9434_v54  ;;  %4370 = vmatprep.mubr.f32.mxu0 %v3046_v10  ;;  %v3050_v54 = vld [vmem:[#allocation2 + $0x99] sm:$0xff] }
 0x2ae   : > { %7457 = vmatprep.subr.mxu1 %v8270_v33 }
 0x2af   : > { %4156 = vmatmul.mubr.f32.gmra.mxu1 %v3046_v10 }
 0x2b0   : > { %4371 = vmatmul.mubr.f32.gmra.mxu0 %v9512_v12  ;;  %4160 = vmatprep.mubr.f32.mxu1 %v9634_v9  ;;  %v3057_v12 = vld [vmem:[#allocation2 + $0xf1] sm:$0xff] }
 0x2b1   : > { %7489 = vmatpush1.msra.mxu1 %v9454_v48  ;;  %4375 = vmatprep.mubr.f32.mxu0 %v3047_v25  ;;  %v3054_v48 = vld [vmem:[#allocation2 + $0xc9] sm:$0xff] }
 0x2b2   : > { %7458 = vmatprep.subr.mxu1 %v8270_v33  ;;  %v11917_v9 = vld [vmem:[#allocation4_spill] sm:$0xff] }
 0x2b3   : > { %4161 = vmatmul.mubr.f32.gmra.mxu1 %v3047_v25 }
 0x2b4   : > { %4376 = vmatmul.mubr.f32.gmra.mxu0 %v9546_v43  ;;  %4165 = vmatprep.mubr.f32.mxu1 %v9664_v6  ;;  %v11915_v43 = vld [vmem:[#allocation5_spill] sm:$0xff] }
 0x2b5   : > { %7490 = vmatpush1.msra.mxu1 %v9478_v8  ;;  %4380 = vmatprep.mubr.f32.mxu0 %v3048_v32  ;;  %v11911_v8 = vld [vmem:[#allocation16_spill] sm:$0xff] }
 0x2b6   : > { %7459 = vmatprep.subr.mxu1 %v8270_v33 }
 0x2b7   : > { %4166 = vmatmul.mubr.f32.gmra.mxu1 %v3048_v32 }
 0x2b8   : > { %4381 = vmatmul.mubr.f32.gmra.mxu0 %v9575_v14  ;;  %4170 = vmatprep.mubr.f32.mxu1 %v9692_v38  ;;  %v3051_v14 = vld [vmem:[#allocation2 + $0xa9] sm:$0xff]  ;;  %v11919_v38 = vld [vmem:[#allocation9_spill] sm:$0xff] }
 0x2b9   : > { %7491 = vmatpush1.msra.mxu1 %v9497_v42  ;;  %4385 = vmatprep.mubr.f32.mxu0 %v3049_v5  ;;  %v11912_v42 = vld [vmem:[#allocation6_spill] sm:$0xff] }
 0x2ba   : > { %7460 = vmatprep.subr.mxu1 %v8270_v33 }
 0x2bb   : > { %4171 = vmatmul.mubr.f32.gmra.mxu1 %v3049_v5 }
 0x2bc   : > { %4386 = vmatmul.mubr.f32.gmra.mxu0 %v9609_v39  ;;  %4175 = vmatprep.mubr.f32.mxu1 %v9709_v28 }
 0x2bd   : > { %7492 = vmatpush1.msra.mxu1 %v9517_v21  ;;  %4390 = vmatprep.mubr.f32.mxu0 %v3050_v54  ;;  %v11914_v21 = vld [vmem:[#allocation7_spill] sm:$0xff] }
 0x2be   : > { %7461 = vmatprep.subr.mxu1 %v8270_v33 }
 0x2bf   : > { %4176 = vmatmul.mubr.f32.gmra.mxu1 %v3050_v54  ;;  %v11924_v54 = vld [vmem:[#allocation23_spill] sm:$0xff] }
 0x2c0   : > { %4391 = vmatmul.mubr.f32.gmra.mxu0 %v9640_v30  ;;  %4180 = vmatprep.mubr.f32.mxu1 %v9733_v56  ;;  %v11918_v30 = vld [vmem:[#allocation8_spill] sm:$0xff] }
 0x2c1   : > { %7493 = vmatpush1.msra.mxu1 %v9541_v0  ;;  %4395 = vmatprep.mubr.f32.mxu0 %v3051_v14  ;;  %v3673_v0 = vadd.f32 %v10027_v18, %v11915_v43 }
 0x2c2   : > { %7462 = vmatprep.subr.mxu1 %v8270_v33 }
 0x2c3   : > { %4181 = vmatmul.mubr.f32.gmra.mxu1 %v3051_v14 }
 0x2c4   : > { %4396 = vmatmul.mubr.f32.gmra.mxu0 %v9675_v62  ;;  %4185 = vmatprep.mubr.f32.mxu1 %v9752_v57  ;;  %v3678_v62 = vadd.f32 %v10027_v18, %v11918_v30  ;;  %v11920_v57 = vld [vmem:[#allocation25_spill] sm:$0xff] }
 0x2c5   : > { %7494 = vmatpush1.msra.mxu1 %v9560_v52  ;;  %4400 = vmatprep.mubr.f32.mxu0 %v3052_v2 }
 0x2c6   : > { %7463 = vmatprep.subr.mxu1 %v8270_v33 }
 0x2c7   : > { %4186 = vmatmul.mubr.f32.gmra.mxu1 %v3052_v2  ;;  %v11925_v2 = vld [vmem:[#allocation13_spill] sm:$0xff] }
 0x2c8   : > { %4401 = vmatmul.mubr.f32.gmra.mxu0 %v9698_v46  ;;  %4190 = vmatprep.mubr.f32.mxu1 %v9774_v26 }
 0x2c9   : > { %7495 = vmatpush1.msra.mxu1 %v9580_v1  ;;  %4405 = vmatprep.mubr.f32.mxu0 %v3053_v49 }
 0x2ca   : > { %7464 = vmatprep.subr.mxu1 %v8270_v33 }
 0x2cb   : > { %4191 = vmatmul.mubr.f32.gmra.mxu1 %v3053_v49 }
 0x2cc   : > { %4406 = vmatmul.mubr.f32.gmra.mxu0 %v9720_v53  ;;  %4195 = vmatprep.mubr.f32.mxu1 %v9791_v31 }
 0x2cd   : > { %7496 = vmatpush1.msra.mxu1 %v9604_v22  ;;  %4410 = vmatprep.mubr.f32.mxu0 %v3054_v48 }
 0x2ce   : > { %7465 = vmatprep.subr.mxu1 %v8270_v33 }
 0x2cf   : > { %4196 = vmatmul.mubr.f32.gmra.mxu1 %v3054_v48 }
 0x2d0   : > { %4411 = vmatmul.mubr.f32.gmra.mxu0 %v9739_v44  ;;  %4200 = vmatprep.mubr.f32.mxu1 %v9813_v13  ;;  %v3059_v44 = vld [vmem:[#allocation2 + $0x109] sm:$0xff] }
 0x2d1   : > { %7497 = vmatpush1.msra.mxu1 %v9623_v35  ;;  %4415 = vmatprep.mubr.f32.mxu0 %v3055_v58 }
 0x2d2   : > { %7466 = vmatprep.subr.mxu1 %v8270_v33 }
 0x2d3   : > { %4201 = vmatmul.mubr.f32.gmra.mxu1 %v3055_v58 }
 0x2d4   : > { %4416 = vmatmul.mubr.f32.gmra.mxu0 %v11911_v8  ;;  %4205 = vmatprep.mubr.f32.mxu1 %v9830_v15 }
 0x2d5   : > { %7498 = vmatpush2.msra.mxu1 %v11912_v42  ;;  %4420 = vmatprep.mubr.f32.mxu0 %v3056_v27  ;;  %v11926_v42 = vld [vmem:[#allocation29_spill] sm:$0xff] }
 0x2d6   : > { %7467 = vmatprep.subr.mxu1 %v8270_v33 }
 0x2d7   : > { %4206 = vmatmul.mubr.f32.gmra.mxu1 %v3056_v27 }
 0x2d8   : > { %4421 = vmatmul.mubr.f32.gmra.mxu0 %v11913_v20  ;;  %4210 = vmatprep.mubr.f32.mxu1 %v9852_v19  ;;  %v3060_v19 = vld [vmem:[#allocation2 + $0x111] sm:$0xff] }
 0x2d9   : > { %7499 = vmatpush2.msra.mxu1 %v11914_v21  ;;  %4425 = vmatprep.mubr.f32.mxu0 %v3057_v12 }
 0x2da   : > { %7468 = vmatprep.subr.mxu1 %v8270_v33 }
 0x2db   : > { %v3682_v1 = vpop.f32.mrf.mxu1  ;;  %4211 = vmatmul.mubr.f32.gmra.mxu1 %v3057_v12  ;;  %v11927_v12 = vld [vmem:[#allocation15_spill] sm:$0xff] }
 0x2dc   : > { %v3897_v52 = vpop.f32.mrf.mxu0  ;;  %4426 = vmatmul.mubr.f32.gmra.mxu0 %v11916_v3  ;;  %4215 = vmatprep.mubr.f32.mxu1 %v9869_v51  ;;  %v3683_v53 = vadd.f32 %v10027_v18, %v3682_v1  ;;  %v11921_v51 = vld [vmem:[#allocation10_spill] sm:$0xff] }
 0x2dd   : > { %v10037_v39 = vadd.f32 %v3897_v52, %v3673_v0  ;;  %7500 = vmatpush2.msra.mxu1 %v11917_v9  ;;  %4430 = vmatprep.mubr.f32.mxu0 %v3058_v36  ;;  %v3684_v22 = vpop.f32.mrf.mxu1  ;;  %v11928_v3 = vld [vmem:[#allocation26_spill] sm:$0xff]  ;;  %v11929_v9 = vld [vmem:[#allocation11_spill] sm:$0xff] }
 0x2de   : > { %v3899_v35 = vpop.f32.mrf.mxu0  ;;  %7469 = vmatprep.subr.mxu1 %v8270_v33 }
 0x2df   : > { %v3687_v6 = vpop.f32.mrf.mxu1  ;;  %4216 = vmatmul.mubr.f32.gmra.mxu1 %v3058_v36 }
 0x2e0   : > { %v3902_v46 = vpop.f32.mrf.mxu0  ;;  %4431 = vmatmul.mubr.f32.gmra.mxu0 %v9819_v7  ;;  %4220 = vmatprep.mubr.f32.mxu1 %v9880_v60  ;;  %v3688_v16 = vadd.f32 %v10027_v18, %v3687_v6 }
 0x2e1   : > { %v10045_v15 = vadd.f32 %v3902_v46, %v3678_v62  ;;  %7501 = vmatpush2.msra.mxu1 %v11919_v38  ;;  %4435 = vmatprep.mubr.f32.mxu0 %v3059_v44  ;;  %v3689_v28 = vpop.f32.mrf.mxu1  ;;  %v11930_v46 = vld [vmem:[#allocation30_spill] sm:$0xff]  ;;  %v11932_v38 = vld [vmem:[#allocation19_spill] sm:$0xff] }
 0x2e2   : > { %v3904_v13 = vpop.f32.mrf.mxu0  ;;  %7470 = vmatprep.subr.mxu1 %v8270_v33 }
 0x2e3   : > { %v3692_v31 = vpop.f32.mrf.mxu1  ;;  %4221 = vmatmul.mubr.f32.gmra.mxu1 %v3059_v44  ;;  %v11931_v44 = vld [vmem:[#allocation33_spill] sm:$0xff] }
 0x2e4   : > { %v3907_v56 = vpop.f32.mrf.mxu0  ;;  %4436 = vmatmul.mubr.f32.gmra.mxu0 %v11920_v57  ;;  %4225 = vmatprep.mubr.f32.mxu1 %v9889_v59  ;;  %v3061_v59 = vld [vmem:[#allocation2 + $0x121] sm:$0xff]  ;;  %v3693_v25 = vadd.f32 %v10027_v18, %v3692_v31 }
 0x2e5   : > { %v10052_v26 = vadd.f32 %v3907_v56, %v3683_v53  ;;  %7502 = vmatpush2.msra.mxu1 %v11921_v51  ;;  %4440 = vmatprep.mubr.f32.mxu0 %v3060_v19  ;;  %v3694_v60 = vpop.f32.mrf.mxu1  ;;  %v10090_v53 = vld [vmem:[#allocation2 + $0x151] sm:$0xff] }
 0x2e6   : > { %v3909_v7 = vpop.f32.mrf.mxu0  ;;  %7471 = vmatprep.subr.mxu1 %v8270_v33 }
 0x2e7   : > { %v3697_v50 = vpop.f32.mrf.mxu1  ;;  %4226 = vmatmul.mubr.f32.gmra.mxu1 %v3060_v19  ;;  %v11933_v19 = vld [vmem:[#allocation14_spill] sm:$0xff] }
 0x2e8   : > { %v3912_v37 = vpop.f32.mrf.mxu0  ;;  %4441 = vmatmul.mubr.f32.gmra.mxu0 %v11922_v34  ;;  %4230 = vmatprep.mubr.f32.mxu1 %v9898_v45  ;;  %v3062_v45 = vld [vmem:[#allocation2 + $0x129] sm:$0xff]  ;;  %v3698_v58 = vadd.f32 %v10027_v18, %v3697_v50  ;;  %v11934_v50 = vld [vmem:[#allocation22_spill] sm:$0xff] }
 0x2e9   : > { %v10059_v23 = vadd.f32 %v3912_v37, %v3688_v16  ;;  %7503 = vmatpush2.msra.mxu1 %v11923_v61  ;;  %4445 = vmatprep.mubr.f32.mxu0 %v3061_v59  ;;  %v3699_v11 = vpop.f32.mrf.mxu1  ;;  %v2876_v16 = vld [vmem:[#allocation2 + $0x159] sm:$0xff] }
 0x2ea   : > { %v3914_v10 = vpop.f32.mrf.mxu0  ;;  %7472 = vmatprep.subr.mxu1 %v8270_v33 }
 0x2eb   : > { %v3702_v32 = vpop.f32.mrf.mxu1  ;;  %4231 = vmatmul.mubr.f32.gmra.mxu1 %v3061_v59 }
 0x2ec   : > { %v3917_v5 = vpop.f32.mrf.mxu0  ;;  %4446 = vmatmul.mubr.f32.gmra.mxu0 %v11924_v54  ;;  %4235 = vmatprep.mubr.f32.mxu1 %v9907_v55  ;;  %v3063_v55 = vld [vmem:[#allocation2 + $0x139] sm:$0xff]  ;;  %v3703_v0 = vadd.f32 %v10027_v18, %v3702_v32  ;;  %v11936_v32 = vld [vmem:[#allocation24_spill] sm:$0xff] }
 0x2ed   : > { %v10066_v14 = vadd.f32 %v3917_v5, %v3693_v25  ;;  %7504 = vmatpush2.msra.mxu1 %v11925_v2  ;;  %4450 = vmatprep.mubr.f32.mxu0 %v3062_v45  ;;  %v3704_v49 = vpop.f32.mrf.mxu1  ;;  %v10108_v25 = vld [vmem:[#allocation2 + $0x169] sm:$0xff]  ;;  %v3600_v2 = vld [vmem:[%s11706_s2 + $0x478] sm:$0xff] }
 0x2ee   : > { %v3919_v48 = vpop.f32.mrf.mxu0  ;;  %7473 = vmatprep.subr.mxu1 %v8270_v33 }
 0x2ef   : > { %v3707_v8 = vpop.f32.mrf.mxu1  ;;  %4236 = vmatmul.mubr.f32.gmra.mxu1 %v3062_v45  ;;  %v11937_v45 = vld [vmem:[#allocation20_spill] sm:$0xff] }
 0x2f0   : > { %v3922_v27 = vpop.f32.mrf.mxu0  ;;  %4451 = vmatmul.mubr.f32.gmra.mxu0 %v11926_v42  ;;  %4240 = vmatprep.mubr.f32.mxu1 %v9916_v17  ;;  %v3064_v17 = vld [vmem:[#allocation2 + $0x141] sm:$0xff]  ;;  %v3708_v30 = vadd.f32 %v10027_v18, %v3707_v8  ;;  %v10122_v8 = vld [vmem:[#allocation2 + $0x171] sm:$0xff] }
 0x2f1   : > { %v10073_v20 = vadd.f32 %v3922_v27, %v3698_v58  ;;  %7505 = vmatpush2.msra.mxu1 %v11927_v12  ;;  %4455 = vmatprep.mubr.f32.mxu0 %v3063_v55  ;;  %v3709_v21 = vpop.f32.mrf.mxu1  ;;  %v11938_v27 = vld [vmem:[#allocation28_spill] sm:$0xff] }
 0x2f2   : > { %v3924_v43 = vpop.f32.mrf.mxu0  ;;  %7474 = vmatprep.subr.mxu1 %v8270_v33 }
 0x2f3   : > { %v3712_v1 = vpop.f32.mrf.mxu1  ;;  %4241 = vmatmul.mubr.f32.gmra.mxu1 %v3063_v55 }
 0x2f4   : > { %v3927_v52 = vpop.f32.mrf.mxu0  ;;  %4456 = vmatmul.mubr.f32.gmra.mxu0 %v11928_v3  ;;  %4245 = vmatprep.mubr.f32.mxu1 %v9925_v63  ;;  %v3713_v31 = vadd.f32 %v10027_v18, %v3712_v1  ;;  %v10132_v1 = vld [vmem:[#allocation2 + $0x181] sm:$0xff] }
 0x2f5   : > { %v10080_v36 = vadd.f32 %v3927_v52, %v3703_v0  ;;  %7506 = vmatpush2.msra.mxu1 %v11929_v9  ;;  %4460 = vmatprep.mubr.f32.mxu0 %v3064_v17  ;;  %v3714_v22 = vpop.f32.mrf.mxu1 }
 0x2f6   : > { %v3929_v35 = vpop.f32.mrf.mxu0  ;;  %7475 = vmatprep.subr.mxu1 %v8270_v33 }
 0x2f7   : > { %v3717_v62 = vpop.f32.mrf.mxu1  ;;  %4246 = vmatmul.mubr.f32.gmra.mxu1 %v3064_v17  ;;  %v10136_v17 = vld [vmem:[#allocation2 + $0x18a] sm:$0xff] }
 0x2f8   : > { %v3932_v6 = vpop.f32.mrf.mxu0  ;;  %4461 = vmatmul.mubr.f32.gmra.mxu0 %v11930_v46  ;;  %4250 = vmatprep.mubr.f32.mxu1 %v11931_v44  ;;  %v3718_v37 = vadd.f32 %v10027_v18, %v3717_v62  ;;  %v10141_v62 = vld [vmem:[#allocation2 + $0x189] sm:$0xff] }
 0x2f9   : > { %v10087_v63 = vadd.f32 %v3932_v6, %v3708_v30  ;;  %7507 = vmatpush2.msra.mxu1 %v11932_v38  ;;  %v3719_v28 = vpop.f32.mrf.mxu1 }
 0x2fa   : > { %v3934_v13 = vpop.f32.mrf.mxu0  ;;  %7476 = vmatprep.subr.mxu1 %v8270_v33 }
 0x2fb   : > { %v3722_v56 = vpop.f32.mrf.mxu1  ;;  %4251 = vmatmul.mubr.f32.gmra.mxu1 %v10090_v53 }
 0x2fc   : > { %v3937_v57 = vpop.f32.mrf.mxu0  ;;  %4255 = vmatprep.mubr.f32.mxu1 %v9943_v24  ;;  %7508 = vmatpush2.msra.mxu1 %v11933_v19  ;;  %v11935_v24 = vld [vmem:[#allocation17_spill] sm:$0xff]  ;;  %v3723_v5 = vadd.f32 %v10027_v18, %v3722_v56  ;;  %v11939_v19 = vld [vmem:[#allocation32_spill] sm:$0xff] }
 0x2fd   : > { %v10097_v51 = vadd.f32 %v3937_v57, %v3713_v31  ;;  %v3724_v60 = vpop.f32.mrf.mxu1  ;;  %7477 = vmatprep.subr.mxu1 %v8270_v33  ;;  %v3599_v31 = vld [vmem:[%s11706_s2 + $0x470] sm:$0xff] }
 0x2fe   : > { %v3939_v7 = vpop.f32.mrf.mxu0  ;;  %7509 = vmatpush2.msra.mxu1 %v11934_v50 }
 0x2ff   : > { %v3727_v34 = vpop.f32.mrf.mxu1  ;;  %4256 = vmatmul.mubr.f32.gmra.mxu1 %v2876_v16  ;;  %7478 = vmatprep.subr.mxu1 %v8270_v33 }
 0x300   : > { %v3942_v59 = vpop.f32.mrf.mxu0  ;;  %4260 = vmatprep.mubr.f32.mxu1 %v9950_v41  ;;  %7510 = vmatpush2.msra.mxu1 %v11935_v24  ;;  %v3728_v42 = vadd.f32 %v10027_v18, %v3727_v34  ;;  %v3597_v34 = vld [vmem:[%s11706_s2 + $0x460] sm:$0xff] }
 0x301   : > { %v10105_v61 = vadd.f32 %v3942_v59, %v3718_v37  ;;  %v3729_v11 = vpop.f32.mrf.mxu1  ;;  %7479 = vmatprep.subr.mxu1 %v8270_v33 }
 0x302   : > { %v3944_v10 = vpop.f32.mrf.mxu0  ;;  %7511 = vmatpush2.msra.mxu1 %v11936_v32  ;;  %v11940_v11 = vld [vmem:[#allocation34_spill] sm:$0xff] }
 0x303   : > { %v3732_v54 = vpop.f32.mrf.mxu1  ;;  %4261 = vmatmul.mubr.f32.gmra.mxu1 %v10108_v25  ;;  %7480 = vmatprep.subr.mxu1 %v8270_v33  ;;  %v3596_v10 = vld [vmem:[%s11706_s2 + $0x458] sm:$0xff] }
 0x304   : > { %v3947_v41 = vpop.f32.mrf.mxu0  ;;  %4265 = vmatprep.mubr.f32.mxu1 %v9959_v4  ;;  %7512 = vmatpush2.msra.mxu1 %v11937_v45  ;;  %v10127_v4 = vld [vmem:[#allocation2 + $0x182] sm:$0xff]  ;;  %v3733_v52 = vadd.f32 %v10027_v18, %v3732_v54 }
 0x305   : > { %v10119_v49 = vadd.f32 %v3947_v41, %v3723_v5  ;;  %v3734_v48 = vpop.f32.mrf.mxu1  ;;  %7481 = vmatprep.subr.mxu1 %v8270_v33  ;;  %v3595_v41 = vld [vmem:[%s11706_s2 + $0x450] sm:$0xff] }
 0x306   : > { %v3949_v58 = vpop.f32.mrf.mxu0  ;;  %7513 = vmatpush2.msra.mxu1 %v11938_v27  ;;  %v11941_v48 = vld [vmem:[#allocation31_spill] sm:$0xff] }
 0x307   : > { %v3737_v55 = vpop.f32.mrf.mxu1  ;;  %4266 = vmatmul.mubr.f32.gmra.mxu1 %v10122_v8  ;;  %7290 = vmatprep.subr.mxu1 %v3600_v2  ;;  %v3594_v58 = vld [vmem:[%s11706_s2 + $0x448] sm:$0xff] }
 0x308   : > { %v3952_v12 = vpop.f32.mrf.mxu0  ;;  %4270 = vmatprep.mubr.f32.mxu1 %v10127_v4  ;;  %v3738_v6 = vadd.f32 %v10027_v18, %v3737_v55  ;;  %v5674_v55 = vld [vmem:[%s11707_s3 + $0x78] sm:$0xff] }
 0x309   : > { %v10130_v21 = vadd.f32 %v3952_v12, %v3728_v42  ;;  %v3739_v43 = vpop.f32.mrf.mxu1  ;;  %5809 = vmatpush1.msra.mxu0 %v5674_v55 }
 0x30a   : > { %v3954_v0 = vpop.f32.mrf.mxu0  ;;  %v3593_v43 = vld [vmem:[%s11706_s2 + $0x440] sm:$0xff]  ;;  %5810 = vmatprep.subr.mxu0 %v8270_v33 }
 0x30b   : > { %v3742_v3 = vpop.f32.mrf.mxu1  ;;  %4271 = vmatmul.mubr.f32.gmra.mxu1 %v10132_v1 }
 0x30c   : > { %v3957_v9 = vpop.f32.mrf.mxu0  ;;  %4275 = vmatprep.mubr.f32.mxu1 %v10136_v17  ;;  %v3743_v56 = vadd.f32 %v10027_v18, %v3742_v3  ;;  %v3592_v3 = vld [vmem:[%s11706_s2 + $0x438] sm:$0xff] }
 0x30d   : > { %v10139_v22 = vadd.f32 %v3957_v9, %v3733_v52  ;;  %v3744_v35 = vpop.f32.mrf.mxu1 }
 0x30e   : > { %v3959_v30 = vpop.f32.mrf.mxu0 }
 0x30f   : > { %v3747_v46 = vpop.f32.mrf.mxu1  ;;  %4276 = vmatmul.mubr.f32.gmra.mxu1 %v10141_v62  ;;  %v5673_v30 = vld [vmem:[%s11707_s3 + $0x70] sm:$0xff] }
 0x310   : > { %v3962_v44 = vpop.f32.mrf.mxu0  ;;  %4465 = vmatprep.mubr.f32.mxu1 %v10090_v53  ;;  %v3598_v53 = vld [vmem:[%s11706_s2 + $0x468] sm:$0xff]  ;;  %v3748_v59 = vadd.f32 %v10027_v18, %v3747_v46  ;;  %5811 = vmatpush1.msra.mxu0 %v5673_v30 }
 0x311   : > { %v10146_v38 = vadd.f32 %v3962_v44, %v3738_v6  ;;  %v3749_v28 = vpop.f32.mrf.mxu1  ;;  %v5672_v44 = vld [vmem:[%s11707_s3 + $0x68] sm:$0xff]  ;;  %5812 = vmatprep.subr.mxu0 %v8270_v33 }
 0x312   : > { %v3964_v13 = vpop.f32.mrf.mxu0  ;;  %5813 = vmatpush1.msra.mxu0 %v5672_v44  ;;  %v5667_v44 = vld [vmem:[%s11707_s3 + $0x40] sm:$0xff] }
 0x313   : > { %v3752_v57 = vpop.f32.mrf.mxu1  ;;  %4466 = vmatmul.mubr.f32.vlgmr.msra.gmra.mxu1 %v11939_v19  ;;  %v3590_v13 = vld [vmem:[%s11706_s2 + $0x428] sm:$0xff]  ;;  %v3589_v19 = vld [vmem:[%s11706_s2 + $0x420] sm:$0xff]  ;;  %5814 = vmatprep.subr.mxu0 %v8270_v33 }
 0x314   : > { %v3967_v60 = vpop.f32.mrf.mxu0  ;;  %4470 = vmatprep.mubr.f32.mxu1 %v2876_v16  ;;  %7291 = vmatpush3.msra.mxu1 %v3600_v2  ;;  %v3753_v45 = vadd.f32 %v10027_v18, %v3752_v57  ;;  %v3071_v57 = vld [vmem:[#allocation2 + $0x199] sm:$0xff] }
 0x315   : > { %v10156_v7 = vadd.f32 %v3967_v60, %v3743_v56  ;;  %v3754_v50 = vpop.f32.mrf.mxu1  ;;  %7292 = vmatprep.subr.mxu1 %v3599_v31 }
 0x316   : > { %v3969_v37 = vpop.f32.mrf.mxu0  ;;  %7293 = vmatpush3.msra.mxu1 %v3599_v31 }
 0x317   : > { %v3757_v24 = vpop.f32.mrf.mxu1  ;;  %4471 = vmatmul.mubr.f32.gmra.mxu1 %v11940_v11  ;;  %7294 = vmatprep.subr.mxu1 %v3598_v53  ;;  %v3007_v37 = vld [vmem:[#allocation2 + $0x198] sm:$0xff]  ;;  %v3072_v11 = vld [vmem:[#allocation2 + $0x1a1] sm:$0xff] }
 0x318   : > { %v3972_v16 = vpop.f32.mrf.mxu0  ;;  %4475 = vmatprep.mubr.f32.mxu1 %v10108_v25  ;;  %7295 = vmatpush3.msra.mxu1 %v3598_v53  ;;  %v5671_v53 = vld [vmem:[%s11707_s3 + $0x60] sm:$0xff] }
 0x319   : > { %v10167_v32 = vadd.f32 %v3972_v16, %v3748_v59  ;;  %v3759_v5 = vpop.f32.mrf.mxu1  ;;  %7296 = vmatprep.subr.mxu1 %v3597_v34  ;;  %v3587_v16 = vld [vmem:[%s11706_s2 + $0x410] sm:$0xff]  ;;  %5815 = vmatpush1.msra.mxu0 %v5671_v53  ;;  %v3109_v53 = vld [vmem:[#allocation2 + $0x62] sm:$0xff] }
 0x31a   : > { %v3974_v54 = vpop.f32.mrf.mxu0  ;;  %7297 = vmatpush3.msra.mxu1 %v3597_v34  ;;  %v3588_v34 = vld [vmem:[%s11706_s2 + $0x418] sm:$0xff]  ;;  %5816 = vmatprep.subr.mxu0 %v8270_v33 }
 0x31b   : > { %v3762_v2 = vpop.f32.mrf.mxu1  ;;  %4476 = vmatmul.mubr.f32.gmra.mxu1 %v11941_v48  ;;  %7298 = vmatprep.subr.mxu1 %v3596_v10  ;;  %v5670_v54 = vld [vmem:[%s11707_s3 + $0x58] sm:$0xff] }
 0x31c   : > { %v3977_v25 = vpop.f32.mrf.mxu0  ;;  %4480 = vmatprep.mubr.f32.mxu1 %v10122_v8  ;;  %7299 = vmatpush3.msra.mxu1 %v3596_v10  ;;  %v3758_v8 = vadd.f32 %v10027_v18, %v3757_v24  ;;  %v3763_v6 = vadd.f32 %v10027_v18, %v3762_v2  ;;  %v3586_v2 = vld [vmem:[%s11706_s2 + $0x408] sm:$0xff] }
 0x31d   : > { %v10178_v27 = vadd.f32 %v3977_v25, %v3753_v45  ;;  %v3764_v42 = vpop.f32.mrf.mxu1  ;;  %7300 = vmatprep.subr.mxu1 %v3595_v41  ;;  %v3008_v45 = vld [vmem:[#allocation2 + $0x1a0] sm:$0xff]  ;;  %5817 = vmatpush1.msra.mxu0 %v5670_v54 }
 0x31e   : > { %v3979_v12 = vpop.f32.mrf.mxu0  ;;  %7301 = vmatpush3.msra.mxu1 %v3595_v41  ;;  %v3585_v42 = vld [vmem:[%s11706_s2 + $0x400] sm:$0xff]  ;;  %5818 = vmatprep.subr.mxu0 %v8270_v33 }
 0x31f   : > { %v3767_v0 = vpop.f32.mrf.mxu1  ;;  %4481 = vmatmul.mubr.f32.gmra.mxu1 %v9939_v29  ;;  %7302 = vmatprep.subr.mxu1 %v3594_v58  ;;  %v3111_v54 = vld [vmem:[#allocation2 + $0x7a] sm:$0xff] }
 0x320   : > { %v3982_v52 = vpop.f32.mrf.mxu0  ;;  %4485 = vmatprep.mubr.f32.mxu1 %v10132_v1  ;;  %7303 = vmatpush3.msra.mxu1 %v3594_v58  ;;  %v3591_v1 = vld [vmem:[%s11706_s2 + $0x430] sm:$0xff] }
 0x321   : > { %v10192_v9 = vadd.f32 %v3982_v52, %v3758_v8  ;;  %v3769_v35 = vpop.f32.mrf.mxu1  ;;  %7304 = vmatprep.subr.mxu1 %v3593_v43  ;;  %v5669_v8 = vld [vmem:[%s11707_s3 + $0x50] sm:$0xff] }
 0x322   : > { %v3984_v29 = vpop.f32.mrf.mxu0  ;;  %7305 = vmatpush3.msra.mxu1 %v3593_v43  ;;  %v3105_v43 = vld [vmem:[#allocation2 + $0x32] sm:$0xff]  ;;  %v5668_v35 = vld [vmem:[%s11707_s3 + $0x48] sm:$0xff]  ;;  %5819 = vmatpush1.msra.mxu0 %v5669_v8 }
 0x323   : > { %v3772_v46 = vpop.f32.mrf.mxu1  ;;  %4486 = vmatmul.mubr.f32.gmra.mxu1 %v9946_v47  ;;  %7306 = vmatprep.subr.mxu1 %v3592_v3  ;;  %v3106_v29 = vld [vmem:[#allocation2 + $0x3a] sm:$0xff] }
 0x324   : > { %v3987_v28 = vpop.f32.mrf.mxu0  ;;  %4490 = vmatprep.mubr.f32.mxu1 %v10141_v62  ;;  %7307 = vmatpush3.msra.mxu1 %v3592_v3  ;;  %v3768_v62 = vadd.f32 %v10027_v18, %v3767_v0  ;;  %v3773_v10 = vadd.f32 %v10027_v18, %v3772_v46  ;;  %v3107_v46 = vld [vmem:[#allocation2 + $0x4a] sm:$0xff] }
 0x325   : > { %v10210_v31 = vadd.f32 %v3987_v28, %v3763_v6  ;;  %v3774_v56 = vpop.f32.mrf.mxu1  ;;  %7308 = vmatprep.subr.mxu1 %v3591_v1  ;;  %5820 = vmatprep.subr.mxu0 %v8270_v33 }
 0x326   : > { %v3989_v47 = vpop.f32.mrf.mxu0  ;;  %7309 = vmatpush3.msra.mxu1 %v3591_v1  ;;  %5821 = vmatpush1.msra.mxu0 %v5668_v35 }
 0x327   : > { %v3777_v60 = vpop.f32.mrf.mxu1  ;;  %4491 = vmatmul.mubr.f32.gmra.mxu1 %v9953_v40  ;;  %7310 = vmatprep.subr.mxu1 %v3590_v13 }
 0x328   : > { %v3992_v50 = vpop.f32.mrf.mxu0  ;;  %7311 = vmatpush3.msra.mxu1 %v3590_v13  ;;  %4495 = vmatprep.mubr.f32.mxu1 %v3071_v57  ;;  %v3778_v55 = vadd.f32 %v10027_v18, %v3777_v60  ;;  %v5666_v57 = vld [vmem:[%s11707_s3 + $0x38] sm:$0xff] }
 0x329   : > { %v10224_v59 = vadd.f32 %v3992_v50, %v3768_v62  ;;  %v3779_v24 = vpop.f32.mrf.mxu1  ;;  %7312 = vmatprep.subr.mxu1 %v3589_v19  ;;  %5822 = vmatprep.subr.mxu0 %v8270_v33 }
 0x32a   : > { %v3994_v40 = vpop.f32.mrf.mxu0  ;;  %7313 = vmatpush3.msra.mxu1 %v3589_v19  ;;  %v3108_v19 = vld [vmem:[#allocation2 + $0x52] sm:$0xff]  ;;  %5823 = vmatpush1.msra.mxu0 %v5667_v44 }
 0x32b   : > { %v3782_v5 = vpop.f32.mrf.mxu1  ;;  %4496 = vmatmul.mubr.f32.gmra.mxu1 %v3007_v37  ;;  %7314 = vmatprep.subr.mxu1 %v3588_v34  ;;  %v5665_v24 = vld [vmem:[%s11707_s3 + $0x30] sm:$0xff] }
 0x32c   : > { %v3997_v41 = vpop.f32.mrf.mxu0  ;;  %7315 = vmatpush3.msra.mxu1 %v3588_v34  ;;  %4500 = vmatprep.mubr.f32.mxu1 %v3072_v11  ;;  %v3783_v1 = vadd.f32 %v10027_v18, %v3782_v5  ;;  %v3110_v40 = vld [vmem:[#allocation2 + $0x6a] sm:$0xff] }
 0x32d   : > { %v10237_v48 = vadd.f32 %v3997_v41, %v3773_v10  ;;  %v3784_v25 = vpop.f32.mrf.mxu1  ;;  %7316 = vmatprep.subr.mxu1 %v3587_v16  ;;  %5824 = vmatprep.subr.mxu0 %v8270_v33 }
 0x32e   : > { %v3999_v58 = vpop.f32.mrf.mxu0  ;;  %7317 = vmatpush3.msra.mxu1 %v3587_v16  ;;  %5825 = vmatpush1.msra.mxu0 %v5666_v57  ;;  %v5664_v16 = vld [vmem:[%s11707_s3 + $0x28] sm:$0xff]  ;;  %v5663_v25 = vld [vmem:[%s11707_s3 + $0x20] sm:$0xff] }
 0x32f   : > { %v3787_v12 = vpop.f32.mrf.mxu1  ;;  %4501 = vmatmul.mubr.f32.gmra.mxu1 %v3008_v45  ;;  %7318 = vmatprep.subr.mxu1 %v3586_v2 }
 0x330   : > { %v4002_v0 = vpop.f32.mrf.mxu0  ;;  %7319 = vmatpush3.msra.mxu1 %v3586_v2  ;;  %7322 = vmatprep.mubr.f32.mxu1 %v3105_v43  ;;  %v3788_v62 = vadd.f32 %v10027_v18, %v3787_v12  ;;  %v3113_v43 = vld [vmem:[#allocation2 + $0x92] sm:$0xff] }
 0x331   : > { %v10247_v52 = vadd.f32 %v4002_v0, %v3778_v55  ;;  %v3789_v3 = vpop.f32.mrf.mxu1  ;;  %7320 = vmatprep.subr.mxu1 %v3585_v42  ;;  %5826 = vmatprep.subr.mxu0 %v8270_v33  ;;  %v5662_v0 = vld [vmem:[%s11707_s3 + $0x18] sm:$0xff] }
 0x332   : > { %v4004_v30 = vpop.f32.mrf.mxu0  ;;  %7321 = vmatpush3.msra.mxu1 %v3585_v42  ;;  %5827 = vmatpush1.msra.mxu0 %v5665_v24  ;;  %v3112_v42 = vld [vmem:[#allocation2 + $0x82] sm:$0xff] }
 0x333   : > { %v3792_v6 = vpop.f32.mrf.mxu1  ;;  %7323 = vmatmul.mubr.f32.vlgmr.msra.gmra.mxu1 %v3106_v29  ;;  %6033 = vmatprep.subr.mxu1 %v8270_v33  ;;  %v3114_v29 = vld [vmem:[#allocation2 + $0x9a] sm:$0xff]  ;;  %v3117_v24 = vld [vmem:[#allocation2 + $0xc2] sm:$0xff] }
 0x334   : > { %v4007_v28 = vpop.f32.mrf.mxu0  ;;  %7325 = vmatprep.mubr.f32.mxu1 %v3107_v46  ;;  %v3793_v10 = vadd.f32 %v10027_v18, %v3792_v6  ;;  %5828 = vmatprep.subr.mxu0 %v8270_v33  ;;  %v3115_v46 = vld [vmem:[#allocation2 + $0xaa] sm:$0xff] }
 0x335   : > { %v10258_v13 = vadd.f32 %v4007_v28, %v3783_v1  ;;  %v3794_v56 = vpop.f32.mrf.mxu1  ;;  %5829 = vmatpush1.msra.mxu0 %v5664_v16  ;;  %v5661_v28 = vld [vmem:[%s11707_s3 + $0x10] sm:$0xff] }
 0x336   : > { %v4009_v47 = vpop.f32.mrf.mxu0  ;;  %5830 = vmatprep.subr.mxu0 %v8270_v33  ;;  %v5706_v56 = vld [vmem:[%s11707_s3 + $0x178] sm:$0xff] }
 0x337   : > { %v3797_v60 = vpop.f32.mrf.mxu1  ;;  %7326 = vmatmul.mubr.f32.gmra.mxu1 %v3108_v19  ;;  %5831 = vmatpush1.msra.mxu0 %v5663_v25  ;;  %v5660_v19 = vld [vmem:[%s11707_s3 + $0x8] sm:$0xff] }
 0x338   : > { %v4012_v50 = vpop.f32.mrf.mxu0  ;;  %7328 = vmatprep.mubr.f32.mxu1 %v3109_v53  ;;  %v3798_v55 = vadd.f32 %v10027_v18, %v3797_v60  ;;  %5832 = vmatprep.subr.mxu0 %v8270_v33  ;;  %v3116_v53 = vld [vmem:[#allocation2 + $0xb2] sm:$0xff] }
 0x339   : > { %v10267_v37 = vadd.f32 %v4012_v50, %v3788_v62  ;;  %v3799_v34 = vpop.f32.mrf.mxu1  ;;  %5833 = vmatpush1.msra.mxu0 %v5662_v0  ;;  %6034 = vmatpush1.msra.mxu1 %v5706_v56  ;;  %v5705_v62 = vld [vmem:[%s11707_s3 + $0x170] sm:$0xff] }
 0x33a   : > { %v4014_v11 = vpop.f32.mrf.mxu0  ;;  %5834 = vmatprep.subr.mxu0 %v8270_v33  ;;  %6035 = vmatprep.subr.mxu1 %v8270_v33 }
 0x33b   : > { %v3802_v5 = vpop.f32.mrf.mxu1  ;;  %7329 = vmatmul.mubr.f32.gmra.mxu1 %v3110_v40  ;;  %5835 = vmatpush1.msra.mxu0 %v5661_v28  ;;  %v5704_v40 = vld [vmem:[%s11707_s3 + $0x168] sm:$0xff]  ;;  %v5689_v28 = vld [vmem:[%s11707_s3 + $0xf0] sm:$0xff] }
 0x33c   : > { %v4017_v41 = vpop.f32.mrf.mxu0  ;;  %7331 = vmatprep.mubr.f32.mxu1 %v3111_v54  ;;  %v3803_v1 = vadd.f32 %v10027_v18, %v3802_v5  ;;  %5836 = vmatprep.subr.mxu0 %v8270_v33  ;;  %v5659_v5 = vld [vmem:[%s11707_s3] sm:$0xff] }
 0x33d   : > { %v10278_v45 = vadd.f32 %v4017_v41, %v3793_v10  ;;  %v3804_v2 = vpop.f32.mrf.mxu1  ;;  %5837 = vmatpush1.msra.mxu0 %v5660_v19  ;;  %6036 = vmatpush1.msra.mxu1 %v5705_v62  ;;  %v5703_v54 = vld [vmem:[%s11707_s3 + $0x160] sm:$0xff]  ;;  %v5700_v19 = vld [vmem:[%s11707_s3 + $0x148] sm:$0xff] }
 0x33e   : > { %v4019_v58 = vpop.f32.mrf.mxu0  ;;  %6037 = vmatprep.subr.mxu1 %v8270_v33  ;;  %5838 = vmatprep.subr.mxu0 %v8270_v33  ;;  %v3118_v2 = vld [vmem:[#allocation2 + $0xca] sm:$0xff] }
 0x33f   : > { %v3807_v12 = vpop.f32.mrf.mxu1  ;;  %7332 = vmatmul.mubr.f32.gmra.mxu1 %v3112_v42  ;;  %5839 = vmatpush1.msra.mxu0 %v5659_v5  ;;  %v3119_v42 = vld [vmem:[#allocation2 + $0xda] sm:$0xff]  ;;  %v5688_v62 = vld [vmem:[%s11707_s3 + $0xe8] sm:$0xff] }
 0x340   : > { %v4022_v8 = vpop.f32.mrf.mxu0  ;;  %7334 = vmatprep.mubr.f32.mxu1 %v3113_v43  ;;  %v3808_v50 = vadd.f32 %v10027_v18, %v3807_v12  ;;  %6038 = vmatpush1.msra.mxu1 %v5704_v40  ;;  %v5690_v12 = vld [vmem:[%s11707_s3 + $0xf8] sm:$0xff] }
 0x341   : > { %v10289_v3 = vadd.f32 %v4022_v8, %v3798_v55  ;;  %v3809_v35 = vpop.f32.mrf.mxu1  ;;  %6039 = vmatprep.subr.mxu1 %v8270_v33  ;;  %v5702_v43 = vld [vmem:[%s11707_s3 + $0x158] sm:$0xff]  ;;  %5840 = vmatprep.subr.mxu0 %v8270_v33 }
 0x342   : > { %v4024_v30 = vpop.f32.mrf.mxu0  ;;  %6040 = vmatpush1.msra.mxu1 %v5703_v54  ;;  %5841 = vmatpush2.msra.mxu0 %v5690_v12  ;;  %v5697_v12 = vld [vmem:[%s11707_s3 + $0x130] sm:$0xff] }
 0x343   : > { %v3812_v6 = vpop.f32.mrf.mxu1  ;;  %7335 = vmatmul.mubr.f32.gmra.mxu1 %v3114_v29  ;;  %6041 = vmatprep.subr.mxu1 %v8270_v33  ;;  %v3120_v30 = vld [vmem:[#allocation2 + $0xe2] sm:$0xff]  ;;  %v5701_v29 = vld [vmem:[%s11707_s3 + $0x150] sm:$0xff] }
 0x344   : > { %v4027_v44 = vpop.f32.mrf.mxu0  ;;  %7337 = vmatprep.mubr.f32.mxu1 %v3115_v46  ;;  %v3813_v25 = vadd.f32 %v10027_v18, %v3812_v6  ;;  %6042 = vmatpush1.msra.mxu1 %v5702_v43  ;;  %v3121_v46 = vld [vmem:[#allocation2 + $0xf2] sm:$0xff] }
 0x345   : > { %v10299_v57 = vadd.f32 %v4027_v44, %v3803_v1  ;;  %v3814_v47 = vpop.f32.mrf.mxu1  ;;  %6043 = vmatprep.subr.mxu1 %v8270_v33  ;;  %5842 = vmatprep.subr.mxu0 %v8270_v33 }
 0x346   : > { %v4029_v60 = vpop.f32.mrf.mxu0  ;;  %6044 = vmatpush1.msra.mxu1 %v5701_v29  ;;  %5843 = vmatpush2.msra.mxu0 %v5689_v28  ;;  %v5696_v29 = vld [vmem:[%s11707_s3 + $0x128] sm:$0xff] }
 0x347   : > { %v3817_v34 = vpop.f32.mrf.mxu1  ;;  %7338 = vmatmul.mubr.f32.gmra.mxu1 %v3116_v53  ;;  %v3122_v53 = vld [vmem:[#allocation2 + $0xfa] sm:$0xff]  ;;  %6045 = vmatprep.subr.mxu1 %v8270_v33 }
 0x348   : > { %v4032_v11 = vpop.f32.mrf.mxu0  ;;  %7340 = vmatprep.mubr.f32.mxu1 %v3117_v24  ;;  %v3818_v1 = vadd.f32 %v10027_v18, %v3817_v34  ;;  %5844 = vmatprep.subr.mxu0 %v8270_v33  ;;  %v3123_v24 = vld [vmem:[#allocation2 + $0x10a] sm:$0xff] }
 0x349   : > { %v10313_v16 = vadd.f32 %v4032_v11, %v3808_v50  ;;  %v3819_v10 = vpop.f32.mrf.mxu1  ;;  %5845 = vmatpush2.msra.mxu0 %v5688_v62  ;;  %v5699_v11 = vld [vmem:[%s11707_s3 + $0x140] sm:$0xff]  ;;  %6046 = vmatpush1.msra.mxu1 %v5700_v19  ;;  %v5685_v19 = vld [vmem:[%s11707_s3 + $0xd0] sm:$0xff] }
 0x34a   : > { %v4034_v41 = vpop.f32.mrf.mxu0  ;;  %6047 = vmatprep.subr.mxu1 %v8270_v33  ;;  %5846 = vmatprep.subr.mxu0 %v8270_v33 }
 0x34b   : > { %v3822_v58 = vpop.f32.mrf.mxu1  ;;  %7341 = vmatmul.mubr.f32.gmra.mxu1 %v3118_v2  ;;  %v5698_v41 = vld [vmem:[%s11707_s3 + $0x138] sm:$0xff]  ;;  %v5687_v2 = vld [vmem:[%s11707_s3 + $0xe0] sm:$0xff] }
 0x34c   : > { %v4037_v55 = vpop.f32.mrf.mxu0  ;;  %7343 = vmatprep.mubr.f32.mxu1 %v3119_v42  ;;  %v3823_v50 = vadd.f32 %v10027_v18, %v3822_v58  ;;  %v3124_v58 = vld [vmem:[#allocation2 + $0x112] sm:$0xff]  ;;  %6048 = vmatpush1.msra.mxu1 %v5699_v11  ;;  %v5684_v11 = vld [vmem:[%s11707_s3 + $0xc8] sm:$0xff] }
 0x34d   : > { %v10331_v8 = vadd.f32 %v4037_v55, %v3813_v25  ;;  %v3824_v0 = vpop.f32.mrf.mxu1  ;;  %5847 = vmatpush2.msra.mxu0 %v5687_v2  ;;  %v3125_v55 = vld [vmem:[#allocation2 + $0x122] sm:$0xff]  ;;  %6049 = vmatprep.subr.mxu1 %v8270_v33 }
 0x34e   : > { %v4039_v35 = vpop.f32.mrf.mxu0  ;;  %6050 = vmatpush1.msra.mxu1 %v5698_v41  ;;  %5848 = vmatprep.subr.mxu0 %v8270_v33 }
 0x34f   : > { %v3827_v6 = vpop.f32.mrf.mxu1  ;;  %7344 = vmatmul.mubr.f32.gmra.mxu1 %v3120_v30  ;;  %v5686_v35 = vld [vmem:[%s11707_s3 + $0xd8] sm:$0xff]  ;;  %6051 = vmatprep.subr.mxu1 %v8270_v33 }
 0x350   : > { %v4042_v44 = vpop.f32.mrf.mxu0  ;;  %7346 = vmatprep.mubr.f32.mxu1 %v3121_v46  ;;  %6052 = vmatpush1.msra.mxu1 %v5697_v12  ;;  %v3127_v46 = vld [vmem:[#allocation2 + $0x13a] sm:$0xff] }
 0x351   : > { %v10344_v56 = vadd.f32 %v4042_v44, %v3818_v1  ;;  %v3829_v47 = vpop.f32.mrf.mxu1  ;;  %5849 = vmatpush2.msra.mxu0 %v5686_v35  ;;  %6053 = vmatprep.subr.mxu1 %v8270_v33  ;;  %v5695_v44 = vld [vmem:[%s11707_s3 + $0x120] sm:$0xff] }
 0x352   : > { %v4044_v60 = vpop.f32.mrf.mxu0  ;;  %6054 = vmatpush1.msra.mxu1 %v5696_v29  ;;  %5850 = vmatprep.subr.mxu0 %v8270_v33  ;;  %v5691_v29 = vld [vmem:[%s11707_s3 + $0x100] sm:$0xff] }
 0x353   : > { %v4122_v34 = vpop.f32.mrf.mxu1  ;;  %7347 = vmatmul.mubr.f32.gmra.mxu1 %v3122_v53  ;;  %6055 = vmatprep.subr.mxu1 %v8270_v33  ;;  %v5694_v53 = vld [vmem:[%s11707_s3 + $0x118] sm:$0xff] }
 0x354   : > { %v4047_v40 = vpop.f32.mrf.mxu0  ;;  %v4123_v10 = vadd.f32 %v4122_v34, %v10037_v39  ;;  %7349 = vmatprep.mubr.f32.mxu1 %v3123_v24  ;;  %v3828_v39 = vadd.f32 %v10027_v18, %v3827_v6  ;;  %v3126_v6 = vld [vmem:[#allocation2 + $0x12a] sm:$0xff]  ;;  %6056 = vmatpush1.msra.mxu1 %v5695_v44  ;;  %v3129_v24 = vld [vmem:[#allocation2 + $0x152] sm:$0xff] }
 0x355   : > { %v10359_v5 = vadd.f32 %v4047_v40, %v3823_v50  ;;  %v4124_v54 = vpop.f32.mrf.mxu1  ;;  %5851 = vmatpush2.msra.mxu0 %v5685_v19  ;;  %6057 = vmatprep.subr.mxu1 %v8270_v33  ;;  %v5693_v40 = vld [vmem:[%s11707_s3 + $0x110] sm:$0xff] }
 0x356   : > { %v4049_v25 = vpop.f32.mrf.mxu0  ;;  %6058 = vmatpush1.msra.mxu1 %v5694_v53  ;;  %5852 = vmatprep.subr.mxu0 %v8270_v33 }
 0x357   : > { %v4127_v42 = vpop.f32.mrf.mxu1  ;;  %7350 = vmatmul.mubr.f32.gmra.mxu1 %v3124_v58  ;;  %6059 = vmatprep.subr.mxu1 %v8270_v33  ;;  %v3130_v58 = vld [vmem:[#allocation2 + $0x15a] sm:$0xff] }
 0x358   : > { %v4052_v43 = vpop.f32.mrf.mxu0  ;;  %v4128_v0 = vadd.f32 %v4127_v42, %v10045_v15  ;;  %7352 = vmatprep.mubr.f32.mxu1 %v3125_v55  ;;  %5853 = vmatpush2.msra.mxu0 %v5684_v11  ;;  %v3131_v55 = vld [vmem:[#allocation2 + $0x16a] sm:$0xff]  ;;  %v3136_v11 = vld [vmem:[#allocation2 + $0x1a2] sm:$0xff] }
 0x359   : > { %v10378_v30 = vadd.f32 %v4052_v43, %v3828_v39  ;;  %v4129_v18 = vpop.f32.mrf.mxu1  ;;  %6060 = vmatpush1.msra.mxu1 %v5693_v40  ;;  %v5692_v39 = vld [vmem:[%s11707_s3 + $0x108] sm:$0xff]  ;;  %5854 = vmatprep.subr.mxu0 %v8270_v33 }
 0x35a   : > { %v4054_v1 = vpop.f32.mrf.mxu0  ;;  %6061 = vmatprep.subr.mxu1 %v8270_v33 }
 0x35b   : > { %v4132_v15 = vpop.f32.mrf.mxu1  ;;  %7353 = vmatmul.mubr.f32.gmra.mxu1 %v3126_v6  ;;  %v3132_v6 = vld [vmem:[#allocation2 + $0x172] sm:$0xff] }
 0x35c   : > { %v4133_v28 = vadd.f32 %v4132_v15, %v10052_v26  ;;  %v4347_v47 = vpop.f32.mrf.mxu0  ;;  %7355 = vmatprep.mubr.f32.mxu1 %v3127_v46  ;;  %v3128_v26 = vld [vmem:[#allocation2 + $0x142] sm:$0xff]  ;;  %6062 = vmatpush1.msra.mxu1 %v5692_v39  ;;  %v5722_v15 = vld [vmem:[%s11707_s3 + $0x1f8] sm:$0xff] }
 0x35d   : > { %v10393_v62 = vadd.f32 %v4347_v47, %v4123_v10  ;;  %v4134_v60 = vpop.f32.mrf.mxu1  ;;  %6063 = vmatprep.subr.mxu1 %v8270_v33 }
 0x35e   : > { %v4349_v50 = vpop.f32.mrf.mxu0  ;;  %6064 = vmatpush1.msra.mxu1 %v5691_v29  ;;  %v3135_v60 = vld [vmem:[#allocation2 + $0x19a] sm:$0xff] }
 0x35f   : > { %v4137_v34 = vpop.f32.mrf.mxu1  ;;  %7356 = vmatmul.mubr.f32.gmra.mxu1 %v3128_v26  ;;  %6065 = vmatprep.subr.mxu1 %v8270_v33  ;;  %v5720_v50 = vld [vmem:[%s11707_s3 + $0x1e8] sm:$0xff] }
 0x360   : > { %v4138_v10 = vadd.f32 %v4137_v34, %v10059_v23  ;;  %v4352_v54 = vpop.f32.mrf.mxu0  ;;  %7358 = vmatprep.mubr.f32.mxu1 %v3129_v24  ;;  %v5683_v23 = vld [vmem:[%s11707_s3 + $0xc0] sm:$0xff]  ;;  %6066 = vmatpush2.msra.mxu1 %v5722_v15  ;;  %v5680_v26 = vld [vmem:[%s11707_s3 + $0xa8] sm:$0xff] }
 0x361   : > { %v10408_v41 = vadd.f32 %v4352_v54, %v4128_v0  ;;  %v4139_v2 = vpop.f32.mrf.mxu1  ;;  %v5682_v0 = vld [vmem:[%s11707_s3 + $0xb8] sm:$0xff]  ;;  %5855 = vmatpush2.msra.mxu0 %v5683_v23  ;;  %6067 = vmatprep.subr.mxu1 %v8270_v33 }
 0x362   : > { %v4354_v25 = vpop.f32.mrf.mxu0  ;;  %5856 = vmatprep.subr.mxu0 %v8270_v33  ;;  %v5678_v23 = vld [vmem:[%s11707_s3 + $0x98] sm:$0xff] }
 0x363   : > { %v4142_v42 = vpop.f32.mrf.mxu1  ;;  %7359 = vmatmul.mubr.f32.gmra.mxu1 %v3130_v58  ;;  %5857 = vmatpush2.msra.mxu0 %v5682_v0  ;;  %v5718_v25 = vld [vmem:[%s11707_s3 + $0x1d8] sm:$0xff] }
 0x364   : > { %v4143_v12 = vadd.f32 %v4142_v42, %v10066_v14  ;;  %v4357_v43 = vpop.f32.mrf.mxu0  ;;  %7361 = vmatprep.mubr.f32.mxu1 %v3131_v55  ;;  %5858 = vmatprep.subr.mxu0 %v8270_v33 }
 0x365   : > { %v10424_v35 = vadd.f32 %v4357_v43, %v4133_v28  ;;  %v4144_v18 = vpop.f32.mrf.mxu1  ;;  %v5681_v28 = vld [vmem:[%s11707_s3 + $0xb0] sm:$0xff] }
 0x366   : > { %v4359_v1 = vpop.f32.mrf.mxu0  ;;  %5859 = vmatpush2.msra.mxu0 %v5681_v28  ;;  %v5716_v18 = vld [vmem:[%s11707_s3 + $0x1c8] sm:$0xff] }
 0x367   : > { %v4147_v14 = vpop.f32.mrf.mxu1  ;;  %7362 = vmatmul.mubr.f32.gmra.mxu1 %v3132_v6  ;;  %5860 = vmatprep.subr.mxu0 %v8270_v33  ;;  %v5676_v6 = vld [vmem:[%s11707_s3 + $0x88] sm:$0xff] }
 0x368   : > { %v4148_v46 = vadd.f32 %v4147_v14, %v10073_v20  ;;  %v4362_v44 = vpop.f32.mrf.mxu0  ;;  %7364 = vmatprep.mubr.f32.mxu1 %v10127_v4  ;;  %v5721_v20 = vld [vmem:[%s11707_s3 + $0x1f0] sm:$0xff]  ;;  %5861 = vmatpush2.msra.mxu0 %v5680_v26 }
 0x369   : > { %v10439_v47 = vadd.f32 %v4362_v44, %v4138_v10  ;;  %v4149_v19 = vpop.f32.mrf.mxu1  ;;  %6068 = vmatpush2.msra.mxu1 %v5721_v20  ;;  %5862 = vmatprep.subr.mxu0 %v8270_v33 }
 0x36a   : > { %v4364_v53 = vpop.f32.mrf.mxu0  ;;  %6069 = vmatprep.subr.mxu1 %v8270_v33  ;;  %v5714_v19 = vld [vmem:[%s11707_s3 + $0x1b8] sm:$0xff] }
 0x36b   : > { %v4152_v4 = vpop.f32.mrf.mxu1  ;;  %7365 = vmatmul.mubr.f32.gmra.mxu1 %v10136_v17  ;;  %v5719_v17 = vld [vmem:[%s11707_s3 + $0x1e0] sm:$0xff] }
 0x36c   : > { %v4153_v34 = vadd.f32 %v4152_v4, %v10080_v36  ;;  %v4367_v24 = vpop.f32.mrf.mxu0  ;;  %7367 = vmatprep.mubr.f32.mxu1 %v3135_v60  ;;  %6070 = vmatpush2.msra.mxu1 %v5720_v50  ;;  %v5679_v36 = vld [vmem:[%s11707_s3 + $0xa0] sm:$0xff] }
 0x36d   : > { %v10455_v40 = vadd.f32 %v4367_v24, %v4143_v12  ;;  %v4154_v10 = vpop.f32.mrf.mxu1  ;;  %6071 = vmatprep.subr.mxu1 %v8270_v33  ;;  %5863 = vmatpush2.msra.mxu0 %v5679_v36  ;;  %v5717_v12 = vld [vmem:[%s11707_s3 + $0x1d0] sm:$0xff]  ;;  %v4859_v60 = vld [vmem:[#allocation2 + $0x1] sm:$0xff] }
 0x36e   : > { %v4369_v54 = vpop.f32.mrf.mxu0  ;;  %6072 = vmatpush2.msra.mxu1 %v5719_v17  ;;  %5864 = vmatprep.subr.mxu0 %v8270_v33  ;;  %v4795_v4 = vld [vmem:[#allocation2] sm:$0xff]  ;;  %v5712_v10 = vld [vmem:[%s11707_s3 + $0x1a8] sm:$0xff] }
 0x36f   : > { %v4157_v2 = vpop.f32.mrf.mxu1  ;;  %7368 = vmatmul.mubr.f32.gmra.mxu1 %v3136_v11  ;;  %6073 = vmatprep.subr.mxu1 %v8270_v33  ;;  %v4860_v11 = vld [vmem:[#allocation2 + $0x9] sm:$0xff] }
 0x370   : > { %v4158_v58 = vadd.f32 %v4157_v2, %v10087_v63  ;;  %v4372_v39 = vpop.f32.mrf.mxu0  ;;  %6074 = vmatpush2.msra.mxu1 %v5718_v25  ;;  %v5677_v63 = vld [vmem:[%s11707_s3 + $0x90] sm:$0xff]  ;;  %5865 = vmatpush2.msra.mxu0 %v5678_v23  ;;  %v4796_v36 = vld [vmem:[#allocation2 + $0x8] sm:$0xff] }
 0x371   : > { %v10474_v42 = vadd.f32 %v4372_v39, %v4148_v46  ;;  %v4159_v55 = vpop.f32.mrf.mxu1  ;;  %6075 = vmatprep.subr.mxu1 %v8270_v33  ;;  %5866 = vmatprep.subr.mxu0 %v8270_v33  ;;  %v5715_v46 = vld [vmem:[%s11707_s3 + $0x1c0] sm:$0xff] }
 0x372   : > { %v4374_v43 = vpop.f32.mrf.mxu0  ;;  %6076 = vmatpush2.msra.mxu1 %v5717_v12  ;;  %5867 = vmatpush2.msra.mxu0 %v5677_v63 }
 0x373   : > { %v4162_v0 = vpop.f32.mrf.mxu1  ;;  %6077 = vmatprep.subr.mxu1 %v8270_v33  ;;  %5868 = vmatprep.subr.mxu0 %v8270_v33  ;;  %v5738_v43 = vld [vmem:[%s11707_s3 + $0x278] sm:$0xff] }
 0x374   : > { %v4163_v29 = vadd.f32 %v4162_v0, %v10097_v51  ;;  %v4377_v1 = vpop.f32.mrf.mxu0  ;;  %6078 = vmatpush2.msra.mxu1 %v5716_v18  ;;  %v5675_v51 = vld [vmem:[%s11707_s3 + $0x80] sm:$0xff]  ;;  %5869 = vmatpush2.msra.mxu0 %v5676_v6  ;;  %v5709_v18 = vld [vmem:[%s11707_s3 + $0x190] sm:$0xff] }
 0x375   : > { %v10493_v14 = vadd.f32 %v4377_v1, %v4153_v34  ;;  %v4164_v15 = vpop.f32.mrf.mxu1  ;;  %6079 = vmatprep.subr.mxu1 %v8270_v33  ;;  %5870 = vmatprep.subr.mxu0 %v8270_v33  ;;  %v5713_v34 = vld [vmem:[%s11707_s3 + $0x1b0] sm:$0xff]  ;;  %v5708_v1 = vld [vmem:[%s11707_s3 + $0x188] sm:$0xff] }
 0x376   : > { %v4379_v44 = vpop.f32.mrf.mxu0  ;;  %6080 = vmatpush2.msra.mxu1 %v5715_v46  ;;  %5871 = vmatpush2.msra.mxu0 %v5675_v51  ;;  %v5737_v46 = vld [vmem:[%s11707_s3 + $0x270] sm:$0xff] }
 0x377   : > { %v4167_v28 = vpop.f32.mrf.mxu1  ;;  %6081 = vmatprep.subr.mxu1 %v8270_v33  ;;  %5872 = vmatprep.mubr.f32.mxu0 %v4859_v60 }
 0x378   : > { %v4168_v20 = vadd.f32 %v4167_v28, %v10105_v61  ;;  %v4382_v53 = vpop.f32.mrf.mxu0  ;;  %6082 = vmatpush2.msra.mxu1 %v5714_v19  ;;  %5873 = vmatmul.mubr.f32.vlgmr.msra.gmra.mxu0 %v4795_v4  ;;  %v5707_v28 = vld [vmem:[%s11707_s3 + $0x180] sm:$0xff] }
 0x379   : > { %v10509_v50 = vadd.f32 %v4382_v53, %v4158_v58  ;;  %v4169_v26 = vpop.f32.mrf.mxu1  ;;  %6083 = vmatprep.subr.mxu1 %v8270_v33  ;;  %6258 = vmatprep.subr.mxu0 %v8270_v33  ;;  %v5711_v58 = vld [vmem:[%s11707_s3 + $0x1a0] sm:$0xff]  ;;  %v5736_v53 = vld [vmem:[%s11707_s3 + $0x268] sm:$0xff] }
 0x37a   : > { %v4384_v24 = vpop.f32.mrf.mxu0  ;;  %6084 = vmatpush2.msra.mxu1 %v5713_v34  ;;  %5877 = vmatprep.mubr.f32.mxu0 %v4860_v11 }
 0x37b   : > { %v4172_v61 = vpop.f32.mrf.mxu1  ;;  %6085 = vmatprep.subr.mxu1 %v8270_v33  ;;  %6259 = vmatpush1.msra.mxu0 %v5738_v43 }
 0x37c   : > { %v4173_v17 = vadd.f32 %v4172_v61, %v10119_v49  ;;  %v4387_v54 = vpop.f32.mrf.mxu0  ;;  %6086 = vmatpush2.msra.mxu1 %v5712_v10  ;;  %v5710_v49 = vld [vmem:[%s11707_s3 + $0x198] sm:$0xff]  ;;  %5878 = vmatmul.mubr.f32.gmra.mxu0 %v4796_v36 }
 0x37d   : > { %v10521_v2 = vadd.f32 %v4387_v54, %v4163_v29  ;;  %v4174_v25 = vpop.f32.mrf.mxu1  ;;  %6087 = vmatprep.subr.mxu1 %v8270_v33  ;;  %6260 = vmatprep.subr.mxu0 %v8270_v33 }
 0x37e   : > { %v4389_v39 = vpop.f32.mrf.mxu0  ;;  %6088 = vmatpush2.msra.mxu1 %v5711_v58  ;;  %6261 = vmatpush1.msra.mxu0 %v5737_v46 }
 0x37f   : > { %v4177_v23 = vpop.f32.mrf.mxu1  ;;  %6089 = vmatprep.subr.mxu1 %v8270_v33  ;;  %6262 = vmatprep.subr.mxu0 %v8270_v33 }
 0x380   : > { %v4178_v55 = vadd.f32 %v4177_v23, %v10130_v21  ;;  %v4392_v12 = vpop.f32.mrf.mxu0  ;;  %6090 = vmatpush2.msra.mxu1 %v5710_v49  ;;  %6263 = vmatpush1.msra.mxu0 %v5736_v53 }
 0x381   : > { %v10535_v63 = vadd.f32 %v4392_v12, %v4168_v20  ;;  %v4179_v0 = vpop.f32.mrf.mxu1  ;;  %6091 = vmatprep.subr.mxu1 %v8270_v33  ;;  %6264 = vmatprep.subr.mxu0 %v8270_v33 }
 0x382   : > { %v4394_v29 = vpop.f32.mrf.mxu0  ;;  %6092 = vmatpush2.msra.mxu1 %v5709_v18 }
 0x383   : > { %v4182_v21 = vpop.f32.mrf.mxu1  ;;  %6093 = vmatprep.subr.mxu1 %v8270_v33 }
 0x384   : > { %v4183_v6 = vadd.f32 %v4182_v21, %v10139_v22  ;;  %v4397_v15 = vpop.f32.mrf.mxu0  ;;  %6094 = vmatpush2.msra.mxu1 %v5708_v1 }
 0x385   : > { %v10550_v44 = vadd.f32 %v4397_v15, %v4173_v17  ;;  %v4184_v51 = vpop.f32.mrf.mxu1  ;;  %6095 = vmatprep.subr.mxu1 %v8270_v33 }
 0x386   : > { %v4399_v19 = vpop.f32.mrf.mxu0  ;;  %6096 = vmatpush2.msra.mxu1 %v5707_v28 }
 0x387   : > { %v4187_v22 = vpop.f32.mrf.mxu1  ;;  %6483 = vmatprep.subr.mxu1 %v8270_v33 }
 0x388   : > { %v4188_v60 = vadd.f32 %v4187_v22, %v10146_v38  ;;  %v4402_v20 = vpop.f32.mrf.mxu0  ;;  %v5735_v38 = vld [vmem:[%s11707_s3 + $0x260] sm:$0xff] }
 0x389   : > { %v10562_v4 = vadd.f32 %v4402_v20, %v4178_v55  ;;  %v4189_v26 = vpop.f32.mrf.mxu1  ;;  %6265 = vmatpush1.msra.mxu0 %v5735_v38 }
 0x38a   : > { %v4404_v34 = vpop.f32.mrf.mxu0  ;;  %6266 = vmatprep.subr.mxu0 %v8270_v33 }
 0x38b   : > { %v4192_v24 = vpop.f32.mrf.mxu1 }
 0x38c   : > { %v4193_v11 = vadd.f32 %v4192_v24, %v10156_v7  ;;  %v4407_v61 = vpop.f32.mrf.mxu0  ;;  %v5734_v7 = vld [vmem:[%s11707_s3 + $0x258] sm:$0xff] }
 0x38d   : > { %v10570_v10 = vadd.f32 %v4407_v61, %v4183_v6  ;;  %v4194_v17 = vpop.f32.mrf.mxu1  ;;  %6267 = vmatpush1.msra.mxu0 %v5734_v7 }
 0x38e   : > { %v4409_v54 = vpop.f32.mrf.mxu0  ;;  %6268 = vmatprep.subr.mxu0 %v8270_v33 }
 0x38f   : > { %v4197_v36 = vpop.f32.mrf.mxu1 }
 0x390   : > { %v4198_v25 = vadd.f32 %v4197_v36, %v10167_v32  ;;  %v4412_v58 = vpop.f32.mrf.mxu0  ;;  %v5733_v32 = vld [vmem:[%s11707_s3 + $0x250] sm:$0xff] }
 0x391   : > { %v10577_v39 = vadd.f32 %v4412_v58, %v4188_v60  ;;  %v4199_v23 = vpop.f32.mrf.mxu1  ;;  %6269 = vmatpush1.msra.mxu0 %v5733_v32 }
 0x392   : > { %v4414_v49 = vpop.f32.mrf.mxu0  ;;  %6270 = vmatprep.subr.mxu0 %v8270_v33 }
 0x393   : > { %v4202_v55 = vpop.f32.mrf.mxu1 }
 0x394   : > { %v4203_v12 = vadd.f32 %v4202_v55, %v10178_v27  ;;  %v4417_v43 = vpop.f32.mrf.mxu0  ;;  %v5732_v27 = vld [vmem:[%s11707_s3 + $0x248] sm:$0xff] }
 0x395   : > { %v10584_v0 = vadd.f32 %v4417_v43, %v4193_v11  ;;  %v4204_v18 = vpop.f32.mrf.mxu1  ;;  %6271 = vmatpush1.msra.mxu0 %v5732_v27 }
 0x396   : > { %v4419_v29 = vpop.f32.mrf.mxu0  ;;  %6272 = vmatprep.subr.mxu0 %v8270_v33 }
 0x397   : > { %v4207_v21 = vpop.f32.mrf.mxu1 }
 0x398   : > { %v4208_v1 = vadd.f32 %v4207_v21, %v10192_v9  ;;  %v4422_v6 = vpop.f32.mrf.mxu0  ;;  %v5731_v9 = vld [vmem:[%s11707_s3 + $0x240] sm:$0xff] }
 0x399   : > { %v10591_v15 = vadd.f32 %v4422_v6, %v4198_v25  ;;  %v4209_v46 = vpop.f32.mrf.mxu1  ;;  %6273 = vmatpush1.msra.mxu0 %v5731_v9 }
 0x39a   : > { %v4424_v51 = vpop.f32.mrf.mxu0  ;;  %6274 = vmatprep.subr.mxu0 %v8270_v33 }
 0x39b   : > { %v4212_v28 = vpop.f32.mrf.mxu1 }
 0x39c   : > { %v4213_v19 = vadd.f32 %v4212_v28, %v10210_v31  ;;  %v4427_v22 = vpop.f32.mrf.mxu0  ;;  %v5730_v31 = vld [vmem:[%s11707_s3 + $0x238] sm:$0xff] }
 0x39d   : > { %v10598_v60 = vadd.f32 %v4427_v22, %v4203_v12  ;;  %v4214_v20 = vpop.f32.mrf.mxu1  ;;  %6275 = vmatpush1.msra.mxu0 %v5730_v31 }
 0x39e   : > { %v4429_v53 = vpop.f32.mrf.mxu0  ;;  %6276 = vmatprep.subr.mxu0 %v8270_v33 }
 0x39f   : > { %v4217_v26 = vpop.f32.mrf.mxu1 }
 0x3a0   : > { %v4218_v34 = vadd.f32 %v4217_v26, %v10224_v59  ;;  %v4432_v24 = vpop.f32.mrf.mxu0  ;;  %v5729_v59 = vld [vmem:[%s11707_s3 + $0x230] sm:$0xff] }
 0x3a1   : > { %v10605_v11 = vadd.f32 %v4432_v24, %v4208_v1  ;;  %v4219_v61 = vpop.f32.mrf.mxu1  ;;  %6277 = vmatpush1.msra.mxu0 %v5729_v59 }
 0x3a2   : > { %v4434_v38 = vpop.f32.mrf.mxu0  ;;  %6278 = vmatprep.subr.mxu0 %v8270_v33  ;;  %v5724_v61 = vld [vmem:[%s11707_s3 + $0x208] sm:$0xff] }
 0x3a3   : > { %v4222_v17 = vpop.f32.mrf.mxu1 }
 0x3a4   : > { %v4223_v54 = vadd.f32 %v4222_v17, %v10237_v48  ;;  %v4437_v36 = vpop.f32.mrf.mxu0  ;;  %v5728_v48 = vld [vmem:[%s11707_s3 + $0x228] sm:$0xff] }
 0x3a5   : > { %v10612_v25 = vadd.f32 %v4437_v36, %v4213_v19  ;;  %v4224_v58 = vpop.f32.mrf.mxu1  ;;  %6279 = vmatpush1.msra.mxu0 %v5728_v48 }
 0x3a6   : > { %v4439_v7 = vpop.f32.mrf.mxu0  ;;  %6280 = vmatprep.subr.mxu0 %v8270_v33 }
 0x3a7   : > { %v4227_v23 = vpop.f32.mrf.mxu1 }
 0x3a8   : > { %v4228_v49 = vadd.f32 %v4227_v23, %v10247_v52  ;;  %v4442_v55 = vpop.f32.mrf.mxu0  ;;  %v5727_v52 = vld [vmem:[%s11707_s3 + $0x220] sm:$0xff] }
 0x3a9   : > { %v10619_v12 = vadd.f32 %v4442_v55, %v4218_v34  ;;  %v4229_v43 = vpop.f32.mrf.mxu1  ;;  %6281 = vmatpush1.msra.mxu0 %v5727_v52 }
 0x3aa   : > { %v4444_v32 = vpop.f32.mrf.mxu0  ;;  %6282 = vmatprep.subr.mxu0 %v8270_v33  ;;  %v5753_v43 = vld [vmem:[%s11707_s3 + $0x2f0] sm:$0xff] }
 0x3ab   : > { %v4232_v18 = vpop.f32.mrf.mxu1 }
 0x3ac   : > { %v4233_v29 = vadd.f32 %v4232_v18, %v10258_v13  ;;  %v4447_v21 = vpop.f32.mrf.mxu0  ;;  %v5726_v13 = vld [vmem:[%s11707_s3 + $0x218] sm:$0xff] }
 0x3ad   : > { %v10626_v1 = vadd.f32 %v4447_v21, %v4223_v54  ;;  %v4234_v6 = vpop.f32.mrf.mxu1  ;;  %6283 = vmatpush1.msra.mxu0 %v5726_v13  ;;  %v5723_v54 = vld [vmem:[%s11707_s3 + $0x200] sm:$0xff] }
 0x3ae   : > { %v4449_v27 = vpop.f32.mrf.mxu0  ;;  %6284 = vmatprep.subr.mxu0 %v8270_v33  ;;  %v5751_v6 = vld [vmem:[%s11707_s3 + $0x2e0] sm:$0xff] }
 0x3af   : > { %v4237_v46 = vpop.f32.mrf.mxu1 }
 0x3b0   : > { %v4238_v51 = vadd.f32 %v4237_v46, %v10267_v37  ;;  %v4452_v28 = vpop.f32.mrf.mxu0  ;;  %v5725_v37 = vld [vmem:[%s11707_s3 + $0x210] sm:$0xff] }
 0x3b1   : > { %v10633_v19 = vadd.f32 %v4452_v28, %v4228_v49  ;;  %v4239_v22 = vpop.f32.mrf.mxu1  ;;  %6285 = vmatpush1.msra.mxu0 %v5725_v37 }
 0x3b2   : > { %v4454_v9 = vpop.f32.mrf.mxu0  ;;  %6286 = vmatprep.subr.mxu0 %v8270_v33  ;;  %v5749_v22 = vld [vmem:[%s11707_s3 + $0x2d0] sm:$0xff] }
 0x3b3   : > { %v4242_v20 = vpop.f32.mrf.mxu1  ;;  %6287 = vmatpush1.msra.mxu0 %v5724_v61 }
 0x3b4   : > { %v4243_v53 = vadd.f32 %v4242_v20, %v10278_v45  ;;  %v4457_v26 = vpop.f32.mrf.mxu0  ;;  %6288 = vmatprep.subr.mxu0 %v8270_v33 }
 0x3b5   : > { %v10640_v34 = vadd.f32 %v4457_v26, %v4233_v29  ;;  %v4244_v24 = vpop.f32.mrf.mxu1  ;;  %6289 = vmatpush1.msra.mxu0 %v5723_v54  ;;  %v5752_v29 = vld [vmem:[%s11707_s3 + $0x2e8] sm:$0xff] }
 0x3b6   : > { %v4459_v31 = vpop.f32.mrf.mxu0  ;;  %6290 = vmatprep.subr.mxu0 %v8270_v33  ;;  %v5748_v26 = vld [vmem:[%s11707_s3 + $0x2c8] sm:$0xff] }
 0x3b7   : > { %v4247_v38 = vpop.f32.mrf.mxu1  ;;  %v5747_v31 = vld [vmem:[%s11707_s3 + $0x2c0] sm:$0xff] }
 0x3b8   : > { %v4248_v45 = vadd.f32 %v4247_v38, %v10289_v3  ;;  %v4462_v17 = vpop.f32.mrf.mxu0  ;;  %v5754_v3 = vld [vmem:[%s11707_s3 + $0x2f8] sm:$0xff] }
 0x3b9   : > { %v10651_v36 = vadd.f32 %v4462_v17, %v4238_v51  ;;  %v4249_v59 = vpop.f32.mrf.mxu1  ;;  %6291 = vmatpush2.msra.mxu0 %v5754_v3  ;;  %v5750_v51 = vld [vmem:[%s11707_s3 + $0x2d8] sm:$0xff] }
 0x3ba   : > { %v4464_v58 = vpop.f32.mrf.mxu0  ;;  %6292 = vmatprep.subr.mxu0 %v8270_v33  ;;  %v5746_v17 = vld [vmem:[%s11707_s3 + $0x2b8] sm:$0xff] }
 0x3bb   : > { %v4252_v7 = vpop.f32.mrf.mxu1  ;;  %6293 = vmatpush2.msra.mxu0 %v5753_v43  ;;  %v5745_v58 = vld [vmem:[%s11707_s3 + $0x2b0] sm:$0xff] }
 0x3bc   : > { %v4253_v23 = vadd.f32 %v4252_v7, %v10299_v57  ;;  %6294 = vmatprep.subr.mxu0 %v8270_v33 }
 0x3bd   : > { %v4254_v49 = vpop.f32.mrf.mxu1  ;;  %6295 = vmatpush2.msra.mxu0 %v5752_v29 }
 0x3be   : > { %6296 = vmatprep.subr.mxu0 %v8270_v33  ;;  %v5744_v49 = vld [vmem:[%s11707_s3 + $0x2a8] sm:$0xff] }
 0x3bf   : > { %v4257_v55 = vpop.f32.mrf.mxu1  ;;  %6297 = vmatpush2.msra.mxu0 %v5751_v6  ;;  %v5741_v6 = vld [vmem:[%s11707_s3 + $0x290] sm:$0xff] }
 0x3c0   : > { %v4258_v48 = vadd.f32 %v4257_v55, %v10313_v16  ;;  %6298 = vmatprep.subr.mxu0 %v8270_v33 }
 0x3c1   : > { %v4259_v32 = vpop.f32.mrf.mxu1  ;;  %6299 = vmatpush2.msra.mxu0 %v5750_v51  ;;  %v5740_v51 = vld [vmem:[%s11707_s3 + $0x288] sm:$0xff] }
 0x3c2   : > { %6300 = vmatprep.subr.mxu0 %v8270_v33  ;;  %v5743_v32 = vld [vmem:[%s11707_s3 + $0x2a0] sm:$0xff] }
 0x3c3   : > { %v4262_v57 = vpop.f32.mrf.mxu1  ;;  %6301 = vmatpush2.msra.mxu0 %v5749_v22 }
 0x3c4   : > { %v4263_v18 = vadd.f32 %v4262_v57, %v10331_v8  ;;  %6302 = vmatprep.subr.mxu0 %v8270_v33 }
 0x3c5   : > { %v4264_v21 = vpop.f32.mrf.mxu1  ;;  %6303 = vmatpush2.msra.mxu0 %v5748_v26 }
 0x3c6   : > { %6304 = vmatprep.subr.mxu0 %v8270_v33  ;;  %v5742_v21 = vld [vmem:[%s11707_s3 + $0x298] sm:$0xff] }
 0x3c7   : > { %v4267_v16 = vpop.f32.mrf.mxu1  ;;  %6305 = vmatpush2.msra.mxu0 %v5747_v31 }
 0x3c8   : > { %v4268_v52 = vadd.f32 %v4267_v16, %v10344_v56  ;;  %6306 = vmatprep.subr.mxu0 %v8270_v33 }
 0x3c9   : > { %v4269_v27 = vpop.f32.mrf.mxu1  ;;  %6307 = vmatpush2.msra.mxu0 %v5746_v17 }
 0x3ca   : > { %6308 = vmatprep.subr.mxu0 %v8270_v33 }
 0x3cb   : > { %v4272_v8 = vpop.f32.mrf.mxu1  ;;  %6309 = vmatpush2.msra.mxu0 %v5745_v58 }
 0x3cc   : > { %v4273_v46 = vadd.f32 %v4272_v8, %v10359_v5  ;;  %6310 = vmatprep.subr.mxu0 %v8270_v33 }
 0x3cd   : > { %v4274_v28 = vpop.f32.mrf.mxu1  ;;  %6311 = vmatpush2.msra.mxu0 %v5744_v49 }
 0x3ce   : > { %6312 = vmatprep.subr.mxu0 %v8270_v33 }
 0x3cf   : > { %v4277_v56 = vpop.f32.mrf.mxu1  ;;  %6313 = vmatpush2.msra.mxu0 %v5743_v32 }
 0x3d0   : > { %v10680_v13 = vadd.f32 %v4277_v56, %v10378_v30  ;;  %6314 = vmatprep.subr.mxu0 %v8270_v33 }
 0x3d1   : > { %v4279_v9 = vpop.f32.mrf.mxu1  ;;  %6315 = vmatpush2.msra.mxu0 %v5742_v21 }
 0x3d2   : > { %6316 = vmatprep.subr.mxu0 %v8270_v33 }
 0x3d3   : > { %v4467_v5 = vpop.f32.mrf.mxu1  ;;  %6317 = vmatpush2.msra.mxu0 %v5741_v6 }
 0x3d4   : > { %v10686_v20 = vadd.f32 %v4467_v5, %v4243_v53  ;;  %6318 = vmatprep.subr.mxu0 %v8270_v33 }
 0x3d5   : > { %v4469_v37 = vpop.f32.mrf.mxu1  ;;  %6319 = vmatpush2.msra.mxu0 %v5740_v51 }
 0x3d6   : > { %6320 = vmatprep.subr.mxu0 %v8270_v33 }
 0x3d7   : > { %v4472_v30 = vpop.f32.mrf.mxu1 }
 0x3d8   : > { %v10692_v24 = vadd.f32 %v4472_v30, %v4248_v45 }
 0x3d9   : > { %v4474_v61 = vpop.f32.mrf.mxu1 }
 0x3da   : > { %v10751_v61 = vld [vmem:[%s11707_s3 + $0x478] sm:$0xff] }
 0x3db   : > { %v4477_v53 = vpop.f32.mrf.mxu1 }
 0x3dc   : > { %v10698_v38 = vadd.f32 %v4477_v53, %v4253_v23 }
 0x3dd   : > { %v4479_v54 = vpop.f32.mrf.mxu1 }
 0x3df   : > { %v4482_v45 = vpop.f32.mrf.mxu1 }
 0x3e0   : > { %v10704_v59 = vadd.f32 %v4482_v45, %v4258_v48 }
 0x3e1   : > { %v4484_v7 = vpop.f32.mrf.mxu1 }
 0x3e3   : > { %v4487_v23 = vpop.f32.mrf.mxu1 }
 0x3e4   : > { %v10710_v3 = vadd.f32 %v4487_v23, %v4263_v18 }
 0x3e5   : > { %v4489_v55 = vpop.f32.mrf.mxu1 }
 0x3e6   : > { %v5770_v55 = vld [vmem:[%s11707_s3 + $0x378] sm:$0xff] }
 0x3e7   : > { %v4492_v48 = vpop.f32.mrf.mxu1 }
 0x3e8   : > { %v10716_v43 = vadd.f32 %v4492_v48, %v4268_v52 }
 0x3e9   : > { %v4494_v57 = vpop.f32.mrf.mxu1 }
 0x3ea   : > { %v5769_v57 = vld [vmem:[%s11707_s3 + $0x370] sm:$0xff] }
 0x3eb   : > { %v4497_v18 = vpop.f32.mrf.mxu1 }
 0x3ec   : > { %v10722_v29 = vadd.f32 %v4497_v18, %v4273_v46 }
 0x3ed   : > { %v4499_v16 = vpop.f32.mrf.mxu1 }
 0x3ef   : > { %v10728_v52 = vpop.f32.mrf.mxu1 }
 0x3f1   : > { %v4504_v27 = vpop.f32.mrf.mxu1 }
 0x3f3   : > { %v7324_v8 = vpop.f32.mrf.mxu1 }
 0x3f4   : > { %v4578_v46 = vadd.f32 %v7324_v8, %v10408_v41  ;;  %v5739_v41 = vld [vmem:[%s11707_s3 + $0x280] sm:$0xff] }
 0x3f5   : > { %v4572_v28 = vpop.f32.mrf.mxu1  ;;  %6321 = vmatpush2.msra.mxu0 %v5739_v41 }
 0x3f6   : > { %v4732_v56 = vmax.f32 %v4578_v46, 0.0  ;;  %v4573_v22 = vadd.f32 %v4572_v28, %v10393_v62  ;;  %7370 = vmatprep.subr.mxu0 %v10751_v61 }
 0x3f7   : > { %v7327_v9 = vpop.f32.mrf.mxu1 }
 0x3f8   : > { %4764 = vst [vmem:[#allocation2 + $0x21] sm:$0xff] %v4732_v56  ;;  %v4731_v5 = vmax.f32 %v4573_v22, 0.0  ;;  %v10741_v26 = vadd.f32 %v7327_v9, %v10439_v47 }
 0x3f9   : > { %v4582_v37 = vpop.f32.mrf.mxu1 }
 0x3fa   : > { %4763 = vst [vmem:[#allocation2 + $0x19] sm:$0xff] %v4731_v5  ;;  %v4734_v30 = vmax.f32 %v10741_v26, 0.0  ;;  %v4583_v31 = vadd.f32 %v4582_v37, %v10424_v35  ;;  %5882 = vmatprep.mubr.f32.mxu0 %v4731_v5  ;;  %v5766_v37 = vld [vmem:[%s11707_s3 + $0x358] sm:$0xff] }
 0x3fb   : > { %v7330_v62 = vpop.f32.mrf.mxu1 }
 0x3fc   : > { %4766 = vst [vmem:[#allocation2 + $0x39] sm:$0xff] %v4734_v30  ;;  %v4733_v47 = vmax.f32 %v4583_v31, 0.0  ;;  %v10756_v53 = vadd.f32 %v7330_v62, %v10474_v42  ;;  %v4923_v42 = vld [vmem:[#allocation2 + $0x2] sm:$0xff] }
 0x3fd   : > { %v4592_v17 = vpop.f32.mrf.mxu1 }
 0x3fe   : > { %4765 = vst [vmem:[#allocation2 + $0x31] sm:$0xff] %v4733_v47  ;;  %v4736_v35 = vmax.f32 %v10756_v53, 0.0  ;;  %v10761_v54 = vadd.f32 %v4592_v17, %v10455_v40 }
 0x3ff   : > { %v7333_v45 = vpop.f32.mrf.mxu1 }
 0x400   : > { %4768 = vst [vmem:[#allocation2 + $0x51] sm:$0xff] %v4736_v35  ;;  %v4735_v58 = vmax.f32 %v10761_v54, 0.0  ;;  %v10767_v7 = vadd.f32 %v7333_v45, %v10509_v50  ;;  %v5764_v54 = vld [vmem:[%s11707_s3 + $0x348] sm:$0xff] }
 0x401   : > { %v4602_v23 = vpop.f32.mrf.mxu1  ;;  %v4987_v49 = vld [vmem:[#allocation2 + $0x18] sm:$0xff]  ;;  %v4988_v50 = vld [vmem:[#allocation2 + $0x20] sm:$0xff] }
 0x402   : > { %4767 = vst [vmem:[#allocation2 + $0x49] sm:$0xff] %v4735_v58  ;;  %v4738_v40 = vmax.f32 %v10767_v7, 0.0  ;;  %v10776_v48 = vadd.f32 %v4602_v23, %v10493_v14  ;;  %6097 = vmatprep.mubr.f32.mxu1 %v4987_v49  ;;  %5883 = vmatmul.mubr.f32.gmra.mxu0 %v4987_v49  ;;  %v4924_v14 = vld [vmem:[#allocation2 + $0xa] sm:$0xff] }
 0x403   : > { %v7336_v32 = vpop.f32.mrf.mxu1  ;;  %6098 = vmatmul.mubr.f32.vlgmr.msra.gmra.mxu1 %v4923_v42  ;;  %5887 = vmatprep.mubr.f32.mxu0 %v4732_v56  ;;  %v5767_v56 = vld [vmem:[%s11707_s3 + $0x360] sm:$0xff] }
 0x404   : > { %4770 = vst [vmem:[#allocation2 + $0x69] sm:$0xff] %v4738_v40  ;;  %v4737_v18 = vmax.f32 %v10776_v48, 0.0  ;;  %v10785_v21 = vadd.f32 %v7336_v32, %v10535_v63  ;;  %6102 = vmatprep.mubr.f32.mxu1 %v4988_v50  ;;  %6484 = vmatpush1.msra.mxu1 %v5770_v55  ;;  %v5768_v63 = vld [vmem:[%s11707_s3 + $0x368] sm:$0xff]  ;;  %v5761_v48 = vld [vmem:[%s11707_s3 + $0x330] sm:$0xff] }
 0x405   : > { %v4612_v16 = vpop.f32.mrf.mxu1  ;;  %6485 = vmatprep.subr.mxu1 %v8270_v33  ;;  %v4989_v46 = vld [vmem:[#allocation2 + $0x30] sm:$0xff]  ;;  %v10819_v41 = vld [vmem:[#allocation2 + $0x38] sm:$0xff] }
 0x406   : > { %4769 = vst [vmem:[#allocation2 + $0x61] sm:$0xff] %v4737_v18  ;;  %v4740_v6 = vmax.f32 %v10785_v21, 0.0  ;;  %v10792_v27 = vadd.f32 %v4612_v16, %v10521_v2  ;;  %5888 = vmatmul.mubr.f32.gmra.mxu0 %v4988_v50  ;;  %6486 = vmatpush1.msra.mxu1 %v5769_v57  ;;  %v5763_v50 = vld [vmem:[%s11707_s3 + $0x340] sm:$0xff] }
 0x407   : > { %v7339_v8 = vpop.f32.mrf.mxu1  ;;  %6103 = vmatmul.mubr.f32.gmra.mxu1 %v4924_v14  ;;  %5892 = vmatprep.mubr.f32.mxu0 %v4733_v47  ;;  %v10839_v47 = vld [vmem:[#allocation2 + $0x22] sm:$0xff]  ;;  %v10893_v16 = vld [vmem:[#allocation2 + $0x3a] sm:$0xff] }
 0x408   : > { %4772 = vst [vmem:[#allocation2 + $0x81] sm:$0xff] %v4740_v6  ;;  %v4739_v51 = vmax.f32 %v10792_v27, 0.0  ;;  %v10801_v28 = vadd.f32 %v7339_v8, %v10562_v4  ;;  %6107 = vmatprep.mubr.f32.mxu1 %v4989_v46  ;;  %6487 = vmatprep.subr.mxu1 %v8270_v33  ;;  %v10813_v4 = vld [vmem:[#allocation2 + $0x1a] sm:$0xff] }
 0x409   : > { %v4622_v2 = vpop.f32.mrf.mxu1  ;;  %6488 = vmatpush1.msra.mxu1 %v5768_v63  ;;  %v10847_v45 = vld [vmem:[#allocation2 + $0x48] sm:$0xff]  ;;  %v10873_v32 = vld [vmem:[#allocation2 + $0x50] sm:$0xff]  ;;  %v5758_v27 = vld [vmem:[%s11707_s3 + $0x318] sm:$0xff] }
 0x40a   : > { %4771 = vst [vmem:[#allocation2 + $0x79] sm:$0xff] %v4739_v51  ;;  %v4742_v22 = vmax.f32 %v10801_v28, 0.0  ;;  %v10811_v9 = vadd.f32 %v4622_v2, %v10550_v44  ;;  %5893 = vmatmul.mubr.f32.gmra.mxu0 %v4989_v46  ;;  %6489 = vmatprep.subr.mxu1 %v8270_v33  ;;  %v4503_v28 = vadd.f32 %v10728_v52, %v10680_v13 }
 0x40b   : > { %v7342_v5 = vpop.f32.mrf.mxu1  ;;  %6108 = vmatmul.mubr.f32.gmra.mxu1 %v10813_v4  ;;  %5897 = vmatprep.mubr.f32.mxu0 %v4734_v30 }
 0x40c   : > { %4774 = vst [vmem:[#allocation2 + $0x99] sm:$0xff] %v4742_v22  ;;  %v4741_v44 = vmax.f32 %v10811_v9, 0.0  ;;  %v10828_v31 = vadd.f32 %v7342_v5, %v10577_v39  ;;  %6112 = vmatprep.mubr.f32.mxu1 %v10819_v41  ;;  %6490 = vmatpush1.msra.mxu1 %v5767_v56  ;;  %v5765_v39 = vld [vmem:[%s11707_s3 + $0x350] sm:$0xff]  ;;  %v5755_v9 = vld [vmem:[%s11707_s3 + $0x300] sm:$0xff] }
 0x40d   : > { %v4632_v62 = vpop.f32.mrf.mxu1  ;;  %6491 = vmatprep.subr.mxu1 %v8270_v33  ;;  %v10901_v8 = vld [vmem:[#allocation2 + $0x60] sm:$0xff] }
 0x40e   : > { %4773 = vst [vmem:[#allocation2 + $0x91] sm:$0xff] %v4741_v44  ;;  %v4744_v26 = vmax.f32 %v10828_v31, 0.0  ;;  %v10836_v30 = vadd.f32 %v4632_v62, %v10570_v10  ;;  %5898 = vmatmul.mubr.f32.gmra.mxu0 %v10819_v41  ;;  %6492 = vmatpush1.msra.mxu1 %v5766_v37  ;;  %v10927_v37 = vld [vmem:[#allocation2 + $0x68] sm:$0xff]  ;;  %v5782_v31 = vld [vmem:[%s11707_s3 + $0x3d8] sm:$0xff] }
 0x40f   : > { %v7345_v17 = vpop.f32.mrf.mxu1  ;;  %6113 = vmatmul.mubr.f32.gmra.mxu1 %v10839_v47  ;;  %5902 = vmatprep.mubr.f32.mxu0 %v4735_v58  ;;  %v5760_v62 = vld [vmem:[%s11707_s3 + $0x328] sm:$0xff] }
 0x410   : > { %4776 = vst [vmem:[#allocation2 + $0xb1] sm:$0xff] %v4744_v26  ;;  %v4743_v10 = vmax.f32 %v10836_v30, 0.0  ;;  %v10853_v42 = vadd.f32 %v7345_v17, %v10591_v15  ;;  %6117 = vmatprep.mubr.f32.mxu1 %v10847_v45  ;;  %6493 = vmatprep.subr.mxu1 %v8270_v33  ;;  %v10867_v15 = vld [vmem:[#allocation2 + $0x32] sm:$0xff] }
 0x411   : > { %v4642_v23 = vpop.f32.mrf.mxu1  ;;  %6494 = vmatpush1.msra.mxu1 %v5765_v39 }
 0x412   : > { %4775 = vst [vmem:[#allocation2 + $0xa9] sm:$0xff] %v4743_v10  ;;  %v4746_v58 = vmax.f32 %v10853_v42, 0.0  ;;  %v10864_v49 = vadd.f32 %v4642_v23, %v10584_v0  ;;  %5903 = vmatmul.mubr.f32.gmra.mxu0 %v10847_v45  ;;  %6495 = vmatprep.subr.mxu1 %v8270_v33  ;;  %v10947_v23 = vld [vmem:[#allocation2 + $0x52] sm:$0xff]  ;;  %v5779_v42 = vld [vmem:[%s11707_s3 + $0x3c0] sm:$0xff] }
 0x413   : > { %v7348_v55 = vpop.f32.mrf.mxu1  ;;  %6118 = vmatmul.mubr.f32.gmra.mxu1 %v10867_v15  ;;  %5907 = vmatprep.mubr.f32.mxu0 %v4736_v35 }
 0x414   : > { %4778 = vst [vmem:[#allocation2 + $0xc9] sm:$0xff] %v4746_v58  ;;  %v4745_v0 = vmax.f32 %v10864_v49, 0.0  ;;  %v10882_v57 = vadd.f32 %v7348_v55, %v10605_v11  ;;  %6122 = vmatprep.mubr.f32.mxu1 %v10873_v32  ;;  %6496 = vmatpush1.msra.mxu1 %v5764_v54  ;;  %v5762_v11 = vld [vmem:[%s11707_s3 + $0x338] sm:$0xff] }
 0x415   : > { %v4652_v14 = vpop.f32.mrf.mxu1  ;;  %6497 = vmatprep.subr.mxu1 %v8270_v33  ;;  %v10955_v55 = vld [vmem:[#allocation2 + $0x78] sm:$0xff] }
 0x416   : > { %4777 = vst [vmem:[#allocation2 + $0xc1] sm:$0xff] %v4745_v0  ;;  %v4748_v53 = vmax.f32 %v10882_v57, 0.0  ;;  %v10890_v35 = vadd.f32 %v4652_v14, %v10598_v60  ;;  %5908 = vmatmul.mubr.f32.gmra.mxu0 %v10873_v32  ;;  %6498 = vmatpush1.msra.mxu1 %v5763_v50  ;;  %v5776_v57 = vld [vmem:[%s11707_s3 + $0x3a8] sm:$0xff] }
 0x417   : > { %v7351_v63 = vpop.f32.mrf.mxu1  ;;  %6123 = vmatmul.mubr.f32.gmra.mxu1 %v10893_v16  ;;  %5912 = vmatprep.mubr.f32.mxu0 %v4737_v18 }
 0x418   : > { %4780 = vst [vmem:[#allocation2 + $0xe1] sm:$0xff] %v4748_v53  ;;  %v4747_v60 = vmax.f32 %v10890_v35, 0.0  ;;  %v10907_v46 = vadd.f32 %v7351_v63, %v10619_v12  ;;  %6127 = vmatprep.mubr.f32.mxu1 %v10901_v8  ;;  %6499 = vmatprep.subr.mxu1 %v8270_v33  ;;  %v10921_v12 = vld [vmem:[#allocation2 + $0x4a] sm:$0xff] }
 0x419   : > { %v4662_v2 = vpop.f32.mrf.mxu1  ;;  %6500 = vmatpush1.msra.mxu1 %v5762_v11  ;;  %v11065_v13 = vld [vmem:[#allocation2 + $0xa8] sm:$0xff] }
 0x41a   : > { %4779 = vst [vmem:[#allocation2 + $0xd9] sm:$0xff] %v4747_v60  ;;  %v4750_v18 = vmax.f32 %v10907_v46, 0.0  ;;  %v10918_v56 = vadd.f32 %v4662_v2, %v10612_v25  ;;  %5913 = vmatmul.mubr.f32.gmra.mxu0 %v10901_v8  ;;  %6501 = vmatprep.subr.mxu1 %v8270_v33  ;;  %v10981_v2 = vld [vmem:[#allocation2 + $0x80] sm:$0xff]  ;;  %v5773_v46 = vld [vmem:[%s11707_s3 + $0x390] sm:$0xff] }
 0x41b   : > { %v7354_v5 = vpop.f32.mrf.mxu1  ;;  %6128 = vmatmul.mubr.f32.gmra.mxu1 %v10921_v12  ;;  %5917 = vmatprep.mubr.f32.mxu0 %v4738_v40 }
 0x41c   : > { %4782 = vst [vmem:[#allocation2 + $0xf9] sm:$0xff] %v4750_v18  ;;  %v4749_v25 = vmax.f32 %v10918_v56, 0.0  ;;  %v10936_v39 = vadd.f32 %v7354_v5, %v10633_v19  ;;  %6132 = vmatprep.mubr.f32.mxu1 %v10927_v37  ;;  %6502 = vmatpush1.msra.mxu1 %v5761_v48  ;;  %v5759_v19 = vld [vmem:[%s11707_s3 + $0x320] sm:$0xff]  ;;  %v5757_v48 = vld [vmem:[%s11707_s3 + $0x310] sm:$0xff] }
 0x41d   : > { %v4672_v17 = vpop.f32.mrf.mxu1  ;;  %6503 = vmatprep.subr.mxu1 %v8270_v33  ;;  %v11115_v49 = vld [vmem:[#allocation2 + $0xc8] sm:$0xff] }
 0x41e   : > { %4781 = vst [vmem:[#allocation2 + $0xf1] sm:$0xff] %v4749_v25  ;;  %v4752_v7 = vmax.f32 %v10936_v39, 0.0  ;;  %v10944_v40 = vadd.f32 %v4672_v17, %v10626_v1  ;;  %5918 = vmatmul.mubr.f32.gmra.mxu0 %v10927_v37  ;;  %6504 = vmatpush1.msra.mxu1 %v5760_v62  ;;  %v11001_v17 = vld [vmem:[#allocation2 + $0x6a] sm:$0xff] }
 0x41f   : > { %v7357_v54 = vpop.f32.mrf.mxu1  ;;  %6133 = vmatmul.mubr.f32.gmra.mxu1 %v10947_v23  ;;  %5922 = vmatprep.mubr.f32.mxu0 %v4739_v51 }
 0x420   : > { %4784 = vst [vmem:[#allocation2 + $0x111] sm:$0xff] %v4752_v7  ;;  %v4751_v1 = vmax.f32 %v10944_v40, 0.0  ;;  %v10961_v50 = vadd.f32 %v7357_v54, %v10651_v36  ;;  %6137 = vmatprep.mubr.f32.mxu1 %v10955_v55  ;;  %6505 = vmatprep.subr.mxu1 %v8270_v33  ;;  %v10975_v36 = vld [vmem:[#allocation2 + $0x62] sm:$0xff]  ;;  %v11009_v54 = vld [vmem:[#allocation2 + $0x90] sm:$0xff] }
 0x421   : > { %v4682_v14 = vpop.f32.mrf.mxu1  ;;  %6506 = vmatpush1.msra.mxu1 %v5759_v19  ;;  %v11149_v35 = vld [vmem:[#allocation2 + $0xe0] sm:$0xff] }
 0x422   : > { %4783 = vst [vmem:[#allocation2 + $0x109] sm:$0xff] %v4751_v1  ;;  %v4754_v51 = vmax.f32 %v10961_v50, 0.0  ;;  %v10972_v11 = vadd.f32 %v4682_v14, %v10640_v34  ;;  %5923 = vmatmul.mubr.f32.gmra.mxu0 %v10955_v55  ;;  %6507 = vmatprep.subr.mxu1 %v8270_v33 }
 0x423   : > { %v7360_v63 = vpop.f32.mrf.mxu1  ;;  %6138 = vmatmul.mubr.f32.gmra.mxu1 %v10975_v36  ;;  %5927 = vmatprep.mubr.f32.mxu0 %v4740_v6 }
 0x424   : > { %4786 = vst [vmem:[#allocation2 + $0x129] sm:$0xff] %v4754_v51  ;;  %v4753_v34 = vmax.f32 %v10972_v11, 0.0  ;;  %v10990_v5 = vadd.f32 %v7360_v63, %v10692_v24  ;;  %6142 = vmatprep.mubr.f32.mxu1 %v10981_v2  ;;  %6508 = vmatpush1.msra.mxu1 %v5758_v27  ;;  %v5756_v24 = vld [vmem:[%s11707_s3 + $0x308] sm:$0xff] }
 0x425   : > { %v4692_v62 = vpop.f32.mrf.mxu1  ;;  %6509 = vmatprep.subr.mxu1 %v8270_v33  ;;  %v11179_v56 = vld [vmem:[#allocation2 + $0xf8] sm:$0xff] }
 0x426   : > { %4785 = vst [vmem:[#allocation2 + $0x121] sm:$0xff] %v4753_v34  ;;  %v4756_v21 = vmax.f32 %v10990_v5, 0.0  ;;  %v10998_v6 = vadd.f32 %v4692_v62, %v10686_v20  ;;  %5928 = vmatmul.mubr.f32.gmra.mxu0 %v10981_v2  ;;  %6510 = vmatpush1.msra.mxu1 %v5757_v48  ;;  %v11035_v62 = vld [vmem:[#allocation2 + $0x98] sm:$0xff] }
 0x427   : > { %v7363_v19 = vpop.f32.mrf.mxu1  ;;  %6143 = vmatmul.mubr.f32.gmra.mxu1 %v11001_v17  ;;  %5932 = vmatprep.mubr.f32.mxu0 %v4741_v44  ;;  %v11235_v11 = vld [vmem:[#allocation2 + $0x112] sm:$0xff] }
 0x428   : > { %4788 = vst [vmem:[#allocation2 + $0x141] sm:$0xff] %v4756_v21  ;;  %v4755_v20 = vmax.f32 %v10998_v6, 0.0  ;;  %v11015_v14 = vadd.f32 %v7363_v19, %v10704_v59  ;;  %6147 = vmatprep.mubr.f32.mxu1 %v11009_v54  ;;  %6511 = vmatprep.subr.mxu1 %v8270_v33  ;;  %v11029_v59 = vld [vmem:[#allocation2 + $0x7a] sm:$0xff] }
 0x429   : > { %v4702_v27 = vpop.f32.mrf.mxu1  ;;  %6512 = vmatpush1.msra.mxu1 %v5756_v24  ;;  %v5786_v24 = vld [vmem:[%s11707_s3 + $0x3f8] sm:$0xff]  ;;  %v11209_v40 = vld [vmem:[#allocation2 + $0x110] sm:$0xff] }
 0x42a   : > { %4787 = vst [vmem:[#allocation2 + $0x139] sm:$0xff] %v4755_v20  ;;  %v11797_v44 = vmax.f32 %v11015_v14, 0.0  ;;  %v11026_v63 = vadd.f32 %v4702_v27, %v10698_v38  ;;  %5933 = vmatmul.mubr.f32.gmra.mxu0 %v11009_v54  ;;  %6513 = vmatprep.subr.mxu1 %v8270_v33 }
 0x42b   : > { %v7366_v48 = vpop.f32.mrf.mxu1  ;;  %6148 = vmatmul.mubr.f32.gmra.mxu1 %v11029_v59  ;;  %5937 = vmatprep.mubr.f32.mxu0 %v4742_v22  ;;  %v11253_v6 = vld [vmem:[#allocation2 + $0x12a] sm:$0xff] }
 0x42c   : > { %4790 = vst [vmem:[#allocation2 + $0x159] sm:$0xff] %v11797_v44  ;;  %v4757_v38 = vmax.f32 %v11026_v63, 0.0  ;;  %v11044_v19 = vadd.f32 %v7366_v48, %v10716_v43  ;;  %6152 = vmatprep.mubr.f32.mxu1 %v11035_v62  ;;  %6514 = vmatpush1.msra.mxu1 %v5755_v9  ;;  %v11057_v43 = vld [vmem:[#allocation2 + $0x82] sm:$0xff]  ;;  %v5785_v9 = vld [vmem:[%s11707_s3 + $0x3f0] sm:$0xff] }
 0x42d   : > { %v4712_v27 = vpop.f32.mrf.mxu1  ;;  %6515 = vmatprep.subr.mxu1 %v8270_v33  ;;  %v11222_v39 = vld [vmem:[#allocation2 + $0x120] sm:$0xff] }
 0x42e   : > { %4789 = vst [vmem:[#allocation2 + $0x151] sm:$0xff] %v4757_v38  ;;  %v11798_v22 = vmax.f32 %v11044_v19, 0.0  ;;  %v11054_v44 = vadd.f32 %v4712_v27, %v10710_v3  ;;  %5938 = vmatmul.mubr.f32.gmra.mxu0 %v11035_v62  ;;  %6516 = vmatpush2.msra.mxu1 %v5786_v24  ;;  %v5784_v27 = vld [vmem:[%s11707_s3 + $0x3e8] sm:$0xff] }
 0x42f   : > { %v7369_v48 = vpop.f32.mrf.mxu1  ;;  %6153 = vmatmul.mubr.f32.gmra.mxu1 %v11057_v43  ;;  %5942 = vmatprep.mubr.f32.mxu0 %v4743_v10  ;;  %v11244_v50 = vld [vmem:[#allocation2 + $0x122] sm:$0xff] }
 0x430   : > { %4792 = vst [vmem:[#allocation2 + $0x171] sm:$0xff] %v11798_v22  ;;  %v4759_v3 = vmax.f32 %v11054_v44, 0.0  ;;  %v4728_v52 = vadd.f32 %v7369_v48, %v4503_v28  ;;  %6157 = vmatprep.mubr.f32.mxu1 %v11065_v13  ;;  %6517 = vmatprep.subr.mxu1 %v8270_v33  ;;  %v11079_v22 = vld [vmem:[#allocation2 + $0x92] sm:$0xff]  ;;  %v11271_v63 = vld [vmem:[#allocation2 + $0x142] sm:$0xff] }
 0x431   : > { %v4722_v24 = vpop.f32.mrf.mxu1  ;;  %6518 = vmatpush2.msra.mxu1 %v5785_v9  ;;  %v11085_v28 = vld [vmem:[#allocation2 + $0xb0] sm:$0xff]  ;;  %v5783_v9 = vld [vmem:[%s11707_s3 + $0x3e0] sm:$0xff] }
 0x432   : > { %4791 = vst [vmem:[#allocation2 + $0x169] sm:$0xff] %v4759_v3  ;;  %v4762_v30 = vmax.f32 %v4728_v52, 0.0  ;;  %v4723_v10 = vadd.f32 %v4722_v24, %v10722_v29  ;;  %5943 = vmatmul.mubr.f32.gmra.mxu0 %v11065_v13  ;;  %6519 = vmatprep.subr.mxu1 %v8270_v33  ;;  %v11093_v29 = vld [vmem:[#allocation2 + $0x9a] sm:$0xff]  ;;  %v5781_v52 = vld [vmem:[%s11707_s3 + $0x3d0] sm:$0xff] }
 0x433   : > { %6158 = vmatmul.mubr.f32.gmra.mxu1 %v11079_v22  ;;  %5947 = vmatprep.mubr.f32.mxu0 %v4744_v26  ;;  %v11101_v26 = vld [vmem:[#allocation2 + $0xc0] sm:$0xff]  ;;  %v11109_v24 = vld [vmem:[#allocation2 + $0xaa] sm:$0xff] }
 0x434   : > { %4794 = vst [vmem:[#allocation2 + $0x189] sm:$0xff] %v4762_v30  ;;  %v4761_v48 = vmax.f32 %v4723_v10, 0.0  ;;  %6162 = vmatprep.mubr.f32.mxu1 %v11085_v28  ;;  %6520 = vmatpush2.msra.mxu1 %v5784_v27  ;;  %v11125_v10 = vld [vmem:[#allocation2 + $0xb2] sm:$0xff]  ;;  %v11262_v5 = vld [vmem:[#allocation2 + $0x13a] sm:$0xff] }
 0x435   : > { %6521 = vmatprep.subr.mxu1 %v8270_v33  ;;  %v11289_v44 = vld [vmem:[#allocation2 + $0x15a] sm:$0xff] }
 0x436   : > { %4793 = vst [vmem:[#allocation2 + $0x181] sm:$0xff] %v4761_v48  ;;  %5948 = vmatmul.mubr.f32.gmra.mxu0 %v11085_v28  ;;  %6522 = vmatpush2.msra.mxu1 %v5783_v9  ;;  %v5778_v48 = vld [vmem:[%s11707_s3 + $0x3b8] sm:$0xff] }
 0x437   : > { %6163 = vmatmul.mubr.f32.gmra.mxu1 %v11093_v29  ;;  %5952 = vmatprep.mubr.f32.mxu0 %v4745_v0  ;;  %v5780_v0 = vld [vmem:[%s11707_s3 + $0x3c8] sm:$0xff] }
 0x438   : > { %6167 = vmatprep.mubr.f32.mxu1 %v11101_v26  ;;  %6523 = vmatprep.subr.mxu1 %v8270_v33  ;;  %v11120_v27 = vpop.f32.mrf.mxu0 }
 0x439   : > { %6524 = vmatpush2.msra.mxu1 %v5782_v31 }
 0x43a   : > { %5953 = vmatmul.mubr.f32.gmra.mxu0 %v11101_v26  ;;  %6525 = vmatprep.subr.mxu1 %v8270_v33  ;;  %v5876_v30 = vpop.f32.mrf.mxu0 }
 0x43b   : > { %6168 = vmatmul.mubr.f32.gmra.mxu1 %v11109_v24  ;;  %5957 = vmatprep.mubr.f32.mxu0 %v4746_v58  ;;  %v11133_v58 = vld [vmem:[#allocation2 + $0xd8] sm:$0xff]  ;;  %v5775_v30 = vld [vmem:[%s11707_s3 + $0x3a0] sm:$0xff] }
 0x43c   : > { %6172 = vmatprep.mubr.f32.mxu1 %v11115_v49  ;;  %6526 = vmatpush2.msra.mxu1 %v5781_v52  ;;  %v11135_v9 = vpop.f32.mrf.mxu0  ;;  %v11143_v52 = vld [vmem:[#allocation2 + $0xc2] sm:$0xff] }
 0x43d   : > { %6527 = vmatprep.subr.mxu1 %v8270_v33 }
 0x43e   : > { %5958 = vmatmul.mubr.f32.gmra.mxu0 %v11115_v49  ;;  %6528 = vmatpush2.msra.mxu1 %v5780_v0  ;;  %v5881_v31 = vpop.f32.mrf.mxu0  ;;  %v11157_v0 = vld [vmem:[#allocation2 + $0xca] sm:$0xff] }
 0x43f   : > { %6173 = vmatmul.mubr.f32.gmra.mxu1 %v11125_v10  ;;  %5962 = vmatprep.mubr.f32.mxu0 %v4747_v60  ;;  %v5777_v60 = vld [vmem:[%s11707_s3 + $0x3b0] sm:$0xff]  ;;  %v5772_v31 = vld [vmem:[%s11707_s3 + $0x388] sm:$0xff] }
 0x440   : > { %6177 = vmatprep.mubr.f32.mxu1 %v11133_v58  ;;  %6529 = vmatprep.subr.mxu1 %v8270_v33 }
 0x441   : > { %6530 = vmatpush2.msra.mxu1 %v5779_v42  ;;  %v11173_v42 = vld [vmem:[#allocation2 + $0xda] sm:$0xff] }
 0x442   : > { %5963 = vmatmul.mubr.f32.gmra.mxu0 %v11133_v58  ;;  %6531 = vmatprep.subr.mxu1 %v8270_v33 }
 0x443   : > { %6178 = vmatmul.mubr.f32.gmra.mxu1 %v11143_v52  ;;  %5967 = vmatprep.mubr.f32.mxu0 %v4748_v53  ;;  %v11165_v53 = vld [vmem:[#allocation2 + $0xf0] sm:$0xff] }
 0x444   : > { %6182 = vmatprep.mubr.f32.mxu1 %v11149_v35  ;;  %6532 = vmatpush2.msra.mxu1 %v5778_v48  ;;  %v11187_v48 = vld [vmem:[#allocation2 + $0xe2] sm:$0xff] }
 0x445   : > { %6533 = vmatprep.subr.mxu1 %v8270_v33 }
 0x446   : > { %5968 = vmatmul.mubr.f32.gmra.mxu0 %v11149_v35  ;;  %6534 = vmatpush2.msra.mxu1 %v5777_v60  ;;  %v11203_v60 = vld [vmem:[#allocation2 + $0xf2] sm:$0xff] }
 0x447   : > { %6183 = vmatmul.mubr.f32.gmra.mxu1 %v11157_v0  ;;  %5972 = vmatprep.mubr.f32.mxu0 %v4749_v25  ;;  %v5774_v25 = vld [vmem:[%s11707_s3 + $0x398] sm:$0xff] }
 0x448   : > { %6187 = vmatprep.mubr.f32.mxu1 %v11165_v53  ;;  %6535 = vmatprep.subr.mxu1 %v8270_v33 }
 0x449   : > { %6536 = vmatpush2.msra.mxu1 %v5776_v57  ;;  %v11217_v57 = vld [vmem:[#allocation2 + $0xfa] sm:$0xff] }
 0x44a   : > { %5973 = vmatmul.mubr.f32.gmra.mxu0 %v11165_v53  ;;  %6537 = vmatprep.subr.mxu1 %v8270_v33 }
 0x44b   : > { %6188 = vmatmul.mubr.f32.gmra.mxu1 %v11173_v42  ;;  %5977 = vmatprep.mubr.f32.mxu0 %v4750_v18  ;;  %v11195_v18 = vld [vmem:[#allocation2 + $0x108] sm:$0xff] }
 0x44c   : > { %6192 = vmatprep.mubr.f32.mxu1 %v11179_v56  ;;  %6538 = vmatpush2.msra.mxu1 %v5775_v30  ;;  %v11267_v30 = vld [vmem:[#allocation2 + $0x158] sm:$0xff] }
 0x44d   : > { %6539 = vmatprep.subr.mxu1 %v8270_v33 }
 0x44e   : > { %5978 = vmatmul.mubr.f32.gmra.mxu0 %v11179_v56  ;;  %6540 = vmatpush2.msra.mxu1 %v5774_v25  ;;  %v11943_v25 = vmax.f32 %v11044_v19, 0.0  ;;  %v5801_v19 = vld [vmem:[%s11707_s3 + $0x470] sm:$0xff] }
 0x44f   : > { %6193 = vmatmul.mubr.f32.gmra.mxu1 %v11187_v48  ;;  %5982 = vmatprep.mubr.f32.mxu0 %v4751_v1  ;;  %v5771_v1 = vld [vmem:[%s11707_s3 + $0x380] sm:$0xff] }
 0x450   : > { %6197 = vmatprep.mubr.f32.mxu1 %v11195_v18  ;;  %6541 = vmatprep.subr.mxu1 %v8270_v33 }
 0x451   : > { %6542 = vmatpush2.msra.mxu1 %v5773_v46  ;;  %v11285_v46 = vld [vmem:[#allocation2 + $0x170] sm:$0xff] }
 0x452   : > { %5983 = vmatmul.mubr.f32.gmra.mxu0 %v11195_v18  ;;  %6543 = vmatprep.subr.mxu1 %v8270_v33 }
 0x453   : > { %6198 = vmatmul.mubr.f32.gmra.mxu1 %v11203_v60  ;;  %5987 = vmatprep.mubr.f32.mxu0 %v4752_v7  ;;  %v11226_v7 = vld [vmem:[#allocation2 + $0x10a] sm:$0xff] }
 0x454   : > { %6202 = vmatprep.mubr.f32.mxu1 %v11209_v40  ;;  %6544 = vmatpush2.msra.mxu1 %v5772_v31  ;;  %v5051_v31 = vld [vmem:[#allocation2 + $0x19] sm:$0xff] }
 0x455   : > { %6545 = vmatprep.subr.mxu1 %v8270_v33  ;;  %v11231_v33 = vld [vmem:[#allocation2 + $0x128] sm:$0xff] }
 0x456   : > { %5988 = vmatmul.mubr.f32.gmra.mxu0 %v11209_v40  ;;  %6546 = vmatpush2.msra.mxu1 %v5771_v1  ;;  %v11296_v1 = vld [vmem:[#allocation2 + $0x16a] sm:$0xff] }
 0x457   : > { %6203 = vmatmul.mubr.f32.gmra.mxu1 %v11217_v57  ;;  %5992 = vmatprep.mubr.f32.mxu0 %v4753_v34  ;;  %v11240_v34 = vld [vmem:[#allocation2 + $0x138] sm:$0xff] }
 0x458   : > { %6207 = vmatprep.mubr.f32.mxu1 %v11222_v39 }
 0x45a   : > { %5993 = vmatmul.mubr.f32.gmra.mxu0 %v11222_v39 }
 0x45b   : > { %6208 = vmatmul.mubr.f32.gmra.mxu1 %v11226_v7  ;;  %5997 = vmatprep.mubr.f32.mxu0 %v4754_v51  ;;  %v11249_v51 = vld [vmem:[#allocation2 + $0x140] sm:$0xff] }
 0x45c   : > { %6212 = vmatprep.mubr.f32.mxu1 %v11231_v33 }
 0x45e   : > { %5998 = vmatmul.mubr.f32.gmra.mxu0 %v11231_v33 }
 0x45f   : > { %6213 = vmatmul.mubr.f32.gmra.mxu1 %v11235_v11  ;;  %6002 = vmatprep.mubr.f32.mxu0 %v4755_v20  ;;  %v11258_v20 = vld [vmem:[#allocation2 + $0x150] sm:$0xff] }
 0x460   : > { %6217 = vmatprep.mubr.f32.mxu1 %v11240_v34 }
 0x462   : > { %6003 = vmatmul.mubr.f32.gmra.mxu0 %v11240_v34 }
 0x463   : > { %6218 = vmatmul.mubr.f32.gmra.mxu1 %v11244_v50  ;;  %6007 = vmatprep.mubr.f32.mxu0 %v4756_v21  ;;  %v11942_v21 = vmax.f32 %v11015_v14, 0.0  ;;  %v11280_v14 = vld [vmem:[#allocation2 + $0x152] sm:$0xff] }
 0x464   : > { %6222 = vmatprep.mubr.f32.mxu1 %v11249_v51 }
 0x466   : > { %6008 = vmatmul.mubr.f32.gmra.mxu0 %v11249_v51 }
 0x467   : > { %6223 = vmatmul.mubr.f32.gmra.mxu1 %v11253_v6  ;;  %6012 = vmatprep.mubr.f32.mxu0 %v4757_v38  ;;  %v11276_v38 = vld [vmem:[#allocation2 + $0x168] sm:$0xff] }
 0x468   : > { %6227 = vmatprep.mubr.f32.mxu1 %v11258_v20 }
 0x46a   : > { %6013 = vmatmul.mubr.f32.gmra.mxu0 %v11258_v20 }
 0x46b   : > { %6228 = vmatmul.mubr.f32.gmra.mxu1 %v11262_v5  ;;  %6017 = vmatprep.mubr.f32.mxu0 %v11942_v21  ;;  %v11302_v21 = vld [vmem:[#allocation2 + $0x188] sm:$0xff] }
 0x46c   : > { %6232 = vmatprep.mubr.f32.mxu1 %v11267_v30 }
 0x46e   : > { %6018 = vmatmul.mubr.f32.gmra.mxu0 %v11267_v30 }
 0x46f   : > { %6233 = vmatmul.mubr.f32.gmra.mxu1 %v11271_v63  ;;  %6022 = vmatprep.mubr.f32.mxu0 %v4759_v3  ;;  %v11292_v3 = vld [vmem:[#allocation2 + $0x180] sm:$0xff] }
 0x470   : > { %6237 = vmatprep.mubr.f32.mxu1 %v11276_v38  ;;  %11944 = vst [vmem:[#allocation16_spill] sm:$0xff] %v11292_v3 }
 0x472   : > { %6023 = vmatmul.mubr.f32.gmra.mxu0 %v11276_v38 }
 0x473   : > { %6238 = vmatmul.mubr.f32.gmra.mxu1 %v11280_v14  ;;  %6027 = vmatprep.mubr.f32.mxu0 %v11943_v25  ;;  %v11307_v25 = vld [vmem:[#allocation2 + $0x172] sm:$0xff] }
 0x474   : > { %6242 = vmatprep.mubr.f32.mxu1 %v11285_v46 }
 0x476   : > { %6028 = vmatmul.mubr.f32.gmra.mxu0 %v11285_v46 }
 0x477   : > { %6243 = vmatmul.mubr.f32.gmra.mxu1 %v11289_v44  ;;  %6322 = vmatprep.mubr.f32.mxu0 %v10813_v4  ;;  %v5052_v4 = vld [vmem:[#allocation2 + $0x21] sm:$0xff] }
 0x478   : > { %6247 = vmatprep.mubr.f32.mxu1 %v11292_v3  ;;  %v5243_v3 = vld [vmem:[#allocation2 + $0x31] sm:$0xff] }
 0x47a   : > { %6323 = vmatmul.mubr.f32.vlgmr.msra.gmra.mxu0 %v5051_v31  ;;  %v5800_v31 = vld [vmem:[%s11707_s3 + $0x468] sm:$0xff] }
 0x47b   : > { %6248 = vmatmul.mubr.f32.gmra.mxu1 %v11296_v1  ;;  %6327 = vmatprep.mubr.f32.mxu0 %v10839_v47  ;;  %v5179_v47 = vld [vmem:[#allocation2 + $0x30] sm:$0xff] }
 0x47c   : > { %6252 = vmatprep.mubr.f32.mxu1 %v11302_v21  ;;  %7371 = vmatpush3.msra.mxu0 %v10751_v61  ;;  %v5799_v61 = vld [vmem:[%s11707_s3 + $0x460] sm:$0xff] }
 0x47d   : > { %7372 = vmatprep.subr.mxu0 %v5801_v19 }
 0x47e   : > { %6328 = vmatmul.mubr.f32.gmra.mxu0 %v5052_v4  ;;  %v5244_v4 = vld [vmem:[#allocation2 + $0x39] sm:$0xff] }
 0x47f   : > { %6253 = vmatmul.mubr.f32.gmra.mxu1 %v11307_v25  ;;  %6332 = vmatprep.mubr.f32.mxu0 %v10867_v15  ;;  %v5798_v15 = vld [vmem:[%s11707_s3 + $0x458] sm:$0xff] }
 0x480   : > { %6547 = vmatprep.mubr.f32.mxu1 %v5243_v3  ;;  %7373 = vmatpush3.msra.mxu0 %v5801_v19  ;;  %v5246_v19 = vld [vmem:[#allocation2 + $0x51] sm:$0xff] }
 0x481   : > { %7374 = vmatprep.subr.mxu0 %v5800_v31 }
 0x482   : > { %6333 = vmatmul.mubr.f32.gmra.mxu0 %v5243_v3  ;;  %v5245_v3 = vld [vmem:[#allocation2 + $0x49] sm:$0xff] }
 0x483   : > { %6548 = vmatmul.mubr.f32.vlgmr.msra.gmra.mxu1 %v5179_v47  ;;  %6337 = vmatprep.mubr.f32.mxu0 %v10893_v16  ;;  %v5797_v16 = vld [vmem:[%s11707_s3 + $0x450] sm:$0xff] }
 0x484   : > { %6552 = vmatprep.mubr.f32.mxu1 %v5244_v4  ;;  %7375 = vmatpush3.msra.mxu0 %v5800_v31 }
 0x485   : > { %7376 = vmatprep.subr.mxu0 %v5799_v61 }
 0x486   : > { %6338 = vmatmul.mubr.f32.gmra.mxu0 %v5244_v4 }
 0x487   : > { %6553 = vmatmul.mubr.f32.gmra.mxu1 %v10819_v41  ;;  %6342 = vmatprep.mubr.f32.mxu0 %v10921_v12  ;;  %v5796_v41 = vld [vmem:[%s11707_s3 + $0x448] sm:$0xff] }
 0x488   : > { %6557 = vmatprep.mubr.f32.mxu1 %v5245_v3  ;;  %7377 = vmatpush3.msra.mxu0 %v5799_v61  ;;  %v5247_v12 = vld [vmem:[#allocation2 + $0x61] sm:$0xff] }
 0x489   : > { %7378 = vmatprep.subr.mxu0 %v5798_v15 }
 0x48a   : > { %6343 = vmatmul.mubr.f32.gmra.mxu0 %v5245_v3 }
 0x48b   : > { %6558 = vmatmul.mubr.f32.gmra.mxu1 %v10847_v45  ;;  %6347 = vmatprep.mubr.f32.mxu0 %v10947_v23  ;;  %v5795_v45 = vld [vmem:[%s11707_s3 + $0x440] sm:$0xff]  ;;  %v5248_v23 = vld [vmem:[#allocation2 + $0x69] sm:$0xff] }
 0x48c   : > { %6562 = vmatprep.mubr.f32.mxu1 %v5246_v19  ;;  %7379 = vmatpush3.msra.mxu0 %v5798_v15 }
 0x48d   : > { %7380 = vmatprep.subr.mxu0 %v5797_v16 }
 0x48e   : > { %6348 = vmatmul.mubr.f32.gmra.mxu0 %v5246_v19 }
 0x48f   : > { %6563 = vmatmul.mubr.f32.gmra.mxu1 %v10873_v32  ;;  %6352 = vmatprep.mubr.f32.mxu0 %v10975_v36  ;;  %v5794_v32 = vld [vmem:[%s11707_s3 + $0x438] sm:$0xff] }
 0x490   : > { %6567 = vmatprep.mubr.f32.mxu1 %v5247_v12  ;;  %7381 = vmatpush3.msra.mxu0 %v5797_v16  ;;  %v5249_v36 = vld [vmem:[#allocation2 + $0x79] sm:$0xff] }
 0x491   : > { %7382 = vmatprep.subr.mxu0 %v5796_v41 }
 0x492   : > { %6353 = vmatmul.mubr.f32.gmra.mxu0 %v5247_v12 }
 0x493   : > { %6568 = vmatmul.mubr.f32.gmra.mxu1 %v10901_v8  ;;  %6357 = vmatprep.mubr.f32.mxu0 %v11001_v17  ;;  %v5793_v8 = vld [vmem:[%s11707_s3 + $0x430] sm:$0xff]  ;;  %v5250_v17 = vld [vmem:[#allocation2 + $0x81] sm:$0xff] }
 0x494   : > { %6572 = vmatprep.mubr.f32.mxu1 %v5248_v23  ;;  %7383 = vmatpush3.msra.mxu0 %v5796_v41 }
 0x495   : > { %7384 = vmatprep.subr.mxu0 %v5795_v45 }
 0x496   : > { %6358 = vmatmul.mubr.f32.gmra.mxu0 %v5248_v23 }
 0x497   : > { %6573 = vmatmul.mubr.f32.gmra.mxu1 %v10927_v37  ;;  %6362 = vmatprep.mubr.f32.mxu0 %v11029_v59  ;;  %v5792_v37 = vld [vmem:[%s11707_s3 + $0x428] sm:$0xff]  ;;  %v5251_v59 = vld [vmem:[#allocation2 + $0x91] sm:$0xff] }
 0x498   : > { %6577 = vmatprep.mubr.f32.mxu1 %v5249_v36  ;;  %7385 = vmatpush3.msra.mxu0 %v5795_v45 }
 0x499   : > { %7386 = vmatprep.subr.mxu0 %v5794_v32 }
 0x49a   : > { %6363 = vmatmul.mubr.f32.gmra.mxu0 %v5249_v36 }
 0x49b   : > { %6578 = vmatmul.mubr.f32.gmra.mxu1 %v10955_v55  ;;  %6367 = vmatprep.mubr.f32.mxu0 %v11057_v43  ;;  %v5791_v55 = vld [vmem:[%s11707_s3 + $0x420] sm:$0xff] }
 0x49c   : > { %6582 = vmatprep.mubr.f32.mxu1 %v5250_v17  ;;  %7387 = vmatpush3.msra.mxu0 %v5794_v32  ;;  %v5252_v43 = vld [vmem:[#allocation2 + $0x99] sm:$0xff]  ;;  %v5263_v32 = vld [vmem:[#allocation2 + $0x121] sm:$0xff] }
 0x49d   : > { %7388 = vmatprep.subr.mxu0 %v5793_v8 }
 0x49e   : > { %6368 = vmatmul.mubr.f32.gmra.mxu0 %v5250_v17 }
 0x49f   : > { %6583 = vmatmul.mubr.f32.gmra.mxu1 %v10981_v2  ;;  %6372 = vmatprep.mubr.f32.mxu0 %v11079_v22  ;;  %v5790_v2 = vld [vmem:[%s11707_s3 + $0x418] sm:$0xff]  ;;  %v5253_v22 = vld [vmem:[#allocation2 + $0xa9] sm:$0xff] }
 0x4a0   : > { %6587 = vmatprep.mubr.f32.mxu1 %v5251_v59  ;;  %7389 = vmatpush3.msra.mxu0 %v5793_v8 }
 0x4a1   : > { %7390 = vmatprep.subr.mxu0 %v5792_v37 }
 0x4a2   : > { %6373 = vmatmul.mubr.f32.gmra.mxu0 %v5251_v59  ;;  %v5264_v59 = vld [vmem:[#allocation2 + $0x129] sm:$0xff] }
 0x4a3   : > { %6588 = vmatmul.mubr.f32.gmra.mxu1 %v11009_v54  ;;  %6377 = vmatprep.mubr.f32.mxu0 %v11093_v29  ;;  %v5789_v54 = vld [vmem:[%s11707_s3 + $0x410] sm:$0xff] }
 0x4a4   : > { %6592 = vmatprep.mubr.f32.mxu1 %v5252_v43  ;;  %7391 = vmatpush3.msra.mxu0 %v5792_v37  ;;  %v5254_v29 = vld [vmem:[#allocation2 + $0xb1] sm:$0xff] }
 0x4a5   : > { %7392 = vmatprep.subr.mxu0 %v5791_v55 }
 0x4a6   : > { %6378 = vmatmul.mubr.f32.gmra.mxu0 %v5252_v43 }
 0x4a7   : > { %6593 = vmatmul.mubr.f32.gmra.mxu1 %v11035_v62  ;;  %6382 = vmatprep.mubr.f32.mxu0 %v11109_v24  ;;  %v5788_v62 = vld [vmem:[%s11707_s3 + $0x408] sm:$0xff] }
 0x4a8   : > { %6597 = vmatprep.mubr.f32.mxu1 %v5253_v22  ;;  %7393 = vmatpush3.msra.mxu0 %v5791_v55  ;;  %v5255_v24 = vld [vmem:[#allocation2 + $0xc1] sm:$0xff] }
 0x4a9   : > { %7394 = vmatprep.subr.mxu0 %v5790_v2 }
 0x4aa   : > { %6383 = vmatmul.mubr.f32.gmra.mxu0 %v5253_v22 }
 0x4ab   : > { %6598 = vmatmul.mubr.f32.gmra.mxu1 %v11065_v13  ;;  %6387 = vmatprep.mubr.f32.mxu0 %v11125_v10  ;;  %v5787_v13 = vld [vmem:[%s11707_s3 + $0x400] sm:$0xff]  ;;  %v5256_v10 = vld [vmem:[#allocation2 + $0xc9] sm:$0xff] }
 0x4ac   : > { %6602 = vmatprep.mubr.f32.mxu1 %v5254_v29  ;;  %7395 = vmatpush3.msra.mxu0 %v5790_v2 }
 0x4ad   : > { %7396 = vmatprep.subr.mxu0 %v5789_v54 }
 0x4ae   : > { %6388 = vmatmul.mubr.f32.gmra.mxu0 %v5254_v29 }
 0x4af   : > { %6603 = vmatmul.mubr.f32.gmra.mxu1 %v11085_v28  ;;  %6392 = vmatprep.mubr.f32.mxu0 %v11143_v52  ;;  %v5257_v28 = vld [vmem:[#allocation2 + $0xd9] sm:$0xff]  ;;  %v11385_v52 = vld [vmem:[%s11708_s4 + $0x2] ss:$0 sm:$0xff] }
 0x4b0   : > { %6607 = vmatprep.mubr.f32.mxu1 %v5255_v24  ;;  %7397 = vmatpush3.msra.mxu0 %v5789_v54  ;;  %v5265_v54 = vld [vmem:[#allocation2 + $0x139] sm:$0xff] }
 0x4b1   : > { %7398 = vmatprep.subr.mxu0 %v5788_v62 }
 0x4b2   : > { %6393 = vmatmul.mubr.f32.gmra.mxu0 %v5255_v24 }
 0x4b3   : > { %6608 = vmatmul.mubr.f32.gmra.mxu1 %v11101_v26  ;;  %6397 = vmatprep.mubr.f32.mxu0 %v11157_v0  ;;  %v5258_v26 = vld [vmem:[#allocation2 + $0xe1] sm:$0xff]  ;;  %v5875_v0 = vadd.f32 %v11385_v52, %v11120_v27  ;;  %v5261_v27 = vld [vmem:[#allocation2 + $0x109] sm:$0xff] }
 0x4b4   : > { %6612 = vmatprep.mubr.f32.mxu1 %v5256_v10  ;;  %7399 = vmatpush3.msra.mxu0 %v5788_v62 }
 0x4b5   : > { %7400 = vmatprep.subr.mxu0 %v5787_v13 }
 0x4b6   : > { %6398 = vmatmul.mubr.f32.gmra.mxu0 %v5256_v10  ;;  %v5266_v10 = vld [vmem:[#allocation2 + $0x141] sm:$0xff] }
 0x4b7   : > { %6613 = vmatmul.mubr.f32.gmra.mxu1 %v11115_v49  ;;  %6402 = vmatprep.mubr.f32.mxu0 %v11173_v42  ;;  %v5259_v49 = vld [vmem:[#allocation2 + $0xf1] sm:$0xff] }
 0x4b8   : > { %6617 = vmatprep.mubr.f32.mxu1 %v5257_v28  ;;  %7401 = vmatpush3.msra.mxu0 %v5787_v13 }
 0x4ba   : > { %6403 = vmatmul.mubr.f32.gmra.mxu0 %v5257_v28 }
 0x4bb   : > { %6618 = vmatmul.mubr.f32.gmra.mxu1 %v11133_v58  ;;  %6407 = vmatprep.mubr.f32.mxu0 %v11187_v48  ;;  %v5260_v48 = vld [vmem:[#allocation2 + $0xf9] sm:$0xff] }
 0x4bc   : > { %6622 = vmatprep.mubr.f32.mxu1 %v5258_v26 }
 0x4be   : > { %6408 = vmatmul.mubr.f32.gmra.mxu0 %v5258_v26 }
 0x4bf   : > { %6623 = vmatmul.mubr.f32.gmra.mxu1 %v11149_v35  ;;  %6412 = vmatprep.mubr.f32.mxu0 %v11203_v60  ;;  %v5880_v60 = vadd.f32 %v11385_v52, %v11135_v9  ;;  %v5262_v9 = vld [vmem:[#allocation2 + $0x111] sm:$0xff] }
 0x4c0   : > { %6627 = vmatprep.mubr.f32.mxu1 %v5259_v49 }
 0x4c2   : > { %v5884_v58 = vpop.f32.mrf.mxu0  ;;  %6413 = vmatmul.mubr.f32.gmra.mxu0 %v5259_v49 }
 0x4c3   : > { %v6099_v42 = vpop.f32.mrf.mxu1  ;;  %6628 = vmatmul.mubr.f32.gmra.mxu1 %v11165_v53  ;;  %6417 = vmatprep.mubr.f32.mxu0 %v11217_v57  ;;  %v5885_v3 = vadd.f32 %v11385_v52, %v5884_v58  ;;  %v5267_v58 = vld [vmem:[#allocation2 + $0x151] sm:$0xff] }
 0x4c4   : > { %v11393_v31 = vadd.f32 %v6099_v42, %v5875_v0  ;;  %6632 = vmatprep.mubr.f32.mxu1 %v5260_v48  ;;  %v5886_v47 = vpop.f32.mrf.mxu0 }
 0x4c5   : > { %v6101_v35 = vpop.f32.mrf.mxu1 }
 0x4c6   : > { %v5889_v61 = vpop.f32.mrf.mxu0  ;;  %6418 = vmatmul.mubr.f32.gmra.mxu0 %v5260_v48 }
 0x4c7   : > { %v6104_v4 = vpop.f32.mrf.mxu1  ;;  %6633 = vmatmul.mubr.f32.gmra.mxu1 %v11179_v56  ;;  %6422 = vmatprep.mubr.f32.mxu0 %v11226_v7  ;;  %v5890_v12 = vadd.f32 %v11385_v52, %v5889_v61 }
 0x4c8   : > { %v11399_v53 = vadd.f32 %v6104_v4, %v5880_v60  ;;  %6637 = vmatprep.mubr.f32.mxu1 %v5261_v27  ;;  %v5891_v57 = vpop.f32.mrf.mxu0  ;;  %v5268_v60 = vld [vmem:[#allocation2 + $0x159] sm:$0xff] }
 0x4c9   : > { %v6106_v15 = vpop.f32.mrf.mxu1 }
 0x4ca   : > { %v5894_v16 = vpop.f32.mrf.mxu0  ;;  %6423 = vmatmul.mubr.f32.gmra.mxu0 %v5261_v27  ;;  %v5269_v15 = vld [vmem:[#allocation2 + $0x169] sm:$0xff] }
 0x4cb   : > { %v6109_v19 = vpop.f32.mrf.mxu1  ;;  %6638 = vmatmul.mubr.f32.gmra.mxu1 %v11195_v18  ;;  %6427 = vmatprep.mubr.f32.mxu0 %v11235_v11  ;;  %v5895_v8 = vadd.f32 %v11385_v52, %v5894_v16 }
 0x4cc   : > { %v11404_v41 = vadd.f32 %v6109_v19, %v5885_v3  ;;  %6642 = vmatprep.mubr.f32.mxu1 %v5262_v9  ;;  %v5896_v56 = vpop.f32.mrf.mxu0 }
 0x4cd   : > { %v6111_v7 = vpop.f32.mrf.mxu1  ;;  %v5270_v56 = vld [vmem:[#allocation2 + $0x171] sm:$0xff] }
 0x4ce   : > { %v5899_v45 = vpop.f32.mrf.mxu0  ;;  %6428 = vmatmul.mubr.f32.gmra.mxu0 %v5262_v9 }
 0x4cf   : > { %v6114_v23 = vpop.f32.mrf.mxu1  ;;  %6643 = vmatmul.mubr.f32.gmra.mxu1 %v11209_v40  ;;  %6432 = vmatprep.mubr.f32.mxu0 %v11244_v50  ;;  %v5900_v43 = vadd.f32 %v11385_v52, %v5899_v45 }
 0x4d0   : > { %v11409_v36 = vadd.f32 %v6114_v23, %v5890_v12  ;;  %6647 = vmatprep.mubr.f32.mxu1 %v5263_v32  ;;  %v5901_v18 = vpop.f32.mrf.mxu0  ;;  %v11447_v23 = vld [vmem:[#allocation2 + $0x182] sm:$0xff] }
 0x4d1   : > { %v6116_v11 = vpop.f32.mrf.mxu1 }
 0x4d2   : > { %v5904_v17 = vpop.f32.mrf.mxu0  ;;  %6433 = vmatmul.mubr.f32.gmra.mxu0 %v5263_v32 }
 0x4d3   : > { %v6119_v37 = vpop.f32.mrf.mxu1  ;;  %6648 = vmatmul.mubr.f32.gmra.mxu1 %v11222_v39  ;;  %6437 = vmatprep.mubr.f32.mxu0 %v11253_v6  ;;  %v5905_v62 = vadd.f32 %v11385_v52, %v5904_v17 }
 0x4d4   : > { %v11414_v55 = vadd.f32 %v6119_v37, %v5895_v8  ;;  %6652 = vmatprep.mubr.f32.mxu1 %v5264_v59  ;;  %v5906_v40 = vpop.f32.mrf.mxu0  ;;  %v11454_v37 = vld [vmem:[#allocation2 + $0x18a] sm:$0xff] }
 0x4d5   : > { %v6121_v50 = vpop.f32.mrf.mxu1  ;;  %v11945_v40 = vld [vmem:[#allocation16_spill] sm:$0xff] }
 0x4d6   : > { %v5909_v2 = vpop.f32.mrf.mxu0  ;;  %6438 = vmatmul.mubr.f32.gmra.mxu0 %v5264_v59 }
 0x4d7   : > { %v6124_v22 = vpop.f32.mrf.mxu1  ;;  %6653 = vmatmul.mubr.f32.gmra.mxu1 %v11231_v33  ;;  %6442 = vmatprep.mubr.f32.mxu0 %v11262_v5  ;;  %v5910_v26 = vadd.f32 %v11385_v52, %v5909_v2 }
 0x4d8   : > { %v11419_v29 = vadd.f32 %v6124_v22, %v5900_v43  ;;  %6657 = vmatprep.mubr.f32.mxu1 %v5265_v54  ;;  %v5911_v39 = vpop.f32.mrf.mxu0  ;;  %v5273_v22 = vld [vmem:[#allocation2 + $0x199] sm:$0xff] }
 0x4d9   : > { %v6126_v6 = vpop.f32.mrf.mxu1 }
 0x4da   : > { %v5914_v24 = vpop.f32.mrf.mxu0  ;;  %6443 = vmatmul.mubr.f32.gmra.mxu0 %v5265_v54  ;;  %v5307_v6 = vld [vmem:[#allocation2 + $0x32] sm:$0xff] }
 0x4db   : > { %v6129_v13 = vpop.f32.mrf.mxu1  ;;  %6658 = vmatmul.mubr.f32.gmra.mxu1 %v11240_v34  ;;  %6447 = vmatprep.mubr.f32.mxu0 %v11271_v63  ;;  %v5915_v48 = vadd.f32 %v11385_v52, %v5914_v24 }
 0x4dc   : > { %v11424_v28 = vadd.f32 %v6129_v13, %v5905_v62  ;;  %6662 = vmatprep.mubr.f32.mxu1 %v5266_v10  ;;  %v5916_v33 = vpop.f32.mrf.mxu0 }
 0x4dd   : > { %v6131_v5 = vpop.f32.mrf.mxu1 }
 0x4de   : > { %v5919_v49 = vpop.f32.mrf.mxu0  ;;  %6448 = vmatmul.mubr.f32.gmra.mxu0 %v5266_v10  ;;  %v5209_v10 = vld [vmem:[#allocation2 + $0x198] sm:$0xff] }
 0x4df   : > { %v6134_v0 = vpop.f32.mrf.mxu1  ;;  %6663 = vmatmul.mubr.f32.gmra.mxu1 %v11249_v51  ;;  %6452 = vmatprep.mubr.f32.mxu0 %v11280_v14  ;;  %v5920_v4 = vadd.f32 %v11385_v52, %v5919_v49  ;;  %v5308_v5 = vld [vmem:[#allocation2 + $0x3a] sm:$0xff] }
 0x4e0   : > { %v11429_v42 = vadd.f32 %v6134_v0, %v5910_v26  ;;  %6667 = vmatprep.mubr.f32.mxu1 %v5267_v58  ;;  %v5921_v34 = vpop.f32.mrf.mxu0  ;;  %v5274_v26 = vld [vmem:[#allocation2 + $0x1a1] sm:$0xff] }
 0x4e1   : > { %v6136_v63 = vpop.f32.mrf.mxu1 }
 0x4e2   : > { %v5924_v47 = vpop.f32.mrf.mxu0  ;;  %6453 = vmatmul.mubr.f32.gmra.mxu0 %v5267_v58  ;;  %v5309_v58 = vld [vmem:[#allocation2 + $0x4a] sm:$0xff] }
 0x4e3   : > { %v6139_v35 = vpop.f32.mrf.mxu1  ;;  %6668 = vmatmul.mubr.f32.gmra.mxu1 %v11258_v20  ;;  %6457 = vmatprep.mubr.f32.mxu0 %v11289_v44  ;;  %v5925_v16 = vadd.f32 %v11385_v52, %v5924_v47 }
 0x4e4   : > { %v11434_v61 = vadd.f32 %v6139_v35, %v5915_v48  ;;  %6672 = vmatprep.mubr.f32.mxu1 %v5268_v60  ;;  %v5926_v51 = vpop.f32.mrf.mxu0  ;;  %v5210_v48 = vld [vmem:[#allocation2 + $0x1a0] sm:$0xff]  ;;  %v5310_v35 = vld [vmem:[#allocation2 + $0x52] sm:$0xff] }
 0x4e5   : > { %v6141_v14 = vpop.f32.mrf.mxu1 }
 0x4e6   : > { %v5929_v27 = vpop.f32.mrf.mxu0  ;;  %6458 = vmatmul.mubr.f32.gmra.mxu0 %v5268_v60  ;;  %v5311_v14 = vld [vmem:[#allocation2 + $0x62] sm:$0xff] }
 0x4e7   : > { %v6144_v57 = vpop.f32.mrf.mxu1  ;;  %6673 = vmatmul.mubr.f32.gmra.mxu1 %v11267_v30  ;;  %6462 = vmatprep.mubr.f32.mxu0 %v11296_v1  ;;  %v5930_v12 = vadd.f32 %v11385_v52, %v5929_v27 }
 0x4e8   : > { %v11439_v3 = vadd.f32 %v6144_v57, %v5920_v4  ;;  %6677 = vmatprep.mubr.f32.mxu1 %v5269_v15  ;;  %v5931_v20 = vpop.f32.mrf.mxu0 }
 0x4e9   : > { %v6146_v44 = vpop.f32.mrf.mxu1  ;;  %v5312_v20 = vld [vmem:[#allocation2 + $0x6a] sm:$0xff] }
 0x4ea   : > { %v5934_v19 = vpop.f32.mrf.mxu0  ;;  %6463 = vmatmul.mubr.f32.gmra.mxu0 %v5269_v15 }
 0x4eb   : > { %v6149_v9 = vpop.f32.mrf.mxu1  ;;  %6678 = vmatmul.mubr.f32.gmra.mxu1 %v11276_v38  ;;  %6467 = vmatprep.mubr.f32.mxu0 %v11307_v25  ;;  %v5271_v38 = vld [vmem:[#allocation2 + $0x181] sm:$0xff]  ;;  %v5935_v8 = vadd.f32 %v11385_v52, %v5934_v19 }
 0x4ec   : > { %v11444_v7 = vadd.f32 %v6149_v9, %v5925_v16  ;;  %6682 = vmatprep.mubr.f32.mxu1 %v5270_v56  ;;  %v5936_v30 = vpop.f32.mrf.mxu0  ;;  %v5313_v19 = vld [vmem:[#allocation2 + $0x7a] sm:$0xff] }
 0x4ed   : > { %v6151_v1 = vpop.f32.mrf.mxu1 }
 0x4ee   : > { %v5939_v45 = vpop.f32.mrf.mxu0  ;;  %6468 = vmatmul.mubr.f32.gmra.mxu0 %v5270_v56 }
 0x4ef   : > { %v6154_v32 = vpop.f32.mrf.mxu1  ;;  %6683 = vmatmul.mubr.f32.gmra.mxu1 %v11285_v46  ;;  %6472 = vmatprep.mubr.f32.mxu0 %v11447_v23  ;;  %v5272_v46 = vld [vmem:[#allocation2 + $0x189] sm:$0xff]  ;;  %v5940_v54 = vadd.f32 %v11385_v52, %v5939_v45 }
 0x4f0   : > { %v11451_v18 = vadd.f32 %v6154_v32, %v5930_v12  ;;  %6687 = vmatprep.mubr.f32.mxu1 %v5271_v38  ;;  %v5941_v25 = vpop.f32.mrf.mxu0  ;;  %v5314_v12 = vld [vmem:[#allocation2 + $0x82] sm:$0xff] }
 0x4f1   : > { %v6156_v11 = vpop.f32.mrf.mxu1 }
 0x4f2   : > { %v5944_v17 = vpop.f32.mrf.mxu0  ;;  %6473 = vmatmul.mubr.f32.gmra.mxu0 %v5271_v38  ;;  %v5315_v38 = vld [vmem:[#allocation2 + $0x92] sm:$0xff] }
 0x4f3   : > { %v6159_v59 = vpop.f32.mrf.mxu1  ;;  %6688 = vmatmul.mubr.f32.gmra.mxu1 %v11945_v40  ;;  %6477 = vmatprep.mubr.f32.mxu0 %v11454_v37  ;;  %v5945_v49 = vadd.f32 %v11385_v52, %v5944_v17 }
 0x4f4   : > { %v11458_v50 = vadd.f32 %v6159_v59, %v5935_v8  ;;  %6692 = vmatprep.mubr.f32.mxu1 %v5272_v46  ;;  %v5946_v43 = vpop.f32.mrf.mxu0  ;;  %v5316_v59 = vld [vmem:[#allocation2 + $0x9a] sm:$0xff] }
 0x4f5   : > { %v6161_v2 = vpop.f32.mrf.mxu1  ;;  %v5317_v43 = vld [vmem:[#allocation2 + $0xaa] sm:$0xff] }
 0x4f6   : > { %v5949_v39 = vpop.f32.mrf.mxu0  ;;  %6478 = vmatmul.mubr.f32.gmra.mxu0 %v5272_v46 }
 0x4f7   : > { %v6164_v62 = vpop.f32.mrf.mxu1  ;;  %6693 = vmatmul.mubr.f32.gmra.mxu1 %v11302_v21  ;;  %7402 = vmatprep.mubr.f32.mxu0 %v5307_v6  ;;  %v5950_v60 = vadd.f32 %v11385_v52, %v5949_v39  ;;  %v5318_v6 = vld [vmem:[#allocation2 + $0xb2] sm:$0xff] }
 0x4f8   : > { %v11462_v24 = vadd.f32 %v6164_v62, %v5940_v54  ;;  %v5951_v13 = vpop.f32.mrf.mxu0  ;;  %6697 = vmatprep.mubr.f32.mxu1 %v5273_v22 }
 0x4f9   : > { %v6166_v33 = vpop.f32.mrf.mxu1 }
 0x4fa   : > { %v5954_v0 = vpop.f32.mrf.mxu0  ;;  %7403 = vmatmul.mubr.f32.vlgmr.msra.gmra.mxu0 %v5308_v5 }
 0x4fb   : > { %v6169_v34 = vpop.f32.mrf.mxu1  ;;  %6698 = vmatmul.mubr.f32.gmra.mxu1 %v5209_v10  ;;  %7405 = vmatprep.mubr.f32.mxu0 %v5309_v58  ;;  %v5955_v44 = vadd.f32 %v11385_v52, %v5954_v0  ;;  %v5319_v10 = vld [vmem:[#allocation2 + $0xc2] sm:$0xff]  ;;  %v5320_v0 = vld [vmem:[#allocation2 + $0xca] sm:$0xff] }
 0x4fc   : > { %v11465_v63 = vadd.f32 %v6169_v34, %v5945_v49  ;;  %v5956_v21 = vpop.f32.mrf.mxu0  ;;  %6702 = vmatprep.mubr.f32.mxu1 %v5274_v26 }
 0x4fd   : > { %v6171_v47 = vpop.f32.mrf.mxu1  ;;  %v5321_v21 = vld [vmem:[#allocation2 + $0xda] sm:$0xff] }
 0x4fe   : > { %v5959_v51 = vpop.f32.mrf.mxu0  ;;  %7406 = vmatmul.mubr.f32.gmra.mxu0 %v5310_v35 }
 0x4ff   : > { %v6174_v4 = vpop.f32.mrf.mxu1  ;;  %6703 = vmatmul.mubr.f32.gmra.mxu1 %v5210_v48  ;;  %7408 = vmatprep.mubr.f32.mxu0 %v5311_v14  ;;  %v5960_v45 = vadd.f32 %v11385_v52, %v5959_v51  ;;  %v5322_v51 = vld [vmem:[#allocation2 + $0xe2] sm:$0xff] }
 0x500   : > { %v11468_v27 = vadd.f32 %v6174_v4, %v5950_v60  ;;  %v5961_v57 = vpop.f32.mrf.mxu0 }
 0x501   : > { %v6176_v15 = vpop.f32.mrf.mxu1  ;;  %v5323_v57 = vld [vmem:[#allocation2 + $0xf2] sm:$0xff] }
 0x502   : > { %v5964_v16 = vpop.f32.mrf.mxu0  ;;  %7409 = vmatmul.mubr.f32.gmra.mxu0 %v5312_v20 }
 0x503   : > { %v6179_v9 = vpop.f32.mrf.mxu1  ;;  %7411 = vmatprep.mubr.f32.mxu0 %v5313_v19  ;;  %v5965_v40 = vadd.f32 %v11385_v52, %v5964_v16  ;;  %v5324_v19 = vld [vmem:[#allocation2 + $0xfa] sm:$0xff] }
 0x504   : > { %v11471_v56 = vadd.f32 %v6179_v9, %v5955_v44  ;;  %v5966_v30 = vpop.f32.mrf.mxu0 }
 0x505   : > { %v6181_v1 = vpop.f32.mrf.mxu1 }
 0x506   : > { %v5969_v32 = vpop.f32.mrf.mxu0  ;;  %7412 = vmatmul.mubr.f32.gmra.mxu0 %v5314_v12  ;;  %v5325_v1 = vld [vmem:[#allocation2 + $0x10a] sm:$0xff] }
 0x507   : > { %v6184_v25 = vpop.f32.mrf.mxu1  ;;  %7414 = vmatprep.mubr.f32.mxu0 %v5315_v38  ;;  %v5970_v62 = vadd.f32 %v11385_v52, %v5969_v32 }
 0x508   : > { %v11474_v11 = vadd.f32 %v6184_v25, %v5960_v45  ;;  %v5971_v8 = vpop.f32.mrf.mxu0  ;;  %v5326_v25 = vld [vmem:[#allocation2 + $0x112] sm:$0xff] }
 0x509   : > { %v6186_v17 = vpop.f32.mrf.mxu1 }
 0x50a   : > { %v5974_v46 = vpop.f32.mrf.mxu0  ;;  %7415 = vmatmul.mubr.f32.gmra.mxu0 %v5316_v59  ;;  %v5327_v59 = vld [vmem:[#allocation2 + $0x122] sm:$0xff] }
 0x50b   : > { %v6189_v2 = vpop.f32.mrf.mxu1  ;;  %7417 = vmatprep.mubr.f32.mxu0 %v5317_v43  ;;  %v5975_v58 = vadd.f32 %v11385_v52, %v5974_v46 }
 0x50c   : > { %v11477_v22 = vadd.f32 %v6189_v2, %v5965_v40  ;;  %v5976_v54 = vpop.f32.mrf.mxu0 }
 0x50d   : > { %v6191_v39 = vpop.f32.mrf.mxu1  ;;  %v5328_v54 = vld [vmem:[#allocation2 + $0x12a] sm:$0xff] }
 0x50e   : > { %v5979_v13 = vpop.f32.mrf.mxu0  ;;  %7418 = vmatmul.mubr.f32.gmra.mxu0 %v5318_v6 }
 0x50f   : > { %v6194_v33 = vpop.f32.mrf.mxu1  ;;  %7420 = vmatprep.mubr.f32.mxu0 %v5319_v10  ;;  %v5980_v14 = vadd.f32 %v11385_v52, %v5979_v13 }
 0x510   : > { %v11480_v5 = vadd.f32 %v6194_v33, %v5970_v62  ;;  %v5981_v26 = vpop.f32.mrf.mxu0  ;;  %v5329_v62 = vld [vmem:[#allocation2 + $0x13a] sm:$0xff] }
 0x511   : > { %v6196_v49 = vpop.f32.mrf.mxu1 }
 0x512   : > { %v5984_v34 = vpop.f32.mrf.mxu0  ;;  %7421 = vmatmul.mubr.f32.gmra.mxu0 %v5320_v0  ;;  %v5330_v49 = vld [vmem:[#allocation2 + $0x142] sm:$0xff] }
 0x513   : > { %v6199_v48 = vpop.f32.mrf.mxu1  ;;  %7423 = vmatprep.mubr.f32.mxu0 %v5321_v21  ;;  %v5985_v9 = vadd.f32 %v11385_v52, %v5984_v34  ;;  %v5331_v34 = vld [vmem:[#allocation2 + $0x152] sm:$0xff] }
 0x514   : > { %v11483_v47 = vadd.f32 %v6199_v48, %v5975_v58  ;;  %v5986_v35 = vpop.f32.mrf.mxu0 }
 0x515   : > { %v6201_v60 = vpop.f32.mrf.mxu1 }
 0x516   : > { %v5989_v4 = vpop.f32.mrf.mxu0  ;;  %7424 = vmatmul.mubr.f32.gmra.mxu0 %v5322_v51  ;;  %v5332_v51 = vld [vmem:[#allocation2 + $0x15a] sm:$0xff] }
 0x517   : > { %v6204_v15 = vpop.f32.mrf.mxu1  ;;  %7426 = vmatprep.mubr.f32.mxu0 %v5323_v57  ;;  %v5990_v8 = vadd.f32 %v11385_v52, %v5989_v4  ;;  %v5333_v57 = vld [vmem:[#allocation2 + $0x16a] sm:$0xff] }
 0x518   : > { %v11486_v20 = vadd.f32 %v6204_v15, %v5980_v14  ;;  %v5991_v44 = vpop.f32.mrf.mxu0 }
 0x519   : > { %v6206_v16 = vpop.f32.mrf.mxu1 }
 0x51a   : > { %v5994_v30 = vpop.f32.mrf.mxu0  ;;  %7427 = vmatmul.mubr.f32.gmra.mxu0 %v5324_v19 }
 0x51b   : > { %v6209_v12 = vpop.f32.mrf.mxu1  ;;  %7429 = vmatprep.mubr.f32.mxu0 %v5325_v1  ;;  %v5995_v39 = vadd.f32 %v11385_v52, %v5994_v30 }
 0x51c   : > { %v11489_v45 = vadd.f32 %v6209_v12, %v5985_v9  ;;  %v5996_v32 = vpop.f32.mrf.mxu0  ;;  %v5334_v9 = vld [vmem:[#allocation2 + $0x172] sm:$0xff] }
 0x51d   : > { %v6211_v38 = vpop.f32.mrf.mxu1 }
 0x51e   : > { %v5999_v17 = vpop.f32.mrf.mxu0  ;;  %7430 = vmatmul.mubr.f32.gmra.mxu0 %v5326_v25  ;;  %v5337_v25 = vld [vmem:[#allocation2 + $0x19a] sm:$0xff] }
 0x51f   : > { %v6214_v40 = vpop.f32.mrf.mxu1  ;;  %7432 = vmatprep.mubr.f32.mxu0 %v5327_v59  ;;  %v6000_v0 = vadd.f32 %v11385_v52, %v5999_v17 }
 0x520   : > { %v11492_v46 = vadd.f32 %v6214_v40, %v5990_v8  ;;  %v6001_v43 = vpop.f32.mrf.mxu0 }
 0x521   : > { %v6216_v2 = vpop.f32.mrf.mxu1  ;;  %v5338_v43 = vld [vmem:[#allocation2 + $0x1a2] sm:$0xff] }
 0x522   : > { %v6004_v6 = vpop.f32.mrf.mxu0  ;;  %7433 = vmatmul.mubr.f32.gmra.mxu0 %v5328_v54 }
 0x523   : > { %v6219_v13 = vpop.f32.mrf.mxu1  ;;  %7435 = vmatprep.mubr.f32.mxu0 %v5329_v62  ;;  %v6005_v14 = vadd.f32 %v11385_v52, %v6004_v6 }
 0x524   : > { %v11495_v10 = vadd.f32 %v6219_v13, %v5995_v39  ;;  %v6006_v33 = vpop.f32.mrf.mxu0 }
 0x525   : > { %v6221_v26 = vpop.f32.mrf.mxu1 }
 0x526   : > { %v6009_v58 = vpop.f32.mrf.mxu0  ;;  %7436 = vmatmul.mubr.f32.gmra.mxu0 %v5330_v49 }
 0x527   : > { %v6224_v21 = vpop.f32.mrf.mxu1  ;;  %7438 = vmatprep.mubr.f32.mxu0 %v5331_v34  ;;  %v6010_v30 = vadd.f32 %v11385_v52, %v6009_v58 }
 0x528   : > { %v11498_v48 = vadd.f32 %v6224_v21, %v6000_v0  ;;  %v6011_v35 = vpop.f32.mrf.mxu0 }
 0x529   : > { %v6226_v60 = vpop.f32.mrf.mxu1 }
 0x52a   : > { %v6014_v4 = vpop.f32.mrf.mxu0  ;;  %7439 = vmatmul.mubr.f32.gmra.mxu0 %v5332_v51 }
 0x52b   : > { %v6229_v15 = vpop.f32.mrf.mxu1  ;;  %7441 = vmatprep.mubr.f32.mxu0 %v5333_v57  ;;  %v6015_v17 = vadd.f32 %v11385_v52, %v6014_v4 }
 0x52c   : > { %v11501_v44 = vadd.f32 %v6229_v15, %v6005_v14  ;;  %v6016_v16 = vpop.f32.mrf.mxu0 }
 0x52d   : > { %v6231_v19 = vpop.f32.mrf.mxu1 }
 0x52e   : > { %v6019_v1 = vpop.f32.mrf.mxu0  ;;  %7442 = vmatmul.mubr.f32.gmra.mxu0 %v5334_v9 }
 0x52f   : > { %v6234_v12 = vpop.f32.mrf.mxu1  ;;  %7444 = vmatprep.mubr.f32.mxu0 %v11447_v23  ;;  %v6020_v6 = vadd.f32 %v11385_v52, %v6019_v1 }
 0x530   : > { %v11505_v32 = vadd.f32 %v6234_v12, %v6010_v30  ;;  %v6021_v38 = vpop.f32.mrf.mxu0 }
 0x531   : > { %v6236_v8 = vpop.f32.mrf.mxu1 }
 0x532   : > { %v6024_v59 = vpop.f32.mrf.mxu0  ;;  %7445 = vmatmul.mubr.f32.gmra.mxu0 %v11454_v37 }
 0x533   : > { %v6239_v40 = vpop.f32.mrf.mxu1  ;;  %7447 = vmatprep.mubr.f32.mxu0 %v5337_v25  ;;  %v6025_v49 = vadd.f32 %v11385_v52, %v6024_v59 }
 0x534   : > { %v11509_v2 = vadd.f32 %v6239_v40, %v6015_v17  ;;  %v6026_v54 = vpop.f32.mrf.mxu0 }
 0x535   : > { %v6241_v39 = vpop.f32.mrf.mxu1 }
 0x536   : > { %v6029_v23 = vpop.f32.mrf.mxu0  ;;  %7448 = vmatmul.mubr.f32.gmra.mxu0 %v5338_v43 }
 0x537   : > { %v6244_v62 = vpop.f32.mrf.mxu1  ;;  %v6030_v60 = vadd.f32 %v11385_v52, %v6029_v23 }
 0x538   : > { %v11512_v13 = vadd.f32 %v6244_v62, %v6020_v6  ;;  %v6031_v33 = vpop.f32.mrf.mxu0 }
 0x539   : > { %v6246_v26 = vpop.f32.mrf.mxu1 }
 0x53a   : > { %v6324_v0 = vpop.f32.mrf.mxu0 }
 0x53b   : > { %v6249_v37 = vpop.f32.mrf.mxu1  ;;  %v6325_v58 = vadd.f32 %v6324_v0, %v11393_v31 }
 0x53c   : > { %v11516_v34 = vadd.f32 %v6249_v37, %v6025_v49  ;;  %v6326_v21 = vpop.f32.mrf.mxu0 }
 0x53d   : > { %v6251_v35 = vpop.f32.mrf.mxu1 }
 0x53e   : > { %v6329_v51 = vpop.f32.mrf.mxu0 }
 0x53f   : > { %v6254_v14 = vpop.f32.mrf.mxu1  ;;  %v6330_v4 = vadd.f32 %v6329_v51, %v11399_v53 }
 0x540   : > { %v11520_v57 = vadd.f32 %v6254_v14, %v6030_v60  ;;  %v6331_v15 = vpop.f32.mrf.mxu0 }
 0x541   : > { %v6256_v16 = vpop.f32.mrf.mxu1 }
 0x542   : > { %v6334_v19 = vpop.f32.mrf.mxu0 }
 0x543   : > { %v6335_v9 = vadd.f32 %v6334_v19, %v11404_v41  ;;  %v6549_v30 = vpop.f32.mrf.mxu1 }
 0x544   : > { %v11523_v1 = vadd.f32 %v6549_v30, %v6325_v58  ;;  %v6336_v31 = vpop.f32.mrf.mxu0 }
 0x545   : > { %v6551_v12 = vpop.f32.mrf.mxu1 }
 0x546   : > { %v6339_v38 = vpop.f32.mrf.mxu0 }
 0x547   : > { %v6340_v25 = vadd.f32 %v6339_v38, %v11409_v36  ;;  %v6554_v52 = vpop.f32.mrf.mxu1 }
 0x548   : > { %v11526_v8 = vadd.f32 %v6554_v52, %v6330_v4  ;;  %v6341_v17 = vpop.f32.mrf.mxu0 }
 0x549   : > { %v6556_v53 = vpop.f32.mrf.mxu1 }
 0x54a   : > { %v6344_v59 = vpop.f32.mrf.mxu0 }
 0x54b   : > { %v6345_v40 = vadd.f32 %v6344_v59, %v11414_v55  ;;  %v6559_v43 = vpop.f32.mrf.mxu1 }
 0x54c   : > { %v11529_v54 = vadd.f32 %v6559_v43, %v6335_v9  ;;  %v6346_v41 = vpop.f32.mrf.mxu0 }
 0x54d   : > { %v6561_v39 = vpop.f32.mrf.mxu1 }
 0x54e   : > { %v6349_v6 = vpop.f32.mrf.mxu0 }
 0x54f   : > { %v6350_v23 = vadd.f32 %v6349_v6, %v11419_v29  ;;  %v6564_v62 = vpop.f32.mrf.mxu1 }
 0x550   : > { %v11532_v33 = vadd.f32 %v6564_v62, %v6340_v25  ;;  %v6351_v36 = vpop.f32.mrf.mxu0 }
 0x551   : > { %v6566_v26 = vpop.f32.mrf.mxu1 }
 0x552   : > { %v6354_v49 = vpop.f32.mrf.mxu0 }
 0x553   : > { %v6355_v0 = vadd.f32 %v6354_v49, %v11424_v28  ;;  %v6569_v37 = vpop.f32.mrf.mxu1 }
 0x554   : > { %v11535_v58 = vadd.f32 %v6569_v37, %v6345_v40  ;;  %v6356_v55 = vpop.f32.mrf.mxu0 }
 0x555   : > { %v6571_v21 = vpop.f32.mrf.mxu1 }
 0x556   : > { %v6359_v35 = vpop.f32.mrf.mxu0 }
 0x557   : > { %v6360_v60 = vadd.f32 %v6359_v35, %v11429_v42  ;;  %v6574_v51 = vpop.f32.mrf.mxu1 }
 0x558   : > { %v11538_v14 = vadd.f32 %v6574_v51, %v6350_v23  ;;  %v6361_v29 = vpop.f32.mrf.mxu0 }
 0x559   : > { %v6576_v4 = vpop.f32.mrf.mxu1 }
 0x55a   : > { %v6364_v15 = vpop.f32.mrf.mxu0 }
 0x55b   : > { %v6365_v16 = vadd.f32 %v6364_v15, %v11434_v61  ;;  %v6579_v19 = vpop.f32.mrf.mxu1 }
 0x55c   : > { %v11541_v9 = vadd.f32 %v6579_v19, %v6355_v0  ;;  %v6366_v28 = vpop.f32.mrf.mxu0 }
 0x55d   : > { %v6581_v30 = vpop.f32.mrf.mxu1 }
 0x55e   : > { %v6369_v31 = vpop.f32.mrf.mxu0 }
 0x55f   : > { %v6370_v12 = vadd.f32 %v6369_v31, %v11439_v3  ;;  %v6584_v38 = vpop.f32.mrf.mxu1 }
 0x560   : > { %v11544_v25 = vadd.f32 %v6584_v38, %v6360_v60  ;;  %v6371_v42 = vpop.f32.mrf.mxu0 }
 0x561   : > { %v6586_v52 = vpop.f32.mrf.mxu1 }
 0x562   : > { %v6374_v17 = vpop.f32.mrf.mxu0 }
 0x563   : > { %v6375_v53 = vadd.f32 %v6374_v17, %v11444_v7  ;;  %v6589_v59 = vpop.f32.mrf.mxu1 }
 0x564   : > { %v11547_v40 = vadd.f32 %v6589_v59, %v6365_v16  ;;  %v6376_v61 = vpop.f32.mrf.mxu0 }
 0x565   : > { %v6591_v43 = vpop.f32.mrf.mxu1 }
 0x566   : > { %v6379_v41 = vpop.f32.mrf.mxu0 }
 0x567   : > { %v6380_v39 = vadd.f32 %v6379_v41, %v11451_v18  ;;  %v6594_v6 = vpop.f32.mrf.mxu1 }
 0x568   : > { %v11550_v23 = vadd.f32 %v6594_v6, %v6370_v12  ;;  %v6381_v3 = vpop.f32.mrf.mxu0 }
 0x569   : > { %v6596_v62 = vpop.f32.mrf.mxu1 }
 0x56a   : > { %v6384_v36 = vpop.f32.mrf.mxu0 }
 0x56b   : > { %v6385_v26 = vadd.f32 %v6384_v36, %v11458_v50  ;;  %v6599_v49 = vpop.f32.mrf.mxu1 }
 0x56c   : > { %v11553_v0 = vadd.f32 %v6599_v49, %v6375_v53  ;;  %v6386_v7 = vpop.f32.mrf.mxu0 }
 0x56d   : > { %v6601_v37 = vpop.f32.mrf.mxu1 }
 0x56e   : > { %v6389_v55 = vpop.f32.mrf.mxu0 }
 0x56f   : > { %v6390_v21 = vadd.f32 %v6389_v55, %v11462_v24  ;;  %v6604_v35 = vpop.f32.mrf.mxu1 }
 0x570   : > { %v11556_v60 = vadd.f32 %v6604_v35, %v6380_v39  ;;  %v6391_v18 = vpop.f32.mrf.mxu0 }
 0x571   : > { %v6606_v51 = vpop.f32.mrf.mxu1 }
 0x572   : > { %v6394_v29 = vpop.f32.mrf.mxu0 }
 0x573   : > { %v6395_v4 = vadd.f32 %v6394_v29, %v11465_v63  ;;  %v6609_v15 = vpop.f32.mrf.mxu1 }
 0x574   : > { %v11559_v16 = vadd.f32 %v6609_v15, %v6385_v26  ;;  %v6396_v50 = vpop.f32.mrf.mxu0 }
 0x575   : > { %v6611_v19 = vpop.f32.mrf.mxu1 }
 0x576   : > { %v6399_v28 = vpop.f32.mrf.mxu0 }
 0x577   : > { %v6400_v30 = vadd.f32 %v6399_v28, %v11468_v27  ;;  %v6614_v31 = vpop.f32.mrf.mxu1 }
 0x578   : > { %v11562_v12 = vadd.f32 %v6614_v31, %v6390_v21  ;;  %v6401_v24 = vpop.f32.mrf.mxu0 }
 0x579   : > { %v6616_v38 = vpop.f32.mrf.mxu1 }
 0x57a   : > { %v6404_v42 = vpop.f32.mrf.mxu0 }
 0x57b   : > { %v6405_v52 = vadd.f32 %v6404_v42, %v11471_v56  ;;  %v6619_v17 = vpop.f32.mrf.mxu1 }
 0x57c   : > { %v11565_v53 = vadd.f32 %v6619_v17, %v6395_v4  ;;  %v6406_v63 = vpop.f32.mrf.mxu0 }
 0x57d   : > { %v6621_v59 = vpop.f32.mrf.mxu1 }
 0x57e   : > { %v6409_v61 = vpop.f32.mrf.mxu0 }
 0x57f   : > { %v6410_v43 = vadd.f32 %v6409_v61, %v11474_v11  ;;  %v6624_v41 = vpop.f32.mrf.mxu1 }
 0x580   : > { %v11568_v39 = vadd.f32 %v6624_v41, %v6400_v30  ;;  %v6411_v27 = vpop.f32.mrf.mxu0 }
 0x581   : > { %v6626_v6 = vpop.f32.mrf.mxu1 }
 0x582   : > { %v6414_v3 = vpop.f32.mrf.mxu0 }
 0x583   : > { %v6415_v62 = vadd.f32 %v6414_v3, %v11477_v22  ;;  %v6629_v36 = vpop.f32.mrf.mxu1 }
 0x584   : > { %v11571_v26 = vadd.f32 %v6629_v36, %v6405_v52  ;;  %v6416_v56 = vpop.f32.mrf.mxu0 }
 0x585   : > { %v6631_v49 = vpop.f32.mrf.mxu1 }
 0x586   : > { %v6419_v7 = vpop.f32.mrf.mxu0 }
 0x587   : > { %v6420_v37 = vadd.f32 %v6419_v7, %v11480_v5  ;;  %v6634_v55 = vpop.f32.mrf.mxu1 }
 0x588   : > { %v11574_v21 = vadd.f32 %v6634_v55, %v6410_v43  ;;  %v6421_v11 = vpop.f32.mrf.mxu0 }
 0x589   : > { %v6636_v35 = vpop.f32.mrf.mxu1 }
 0x58a   : > { %v6424_v18 = vpop.f32.mrf.mxu0 }
 0x58b   : > { %v6425_v51 = vadd.f32 %v6424_v18, %v11483_v47  ;;  %v6639_v29 = vpop.f32.mrf.mxu1 }
 0x58c   : > { %v11577_v4 = vadd.f32 %v6639_v29, %v6415_v62  ;;  %v6426_v22 = vpop.f32.mrf.mxu0 }
 0x58d   : > { %v6641_v15 = vpop.f32.mrf.mxu1 }
 0x58e   : > { %v6429_v50 = vpop.f32.mrf.mxu0 }
 0x58f   : > { %v6430_v19 = vadd.f32 %v6429_v50, %v11486_v20  ;;  %v6644_v28 = vpop.f32.mrf.mxu1 }
 0x590   : > { %v11580_v30 = vadd.f32 %v6644_v28, %v6420_v37  ;;  %v6431_v5 = vpop.f32.mrf.mxu0 }
 0x591   : > { %v6646_v31 = vpop.f32.mrf.mxu1 }
 0x592   : > { %v6434_v24 = vpop.f32.mrf.mxu0 }
 0x593   : > { %v6435_v38 = vadd.f32 %v6434_v24, %v11489_v45  ;;  %v6649_v42 = vpop.f32.mrf.mxu1 }
 0x594   : > { %v11583_v52 = vadd.f32 %v6649_v42, %v6425_v51  ;;  %v6436_v47 = vpop.f32.mrf.mxu0 }
 0x595   : > { %v6651_v17 = vpop.f32.mrf.mxu1 }
 0x596   : > { %v6439_v63 = vpop.f32.mrf.mxu0 }
 0x597   : > { %v6440_v59 = vadd.f32 %v6439_v63, %v11492_v46  ;;  %v6654_v61 = vpop.f32.mrf.mxu1 }
 0x598   : > { %v11586_v43 = vadd.f32 %v6654_v61, %v6430_v19  ;;  %v6441_v20 = vpop.f32.mrf.mxu0 }
 0x599   : > { %v6656_v41 = vpop.f32.mrf.mxu1 }
 0x59a   : > { %v6444_v27 = vpop.f32.mrf.mxu0 }
 0x59b   : > { %v6445_v6 = vadd.f32 %v6444_v27, %v11495_v10  ;;  %v6659_v3 = vpop.f32.mrf.mxu1 }
 0x59c   : > { %v11589_v62 = vadd.f32 %v6659_v3, %v6435_v38  ;;  %v6446_v45 = vpop.f32.mrf.mxu0 }
 0x59d   : > { %v6661_v36 = vpop.f32.mrf.mxu1 }
 0x59e   : > { %v6449_v56 = vpop.f32.mrf.mxu0 }
 0x59f   : > { %v6450_v49 = vadd.f32 %v6449_v56, %v11498_v48  ;;  %v6664_v7 = vpop.f32.mrf.mxu1 }
 0x5a0   : > { %v11592_v37 = vadd.f32 %v6664_v7, %v6440_v59  ;;  %v6451_v46 = vpop.f32.mrf.mxu0 }
 0x5a1   : > { %v6666_v55 = vpop.f32.mrf.mxu1 }
 0x5a2   : > { %v6454_v11 = vpop.f32.mrf.mxu0 }
 0x5a3   : > { %v6455_v35 = vadd.f32 %v6454_v11, %v11501_v44  ;;  %v6669_v18 = vpop.f32.mrf.mxu1 }
 0x5a4   : > { %v11595_v51 = vadd.f32 %v6669_v18, %v6445_v6  ;;  %v6456_v10 = vpop.f32.mrf.mxu0 }
 0x5a5   : > { %v6671_v29 = vpop.f32.mrf.mxu1 }
 0x5a6   : > { %v6459_v22 = vpop.f32.mrf.mxu0 }
 0x5a7   : > { %v11598_v15 = vadd.f32 %v6459_v22, %v11505_v32  ;;  %v6674_v50 = vpop.f32.mrf.mxu1 }
 0x5a8   : > { %v11600_v19 = vadd.f32 %v6674_v50, %v6450_v49  ;;  %v6461_v48 = vpop.f32.mrf.mxu0 }
 0x5a9   : > { %v6676_v28 = vpop.f32.mrf.mxu1 }
 0x5aa   : > { %v6464_v5 = vpop.f32.mrf.mxu0 }
 0x5ab   : > { %v11603_v31 = vadd.f32 %v6464_v5, %v11509_v2  ;;  %v6679_v24 = vpop.f32.mrf.mxu1 }
 0x5ac   : > { %v11605_v44 = vadd.f32 %v6679_v24, %v6455_v35  ;;  %v6466_v38 = vpop.f32.mrf.mxu0 }
 0x5ad   : > { %v6681_v42 = vpop.f32.mrf.mxu1 }
 0x5ae   : > { %v6469_v47 = vpop.f32.mrf.mxu0 }
 0x5af   : > { %v11608_v17 = vadd.f32 %v6469_v47, %v11512_v13  ;;  %v11610_v32 = vpop.f32.mrf.mxu1 }
 0x5b0   : > { %v6471_v63 = vpop.f32.mrf.mxu0 }
 0x5b1   : > { %v6686_v59 = vpop.f32.mrf.mxu1 }
 0x5b2   : > { %v6474_v61 = vpop.f32.mrf.mxu0 }
 0x5b3   : > { %v11613_v20 = vadd.f32 %v6474_v61, %v11516_v34  ;;  %v11615_v2 = vpop.f32.mrf.mxu1 }
 0x5b4   : > { %v6476_v41 = vpop.f32.mrf.mxu0 }
 0x5b5   : > { %v6691_v27 = vpop.f32.mrf.mxu1 }
 0x5b6   : > { %v11617_v6 = vpop.f32.mrf.mxu0 }
 0x5b7   : > { %v11619_v3 = vpop.f32.mrf.mxu1 }
 0x5b8   : > { %v6481_v45 = vpop.f32.mrf.mxu0 }
 0x5b9   : > { %v6696_v36 = vpop.f32.mrf.mxu1 }
 0x5ba   : > { %v7404_v13 = vpop.f32.mrf.mxu0 }
 0x5bb   : > { %v11622_v56 = vpop.f32.mrf.mxu1  ;;  %v6780_v49 = vadd.f32 %v7404_v13, %v11526_v8 }
 0x5bc   : > { %v6774_v34 = vpop.f32.mrf.mxu0 }
 0x5bd   : > { %v6934_v7 = vmax.f32 %v6780_v49, 0.0  ;;  %v6701_v46 = vpop.f32.mrf.mxu1  ;;  %v6775_v55 = vadd.f32 %v6774_v34, %v11523_v1 }
 0x5be   : > { %v7407_v11 = vpop.f32.mrf.mxu0 }
 0x5bf   : > { %6966 = vst [vmem:[%s11628_s6 + $0x8] sm:$0xff] %v6934_v7  ;;  %v6933_v35 = vmax.f32 %v6775_v55, 0.0  ;;  %v11632_v18 = vpop.f32.mrf.mxu1  ;;  %v6790_v8 = vadd.f32 %v7407_v11, %v11532_v33 }
 0x5c0   : > { %v6784_v10 = vpop.f32.mrf.mxu0 }
 0x5c1   : > { %6965 = vst [vmem:[%s11628_s6] sm:$0xff] %v6933_v35  ;;  %v6936_v29 = vmax.f32 %v6790_v8, 0.0  ;;  %v6785_v22 = vadd.f32 %v6784_v10, %v11529_v54  ;;  %v6706_v50 = vpop.f32.mrf.mxu1 }
 0x5c2   : > { %v7410_v48 = vpop.f32.mrf.mxu0 }
 0x5c3   : > { %6968 = vst [vmem:[%s11628_s6 + $0x18] sm:$0xff] %v6936_v29  ;;  %v6935_v1 = vmax.f32 %v6785_v22, 0.0  ;;  %v6800_v28 = vadd.f32 %v7410_v48, %v11538_v14 }
 0x5c4   : > { %v6794_v5 = vpop.f32.mrf.mxu0 }
 0x5c5   : > { %6967 = vst [vmem:[%s11628_s6 + $0x10] sm:$0xff] %v6935_v1  ;;  %v6938_v24 = vmax.f32 %v6800_v28, 0.0  ;;  %v6795_v38 = vadd.f32 %v6794_v5, %v11535_v58 }
 0x5c6   : > { %v7413_v33 = vpop.f32.mrf.mxu0 }
 0x5c7   : > { %6970 = vst [vmem:[%s11628_s6 + $0x28] sm:$0xff] %v6938_v24  ;;  %v6937_v42 = vmax.f32 %v6795_v38, 0.0  ;;  %v6810_v47 = vadd.f32 %v7413_v33, %v11544_v25 }
 0x5c8   : > { %v6804_v54 = vpop.f32.mrf.mxu0 }
 0x5c9   : > { %6969 = vst [vmem:[%s11628_s6 + $0x20] sm:$0xff] %v6937_v42  ;;  %v6940_v63 = vmax.f32 %v6810_v47, 0.0  ;;  %v6805_v59 = vadd.f32 %v6804_v54, %v11541_v9 }
 0x5ca   : > { %v7416_v61 = vpop.f32.mrf.mxu0 }
 0x5cb   : > { %6972 = vst [vmem:[%s11628_s6 + $0x38] sm:$0xff] %v6940_v63  ;;  %v6939_v14 = vmax.f32 %v6805_v59, 0.0  ;;  %v6820_v41 = vadd.f32 %v7416_v61, %v11550_v23 }
 0x5cc   : > { %v6814_v27 = vpop.f32.mrf.mxu0 }
 0x5cd   : > { %6971 = vst [vmem:[%s11628_s6 + $0x30] sm:$0xff] %v6939_v14  ;;  %v6942_v58 = vmax.f32 %v6820_v41, 0.0  ;;  %v6815_v45 = vadd.f32 %v6814_v27, %v11547_v40 }
 0x5ce   : > { %v7419_v36 = vpop.f32.mrf.mxu0 }
 0x5cf   : > { %6974 = vst [vmem:[%s11628_s6 + $0x48] sm:$0xff] %v6942_v58  ;;  %v6941_v25 = vmax.f32 %v6815_v45, 0.0  ;;  %v6830_v13 = vadd.f32 %v7419_v36, %v11556_v60 }
 0x5d0   : > { %v6824_v49 = vpop.f32.mrf.mxu0 }
 0x5d1   : > { %6973 = vst [vmem:[%s11628_s6 + $0x40] sm:$0xff] %v6941_v25  ;;  %v6944_v9 = vmax.f32 %v6830_v13, 0.0  ;;  %v6825_v34 = vadd.f32 %v6824_v49, %v11553_v0  ;;  %v6695_v49 = vadd.f32 %v11619_v3, %v11608_v17 }
 0x5d2   : > { %v7422_v7 = vpop.f32.mrf.mxu0 }
 0x5d3   : > { %6976 = vst [vmem:[%s11628_s6 + $0x58] sm:$0xff] %v6944_v9  ;;  %v6943_v23 = vmax.f32 %v6825_v34, 0.0  ;;  %v6840_v46 = vadd.f32 %v7422_v7, %v11562_v12 }
 0x5d4   : > { %v6834_v55 = vpop.f32.mrf.mxu0 }
 0x5d5   : > { %6975 = vst [vmem:[%s11628_s6 + $0x50] sm:$0xff] %v6943_v23  ;;  %v6946_v40 = vmax.f32 %v6840_v46, 0.0  ;;  %v6835_v11 = vadd.f32 %v6834_v55, %v11559_v16  ;;  %v6700_v55 = vadd.f32 %v11622_v56, %v11613_v20 }
 0x5d6   : > { %v7425_v35 = vpop.f32.mrf.mxu0 }
 0x5d7   : > { %6978 = vst [vmem:[%s11628_s6 + $0x68] sm:$0xff] %v6946_v40  ;;  %v6945_v60 = vmax.f32 %v6835_v11, 0.0  ;;  %v6850_v8 = vadd.f32 %v7425_v35, %v11568_v39 }
 0x5d8   : > { %v6844_v10 = vpop.f32.mrf.mxu0 }
 0x5d9   : > { %6977 = vst [vmem:[%s11628_s6 + $0x60] sm:$0xff] %v6945_v60  ;;  %v6948_v0 = vmax.f32 %v6850_v8, 0.0  ;;  %v6845_v29 = vadd.f32 %v6844_v10, %v11565_v53 }
 0x5da   : > { %v7428_v22 = vpop.f32.mrf.mxu0 }
 0x5db   : > { %6980 = vst [vmem:[%s11628_s6 + $0x78] sm:$0xff] %v6948_v0  ;;  %v6947_v12 = vmax.f32 %v6845_v29, 0.0  ;;  %v6860_v50 = vadd.f32 %v7428_v22, %v11574_v21 }
 0x5dc   : > { %v6854_v48 = vpop.f32.mrf.mxu0 }
 0x5dd   : > { %6979 = vst [vmem:[%s11628_s6 + $0x70] sm:$0xff] %v6947_v12  ;;  %v6950_v16 = vmax.f32 %v6860_v50, 0.0  ;;  %v6855_v1 = vadd.f32 %v6854_v48, %v11571_v26 }
 0x5de   : > { %v7431_v28 = vpop.f32.mrf.mxu0 }
 0x5df   : > { %6982 = vst [vmem:[%s11628_s6 + $0x88] sm:$0xff] %v6950_v16  ;;  %v6949_v39 = vmax.f32 %v6855_v1, 0.0  ;;  %v6870_v5 = vadd.f32 %v7431_v28, %v11580_v30 }
 0x5e0   : > { %v6864_v24 = vpop.f32.mrf.mxu0 }
 0x5e1   : > { %6981 = vst [vmem:[%s11628_s6 + $0x80] sm:$0xff] %v6949_v39  ;;  %v6952_v53 = vmax.f32 %v6870_v5, 0.0  ;;  %v6865_v38 = vadd.f32 %v6864_v24, %v11577_v4 }
 0x5e2   : > { %v7434_v33 = vpop.f32.mrf.mxu0 }
 0x5e3   : > { %6984 = vst [vmem:[%s11628_s6 + $0x98] sm:$0xff] %v6952_v53  ;;  %v6951_v21 = vmax.f32 %v6865_v38, 0.0  ;;  %v6880_v42 = vadd.f32 %v7434_v33, %v11586_v43 }
 0x5e4   : > { %v6874_v47 = vpop.f32.mrf.mxu0 }
 0x5e5   : > { %6983 = vst [vmem:[%s11628_s6 + $0x90] sm:$0xff] %v6951_v21  ;;  %v6954_v26 = vmax.f32 %v6880_v42, 0.0  ;;  %v6875_v54 = vadd.f32 %v6874_v47, %v11583_v52  ;;  %v6685_v52 = vadd.f32 %v11610_v32, %v11598_v15  ;;  %v6690_v32 = vadd.f32 %v11615_v2, %v11603_v31 }
 0x5e6   : > { %v7437_v63 = vpop.f32.mrf.mxu0 }
 0x5e7   : > { %6986 = vst [vmem:[%s11628_s6 + $0xa8] sm:$0xff] %v6954_v26  ;;  %v6953_v30 = vmax.f32 %v6875_v54, 0.0  ;;  %v6890_v59 = vadd.f32 %v7437_v63, %v11592_v37 }
 0x5e8   : > { %v6884_v61 = vpop.f32.mrf.mxu0 }
 0x5e9   : > { %6985 = vst [vmem:[%s11628_s6 + $0xa0] sm:$0xff] %v6953_v30  ;;  %v6956_v4 = vmax.f32 %v6890_v59, 0.0  ;;  %v6885_v14 = vadd.f32 %v6884_v61, %v11589_v62 }
 0x5ea   : > { %v7440_v41 = vpop.f32.mrf.mxu0 }
 0x5eb   : > { %6988 = vst [vmem:[%s11628_s6 + $0xb8] sm:$0xff] %v6956_v4  ;;  %v6955_v43 = vmax.f32 %v6885_v14, 0.0  ;;  %v6900_v27 = vadd.f32 %v7440_v41, %v11600_v19 }
 0x5ec   : > { %v6894_v58 = vpop.f32.mrf.mxu0 }
 0x5ed   : > { %6987 = vst [vmem:[%s11628_s6 + $0xb0] sm:$0xff] %v6955_v43  ;;  %v6958_v45 = vmax.f32 %v6900_v27, 0.0  ;;  %v6895_v37 = vadd.f32 %v6894_v58, %v11595_v51  ;;  %v6480_v51 = vadd.f32 %v11617_v6, %v11520_v57 }
 0x5ee   : > { %v7443_v36 = vpop.f32.mrf.mxu0 }
 0x5ef   : > { %6990 = vst [vmem:[%s11628_s6 + $0xc8] sm:$0xff] %v6958_v45  ;;  %v6957_v25 = vmax.f32 %v6895_v37, 0.0  ;;  %v6910_v62 = vadd.f32 %v7443_v36, %v6685_v52  ;;  %v6705_v17 = vadd.f32 %v11632_v18, %v6480_v51 }
 0x5f0   : > { %v6904_v13 = vpop.f32.mrf.mxu0 }
 0x5f1   : > { %6989 = vst [vmem:[%s11628_s6 + $0xc0] sm:$0xff] %v6957_v25  ;;  %v6960_v19 = vmax.f32 %v6910_v62, 0.0  ;;  %v6905_v9 = vadd.f32 %v6904_v13, %v11605_v44 }
 0x5f2   : > { %v7446_v15 = vpop.f32.mrf.mxu0 }
 0x5f3   : > { %6992 = vst [vmem:[%s11628_s6 + $0xd8] sm:$0xff] %v6960_v19  ;;  %v6959_v34 = vmax.f32 %v6905_v9, 0.0  ;;  %v6920_v7 = vadd.f32 %v7446_v15, %v6695_v49 }
 0x5f4   : > { %v6914_v23 = vpop.f32.mrf.mxu0 }
 0x5f5   : > { %6991 = vst [vmem:[%s11628_s6 + $0xd0] sm:$0xff] %v6959_v34  ;;  %v6962_v3 = vmax.f32 %v6920_v7, 0.0  ;;  %v6915_v46 = vadd.f32 %v6914_v23, %v6690_v32 }
 0x5f6   : > { %v7449_v44 = vpop.f32.mrf.mxu0 }
 0x5f7   : > { %6994 = vst [vmem:[%s11628_s6 + $0xe8] sm:$0xff] %v6962_v3  ;;  %v6961_v31 = vmax.f32 %v6915_v46, 0.0  ;;  %v6930_v2 = vadd.f32 %v7449_v44, %v6705_v17 }
 0x5f8   : > { %v6924_v40 = vpop.f32.mrf.mxu0 }
 0x5f9   : > { %6993 = vst [vmem:[%s11628_s6 + $0xe0] sm:$0xff] %v6961_v31  ;;  %v6964_v57 = vmax.f32 %v6930_v2, 0.0  ;;  %v6925_v6 = vadd.f32 %v6924_v40, %v6700_v55 }
 0x5fb   : > { %6996 = vst [vmem:[%s11628_s6 + $0xf8] sm:$0xff] %v6964_v57  ;;  %v6963_v11 = vmax.f32 %v6925_v6, 0.0 }
 0x5fd   : > { %6995 = vst [vmem:[%s11628_s6 + $0xf0] sm:$0xff] %v6963_v11 }
 0x5fe PF: > { %s15_s18 = sadd.s32 1, %s7531_s18  }
 0x5ff   : > { %p12_p4 = scmp.ge.s32.totalorder %s15_s18, 4  }
 0x601   :  { %14 = sbr.rel (!%p12_p4) target bundleno = 1 (0x1), region = 72 }

</bundles_post_ra>
